<compile_context>
chip_gen: v6e
topology: v6e:2x2x1
jax: 0.10.0
libtpu: 0.0.40
codegen_flags: <defaults>
</compile_context>

<pallas_src>
import functools
import math

import jax
import jax.numpy as jnp
from jax import lax
from jax.experimental import pallas as pl
from jax.experimental.pallas import tpu as pltpu

F_PAD = 128            # every feature dim padded to one lane-dense width
EDGE_TILE = 512        # edge rows per grid step (fills 256-deep MXU, amortizes step overhead)
NUM_AGG_SPLITS = 2     # leading "parallel" axis of the aggregation -> megacore split on v7x
NODE_PAD = 32          # node rows padded to a multiple of 32 (safe sublane packing for bf16)
VMEM_LIMIT = 48 * 1024 * 1024


def _round_up(x, m):
    return (x + m - 1) // m * m


# --------------- kernel 1: edge->node segment-sum (partial, per core) ---------------

def _edge_agg_kernel(ef_ref, we_ref, dst_ref, part_ref):
    # grid = (NUM_AGG_SPLITS, n_tiles_per_split); axis 0 "parallel", axis 1 "arbitrary".
    @pl.when(pl.program_id(1) == 0)
    def _init():
        part_ref[...] = jnp.zeros_like(part_ref)

    # ef_mm tile = ef @ W_edge   (bf16 MXU, f32 accumulate)
    ef_mm = jnp.dot(ef_ref[...], we_ref[...], preferred_element_type=jnp.float32)

    # segment-sum by destination node via one-hot MXU matmul (bf16 one-hot is exact,
    # products of bf16 are exact in f32; accumulation stays f32 in the output slab).
    n_pad = part_ref.shape[1]
    te = ef_ref.shape[0]
    row_ids = lax.broadcasted_iota(jnp.int32, (n_pad, te), 0)
    onehot = (row_ids == dst_ref[...]).astype(jnp.bfloat16)          # [N_pad, TE]
    upd = jnp.dot(onehot, ef_mm.astype(jnp.bfloat16),
                  preferred_element_type=jnp.float32)                # [N_pad, F_PAD]
    part_ref[...] += upd[None]


def _edge_agg_call(ef_p, w_edge, dst_row, n_pad):
    e_pad = ef_p.shape[0]
    n_et = e_pad // EDGE_TILE
    assert n_et % NUM_AGG_SPLITS == 0
    n_half = n_et // NUM_AGG_SPLITS
    flops = n_et * (2 * EDGE_TILE * F_PAD * F_PAD
                    + 2 * n_pad * EDGE_TILE * F_PAD)
    bytes_accessed = int(2 * ef_p.size + 2 * w_edge.size + 4 * dst_row.size
                         + 4 * NUM_AGG_SPLITS * n_pad * F_PAD)
    return pl.pallas_call(
        _edge_agg_kernel,
        out_shape=jax.ShapeDtypeStruct((NUM_AGG_SPLITS, n_pad, F_PAD), jnp.float32),
        grid_spec=pltpu.PrefetchScalarGridSpec(
            num_scalar_prefetch=0,
            grid=(NUM_AGG_SPLITS, n_half),
            in_specs=[
                pl.BlockSpec((EDGE_TILE, F_PAD), lambda c, t: (c * n_half + t, 0)),  # ef tile
                pl.BlockSpec((F_PAD, F_PAD), lambda c, t: (0, 0)),                   # W_edge
                pl.BlockSpec((1, EDGE_TILE), lambda c, t: (0, c * n_half + t)),      # dst ids
            ],
            out_specs=pl.BlockSpec((1, n_pad, F_PAD), lambda c, t: (c, 0, 0)),       # partial sums
        ),
        compiler_params=pltpu.CompilerParams(
            dimension_semantics=("parallel", "arbitrary"),
            vmem_limit_bytes=VMEM_LIMIT),
        cost_estimate=pl.CostEstimate(flops=int(flops), transcendentals=0,
                                      bytes_accessed=bytes_accessed),
    )(ef_p, w_edge, dst_row)


# --------- kernel 2: node transform + combine partial sums + 1/deg scaling ----------

def _node_combine_kernel(nf_ref, wn_ref, bn_ref, part_ref, inv_ref,
                         nf_out_ref, nb_out_ref, *, act):
    # NodeApplyModule: nf_out = act(nf @ W_node + b_node)
    y = jnp.dot(nf_ref[...], wn_ref[...], preferred_element_type=jnp.float32)
    y = y + bn_ref[...]
    if act:
        y = jnp.maximum(y, 0.0)
    nf_out_ref[...] = y.astype(nf_out_ref.dtype)

    # mean aggregation: nb_ef = (partial_0 + partial_1) * (1/in_degree)
    nb = jnp.sum(part_ref[...], axis=0) * inv_ref[...]
    nb_out_ref[...] = nb.astype(nb_out_ref.dtype)


def _node_call(nf_p, w_node, b_node, nb_part, inv_deg, act):
    n_pad = nf_p.shape[0]
    node_tile = n_pad if n_pad <= 512 else 512
    assert n_pad % node_tile == 0
    kern = functools.partial(_node_combine_kernel, act=act)
    return pl.pallas_call(
        kern,
        out_shape=(jax.ShapeDtypeStruct((n_pad, F_PAD), jnp.bfloat16),
                   jax.ShapeDtypeStruct((n_pad, F_PAD), jnp.bfloat16)),
        grid_spec=pltpu.PrefetchScalarGridSpec(
            num_scalar_prefetch=0,
            grid=(n_pad // node_tile,),
            in_specs=[
                pl.BlockSpec((node_tile, F_PAD), lambda i: (i, 0)),                   # nf tile
                pl.BlockSpec((F_PAD, F_PAD), lambda i: (0, 0)),                       # W_node
                pl.BlockSpec((1, F_PAD), lambda i: (0, 0)),                           # b_node
                pl.BlockSpec((NUM_AGG_SPLITS, node_tile, F_PAD), lambda i: (0, i, 0)),  # partials
                pl.BlockSpec((node_tile, 1), lambda i: (i, 0)),                       # 1/in_deg
            ],
            out_specs=[
                pl.BlockSpec((node_tile, F_PAD), lambda i: (i, 0)),                   # nf_out
                pl.BlockSpec((node_tile, F_PAD), lambda i: (i, 0)),                   # nb_ef
            ],
        ),
        compiler_params=pltpu.CompilerParams(dimension_semantics=("parallel",)),
    )(nf_p, w_node, b_node, nb_part, inv_deg)


# ------------------------------ kernel 3: edge update ------------------------------

def _edge_update_kernel(ef_ref, we_ref, nf_ref, nb_ref, src_ref, dst_ref,
                        wdt_ref, wdb_ref, bt_ref, o_ref, *, act):
    # recompute ef_mm tile in VMEM (cheaper than an HBM round-trip of [E,F])
    ef_mm = jnp.dot(ef_ref[...], we_ref[...], preferred_element_type=jnp.float32)

    te = ef_ref.shape[0]
    n_pad = nf_ref.shape[0]
    col_ids = lax.broadcasted_iota(jnp.int32, (te, n_pad), 1)
    oh_src = (col_ids == src_ref[...]).astype(jnp.bfloat16)          # [TE, N_pad]
    oh_dst = (col_ids == dst_ref[...]).astype(jnp.bfloat16)

    # in-kernel gathers via one-hot MXU matmuls on the bf16 node tables:
    #   srcdst_nf = (nf[src] + nf[dst]) / 2 ; nb_ef_dst = nb_ef[dst]
    srcdst = 0.5 * jnp.dot(oh_src + oh_dst, nf_ref[...],
                           preferred_element_type=jnp.float32)
    nb_dst = jnp.dot(oh_dst, nb_ref[...], preferred_element_type=jnp.float32)

    tmp_ef = ef_mm + nb_dst
    # split-weight dense: equivalent to concat([tmp_ef, srcdst]) @ W_dense.T,
    # without materializing the [TE, 2F] temp.
    y = (jnp.dot(tmp_ef.astype(jnp.bfloat16), wdt_ref[...],
                 preferred_element_type=jnp.float32)
         + jnp.dot(srcdst.astype(jnp.bfloat16), wdb_ref[...],
                   preferred_element_type=jnp.float32))
    y = y + bt_ref[...]          # Linear bias + EdgeApplyModule bias (pre-summed)
    if act:
        y = jnp.maximum(y, 0.0)
    o_ref[...] = y.astype(o_ref.dtype)


def _edge_update_call(ef_p, w_edge, nf_out, nb_ef, src_col, dst_col,
                      wd_top, wd_bot, b_total, act):
    e_pad = ef_p.shape[0]
    n_pad = nf_out.shape[0]
    n_et = e_pad // EDGE_TILE
    kern = functools.partial(_edge_update_kernel, act=act)
    flops = n_et * (2 * EDGE_TILE * F_PAD * F_PAD
                    + 4 * EDGE_TILE * n_pad * F_PAD
                    + 4 * EDGE_TILE * F_PAD * F_PAD)
    bytes_accessed = int(2 * (ef_p.size + w_edge.size + nf_out.size + nb_ef.size
                              + wd_top.size + wd_bot.size + e_pad * F_PAD)
                         + 4 * (src_col.size + dst_col.size + b_total.size))
    return pl.pallas_call(
        kern,
        out_shape=jax.ShapeDtypeStruct((e_pad, F_PAD), jnp.bfloat16),
        grid_spec=pltpu.PrefetchScalarGridSpec(
            num_scalar_prefetch=0,
            grid=(n_et,),
            in_specs=[
                pl.BlockSpec((EDGE_TILE, F_PAD), lambda t: (t, 0)),   # ef tile
                pl.BlockSpec((F_PAD, F_PAD), lambda t: (0, 0)),       # W_edge
                pl.BlockSpec((n_pad, F_PAD), lambda t: (0, 0)),       # nf table (bf16)
                pl.BlockSpec((n_pad, F_PAD), lambda t: (0, 0)),       # nb_ef table (bf16)
                pl.BlockSpec((EDGE_TILE, 1), lambda t: (t, 0)),       # src ids
                pl.BlockSpec((EDGE_TILE, 1), lambda t: (t, 0)),       # dst ids
                pl.BlockSpec((F_PAD, F_PAD), lambda t: (0, 0)),       # W_dense (tmp_ef half)
                pl.BlockSpec((F_PAD, F_PAD), lambda t: (0, 0)),       # W_dense (srcdst half)
                pl.BlockSpec((1, F_PAD), lambda t: (0, 0)),           # b_total
            ],
            out_specs=pl.BlockSpec((EDGE_TILE, F_PAD), lambda t: (t, 0)),
        ),
        compiler_params=pltpu.CompilerParams(
            dimension_semantics=("parallel",),
            vmem_limit_bytes=VMEM_LIMIT),
        cost_estimate=pl.CostEstimate(flops=int(flops), transcendentals=0,
                                      bytes_accessed=bytes_accessed),
    )(ef_p, w_edge, nf_out, nb_ef, src_col, dst_col, wd_top, wd_bot, b_total)


# --------------------------- WTAGNN params / model ---------------------------

def init_layer_params(key, in_feats_node, in_feats_edge, out_feats):
    """Deterministic init matching the shapes/ranges of the PyTorch module."""
    k = jax.random.split(key, 6)
    stdv = 1.0 / math.sqrt(out_feats)
    w_node = jax.random.uniform(k[0], (in_feats_node, out_feats),
                                jnp.float32, -stdv, stdv)
    w_edge = jax.random.uniform(k[1], (in_feats_edge, out_feats),
                                jnp.float32, -stdv, stdv)
    b_node = jax.random.uniform(k[2], (out_feats,), jnp.float32, -stdv, stdv)
    b_edge = jax.random.uniform(k[3], (out_feats,), jnp.float32, -stdv, stdv)
    # EdgeApplyModule.my_dense = nn.Linear(2*out, out): weight [out, 2*out]
    bound = 1.0 / math.sqrt(2 * out_feats)
    w_dense = jax.random.uniform(k[4], (out_feats, 2 * out_feats),
                                 jnp.float32, -bound, bound)
    b_dense = jax.random.uniform(k[5], (out_feats,), jnp.float32, -bound, bound)
    return dict(w_node=w_node, w_edge=w_edge, b_node=b_node, b_edge=b_edge,
                w_dense=w_dense, b_dense=b_dense)


def pad_layer_params(p):
    """Pad to lane-dense 128 widths; weights pre-cast to bf16 (biases stay f32)."""
    in_n, out = p['w_node'].shape
    in_e = p['w_edge'].shape[0]
    wn = jnp.zeros((F_PAD, F_PAD), jnp.float32).at[:in_n, :out].set(p['w_node'])
    we = jnp.zeros((F_PAD, F_PAD), jnp.float32).at[:in_e, :out].set(p['w_edge'])
    bn = jnp.zeros((1, F_PAD), jnp.float32).at[0, :out].set(p['b_node'])
    # W_dense split: y = tmp_ef @ Wd[:, :out].T + srcdst @ Wd[:, out:].T
    wd_top = jnp.zeros((F_PAD, F_PAD), jnp.float32).at[:out, :out].set(
        p['w_dense'][:, :out].T)
    wd_bot = jnp.zeros((F_PAD, F_PAD), jnp.float32).at[:out, :out].set(
        p['w_dense'][:, out:].T)
    bt = jnp.zeros((1, F_PAD), jnp.float32).at[0, :out].set(
        p['b_dense'] + p['b_edge'])
    return dict(w_node=wn.astype(jnp.bfloat16), w_edge=we.astype(jnp.bfloat16),
                b_node=bn,
                w_dense_top=wd_top.astype(jnp.bfloat16),
                w_dense_bot=wd_bot.astype(jnp.bfloat16),
                b_total=bt)


def build_wtagnn_params(key, in_node, in_edge, n_hidden, n_classes, n_layers):
    keys = jax.random.split(key, n_layers + 1)
    params = [init_layer_params(keys[0], in_node, in_edge, n_hidden)]
    for i in range(n_layers - 1):
        params.append(init_layer_params(keys[i + 1], n_hidden, n_hidden,
                                        n_hidden))
    params.append(init_layer_params(keys[n_layers], n_hidden, n_hidden,
                                    n_classes))
    return params


def wtagnn_layer_forward(nf_p, ef_p, graph, pp, act):
    n_pad = graph['inv_deg'].shape[0]
    # 1) partial segment-sums of ef@We by dst (split over 2 "parallel" slabs)
    nb_part = _edge_agg_call(ef_p, pp['w_edge'], graph['dst_row'], n_pad)
    # 2) node transform + combine partials + mean scaling (node-tiled, parallel)
    nf_out, nb_ef = _node_call(nf_p, pp['w_node'], pp['b_node'], nb_part,
                               graph['inv_deg'], act)
    # 3) per-edge update (edge-tiled, parallel)
    ef_out = _edge_update_call(ef_p, pp['w_edge'], nf_out, nb_ef,
                               graph['src_col'], graph['dst_col'],
                               pp['w_dense_top'], pp['w_dense_bot'],
                               pp['b_total'], act)
    return nf_out, ef_out


def wtagnn_forward_padded(pparams, nf_p, ef_p, graph):
    n_total = len(pparams)
    for li, pp in enumerate(pparams):
        act = li < n_total - 1      # last layer: activation=None
        nf_p, ef_p = wtagnn_layer_forward(nf_p, ef_p, graph, pp, act)
    return nf_p, ef_p


# ------------------------- pure-JAX reference (check) -------------------------

def _mm_bf16(a, b):
    return jnp.dot(a.astype(jnp.bfloat16), b.astype(jnp.bfloat16),
                   preferred_element_type=jnp.float32)


def wtagnn_reference(params, nf, ef, src, dst):
    """Mirrors the kernel dataflow: bf16 MXU operands / bf16 stored streams,
    f32 accumulation — matches the PyTorch forward up to those roundings."""
    n_nodes = nf.shape[0]
    deg = jnp.zeros((n_nodes,), jnp.float32).at[dst].add(1.0)
    inv = jnp.where(deg > 0, 1.0 / jnp.maximum(deg, 1.0), 0.0)
    n_total = len(params)
    for li, p in enumerate(params):
        act = li < n_total - 1
        out = p['w_node'].shape[1]
        nf_mm = _mm_bf16(nf, p['w_node'])
        ef_mm = _mm_bf16(ef, p['w_edge'])
        nf_new = nf_mm + p['b_node'][None, :]
        if act:
            nf_new = jnp.maximum(nf_new, 0.0)
        nf_b = nf_new.astype(jnp.bfloat16).astype(jnp.float32)
        ef_mm_b = ef_mm.astype(jnp.bfloat16).astype(jnp.float32)
        nb = jnp.zeros((n_nodes, out), jnp.float32).at[dst].add(ef_mm_b)
        nb = nb * inv[:, None]
        nb_b = nb.astype(jnp.bfloat16).astype(jnp.float32)
        tmp_ef = ef_mm + nb_b[dst]
        srcdst = (nf_b[src] + nf_b[dst]) * 0.5
        y = (_mm_bf16(tmp_ef, p['w_dense'][:, :out].T)
             + _mm_bf16(srcdst, p['w_dense'][:, out:].T)
             + p['b_dense'][None, :] + p['b_edge'][None, :])
        if act:
            y = jnp.maximum(y, 0.0)
        nf = nf_b
        ef = y.astype(jnp.bfloat16).astype(jnp.float32)
    return nf, ef


# --------------------------------- main ---------------------------------

if __name__ == "__main__":
    key = jax.random.PRNGKey(0)
    k_graph, k_nf, k_ef, k_params = jax.random.split(key, 4)

    # small synthetic graph (multiple edge tiles per core -> exercises the
    # multi-step accumulation + the 2-way parallel split of the aggregation)
    N_NODES = 50
    N_EDGES = 2500
    IN_NODE = 16
    IN_EDGE = 8
    N_HIDDEN = 32
    N_CLASSES = 4
    N_LAYERS = 2   # -> 3 WTAGNNLayers total, like the PyTorch module

    ksrc, kdst = jax.random.split(k_graph)
    src = jax.random.randint(ksrc, (N_EDGES,), 0, N_NODES)
    dst = jax.random.randint(kdst, (N_EDGES,), 0, N_NODES)

    nf = jax.random.normal(k_nf, (N_NODES, IN_NODE), jnp.float32)
    ef = jax.random.normal(k_ef, (N_EDGES, IN_EDGE), jnp.float32)

    params = build_wtagnn_params(k_params, IN_NODE, IN_EDGE, N_HIDDEN,
                                 N_CLASSES, N_LAYERS)
    pparams = [pad_layer_params(p) for p in params]

    n_pad = _round_up(N_NODES, NODE_PAD)
    e_pad = _round_up(N_EDGES, EDGE_TILE * NUM_AGG_SPLITS)

    deg = jnp.zeros((N_NODES,), jnp.float32).at[dst].add(1.0)
    inv_deg = jnp.where(deg > 0, 1.0 / jnp.maximum(deg, 1.0), 0.0)

    # padded edge slots use dst/src = -1 so they never match a node id
    # (padded edge rows of kernel 3 produce relu(bias) garbage but are sliced off)
    graph = dict(
        dst_row=jnp.full((1, e_pad), -1, jnp.int32).at[0, :N_EDGES].set(dst),
        src_col=jnp.full((e_pad, 1), -1, jnp.int32).at[:N_EDGES, 0].set(src),
        dst_col=jnp.full((e_pad, 1), -1, jnp.int32).at[:N_EDGES, 0].set(dst),
        inv_deg=jnp.zeros((n_pad, 1), jnp.float32).at[:N_NODES, 0].set(inv_deg),
    )

    # bf16 streamed inputs (matches the bf16 MXU operand cast of the reference)
    nf_p = jnp.zeros((n_pad, F_PAD), jnp.bfloat16).at[:N_NODES, :IN_NODE].set(
        nf.astype(jnp.bfloat16))
    ef_p = jnp.zeros((e_pad, F_PAD), jnp.bfloat16).at[:N_EDGES, :IN_EDGE].set(
        ef.astype(jnp.bfloat16))

    fwd = jax.jit(wtagnn_forward_padded)
    nf_out_p, ef_out_p = fwd(pparams, nf_p, ef_p, graph)
    jax.block_until_ready((nf_out_p, ef_out_p))

    nf_out = nf_out_p[:N_NODES, :N_CLASSES].astype(jnp.float32)
    ef_out = ef_out_p[:N_EDGES, :N_CLASSES].astype(jnp.float32)

    # tolerance-checked pure-JAX reference (mirrors bf16 MXU / f32 accumulate)
    nf_ref, ef_ref = wtagnn_reference(params, nf, ef, src, dst)

    assert nf_out.shape == (N_NODES, N_CLASSES)
    assert ef_out.shape == (N_EDGES, N_CLASSES)
    assert bool(jnp.allclose(nf_out, nf_ref, rtol=5e-2, atol=5e-2)), (
        "nf mismatch, max abs err %e"
        % float(jnp.max(jnp.abs(nf_out - nf_ref))))
    assert bool(jnp.allclose(ef_out, ef_ref, rtol=5e-2, atol=5e-2)), (
        "ef mismatch, max abs err %e"
        % float(jnp.max(jnp.abs(ef_out - ef_ref))))
    print("KERNEL_OK")
</pallas_src>

<mosaic_0001>
module attributes {stable_mosaic.version = 11 : i64} {
  func.func @_node_combine_kernel(%arg0: i32, %arg1: memref<64x128xbf16, #tpu.memory_space<vmem>>, %arg2: memref<128x128xbf16, #tpu.memory_space<vmem>>, %arg3: memref<1x128xf32, #tpu.memory_space<vmem>>, %arg4: memref<2x64x128xf32, #tpu.memory_space<vmem>>, %arg5: memref<64x1xf32, #tpu.memory_space<vmem>>, %arg6: memref<64x128xbf16, #tpu.memory_space<vmem>>, %arg7: memref<64x128xbf16, #tpu.memory_space<vmem>>) attributes {dimension_semantics = [#tpu.dimension_semantics<parallel>], iteration_bounds = array<i64: 1>, scalar_prefetch = 0 : i64, scratch_operands = 0 : i64, tpu.core_type = #tpu.core_type<tc>, window_params = [{transform_indices = @transform_0, window_bounds = array<i64: 64, 128>}, {pipeline_mode = #tpu.pipeline_mode<synchronous>, transform_indices = @transform_1, window_bounds = array<i64: 128, 128>}, {pipeline_mode = #tpu.pipeline_mode<synchronous>, transform_indices = @transform_2, window_bounds = array<i64: 1, 128>}, {transform_indices = @transform_3, window_bounds = array<i64: 2, 64, 128>}, {transform_indices = @transform_4, window_bounds = array<i64: 64, 1>}, {transform_indices = @transform_5, window_bounds = array<i64: 64, 128>}, {transform_indices = @transform_6, window_bounds = array<i64: 64, 128>}]} {
    %c0 = arith.constant 0 : index
    %c0_0 = arith.constant 0 : index
    %0 = vector.load %arg1[%c0, %c0_0] : memref<64x128xbf16, #tpu.memory_space<vmem>>, vector<64x128xbf16>
    %c0_1 = arith.constant 0 : index
    %c0_2 = arith.constant 0 : index
    %1 = vector.load %arg2[%c0_1, %c0_2] : memref<128x128xbf16, #tpu.memory_space<vmem>>, vector<128x128xbf16>
    %cst = arith.constant dense<0.000000e+00> : vector<64x128xf32>
    %2 = tpu.matmul %0, %1, %cst {dimension_numbers = #tpu.dot_dimension_numbers<[1], [0], [0], [1], [0, 0, 1, 1], [], []>} : vector<64x128xbf16>, vector<128x128xbf16>, vector<64x128xf32> -> vector<64x128xf32>
    %c0_3 = arith.constant 0 : index
    %c0_4 = arith.constant 0 : index
    %3 = vector.load %arg3[%c0_3, %c0_4] : memref<1x128xf32, #tpu.memory_space<vmem>>, vector<1x128xf32>
    %4 = vector.broadcast %3 : vector<1x128xf32> to vector<64x128xf32>
    %5 = arith.addf %2, %4 : vector<64x128xf32>
    %cst_5 = arith.constant 0.000000e+00 : f32
    %6 = vector.broadcast %cst_5 : f32 to vector<64x128xf32>
    %7 = arith.maximumf %5, %6 : vector<64x128xf32>
    %8 = arith.truncf %7 : vector<64x128xf32> to vector<64x128xbf16>
    %c0_6 = arith.constant 0 : index
    %c0_7 = arith.constant 0 : index
    %9 = vector.load %arg6[%c0_6, %c0_7] : memref<64x128xbf16, #tpu.memory_space<vmem>>, vector<64x128xbf16>
    tpu.vector_store %arg6[%c0_6, %c0_7], %8 {strides = array<i32>} : memref<64x128xbf16, #tpu.memory_space<vmem>>, vector<64x128xbf16>,
    %c0_8 = arith.constant 0 : index
    %c0_9 = arith.constant 0 : index
    %c0_10 = arith.constant 0 : index
    %10 = vector.load %arg4[%c0_8, %c0_9, %c0_10] : memref<2x64x128xf32, #tpu.memory_space<vmem>>, vector<2x64x128xf32>
    %cst_11 = arith.constant dense<0.000000e+00> : vector<64x128xf32>
    %11 = vector.multi_reduction <add>, %10, %cst_11 [0] : vector<2x64x128xf32> to vector<64x128xf32>
    %c0_12 = arith.constant 0 : index
    %c0_13 = arith.constant 0 : index
    %12 = vector.load %arg5[%c0_12, %c0_13] : memref<64x1xf32, #tpu.memory_space<vmem>>, vector<64x1xf32>
    %13 = vector.broadcast %12 : vector<64x1xf32> to vector<64x128xf32>
    %14 = arith.mulf %11, %13 : vector<64x128xf32>
    %15 = arith.truncf %14 : vector<64x128xf32> to vector<64x128xbf16>
    %c0_14 = arith.constant 0 : index
    %c0_15 = arith.constant 0 : index
    %16 = vector.load %arg7[%c0_14, %c0_15] : memref<64x128xbf16, #tpu.memory_space<vmem>>, vector<64x128xbf16>
    tpu.vector_store %arg7[%c0_14, %c0_15], %15 {strides = array<i32>} : memref<64x128xbf16, #tpu.memory_space<vmem>>, vector<64x128xbf16>,
    return
  }
  func.func @transform_0(%arg0: i32) -> (i32, i32) {
    %c0_i32 = arith.constant 0 : i32
    %c0_i32_0 = arith.constant 0 : i32
    return %arg0, %c0_i32 : i32, i32
  }
  func.func @transform_1(%arg0: i32) -> (i32, i32) {
    %c0_i32 = arith.constant 0 : i32
    %c0_i32_0 = arith.constant 0 : i32
    %c0_i32_1 = arith.constant 0 : i32
    return %c0_i32, %c0_i32_0 : i32, i32
  }
  func.func @transform_2(%arg0: i32) -> (i32, i32) {
    %c0_i32 = arith.constant 0 : i32
    %c0_i32_0 = arith.constant 0 : i32
    %c0_i32_1 = arith.constant 0 : i32
    return %c0_i32, %c0_i32_0 : i32, i32
  }
  func.func @transform_3(%arg0: i32) -> (i32, i32, i32) {
    %c0_i32 = arith.constant 0 : i32
    %c0_i32_0 = arith.constant 0 : i32
    %c0_i32_1 = arith.constant 0 : i32
    return %c0_i32, %arg0, %c0_i32_0 : i32, i32, i32
  }
  func.func @transform_4(%arg0: i32) -> (i32, i32) {
    %c0_i32 = arith.constant 0 : i32
    %c0_i32_0 = arith.constant 0 : i32
    return %arg0, %c0_i32 : i32, i32
  }
  func.func @transform_5(%arg0: i32) -> (i32, i32) {
    %c0_i32 = arith.constant 0 : i32
    %c0_i32_0 = arith.constant 0 : i32
    return %arg0, %c0_i32 : i32, i32
  }
  func.func @transform_6(%arg0: i32) -> (i32, i32) {
    %c0_i32 = arith.constant 0 : i32
    %c0_i32_0 = arith.constant 0 : i32
    return %arg0, %c0_i32 : i32, i32
  }
}

module attributes {stable_mosaic.version = 11 : i64} {
  func.func @_edge_agg_kernel(%arg0: i32, %arg1: i32, %arg2: memref<512x128xbf16, #tpu.memory_space<vmem>>, %arg3: memref<128x128xbf16, #tpu.memory_space<vmem>>, %arg4: memref<1x512xi32, #tpu.memory_space<vmem>>, %arg5: memref<1x64x128xf32, #tpu.memory_space<vmem>>) attributes {dimension_semantics = [#tpu.dimension_semantics<parallel>, #tpu.dimension_semantics<arbitrary>], iteration_bounds = array<i64: 2, 3>, scalar_prefetch = 0 : i64, scratch_operands = 0 : i64, tpu.core_type = #tpu.core_type<tc>, window_params = [{transform_indices = @transform_0, window_bounds = array<i64: 512, 128>}, {pipeline_mode = #tpu.pipeline_mode<synchronous>, transform_indices = @transform_1, window_bounds = array<i64: 128, 128>}, {transform_indices = @transform_2, window_bounds = array<i64: 1, 512>}, {transform_indices = @transform_3, window_bounds = array<i64: 1, 64, 128>}]} {
    %c0_i32 = arith.constant 0 : i32
    %0 = arith.cmpi eq, %arg1, %c0_i32 : i32
    %1 = arith.extui %0 : i1 to i32
    %c0_i32_0 = arith.constant 0 : i32
    %2 = arith.cmpi ne, %1, %c0_i32_0 : i32
    scf.if %2 {
      %cst_13 = arith.constant 0.000000e+00 : f32
      %19 = vector.broadcast %cst_13 : f32 to vector<1x64x128xf32>
      %c0_14 = arith.constant 0 : index
      %c0_15 = arith.constant 0 : index
      %c0_16 = arith.constant 0 : index
      %20 = vector.load %arg5[%c0_14, %c0_15, %c0_16] : memref<1x64x128xf32, #tpu.memory_space<vmem>>, vector<1x64x128xf32>
      tpu.vector_store %arg5[%c0_14, %c0_15, %c0_16], %19 {strides = array<i32>} : memref<1x64x128xf32, #tpu.memory_space<vmem>>, vector<1x64x128xf32>,
    } else {
    }
    %c0 = arith.constant 0 : index
    %c0_1 = arith.constant 0 : index
    %3 = vector.load %arg2[%c0, %c0_1] : memref<512x128xbf16, #tpu.memory_space<vmem>>, vector<512x128xbf16>
    %c0_2 = arith.constant 0 : index
    %c0_3 = arith.constant 0 : index
    %4 = vector.load %arg3[%c0_2, %c0_3] : memref<128x128xbf16, #tpu.memory_space<vmem>>, vector<128x128xbf16>
    %cst = arith.constant dense<0.000000e+00> : vector<512x128xf32>
    %5 = tpu.matmul %3, %4, %cst {dimension_numbers = #tpu.dot_dimension_numbers<[1], [0], [0], [1], [0, 0, 1, 1], [], []>} : vector<512x128xbf16>, vector<128x128xbf16>, vector<512x128xf32> -> vector<512x128xf32>
    %6 = tpu.iota {dimensions = array<i32: 0>} : vector<64x512xi32>
    %c0_4 = arith.constant 0 : index
    %c0_5 = arith.constant 0 : index
    %7 = vector.load %arg4[%c0_4, %c0_5] : memref<1x512xi32, #tpu.memory_space<vmem>>, vector<1x512xi32>
    %8 = vector.broadcast %7 : vector<1x512xi32> to vector<64x512xi32>
    %9 = arith.cmpi eq, %6, %8 : vector<64x512xi32>
    %10 = arith.extui %9 : vector<64x512xi1> to vector<64x512xi32>
    %11 = arith.sitofp %10 : vector<64x512xi32> to vector<64x512xf32>
    %12 = arith.truncf %11 : vector<64x512xf32> to vector<64x512xbf16>
    %13 = arith.truncf %5 : vector<512x128xf32> to vector<512x128xbf16>
    %cst_6 = arith.constant dense<0.000000e+00> : vector<64x128xf32>
    %14 = tpu.matmul %12, %13, %cst_6 {dimension_numbers = #tpu.dot_dimension_numbers<[1], [0], [0], [1], [0, 0, 1, 1], [], []>} : vector<64x512xbf16>, vector<512x128xbf16>, vector<64x128xf32> -> vector<64x128xf32>
    %c0_7 = arith.constant 0 : index
    %c0_8 = arith.constant 0 : index
    %c0_9 = arith.constant 0 : index
    %15 = vector.load %arg5[%c0_7, %c0_8, %c0_9] : memref<1x64x128xf32, #tpu.memory_space<vmem>>, vector<1x64x128xf32>
    %16 = vector.shape_cast %14 : vector<64x128xf32> to vector<1x64x128xf32>
    %17 = arith.addf %15, %16 : vector<1x64x128xf32>
    %c0_10 = arith.constant 0 : index
    %c0_11 = arith.constant 0 : index
    %c0_12 = arith.constant 0 : index
    %18 = vector.load %arg5[%c0_10, %c0_11, %c0_12] : memref<1x64x128xf32, #tpu.memory_space<vmem>>, vector<1x64x128xf32>
    tpu.vector_store %arg5[%c0_10, %c0_11, %c0_12], %17 {strides = array<i32>} : memref<1x64x128xf32, #tpu.memory_space<vmem>>, vector<1x64x128xf32>,
    return
  }
  func.func @transform_0(%arg0: i32, %arg1: i32) -> (i32, i32) {
    %c3_i32 = arith.constant 3 : i32
    %0 = arith.muli %arg0, %c3_i32 : i32
    %1 = arith.addi %0, %arg1 : i32
    %c0_i32 = arith.constant 0 : i32
    %c0_i32_0 = arith.constant 0 : i32
    return %1, %c0_i32 : i32, i32
  }
  func.func @transform_1(%arg0: i32, %arg1: i32) -> (i32, i32) {
    %c0_i32 = arith.constant 0 : i32
    %c0_i32_0 = arith.constant 0 : i32
    %c0_i32_1 = arith.constant 0 : i32
    return %c0_i32, %c0_i32_0 : i32, i32
  }
  func.func @transform_2(%arg0: i32, %arg1: i32) -> (i32, i32) {
    %c3_i32 = arith.constant 3 : i32
    %0 = arith.muli %arg0, %c3_i32 : i32
    %1 = arith.addi %0, %arg1 : i32
    %c0_i32 = arith.constant 0 : i32
    %c0_i32_0 = arith.constant 0 : i32
    return %c0_i32, %1 : i32, i32
  }
  func.func @transform_3(%arg0: i32, %arg1: i32) -> (i32, i32, i32) {
    %c0_i32 = arith.constant 0 : i32
    %c0_i32_0 = arith.constant 0 : i32
    %c0_i32_1 = arith.constant 0 : i32
    return %arg0, %c0_i32, %c0_i32_0 : i32, i32, i32
  }
}

module attributes {stable_mosaic.version = 11 : i64} {
  func.func @_edge_update_kernel(%arg0: i32, %arg1: memref<512x128xbf16, #tpu.memory_space<vmem>>, %arg2: memref<128x128xbf16, #tpu.memory_space<vmem>>, %arg3: memref<64x128xbf16, #tpu.memory_space<vmem>>, %arg4: memref<64x128xbf16, #tpu.memory_space<vmem>>, %arg5: memref<512x1xi32, #tpu.memory_space<vmem>>, %arg6: memref<512x1xi32, #tpu.memory_space<vmem>>, %arg7: memref<128x128xbf16, #tpu.memory_space<vmem>>, %arg8: memref<128x128xbf16, #tpu.memory_space<vmem>>, %arg9: memref<1x128xf32, #tpu.memory_space<vmem>>, %arg10: memref<512x128xbf16, #tpu.memory_space<vmem>>) attributes {dimension_semantics = [#tpu.dimension_semantics<parallel>], iteration_bounds = array<i64: 6>, scalar_prefetch = 0 : i64, scratch_operands = 0 : i64, tpu.core_type = #tpu.core_type<tc>, window_params = [{transform_indices = @transform_0, window_bounds = array<i64: 512, 128>}, {pipeline_mode = #tpu.pipeline_mode<synchronous>, transform_indices = @transform_1, window_bounds = array<i64: 128, 128>}, {pipeline_mode = #tpu.pipeline_mode<synchronous>, transform_indices = @transform_2, window_bounds = array<i64: 64, 128>}, {pipeline_mode = #tpu.pipeline_mode<synchronous>, transform_indices = @transform_3, window_bounds = array<i64: 64, 128>}, {transform_indices = @transform_4, window_bounds = array<i64: 512, 1>}, {transform_indices = @transform_5, window_bounds = array<i64: 512, 1>}, {pipeline_mode = #tpu.pipeline_mode<synchronous>, transform_indices = @transform_6, window_bounds = array<i64: 128, 128>}, {pipeline_mode = #tpu.pipeline_mode<synchronous>, transform_indices = @transform_7, window_bounds = array<i64: 128, 128>}, {pipeline_mode = #tpu.pipeline_mode<synchronous>, transform_indices = @transform_8, window_bounds = array<i64: 1, 128>}, {transform_indices = @transform_9, window_bounds = array<i64: 512, 128>}]} {
    %c0 = arith.constant 0 : index
    %c0_0 = arith.constant 0 : index
    %0 = vector.load %arg1[%c0, %c0_0] : memref<512x128xbf16, #tpu.memory_space<vmem>>, vector<512x128xbf16>
    %c0_1 = arith.constant 0 : index
    %c0_2 = arith.constant 0 : index
    %1 = vector.load %arg2[%c0_1, %c0_2] : memref<128x128xbf16, #tpu.memory_space<vmem>>, vector<128x128xbf16>
    %cst = arith.constant dense<0.000000e+00> : vector<512x128xf32>
    %2 = tpu.matmul %0, %1, %cst {dimension_numbers = #tpu.dot_dimension_numbers<[1], [0], [0], [1], [0, 0, 1, 1], [], []>} : vector<512x128xbf16>, vector<128x128xbf16>, vector<512x128xf32> -> vector<512x128xf32>
    %3 = tpu.iota {dimensions = array<i32: 1>} : vector<512x64xi32>
    %c0_3 = arith.constant 0 : index
    %c0_4 = arith.constant 0 : index
    %4 = vector.load %arg5[%c0_3, %c0_4] : memref<512x1xi32, #tpu.memory_space<vmem>>, vector<512x1xi32>
    %5 = vector.broadcast %4 : vector<512x1xi32> to vector<512x64xi32>
    %6 = arith.cmpi eq, %3, %5 : vector<512x64xi32>
    %7 = arith.extui %6 : vector<512x64xi1> to vector<512x64xi32>
    %8 = arith.sitofp %7 : vector<512x64xi32> to vector<512x64xf32>
    %9 = arith.truncf %8 : vector<512x64xf32> to vector<512x64xbf16>
    %c0_5 = arith.constant 0 : index
    %c0_6 = arith.constant 0 : index
    %10 = vector.load %arg6[%c0_5, %c0_6] : memref<512x1xi32, #tpu.memory_space<vmem>>, vector<512x1xi32>
    %11 = vector.broadcast %10 : vector<512x1xi32> to vector<512x64xi32>
    %12 = arith.cmpi eq, %3, %11 : vector<512x64xi32>
    %13 = arith.extui %12 : vector<512x64xi1> to vector<512x64xi32>
    %14 = arith.sitofp %13 : vector<512x64xi32> to vector<512x64xf32>
    %15 = arith.truncf %14 : vector<512x64xf32> to vector<512x64xbf16>
    %16 = arith.addf %9, %15 : vector<512x64xbf16>
    %c0_7 = arith.constant 0 : index
    %c0_8 = arith.constant 0 : index
    %17 = vector.load %arg3[%c0_7, %c0_8] : memref<64x128xbf16, #tpu.memory_space<vmem>>, vector<64x128xbf16>
    %cst_9 = arith.constant dense<0.000000e+00> : vector<512x128xf32>
    %18 = tpu.matmul %16, %17, %cst_9 {dimension_numbers = #tpu.dot_dimension_numbers<[1], [0], [0], [1], [0, 0, 1, 1], [], []>} : vector<512x64xbf16>, vector<64x128xbf16>, vector<512x128xf32> -> vector<512x128xf32>
    %cst_10 = arith.constant 5.000000e-01 : f32
    %19 = vector.broadcast %cst_10 : f32 to vector<512x128xf32>
    %20 = arith.mulf %19, %18 : vector<512x128xf32>
    %c0_11 = arith.constant 0 : index
    %c0_12 = arith.constant 0 : index
    %21 = vector.load %arg4[%c0_11, %c0_12] : memref<64x128xbf16, #tpu.memory_space<vmem>>, vector<64x128xbf16>
    %cst_13 = arith.constant dense<0.000000e+00> : vector<512x128xf32>
    %22 = tpu.matmul %15, %21, %cst_13 {dimension_numbers = #tpu.dot_dimension_numbers<[1], [0], [0], [1], [0, 0, 1, 1], [], []>} : vector<512x64xbf16>, vector<64x128xbf16>, vector<512x128xf32> -> vector<512x128xf32>
    %23 = arith.addf %2, %22 : vector<512x128xf32>
    %24 = arith.truncf %23 : vector<512x128xf32> to vector<512x128xbf16>
    %c0_14 = arith.constant 0 : index
    %c0_15 = arith.constant 0 : index
    %25 = vector.load %arg7[%c0_14, %c0_15] : memref<128x128xbf16, #tpu.memory_space<vmem>>, vector<128x128xbf16>
    %cst_16 = arith.constant dense<0.000000e+00> : vector<512x128xf32>
    %26 = tpu.matmul %24, %25, %cst_16 {dimension_numbers = #tpu.dot_dimension_numbers<[1], [0], [0], [1], [0, 0, 1, 1], [], []>} : vector<512x128xbf16>, vector<128x128xbf16>, vector<512x128xf32> -> vector<512x128xf32>
    %27 = arith.truncf %20 : vector<512x128xf32> to vector<512x128xbf16>
    %c0_17 = arith.constant 0 : index
    %c0_18 = arith.constant 0 : index
    %28 = vector.load %arg8[%c0_17, %c0_18] : memref<128x128xbf16, #tpu.memory_space<vmem>>, vector<128x128xbf16>
    %cst_19 = arith.constant dense<0.000000e+00> : vector<512x128xf32>
    %29 = tpu.matmul %27, %28, %cst_19 {dimension_numbers = #tpu.dot_dimension_numbers<[1], [0], [0], [1], [0, 0, 1, 1], [], []>} : vector<512x128xbf16>, vector<128x128xbf16>, vector<512x128xf32> -> vector<512x128xf32>
    %30 = arith.addf %26, %29 : vector<512x128xf32>
    %c0_20 = arith.constant 0 : index
    %c0_21 = arith.constant 0 : index
    %31 = vector.load %arg9[%c0_20, %c0_21] : memref<1x128xf32, #tpu.memory_space<vmem>>, vector<1x128xf32>
    %32 = vector.broadcast %31 : vector<1x128xf32> to vector<512x128xf32>
    %33 = arith.addf %30, %32 : vector<512x128xf32>
    %cst_22 = arith.constant 0.000000e+00 : f32
    %34 = vector.broadcast %cst_22 : f32 to vector<512x128xf32>
    %35 = arith.maximumf %33, %34 : vector<512x128xf32>
    %36 = arith.truncf %35 : vector<512x128xf32> to vector<512x128xbf16>
    %c0_23 = arith.constant 0 : index
    %c0_24 = arith.constant 0 : index
    %37 = vector.load %arg10[%c0_23, %c0_24] : memref<512x128xbf16, #tpu.memory_space<vmem>>, vector<512x128xbf16>
    tpu.vector_store %arg10[%c0_23, %c0_24], %36 {strides = array<i32>} : memref<512x128xbf16, #tpu.memory_space<vmem>>, vector<512x128xbf16>,
    return
  }
  func.func @transform_0(%arg0: i32) -> (i32, i32) {
    %c0_i32 = arith.constant 0 : i32
    %c0_i32_0 = arith.constant 0 : i32
    return %arg0, %c0_i32 : i32, i32
  }
  func.func @transform_1(%arg0: i32) -> (i32, i32) {
    %c0_i32 = arith.constant 0 : i32
    %c0_i32_0 = arith.constant 0 : i32
    %c0_i32_1 = arith.constant 0 : i32
    return %c0_i32, %c0_i32_0 : i32, i32
  }
  func.func @transform_2(%arg0: i32) -> (i32, i32) {
    %c0_i32 = arith.constant 0 : i32
    %c0_i32_0 = arith.constant 0 : i32
    %c0_i32_1 = arith.constant 0 : i32
    return %c0_i32, %c0_i32_0 : i32, i32
  }
  func.func @transform_3(%arg0: i32) -> (i32, i32) {
    %c0_i32 = arith.constant 0 : i32
    %c0_i32_0 = arith.constant 0 : i32
    %c0_i32_1 = arith.constant 0 : i32
    return %c0_i32, %c0_i32_0 : i32, i32
  }
  func.func @transform_4(%arg0: i32) -> (i32, i32) {
    %c0_i32 = arith.constant 0 : i32
    %c0_i32_0 = arith.constant 0 : i32
    return %arg0, %c0_i32 : i32, i32
  }
  func.func @transform_5(%arg0: i32) -> (i32, i32) {
    %c0_i32 = arith.constant 0 : i32
    %c0_i32_0 = arith.constant 0 : i32
    return %arg0, %c0_i32 : i32, i32
  }
  func.func @transform_6(%arg0: i32) -> (i32, i32) {
    %c0_i32 = arith.constant 0 : i32
    %c0_i32_0 = arith.constant 0 : i32
    %c0_i32_1 = arith.constant 0 : i32
    return %c0_i32, %c0_i32_0 : i32, i32
  }
  func.func @transform_7(%arg0: i32) -> (i32, i32) {
    %c0_i32 = arith.constant 0 : i32
    %c0_i32_0 = arith.constant 0 : i32
    %c0_i32_1 = arith.constant 0 : i32
    return %c0_i32, %c0_i32_0 : i32, i32
  }
  func.func @transform_8(%arg0: i32) -> (i32, i32) {
    %c0_i32 = arith.constant 0 : i32
    %c0_i32_0 = arith.constant 0 : i32
    %c0_i32_1 = arith.constant 0 : i32
    return %c0_i32, %c0_i32_0 : i32, i32
  }
  func.func @transform_9(%arg0: i32) -> (i32, i32) {
    %c0_i32 = arith.constant 0 : i32
    %c0_i32_0 = arith.constant 0 : i32
    return %arg0, %c0_i32 : i32, i32
  }
}

module attributes {stable_mosaic.version = 11 : i64} {
  func.func @_edge_agg_kernel(%arg0: i32, %arg1: i32, %arg2: memref<512x128xbf16, #tpu.memory_space<vmem>>, %arg3: memref<128x128xbf16, #tpu.memory_space<vmem>>, %arg4: memref<1x512xi32, #tpu.memory_space<vmem>>, %arg5: memref<1x64x128xf32, #tpu.memory_space<vmem>>) attributes {dimension_semantics = [#tpu.dimension_semantics<parallel>, #tpu.dimension_semantics<arbitrary>], iteration_bounds = array<i64: 2, 3>, scalar_prefetch = 0 : i64, scratch_operands = 0 : i64, tpu.core_type = #tpu.core_type<tc>, window_params = [{transform_indices = @transform_0, window_bounds = array<i64: 512, 128>}, {pipeline_mode = #tpu.pipeline_mode<synchronous>, transform_indices = @transform_1, window_bounds = array<i64: 128, 128>}, {transform_indices = @transform_2, window_bounds = array<i64: 1, 512>}, {transform_indices = @transform_3, window_bounds = array<i64: 1, 64, 128>}]} {
    %c0_i32 = arith.constant 0 : i32
    %0 = arith.cmpi eq, %arg1, %c0_i32 : i32
    %1 = arith.extui %0 : i1 to i32
    %c0_i32_0 = arith.constant 0 : i32
    %2 = arith.cmpi ne, %1, %c0_i32_0 : i32
    scf.if %2 {
      %cst_13 = arith.constant 0.000000e+00 : f32
      %19 = vector.broadcast %cst_13 : f32 to vector<1x64x128xf32>
      %c0_14 = arith.constant 0 : index
      %c0_15 = arith.constant 0 : index
      %c0_16 = arith.constant 0 : index
      %20 = vector.load %arg5[%c0_14, %c0_15, %c0_16] : memref<1x64x128xf32, #tpu.memory_space<vmem>>, vector<1x64x128xf32>
      tpu.vector_store %arg5[%c0_14, %c0_15, %c0_16], %19 {strides = array<i32>} : memref<1x64x128xf32, #tpu.memory_space<vmem>>, vector<1x64x128xf32>,
    } else {
    }
    %c0 = arith.constant 0 : index
    %c0_1 = arith.constant 0 : index
    %3 = vector.load %arg2[%c0, %c0_1] : memref<512x128xbf16, #tpu.memory_space<vmem>>, vector<512x128xbf16>
    %c0_2 = arith.constant 0 : index
    %c0_3 = arith.constant 0 : index
    %4 = vector.load %arg3[%c0_2, %c0_3] : memref<128x128xbf16, #tpu.memory_space<vmem>>, vector<128x128xbf16>
    %cst = arith.constant dense<0.000000e+00> : vector<512x128xf32>
    %5 = tpu.matmul %3, %4, %cst {dimension_numbers = #tpu.dot_dimension_numbers<[1], [0], [0], [1], [0, 0, 1, 1], [], []>} : vector<512x128xbf16>, vector<128x128xbf16>, vector<512x128xf32> -> vector<512x128xf32>
    %6 = tpu.iota {dimensions = array<i32: 0>} : vector<64x512xi32>
    %c0_4 = arith.constant 0 : index
    %c0_5 = arith.constant 0 : index
    %7 = vector.load %arg4[%c0_4, %c0_5] : memref<1x512xi32, #tpu.memory_space<vmem>>, vector<1x512xi32>
    %8 = vector.broadcast %7 : vector<1x512xi32> to vector<64x512xi32>
    %9 = arith.cmpi eq, %6, %8 : vector<64x512xi32>
    %10 = arith.extui %9 : vector<64x512xi1> to vector<64x512xi32>
    %11 = arith.sitofp %10 : vector<64x512xi32> to vector<64x512xf32>
    %12 = arith.truncf %11 : vector<64x512xf32> to vector<64x512xbf16>
    %13 = arith.truncf %5 : vector<512x128xf32> to vector<512x128xbf16>
    %cst_6 = arith.constant dense<0.000000e+00> : vector<64x128xf32>
    %14 = tpu.matmul %12, %13, %cst_6 {dimension_numbers = #tpu.dot_dimension_numbers<[1], [0], [0], [1], [0, 0, 1, 1], [], []>} : vector<64x512xbf16>, vector<512x128xbf16>, vector<64x128xf32> -> vector<64x128xf32>
    %c0_7 = arith.constant 0 : index
    %c0_8 = arith.constant 0 : index
    %c0_9 = arith.constant 0 : index
    %15 = vector.load %arg5[%c0_7, %c0_8, %c0_9] : memref<1x64x128xf32, #tpu.memory_space<vmem>>, vector<1x64x128xf32>
    %16 = vector.shape_cast %14 : vector<64x128xf32> to vector<1x64x128xf32>
    %17 = arith.addf %15, %16 : vector<1x64x128xf32>
    %c0_10 = arith.constant 0 : index
    %c0_11 = arith.constant 0 : index
    %c0_12 = arith.constant 0 : index
    %18 = vector.load %arg5[%c0_10, %c0_11, %c0_12] : memref<1x64x128xf32, #tpu.memory_space<vmem>>, vector<1x64x128xf32>
    tpu.vector_store %arg5[%c0_10, %c0_11, %c0_12], %17 {strides = array<i32>} : memref<1x64x128xf32, #tpu.memory_space<vmem>>, vector<1x64x128xf32>,
    return
  }
  func.func @transform_0(%arg0: i32, %arg1: i32) -> (i32, i32) {
    %c3_i32 = arith.constant 3 : i32
    %0 = arith.muli %arg0, %c3_i32 : i32
    %1 = arith.addi %0, %arg1 : i32
    %c0_i32 = arith.constant 0 : i32
    %c0_i32_0 = arith.constant 0 : i32
    return %1, %c0_i32 : i32, i32
  }
  func.func @transform_1(%arg0: i32, %arg1: i32) -> (i32, i32) {
    %c0_i32 = arith.constant 0 : i32
    %c0_i32_0 = arith.constant 0 : i32
    %c0_i32_1 = arith.constant 0 : i32
    return %c0_i32, %c0_i32_0 : i32, i32
  }
  func.func @transform_2(%arg0: i32, %arg1: i32) -> (i32, i32) {
    %c3_i32 = arith.constant 3 : i32
    %0 = arith.muli %arg0, %c3_i32 : i32
    %1 = arith.addi %0, %arg1 : i32
    %c0_i32 = arith.constant 0 : i32
    %c0_i32_0 = arith.constant 0 : i32
    return %c0_i32, %1 : i32, i32
  }
  func.func @transform_3(%arg0: i32, %arg1: i32) -> (i32, i32, i32) {
    %c0_i32 = arith.constant 0 : i32
    %c0_i32_0 = arith.constant 0 : i32
    %c0_i32_1 = arith.constant 0 : i32
    return %arg0, %c0_i32, %c0_i32_0 : i32, i32, i32
  }
}

module attributes {stable_mosaic.version = 11 : i64} {
  func.func @_node_combine_kernel(%arg0: i32, %arg1: memref<64x128xbf16, #tpu.memory_space<vmem>>, %arg2: memref<128x128xbf16, #tpu.memory_space<vmem>>, %arg3: memref<1x128xf32, #tpu.memory_space<vmem>>, %arg4: memref<2x64x128xf32, #tpu.memory_space<vmem>>, %arg5: memref<64x1xf32, #tpu.memory_space<vmem>>, %arg6: memref<64x128xbf16, #tpu.memory_space<vmem>>, %arg7: memref<64x128xbf16, #tpu.memory_space<vmem>>) attributes {dimension_semantics = [#tpu.dimension_semantics<parallel>], iteration_bounds = array<i64: 1>, scalar_prefetch = 0 : i64, scratch_operands = 0 : i64, tpu.core_type = #tpu.core_type<tc>, window_params = [{transform_indices = @transform_0, window_bounds = array<i64: 64, 128>}, {pipeline_mode = #tpu.pipeline_mode<synchronous>, transform_indices = @transform_1, window_bounds = array<i64: 128, 128>}, {pipeline_mode = #tpu.pipeline_mode<synchronous>, transform_indices = @transform_2, window_bounds = array<i64: 1, 128>}, {transform_indices = @transform_3, window_bounds = array<i64: 2, 64, 128>}, {transform_indices = @transform_4, window_bounds = array<i64: 64, 1>}, {transform_indices = @transform_5, window_bounds = array<i64: 64, 128>}, {transform_indices = @transform_6, window_bounds = array<i64: 64, 128>}]} {
    %c0 = arith.constant 0 : index
    %c0_0 = arith.constant 0 : index
    %0 = vector.load %arg1[%c0, %c0_0] : memref<64x128xbf16, #tpu.memory_space<vmem>>, vector<64x128xbf16>
    %c0_1 = arith.constant 0 : index
    %c0_2 = arith.constant 0 : index
    %1 = vector.load %arg2[%c0_1, %c0_2] : memref<128x128xbf16, #tpu.memory_space<vmem>>, vector<128x128xbf16>
    %cst = arith.constant dense<0.000000e+00> : vector<64x128xf32>
    %2 = tpu.matmul %0, %1, %cst {dimension_numbers = #tpu.dot_dimension_numbers<[1], [0], [0], [1], [0, 0, 1, 1], [], []>} : vector<64x128xbf16>, vector<128x128xbf16>, vector<64x128xf32> -> vector<64x128xf32>
    %c0_3 = arith.constant 0 : index
    %c0_4 = arith.constant 0 : index
    %3 = vector.load %arg3[%c0_3, %c0_4] : memref<1x128xf32, #tpu.memory_space<vmem>>, vector<1x128xf32>
    %4 = vector.broadcast %3 : vector<1x128xf32> to vector<64x128xf32>
    %5 = arith.addf %2, %4 : vector<64x128xf32>
    %cst_5 = arith.constant 0.000000e+00 : f32
    %6 = vector.broadcast %cst_5 : f32 to vector<64x128xf32>
    %7 = arith.maximumf %5, %6 : vector<64x128xf32>
    %8 = arith.truncf %7 : vector<64x128xf32> to vector<64x128xbf16>
    %c0_6 = arith.constant 0 : index
    %c0_7 = arith.constant 0 : index
    %9 = vector.load %arg6[%c0_6, %c0_7] : memref<64x128xbf16, #tpu.memory_space<vmem>>, vector<64x128xbf16>
    tpu.vector_store %arg6[%c0_6, %c0_7], %8 {strides = array<i32>} : memref<64x128xbf16, #tpu.memory_space<vmem>>, vector<64x128xbf16>,
    %c0_8 = arith.constant 0 : index
    %c0_9 = arith.constant 0 : index
    %c0_10 = arith.constant 0 : index
    %10 = vector.load %arg4[%c0_8, %c0_9, %c0_10] : memref<2x64x128xf32, #tpu.memory_space<vmem>>, vector<2x64x128xf32>
    %cst_11 = arith.constant dense<0.000000e+00> : vector<64x128xf32>
    %11 = vector.multi_reduction <add>, %10, %cst_11 [0] : vector<2x64x128xf32> to vector<64x128xf32>
    %c0_12 = arith.constant 0 : index
    %c0_13 = arith.constant 0 : index
    %12 = vector.load %arg5[%c0_12, %c0_13] : memref<64x1xf32, #tpu.memory_space<vmem>>, vector<64x1xf32>
    %13 = vector.broadcast %12 : vector<64x1xf32> to vector<64x128xf32>
    %14 = arith.mulf %11, %13 : vector<64x128xf32>
    %15 = arith.truncf %14 : vector<64x128xf32> to vector<64x128xbf16>
    %c0_14 = arith.constant 0 : index
    %c0_15 = arith.constant 0 : index
    %16 = vector.load %arg7[%c0_14, %c0_15] : memref<64x128xbf16, #tpu.memory_space<vmem>>, vector<64x128xbf16>
    tpu.vector_store %arg7[%c0_14, %c0_15], %15 {strides = array<i32>} : memref<64x128xbf16, #tpu.memory_space<vmem>>, vector<64x128xbf16>,
    return
  }
  func.func @transform_0(%arg0: i32) -> (i32, i32) {
    %c0_i32 = arith.constant 0 : i32
    %c0_i32_0 = arith.constant 0 : i32
    return %arg0, %c0_i32 : i32, i32
  }
  func.func @transform_1(%arg0: i32) -> (i32, i32) {
    %c0_i32 = arith.constant 0 : i32
    %c0_i32_0 = arith.constant 0 : i32
    %c0_i32_1 = arith.constant 0 : i32
    return %c0_i32, %c0_i32_0 : i32, i32
  }
  func.func @transform_2(%arg0: i32) -> (i32, i32) {
    %c0_i32 = arith.constant 0 : i32
    %c0_i32_0 = arith.constant 0 : i32
    %c0_i32_1 = arith.constant 0 : i32
    return %c0_i32, %c0_i32_0 : i32, i32
  }
  func.func @transform_3(%arg0: i32) -> (i32, i32, i32) {
    %c0_i32 = arith.constant 0 : i32
    %c0_i32_0 = arith.constant 0 : i32
    %c0_i32_1 = arith.constant 0 : i32
    return %c0_i32, %arg0, %c0_i32_0 : i32, i32, i32
  }
  func.func @transform_4(%arg0: i32) -> (i32, i32) {
    %c0_i32 = arith.constant 0 : i32
    %c0_i32_0 = arith.constant 0 : i32
    return %arg0, %c0_i32 : i32, i32
  }
  func.func @transform_5(%arg0: i32) -> (i32, i32) {
    %c0_i32 = arith.constant 0 : i32
    %c0_i32_0 = arith.constant 0 : i32
    return %arg0, %c0_i32 : i32, i32
  }
  func.func @transform_6(%arg0: i32) -> (i32, i32) {
    %c0_i32 = arith.constant 0 : i32
    %c0_i32_0 = arith.constant 0 : i32
    return %arg0, %c0_i32 : i32, i32
  }
}

module attributes {stable_mosaic.version = 11 : i64} {
  func.func @_edge_update_kernel(%arg0: i32, %arg1: memref<512x128xbf16, #tpu.memory_space<vmem>>, %arg2: memref<128x128xbf16, #tpu.memory_space<vmem>>, %arg3: memref<64x128xbf16, #tpu.memory_space<vmem>>, %arg4: memref<64x128xbf16, #tpu.memory_space<vmem>>, %arg5: memref<512x1xi32, #tpu.memory_space<vmem>>, %arg6: memref<512x1xi32, #tpu.memory_space<vmem>>, %arg7: memref<128x128xbf16, #tpu.memory_space<vmem>>, %arg8: memref<128x128xbf16, #tpu.memory_space<vmem>>, %arg9: memref<1x128xf32, #tpu.memory_space<vmem>>, %arg10: memref<512x128xbf16, #tpu.memory_space<vmem>>) attributes {dimension_semantics = [#tpu.dimension_semantics<parallel>], iteration_bounds = array<i64: 6>, scalar_prefetch = 0 : i64, scratch_operands = 0 : i64, tpu.core_type = #tpu.core_type<tc>, window_params = [{transform_indices = @transform_0, window_bounds = array<i64: 512, 128>}, {pipeline_mode = #tpu.pipeline_mode<synchronous>, transform_indices = @transform_1, window_bounds = array<i64: 128, 128>}, {pipeline_mode = #tpu.pipeline_mode<synchronous>, transform_indices = @transform_2, window_bounds = array<i64: 64, 128>}, {pipeline_mode = #tpu.pipeline_mode<synchronous>, transform_indices = @transform_3, window_bounds = array<i64: 64, 128>}, {transform_indices = @transform_4, window_bounds = array<i64: 512, 1>}, {transform_indices = @transform_5, window_bounds = array<i64: 512, 1>}, {pipeline_mode = #tpu.pipeline_mode<synchronous>, transform_indices = @transform_6, window_bounds = array<i64: 128, 128>}, {pipeline_mode = #tpu.pipeline_mode<synchronous>, transform_indices = @transform_7, window_bounds = array<i64: 128, 128>}, {pipeline_mode = #tpu.pipeline_mode<synchronous>, transform_indices = @transform_8, window_bounds = array<i64: 1, 128>}, {transform_indices = @transform_9, window_bounds = array<i64: 512, 128>}]} {
    %c0 = arith.constant 0 : index
    %c0_0 = arith.constant 0 : index
    %0 = vector.load %arg1[%c0, %c0_0] : memref<512x128xbf16, #tpu.memory_space<vmem>>, vector<512x128xbf16>
    %c0_1 = arith.constant 0 : index
    %c0_2 = arith.constant 0 : index
    %1 = vector.load %arg2[%c0_1, %c0_2] : memref<128x128xbf16, #tpu.memory_space<vmem>>, vector<128x128xbf16>
    %cst = arith.constant dense<0.000000e+00> : vector<512x128xf32>
    %2 = tpu.matmul %0, %1, %cst {dimension_numbers = #tpu.dot_dimension_numbers<[1], [0], [0], [1], [0, 0, 1, 1], [], []>} : vector<512x128xbf16>, vector<128x128xbf16>, vector<512x128xf32> -> vector<512x128xf32>
    %3 = tpu.iota {dimensions = array<i32: 1>} : vector<512x64xi32>
    %c0_3 = arith.constant 0 : index
    %c0_4 = arith.constant 0 : index
    %4 = vector.load %arg5[%c0_3, %c0_4] : memref<512x1xi32, #tpu.memory_space<vmem>>, vector<512x1xi32>
    %5 = vector.broadcast %4 : vector<512x1xi32> to vector<512x64xi32>
    %6 = arith.cmpi eq, %3, %5 : vector<512x64xi32>
    %7 = arith.extui %6 : vector<512x64xi1> to vector<512x64xi32>
    %8 = arith.sitofp %7 : vector<512x64xi32> to vector<512x64xf32>
    %9 = arith.truncf %8 : vector<512x64xf32> to vector<512x64xbf16>
    %c0_5 = arith.constant 0 : index
    %c0_6 = arith.constant 0 : index
    %10 = vector.load %arg6[%c0_5, %c0_6] : memref<512x1xi32, #tpu.memory_space<vmem>>, vector<512x1xi32>
    %11 = vector.broadcast %10 : vector<512x1xi32> to vector<512x64xi32>
    %12 = arith.cmpi eq, %3, %11 : vector<512x64xi32>
    %13 = arith.extui %12 : vector<512x64xi1> to vector<512x64xi32>
    %14 = arith.sitofp %13 : vector<512x64xi32> to vector<512x64xf32>
    %15 = arith.truncf %14 : vector<512x64xf32> to vector<512x64xbf16>
    %16 = arith.addf %9, %15 : vector<512x64xbf16>
    %c0_7 = arith.constant 0 : index
    %c0_8 = arith.constant 0 : index
    %17 = vector.load %arg3[%c0_7, %c0_8] : memref<64x128xbf16, #tpu.memory_space<vmem>>, vector<64x128xbf16>
    %cst_9 = arith.constant dense<0.000000e+00> : vector<512x128xf32>
    %18 = tpu.matmul %16, %17, %cst_9 {dimension_numbers = #tpu.dot_dimension_numbers<[1], [0], [0], [1], [0, 0, 1, 1], [], []>} : vector<512x64xbf16>, vector<64x128xbf16>, vector<512x128xf32> -> vector<512x128xf32>
    %cst_10 = arith.constant 5.000000e-01 : f32
    %19 = vector.broadcast %cst_10 : f32 to vector<512x128xf32>
    %20 = arith.mulf %19, %18 : vector<512x128xf32>
    %c0_11 = arith.constant 0 : index
    %c0_12 = arith.constant 0 : index
    %21 = vector.load %arg4[%c0_11, %c0_12] : memref<64x128xbf16, #tpu.memory_space<vmem>>, vector<64x128xbf16>
    %cst_13 = arith.constant dense<0.000000e+00> : vector<512x128xf32>
    %22 = tpu.matmul %15, %21, %cst_13 {dimension_numbers = #tpu.dot_dimension_numbers<[1], [0], [0], [1], [0, 0, 1, 1], [], []>} : vector<512x64xbf16>, vector<64x128xbf16>, vector<512x128xf32> -> vector<512x128xf32>
    %23 = arith.addf %2, %22 : vector<512x128xf32>
    %24 = arith.truncf %23 : vector<512x128xf32> to vector<512x128xbf16>
    %c0_14 = arith.constant 0 : index
    %c0_15 = arith.constant 0 : index
    %25 = vector.load %arg7[%c0_14, %c0_15] : memref<128x128xbf16, #tpu.memory_space<vmem>>, vector<128x128xbf16>
    %cst_16 = arith.constant dense<0.000000e+00> : vector<512x128xf32>
    %26 = tpu.matmul %24, %25, %cst_16 {dimension_numbers = #tpu.dot_dimension_numbers<[1], [0], [0], [1], [0, 0, 1, 1], [], []>} : vector<512x128xbf16>, vector<128x128xbf16>, vector<512x128xf32> -> vector<512x128xf32>
    %27 = arith.truncf %20 : vector<512x128xf32> to vector<512x128xbf16>
    %c0_17 = arith.constant 0 : index
    %c0_18 = arith.constant 0 : index
    %28 = vector.load %arg8[%c0_17, %c0_18] : memref<128x128xbf16, #tpu.memory_space<vmem>>, vector<128x128xbf16>
    %cst_19 = arith.constant dense<0.000000e+00> : vector<512x128xf32>
    %29 = tpu.matmul %27, %28, %cst_19 {dimension_numbers = #tpu.dot_dimension_numbers<[1], [0], [0], [1], [0, 0, 1, 1], [], []>} : vector<512x128xbf16>, vector<128x128xbf16>, vector<512x128xf32> -> vector<512x128xf32>
    %30 = arith.addf %26, %29 : vector<512x128xf32>
    %c0_20 = arith.constant 0 : index
    %c0_21 = arith.constant 0 : index
    %31 = vector.load %arg9[%c0_20, %c0_21] : memref<1x128xf32, #tpu.memory_space<vmem>>, vector<1x128xf32>
    %32 = vector.broadcast %31 : vector<1x128xf32> to vector<512x128xf32>
    %33 = arith.addf %30, %32 : vector<512x128xf32>
    %34 = arith.truncf %33 : vector<512x128xf32> to vector<512x128xbf16>
    %c0_22 = arith.constant 0 : index
    %c0_23 = arith.constant 0 : index
    %35 = vector.load %arg10[%c0_22, %c0_23] : memref<512x128xbf16, #tpu.memory_space<vmem>>, vector<512x128xbf16>
    tpu.vector_store %arg10[%c0_22, %c0_23], %34 {strides = array<i32>} : memref<512x128xbf16, #tpu.memory_space<vmem>>, vector<512x128xbf16>,
    return
  }
  func.func @transform_0(%arg0: i32) -> (i32, i32) {
    %c0_i32 = arith.constant 0 : i32
    %c0_i32_0 = arith.constant 0 : i32
    return %arg0, %c0_i32 : i32, i32
  }
  func.func @transform_1(%arg0: i32) -> (i32, i32) {
    %c0_i32 = arith.constant 0 : i32
    %c0_i32_0 = arith.constant 0 : i32
    %c0_i32_1 = arith.constant 0 : i32
    return %c0_i32, %c0_i32_0 : i32, i32
  }
  func.func @transform_2(%arg0: i32) -> (i32, i32) {
    %c0_i32 = arith.constant 0 : i32
    %c0_i32_0 = arith.constant 0 : i32
    %c0_i32_1 = arith.constant 0 : i32
    return %c0_i32, %c0_i32_0 : i32, i32
  }
  func.func @transform_3(%arg0: i32) -> (i32, i32) {
    %c0_i32 = arith.constant 0 : i32
    %c0_i32_0 = arith.constant 0 : i32
    %c0_i32_1 = arith.constant 0 : i32
    return %c0_i32, %c0_i32_0 : i32, i32
  }
  func.func @transform_4(%arg0: i32) -> (i32, i32) {
    %c0_i32 = arith.constant 0 : i32
    %c0_i32_0 = arith.constant 0 : i32
    return %arg0, %c0_i32 : i32, i32
  }
  func.func @transform_5(%arg0: i32) -> (i32, i32) {
    %c0_i32 = arith.constant 0 : i32
    %c0_i32_0 = arith.constant 0 : i32
    return %arg0, %c0_i32 : i32, i32
  }
  func.func @transform_6(%arg0: i32) -> (i32, i32) {
    %c0_i32 = arith.constant 0 : i32
    %c0_i32_0 = arith.constant 0 : i32
    %c0_i32_1 = arith.constant 0 : i32
    return %c0_i32, %c0_i32_0 : i32, i32
  }
  func.func @transform_7(%arg0: i32) -> (i32, i32) {
    %c0_i32 = arith.constant 0 : i32
    %c0_i32_0 = arith.constant 0 : i32
    %c0_i32_1 = arith.constant 0 : i32
    return %c0_i32, %c0_i32_0 : i32, i32
  }
  func.func @transform_8(%arg0: i32) -> (i32, i32) {
    %c0_i32 = arith.constant 0 : i32
    %c0_i32_0 = arith.constant 0 : i32
    %c0_i32_1 = arith.constant 0 : i32
    return %c0_i32, %c0_i32_0 : i32, i32
  }
  func.func @transform_9(%arg0: i32) -> (i32, i32) {
    %c0_i32 = arith.constant 0 : i32
    %c0_i32_0 = arith.constant 0 : i32
    return %arg0, %c0_i32 : i32, i32
  }
}

module attributes {stable_mosaic.version = 11 : i64} {
  func.func @_node_combine_kernel(%arg0: i32, %arg1: memref<64x128xbf16, #tpu.memory_space<vmem>>, %arg2: memref<128x128xbf16, #tpu.memory_space<vmem>>, %arg3: memref<1x128xf32, #tpu.memory_space<vmem>>, %arg4: memref<2x64x128xf32, #tpu.memory_space<vmem>>, %arg5: memref<64x1xf32, #tpu.memory_space<vmem>>, %arg6: memref<64x128xbf16, #tpu.memory_space<vmem>>, %arg7: memref<64x128xbf16, #tpu.memory_space<vmem>>) attributes {dimension_semantics = [#tpu.dimension_semantics<parallel>], iteration_bounds = array<i64: 1>, scalar_prefetch = 0 : i64, scratch_operands = 0 : i64, tpu.core_type = #tpu.core_type<tc>, window_params = [{transform_indices = @transform_0, window_bounds = array<i64: 64, 128>}, {pipeline_mode = #tpu.pipeline_mode<synchronous>, transform_indices = @transform_1, window_bounds = array<i64: 128, 128>}, {pipeline_mode = #tpu.pipeline_mode<synchronous>, transform_indices = @transform_2, window_bounds = array<i64: 1, 128>}, {transform_indices = @transform_3, window_bounds = array<i64: 2, 64, 128>}, {transform_indices = @transform_4, window_bounds = array<i64: 64, 1>}, {transform_indices = @transform_5, window_bounds = array<i64: 64, 128>}, {transform_indices = @transform_6, window_bounds = array<i64: 64, 128>}]} {
    %c0 = arith.constant 0 : index
    %c0_0 = arith.constant 0 : index
    %0 = vector.load %arg1[%c0, %c0_0] : memref<64x128xbf16, #tpu.memory_space<vmem>>, vector<64x128xbf16>
    %c0_1 = arith.constant 0 : index
    %c0_2 = arith.constant 0 : index
    %1 = vector.load %arg2[%c0_1, %c0_2] : memref<128x128xbf16, #tpu.memory_space<vmem>>, vector<128x128xbf16>
    %cst = arith.constant dense<0.000000e+00> : vector<64x128xf32>
    %2 = tpu.matmul %0, %1, %cst {dimension_numbers = #tpu.dot_dimension_numbers<[1], [0], [0], [1], [0, 0, 1, 1], [], []>} : vector<64x128xbf16>, vector<128x128xbf16>, vector<64x128xf32> -> vector<64x128xf32>
    %c0_3 = arith.constant 0 : index
    %c0_4 = arith.constant 0 : index
    %3 = vector.load %arg3[%c0_3, %c0_4] : memref<1x128xf32, #tpu.memory_space<vmem>>, vector<1x128xf32>
    %4 = vector.broadcast %3 : vector<1x128xf32> to vector<64x128xf32>
    %5 = arith.addf %2, %4 : vector<64x128xf32>
    %6 = arith.truncf %5 : vector<64x128xf32> to vector<64x128xbf16>
    %c0_5 = arith.constant 0 : index
    %c0_6 = arith.constant 0 : index
    %7 = vector.load %arg6[%c0_5, %c0_6] : memref<64x128xbf16, #tpu.memory_space<vmem>>, vector<64x128xbf16>
    tpu.vector_store %arg6[%c0_5, %c0_6], %6 {strides = array<i32>} : memref<64x128xbf16, #tpu.memory_space<vmem>>, vector<64x128xbf16>,
    %c0_7 = arith.constant 0 : index
    %c0_8 = arith.constant 0 : index
    %c0_9 = arith.constant 0 : index
    %8 = vector.load %arg4[%c0_7, %c0_8, %c0_9] : memref<2x64x128xf32, #tpu.memory_space<vmem>>, vector<2x64x128xf32>
    %cst_10 = arith.constant dense<0.000000e+00> : vector<64x128xf32>
    %9 = vector.multi_reduction <add>, %8, %cst_10 [0] : vector<2x64x128xf32> to vector<64x128xf32>
    %c0_11 = arith.constant 0 : index
    %c0_12 = arith.constant 0 : index
    %10 = vector.load %arg5[%c0_11, %c0_12] : memref<64x1xf32, #tpu.memory_space<vmem>>, vector<64x1xf32>
    %11 = vector.broadcast %10 : vector<64x1xf32> to vector<64x128xf32>
    %12 = arith.mulf %9, %11 : vector<64x128xf32>
    %13 = arith.truncf %12 : vector<64x128xf32> to vector<64x128xbf16>
    %c0_13 = arith.constant 0 : index
    %c0_14 = arith.constant 0 : index
    %14 = vector.load %arg7[%c0_13, %c0_14] : memref<64x128xbf16, #tpu.memory_space<vmem>>, vector<64x128xbf16>
    tpu.vector_store %arg7[%c0_13, %c0_14], %13 {strides = array<i32>} : memref<64x128xbf16, #tpu.memory_space<vmem>>, vector<64x128xbf16>,
    return
  }
  func.func @transform_0(%arg0: i32) -> (i32, i32) {
    %c0_i32 = arith.constant 0 : i32
    %c0_i32_0 = arith.constant 0 : i32
    return %arg0, %c0_i32 : i32, i32
  }
  func.func @transform_1(%arg0: i32) -> (i32, i32) {
    %c0_i32 = arith.constant 0 : i32
    %c0_i32_0 = arith.constant 0 : i32
    %c0_i32_1 = arith.constant 0 : i32
    return %c0_i32, %c0_i32_0 : i32, i32
  }
  func.func @transform_2(%arg0: i32) -> (i32, i32) {
    %c0_i32 = arith.constant 0 : i32
    %c0_i32_0 = arith.constant 0 : i32
    %c0_i32_1 = arith.constant 0 : i32
    return %c0_i32, %c0_i32_0 : i32, i32
  }
  func.func @transform_3(%arg0: i32) -> (i32, i32, i32) {
    %c0_i32 = arith.constant 0 : i32
    %c0_i32_0 = arith.constant 0 : i32
    %c0_i32_1 = arith.constant 0 : i32
    return %c0_i32, %arg0, %c0_i32_0 : i32, i32, i32
  }
  func.func @transform_4(%arg0: i32) -> (i32, i32) {
    %c0_i32 = arith.constant 0 : i32
    %c0_i32_0 = arith.constant 0 : i32
    return %arg0, %c0_i32 : i32, i32
  }
  func.func @transform_5(%arg0: i32) -> (i32, i32) {
    %c0_i32 = arith.constant 0 : i32
    %c0_i32_0 = arith.constant 0 : i32
    return %arg0, %c0_i32 : i32, i32
  }
  func.func @transform_6(%arg0: i32) -> (i32, i32) {
    %c0_i32 = arith.constant 0 : i32
    %c0_i32_0 = arith.constant 0 : i32
    return %arg0, %c0_i32 : i32, i32
  }
}

</mosaic_0001>

<bundles_post_ra>
// kernel: wtagnn_forward_padded.10
= control target key start
LH: loop header
LB: loop body
LE: loop exit
PB: predicated region body
PF: predicated region fallthrough
CT: control target
= control target key end

     0   :  { %12 = vsyncpa [#allocation3], 0  ;;  %s781_s0 = inlined_call_operand.hbm [shape: bf16[64,128], index: 0, kind: input, shape index: {}]   ;;  %s782_s1 = inlined_call_operand.hbm [shape: bf16[128,128], index: 1, kind: input, shape index: {}]   ;;  %s783_s2 = inlined_call_operand.hbm [shape: f32[1,128], index: 2, kind: input, shape index: {}]   ;;  %s784_s3 = inlined_call_operand.vmem [shape: f32[2,64,128], index: 3, kind: input, shape index: {}]   ;;  %s785_s4 = inlined_call_operand.vmem [shape: f32[64,1], index: 4, kind: input, shape index: {}]   ;;  %s786_s5 = inlined_call_operand.vmem [shape: bf16[64,128], index: 5, kind: output, shape index: {0}]   ;;  %s787_s6 = inlined_call_operand.vmem [shape: bf16[64,128], index: 6, kind: output, shape index: {1}]  }
   0x1   :  { %13 = vsyncpa [#allocation5], 0  ;;  %s635_s21 = smov [#allocation4]   ;;  %s636_s23 = smov [#allocation2]  }
   0x2   :  { %s31_s22 = sshll.u32 %s635_s21, 4  ;;  %s19_s24 = sshll.u32 %s636_s23, 4  ;;  %s32_s22 = int_to_ptr.vmem [resolvable:$true] %s31_s22  ;;  %s20_s24 = int_to_ptr.vmem [resolvable:$true] %s19_s24 }
   0x3   :  { %s579_s25 = scalar_lea.vmem %s32_s22, 1024  ;;  %p584_p1 = scmp.lt.s32.totalorder %s32_s22, %s32_s22 }
   0x4   :  { %p580_p0 = scmp.ne.s32.totalorder %s32_s22, %s579_s25  ;;  %p585_p2 = scmp.lt.s32.totalorder %s579_s25, %s579_s25 }
   0x6   :  { %p586_p3 = por %p585_p2, %p584_p1 }
   0x8   :  { %p587_p4 = pnand %p586_p3, %p580_p0 }
   0xa   :  { %590 = shalt.err (!%p587_p4)
}
   0xb   :  { %s637_s26 = smov 64   ;;  %s638_s27 = smov 4  }
   0xc   :  { %37 = dma.hbm_to_vmem [thread:$0]  %s782_s1, 1024, %s32_s22, [#allocation5], %s637_s26, %s637_s26, %s638_s27  }
   0xd   :  { %s599_s30 = scalar_lea.vmem %s20_s24, 512  ;;  %p604_p6 = scmp.lt.s32.totalorder %s20_s24, %s20_s24 }
   0xe   :  { %p600_p5 = scmp.ne.s32.totalorder %s20_s24, %s599_s30  ;;  %p605_p7 = scmp.lt.s32.totalorder %s599_s30, %s599_s30 }
  0x10   :  { %p606_p8 = por %p605_p7, %p604_p6 }
  0x12   :  { %p607_p9 = pnand %p606_p8, %p600_p5 }
  0x14   :  { %610 = shalt.err (!%p607_p9)
}
  0x15   :  { %25 = dma.hbm_to_vmem [thread:$0]  %s781_s0, 512, %s20_s24, [#allocation3], %s637_s26, %s637_s26, %s638_s27  }
  0x16   :  { %s639_s9 = smov [#allocation6]  }
  0x17   :  { %s44_s10 = sshll.u32 %s639_s9, 4  ;;  %s45_s10 = int_to_ptr.vmem [resolvable:$true] %s44_s10 }
  0x18   :  { %s619_s11 = scalar_lea.vmem %s45_s10, 16  ;;  %s623_s12 = scalar_lea.vmem %s45_s10, 32 }
  0x19   :  { %p620_p10 = scmp.ne.s32.totalorder %s45_s10, %s619_s11  ;;  %p624_p11 = scmp.lt.s32.totalorder %s45_s10, %s45_s10 }
  0x1a   :  { %p625_p12 = scmp.lt.s32.totalorder %s623_s12, %s619_s11 }
  0x1c   :  { %p626_p13 = por %p625_p12, %p624_p11 }
  0x1e   :  { %p627_p0 = pnand %p626_p13, %p620_p10 }
  0x20   :  { %630 = shalt.err (!%p627_p0)
}
  0x21   :  { %47 = dma.hbm_to_vmem [thread:$0]  %s783_s2, 16, %s45_s10, [#allocation5]  }
  0x22   :  { %631 = dma.done.wait [#allocation3], 512  }
  0x23   :  { %632 = vsyncadd [#allocation3], 4294966784 }
  0x24   :  { %633 = dma.done.wait [#allocation5], 1040  }
  0x25   :  { %634 = vsyncadd [#allocation5], 4294966256  ;;  %v640_v0 = vmov 0   ;;  %v559_v1 = vld [vmem:[#allocation4 + $0x38] sm:$0xff]   ;;  %v560_v2 = vld [vmem:[#allocation4 + $0x30] sm:$0xff]  }
  0x26   :  { %558 = vset.pattern.permute.xlu1 %v640_v0  ;;  %557 = vset.pattern.permute.xlu0 %v640_v0  ;;  %v561_v3 = vld [vmem:[#allocation4 + $0x28] sm:$0xff]   ;;  %v562_v4 = vld [vmem:[#allocation4 + $0x20] sm:$0xff]   ;;  %v568_v6 = vld [vmem:[#allocation2 + $0x10] sm:$0xff]  }
  0x27   :  { %511 = vmatprep.subr.bf16.mxu0 %v559_v1  ;;  %535 = vmatprep.subr.bf16.mxu1 %v559_v1  ;;  %v567_v5 = vld [vmem:[#allocation2] sm:$0xff]   ;;  %v563_v7 = vld [vmem:[#allocation4 + $0x18] sm:$0xff]   ;;  %v304_v8 = vld [vmem:[%s785_s4 + $0x10] sm:$0xff] }
  0x28   :  { %512 = vmatpush3.bf16.msra.mxu0 %v559_v1  ;;  %543 = vmatpush3.bf16.msra.mxu1 %v559_v1  ;;  %v302_v9 = vld [vmem:[%s785_s4] sm:$0xff]  ;;  %v305_v10 = vld [vmem:[%s785_s4 + $0x18] sm:$0xff]  ;;  %v303_v11 = vld [vmem:[%s785_s4 + $0x8] sm:$0xff] }
  0x29   :  { %513 = vmatprep.subr.bf16.mxu0 %v560_v2  ;;  %536 = vmatprep.subr.bf16.mxu1 %v560_v2  ;;  %v564_v12 = vld [vmem:[#allocation4 + $0x10] sm:$0xff]   ;;  %v307_v13 = vld [vmem:[%s785_s4 + $0x28] sm:$0xff]  ;;  %v306_v14 = vld [vmem:[%s785_s4 + $0x20] sm:$0xff] }
  0x2a   :  { %527 = vmatprep.mubr.bf16.mxu0 %v567_v5  ;;  %531 = vmatprep.mubr.bf16.mxu1 %v568_v6  ;;  %v565_v15 = vld [vmem:[#allocation4 + $0x8] sm:$0xff]   ;;  %v309_v16 = vld [vmem:[%s785_s4 + $0x38] sm:$0xff]  ;;  %v308_v17 = vld [vmem:[%s785_s4 + $0x30] sm:$0xff] }
  0x2b   :  { %322 = vperm.xlu1 %558, %v304_v8   ;;  %312 = vperm.xlu0 %557, %v302_v9   ;;  %v566_v18 = vld [vmem:[#allocation4] sm:$0xff]   ;;  %v569_v19 = vld [vmem:[#allocation2 + $0x8] sm:$0xff]   ;;  %v570_v20 = vld [vmem:[#allocation2 + $0x18] sm:$0xff]  }
  0x2c   :  { %514 = vmatpush3.bf16.msra.mxu0 %v560_v2  ;;  %544 = vmatpush3.bf16.msra.mxu1 %v560_v2  ;;  %v280_v21 = vld [vmem:[%s784_s3 + $0x10] sm:$0xff]  ;;  %v278_v23 = vld [vmem:[%s784_s3] sm:$0xff]  ;;  %v281_v25 = vld [vmem:[%s784_s3 + $0x18] sm:$0xff] }
  0x2d   :  { %515 = vmatprep.subr.bf16.mxu0 %v561_v3  ;;  %537 = vmatprep.subr.bf16.mxu1 %v561_v3  ;;  %v288_v22 = vld [vmem:[%s784_s3 + $0x50] sm:$0xff]  ;;  %v286_v24 = vld [vmem:[%s784_s3 + $0x40] sm:$0xff]  ;;  %v289_v26 = vld [vmem:[%s784_s3 + $0x58] sm:$0xff] }
  0x2e   :  { %v296_v27 = vadd.f32 %v288_v22, %v280_v21  ;;  %v279_v28 = vld [vmem:[%s784_s3 + $0x8] sm:$0xff]  ;;  %v294_v31 = vadd.f32 %v286_v24, %v278_v23  ;;  %v297_v33 = vadd.f32 %v289_v26, %v281_v25  ;;  %v282_v38 = vld [vmem:[%s784_s3 + $0x20] sm:$0xff]  ;;  %v285_v47 = vld [vmem:[%s784_s3 + $0x38] sm:$0xff] }
  0x2f   :  { %327 = vperm.xlu1 %558, %v305_v10   ;;  %317 = vperm.xlu0 %557, %v303_v11   ;;  %v287_v29 = vld [vmem:[%s784_s3 + $0x48] sm:$0xff]  ;;  %v290_v39 = vld [vmem:[%s784_s3 + $0x60] sm:$0xff]  ;;  %v293_v48 = vld [vmem:[%s784_s3 + $0x78] sm:$0xff] }
  0x30   :  { %516 = vmatpush3.bf16.msra.mxu0 %v561_v3  ;;  %545 = vmatpush3.bf16.msra.mxu1 %v561_v3  ;;  %v295_v34 = vadd.f32 %v287_v29, %v279_v28  ;;  %v283_v35 = vld [vmem:[%s784_s3 + $0x28] sm:$0xff]  ;;  %v298_v46 = vadd.f32 %v290_v39, %v282_v38  ;;  %v284_v50 = vld [vmem:[%s784_s3 + $0x30] sm:$0xff]  ;;  %v301_v56 = vadd.f32 %v293_v48, %v285_v47  ;;  %v408_v1 = vld [vmem:[#allocation6] ss:$0 sm:$0xff] }
  0x31   :  { %517 = vmatprep.subr.bf16.mxu0 %v562_v4  ;;  %538 = vmatprep.subr.bf16.mxu1 %v562_v4  ;;  %v291_v36 = vld [vmem:[%s784_s3 + $0x68] sm:$0xff]  ;;  %v292_v51 = vld [vmem:[%s784_s3 + $0x70] sm:$0xff] }
  0x32   :  { %v299_v44 = vadd.f32 %v291_v36, %v283_v35  ;;  %v300_v58 = vadd.f32 %v292_v51, %v284_v50 }
  0x33   :  { %337 = vperm.xlu1 %558, %v307_v13   ;;  %332 = vperm.xlu0 %557, %v306_v14  }
  0x34   :  { %518 = vmatpush3.bf16.msra.mxu0 %v562_v4  ;;  %546 = vmatpush3.bf16.msra.mxu1 %v562_v4 }
  0x35   :  { %519 = vmatprep.subr.bf16.mxu0 %v563_v7  ;;  %539 = vmatprep.subr.bf16.mxu1 %v563_v7 }
  0x37   :  { %347 = vperm.xlu1 %558, %v309_v16   ;;  %342 = vperm.xlu0 %557, %v308_v17  }
  0x38   :  { %520 = vmatpush3.bf16.msra.mxu0 %v563_v7  ;;  %547 = vmatpush3.bf16.msra.mxu1 %v563_v7 }
  0x39   :  { %521 = vmatprep.subr.bf16.mxu0 %v564_v12  ;;  %540 = vmatprep.subr.bf16.mxu1 %v564_v12 }
  0x3c   :  { %522 = vmatpush3.bf16.msra.mxu0 %v564_v12  ;;  %548 = vmatpush3.bf16.msra.mxu1 %v564_v12 }
  0x3d   :  { %523 = vmatprep.subr.bf16.mxu0 %v565_v15  ;;  %541 = vmatprep.subr.bf16.mxu1 %v565_v15 }
  0x40   :  { %524 = vmatpush3.bf16.msra.mxu0 %v565_v15  ;;  %549 = vmatpush3.bf16.msra.mxu1 %v565_v15 }
  0x41   :  { %525 = vmatprep.subr.bf16.mxu0 %v566_v18  ;;  %542 = vmatprep.subr.bf16.mxu1 %v566_v18 }
  0x44   :  { %526 = vmatpush3.bf16.msra.mxu0 %v566_v18  ;;  %550 = vmatpush3.bf16.msra.mxu1 %v566_v18 }
  0x47   :  { %528 = vmatmul.mubr.bf16.vlgmr.msra.gmra.mxu0 %v569_v19  ;;  %532 = vmatmul.mubr.bf16.vlgmr.msra.gmra.mxu1 %v570_v20 }
  0xa6   :  { %v323_v30 = vpop.permute.xlu1 %322  ;;  %v313_v32 = vpop.permute.xlu0 %312 }
  0xa7   :  { %v352_v37 = vmul.f32 %v323_v30, %v296_v27  ;;  %v350_v40 = vmul.f32 %v313_v32, %v294_v31 }
  0xaa   :  { %v328_v41 = vpop.permute.xlu1 %327  ;;  %v318_v43 = vpop.permute.xlu0 %317 }
  0xab   :  { %v353_v42 = vmul.f32 %v328_v41, %v297_v33  ;;  %v351_v45 = vmul.f32 %v318_v43, %v295_v34 }
  0xad   :  { %v481_v49 = vpack.c.bf16 %v353_v42, %v352_v37  ;;  %v476_v52 = vpack.c.bf16 %v351_v45, %v350_v40 }
  0xae   :  { %v338_v53 = vpop.permute.xlu1 %337  ;;  %v333_v55 = vpop.permute.xlu0 %332 }
  0xaf   :  { %496 = vst [vmem:[%s787_s6 + $0x8] sm:$0xff] %v481_v49   ;;  %v355_v54 = vmul.f32 %v338_v53, %v299_v44  ;;  %477 = vst [vmem:[%s787_s6] sm:$0xff] %v476_v52   ;;  %v354_v57 = vmul.f32 %v333_v55, %v298_v46 }
  0xb1   :  { %v486_v59 = vpack.c.bf16 %v355_v54, %v354_v57 }
  0xb2   :  { %v348_v60 = vpop.permute.xlu1 %347  ;;  %v343_v62 = vpop.permute.xlu0 %342 }
  0xb3   :  { %v357_v61 = vmul.f32 %v348_v60, %v301_v56  ;;  %497 = vst [vmem:[%s787_s6 + $0x10] sm:$0xff] %v486_v59   ;;  %v356_v63 = vmul.f32 %v343_v62, %v300_v58 }
  0xb5   :  { %v491_v0 = vpack.c.bf16 %v357_v61, %v356_v63 }
  0xb7   :  { %498 = vst [vmem:[%s787_s6 + $0x18] sm:$0xff] %v491_v0  }
 0x107   :  { %v529_v2 = vpop.f32.mrf.mxu0  ;;  %v533_v3 = vpop.f32.mrf.mxu1 }
 0x108   :  { %v208_v4 = vadd.f32 %v529_v2, %v408_v1  ;;  %v224_v5 = vadd.f32 %v533_v3, %v408_v1 }
 0x109   :  { %v199_v6 = vpop.f32.mrf.mxu0  ;;  %v215_v7 = vpop.f32.mrf.mxu1 }
 0x10a   :  { %v200_v8 = vadd.f32 %v408_v1, %v199_v6  ;;  %v216_v9 = vadd.f32 %v408_v1, %v215_v7  ;;  %v232_v14 = vmax.f32 %v208_v4, 0.0  ;;  %v236_v15 = vmax.f32 %v224_v5, 0.0 }
 0x10b   :  { %v530_v10 = vpop.f32.mrf.mxu0  ;;  %v534_v11 = vpop.f32.mrf.mxu1 }
 0x10c   :  { %v211_v12 = vadd.f32 %v530_v10, %v408_v1  ;;  %v227_v13 = vadd.f32 %v534_v11, %v408_v1  ;;  %v230_v22 = vmax.f32 %v200_v8, 0.0  ;;  %v234_v23 = vmax.f32 %v216_v9, 0.0 }
 0x10d   :  { %v202_v16 = vpop.f32.mrf.mxu0  ;;  %v218_v17 = vpop.f32.mrf.mxu1 }
 0x10e   :  { %v233_v18 = vmax.f32 %v211_v12, 0.0  ;;  %v237_v19 = vmax.f32 %v227_v13, 0.0  ;;  %v203_v20 = vadd.f32 %v408_v1, %v202_v16  ;;  %v219_v21 = vadd.f32 %v408_v1, %v218_v17 }
 0x110   :  { %v461_v24 = vpack.c.bf16 %v233_v18, %v232_v14  ;;  %v471_v25 = vpack.c.bf16 %v237_v19, %v236_v15  ;;  %v231_v26 = vmax.f32 %v203_v20, 0.0  ;;  %v235_v27 = vmax.f32 %v219_v21, 0.0 }
 0x112   :  { %493 = vst [vmem:[%s786_s5 + $0x8] sm:$0xff] %v461_v24   ;;  %495 = vst [vmem:[%s786_s5 + $0x18] sm:$0xff] %v471_v25   ;;  %v456_v28 = vpack.c.bf16 %v231_v26, %v230_v22  ;;  %v466_v29 = vpack.c.bf16 %v235_v27, %v234_v23 }
 0x114   :  { %457 = vst [vmem:[%s786_s5] sm:$0xff] %v456_v28   ;;  %494 = vst [vmem:[%s786_s5 + $0x10] sm:$0xff] %v466_v29  }
 0x115   :  { %406 = vsyncpa [#allocation3], 1 }
 0x116   :  { %407 = vsyncpa [#allocation5], 1 }

// kernel: wtagnn_forward_padded.9
= control target key start
LH: loop header
LB: loop body
LE: loop exit
PB: predicated region body
PF: predicated region fallthrough
CT: control target
= control target key end

     0   :  { %8 = vsyncpa [#allocation3], 0  ;;  %s2436_s0 = inlined_call_operand.hbm [shape: bf16[3072,128], index: 0, kind: input, shape index: {}]   ;;  %s2437_s1 = inlined_call_operand.hbm [shape: bf16[128,128], index: 1, kind: input, shape index: {}]   ;;  %s2438_s2 = inlined_call_operand.hbm [shape: s32[1,3072], index: 2, kind: input, shape index: {}]   ;;  %s2439_s3 = inlined_call_operand.vmem [shape: f32[2,64,128], index: 3, kind: output, shape index: {}]  }
   0x1   :  { %10 = vsyncpa [#allocation3 + $0x1], 0 }
   0x2   :  { %11 = vsyncpa [#allocation5], 0  ;;  %s1988_s12 = smov 0   ;;  %s1990_s13 = smov 0  }
   0x3   :  { %s1992_s14 = smov 0   ;;  %s1994_s15 = smov 0  }
   0x4   :  { %s1996_s16 = smov 0   ;;  %s1998_s17 = smov 0  }
   0x5   :  { %s2000_s18 = smov 0   ;;  %s2002_s19 = smov 0  }
   0x6 LB: > { %s26_s20 = sadd.s32 1, %s1951_s17  ;;  %s29_s21 = sadd.s32 1, %s1955_s18  ;;  %s1959_s19 = sphi %s2002_s19, %s17_s19   ;;  %s1955_s18 = sphi %s2000_s18, %s2506_s18   ;;  %s1951_s17 = sphi %s1998_s17, %s2505_s17   ;;  %s1947_s16 = sphi %s1996_s16, %s2504_s16   ;;  %s1943_s15 = sphi %s1994_s15, %s2503_s15   ;;  %s1939_s14 = sphi %s1992_s14, %s2502_s14   ;;  %s1935_s13 = sphi %s1990_s13, %s2501_s13   ;;  %s1931_s12 = sphi %s1988_s12, %s2500_s12  }
   0x7   : > { %p27_p0 = scmp.ge.s32.totalorder %s26_s20, 3  ;;  %s33_s22 = smul.u32 3, %s1955_s18 }
   0x8   : > { %s40_s23 = sadd.s32 1, %s1939_s14  ;;  %p47_p1 = scmp.ne.s32.totalorder %s1939_s14, %s1935_s13 }
   0x9   : > { %s2508_s20 = smov (%p27_p0, %s26_s20), 0  ;;  %s2510_s21 = smov (!%p27_p0, %s29_s21), %s1955_s18 }
   0xa   : > { %s2038_s24 = sadd.s32 %s1951_s17, %s33_s22  ;;  %p48_p2 = scmp.eq.s32.totalorder %s1959_s19, 0 }
   0xb   : > { %p31_p3 = scmp.ge.s32.totalorder %s2510_s21, 2  ;;  %p1692_p5 = scmp.lt.s32.totalorder %s1959_s19, 6 }
   0xc   : > { %p2041_p4 = por %p48_p2, %p47_p1  ;;  %s167_s27 = sand.u32 1, %s1959_s19  }
   0xd   : > { %s2512_s21 = smov (%p31_p3, %s2510_s21), 0  ;;  %s169_s28 = sand.u32 1, %s1939_s14  }
   0xe   : > { %s35_s26 = smul.u32 3, %s2512_s21  ;;  %s1334_s30 = sshll.u32 %s169_s28, 8 }
   0xf   : > { %s1453_s5 = sshll.u32 %s2038_s24, 12  ;;  %s171_s9 = scalar_lea.vmem [#allocation2], %s1334_s30 }
  0x10   : > { %s36_s29 = sadd.s32 %s35_s26, %s2508_s20  ;;  %s179_s8 = scalar_lea.hbm %s2436_s0, %s1453_s5 }
  0x11   : > { %s37_s4 = ssub.s32 %s2038_s24, %s36_s29  ;;  %s180_s10 = sshll.u32 %s171_s9, 4  ;;  %s181_s10 = int_to_ptr.vmem [resolvable:$true] %s180_s10 }
  0x12   : > { %p38_p6 = scmp.eq.s32.totalorder %s37_s4, 0  ;;  %p2066_p7 = pnand %p1692_p5, %p2041_p4 }
  0x13   : > { %s2070_s26 = scalar_lea.sflag [#allocation3], %s167_s27  ;;  %s1816_s29 = scalar_lea.vmem %s181_s10, 4096 }
  0x14   : > { %s2060_s11 = scalar_select %p38_p6, %s1939_s14, %s40_s23  }
  0x15   : > { %p2443_p8 = pneg %p2066_p7  ;;  %p1817_p9 = scmp.ne.s32.totalorder %s181_s10, %s1816_s29 }
  0x16   : > { %s1961_s23 = smov [#allocation2]  }
  0x17   : > { %p1819_p10 = pnand %p1817_p9, %p2443_p8  ;;  %s1821_s30 = sshll.u32 %s1961_s23, 4  ;;  %s1822_s30 = int_to_ptr.vmem [resolvable:$false] %s1821_s30 }
  0x18   : > { %s1823_s25 = scalar_lea.vmem %s1822_s30, 8192  ;;  %p1824_p12 = scmp.lt.s32.totalorder %s181_s10, %s1822_s30 }
  0x19   : > { %p1820_p11 = pneg %p1819_p10  ;;  %p1825_p13 = scmp.lt.s32.totalorder %s1823_s25, %s1816_s29 }
  0x1b   : > { %p1826_p0 = por %p1825_p13, %p1824_p12 }
  0x1d   : > { %p1827_p1 = pnand %p1826_p0, %p1820_p11 }
  0x1f   : > { %1830 = shalt.err (!%p1827_p1)
}
  0x20   : > { %s2441_s4 = smov 64   ;;  %s2442_s27 = smov 4  }
  0x21   : > { %1687 = dma.hbm_to_vmem [thread:$0]  (!%p2066_p7), %s179_s8, 4096, %s181_s10, %s2070_s26, %s2441_s4, %s2441_s4, %s2442_s27  }
  0x22   : > { %s2440_s5 = sadd.s32 4294967295, %s1959_s19   ;;  %p53_p2 = scmp.ne.s32.totalorder %s1935_s13, %s1931_s12 }
  0x23   : > { %p2088_p3 = scmp.eq.s32.totalorder %s2440_s5, 0  ;;  %p1331_p4 = scmp.ge.s32.totalorder %s1959_s19, 1 }
  0x24   : > { %p141_p5 = scmp.lt.s32.totalorder %s1959_s19, 7  ;;  %s1964_s12 = smov [#allocation4]  }
  0x25   : > { %p2096_p6 = por %p2088_p3, %p53_p2  ;;  %s153_s8 = sshll.u32 %s1964_s12, 4  ;;  %s154_s8 = int_to_ptr.vmem [resolvable:$true] %s153_s8 }
  0x26   : > { %p2100_p9 = pnand %p1331_p4, %p141_p5  ;;  %s1337_s10 = sshll.u32 %s169_s28, 2 }
  0x27   : > { %s1454_s29 = sshll.u32 %s2038_s24, 6  ;;  %s194_s4 = scalar_lea.vmem [#allocation6], %s1337_s10 }
  0x28   : > { %p1680_p10 = pneg %p2100_p9  ;;  %s2118_s5 = scalar_lea.hbm %s2438_s2, %s1454_s29 }
  0x29   : > { %s204_s27 = sshll.u32 %s194_s4, 4  ;;  %s1842_s28 = scalar_lea.vmem %s154_s8, 1024  ;;  %s205_s27 = int_to_ptr.vmem [resolvable:$true] %s204_s27 }
  0x2a   : > { %p2111_p11 = pnand %p1680_p10, %p2088_p3  ;;  %p1843_p13 = scmp.ne.s32.totalorder %s154_s8, %s1842_s28 }
  0x2b   : > { %p1850_p2 = scmp.lt.s32.totalorder %s154_s8, %s154_s8  ;;  %p1851_p4 = scmp.lt.s32.totalorder %s1842_s28, %s1842_s28 }
  0x2c   : > { %p1833_p12 = pneg %p2111_p11 }
  0x2d   : > { %p1852_p5 = por %p1851_p4, %p1850_p2 }
  0x2e   : > { %p1845_p0 = pnand %p1843_p13, %p1833_p12 }
  0x30   : > { %p1846_p1 = pneg %p1845_p0 }
  0x32   : > { %p1853_p10 = pnand %p1852_p5, %p1846_p1 }
  0x34   : > { %1856 = shalt.err (!%p1853_p10)
}
  0x35   : > { %s2454_s24 = smov 4   ;;  %s2455_s12 = smov 64  }
  0x36   : > { %1683 = dma.hbm_to_vmem [thread:$0]  (!%p2111_p11), %s2437_s1, 1024, %s154_s8, [#allocation5], %s2455_s12, %s2455_s12, %s2454_s24  }
  0x37   : > { %s1870_s4 = scalar_lea.vmem %s205_s27, 64  ;;  %p2456_p12 = pneg %p2066_p7 }
  0x38   : > { %p1871_p8 = scmp.ne.s32.totalorder %s205_s27, %s1870_s4  ;;  %s1965_s30 = smov [#allocation6]  }
  0x39   : > { %s1875_s25 = sshll.u32 %s1965_s30, 4  ;;  %s1876_s25 = int_to_ptr.vmem [resolvable:$false] %s1875_s25 }
  0x3a   : > { %p1873_p13 = pnand %p1871_p8, %p2456_p12  ;;  %s1877_s28 = scalar_lea.vmem %s1876_s25, 128 }
  0x3b   : > { %p1878_p1 = scmp.lt.s32.totalorder %s205_s27, %s1876_s25  ;;  %p1879_p2 = scmp.lt.s32.totalorder %s1877_s28, %s1870_s4 }
  0x3c   : > { %p1874_p0 = pneg %p1873_p13 }
  0x3d   : > { %p1880_p4 = por %p1879_p2, %p1878_p1 }
  0x3f   : > { %p1881_p5 = pnand %p1880_p4, %p1874_p0 }
  0x41   : > { %1884 = shalt.err (!%p1881_p5)
}
  0x42   : > { %1690 = dma.hbm_to_vmem [thread:$0]  (!%p2066_p7), %s2118_s5, 64, %s205_s27, %s2070_s26  }
  0x43   : > { %213 = sbr.rel (%p2100_p9) target bundleno = 675 (0x2a3), region = 32 }
  0x48   : > { %s2457_s8 = sadd.s32 4294967295, %s1959_s19   ;;  %s217_s24 = sand.u32 1, %s1935_s13  }
  0x49   : > { %s215_s23 = sand.u32 1, %s2457_s8   ;;  %s1341_s12 = sshll.u32 %s217_s24, 8 }
  0x4a   : > { %s216_s29 = scalar_lea.sflag [#allocation3], %s215_s23  ;;  %s2142_s10 = scalar_lea.vmem [#allocation2], %s1341_s12 }
  0x4b   : > { %1918 = dma.done.wait (%p2096_p6), %s216_s29, 4096  }
  0x4c   : > { %1920 = vsyncadd (%p2096_p6), %s216_s29, 4294963200 }
  0x4d   : > { %1922 = dma.done.wait (%p2088_p3), [#allocation5], 1024  }
  0x4e   : > { %1924 = vsyncadd (%p2088_p3), [#allocation5], 4294966272  ;;  %s2152_s22 = sshll.u32 %s217_s24, 2 }
  0x4f   : > { %s232_s26 = scalar_lea.vmem [#allocation6], %s2152_s22 }
  0x50   : > { %1926 = dma.done.wait (%p2096_p6), %s216_s29, 64  }
  0x51   : > { %1928 = vsyncadd (%p2096_p6), %s216_s29, 4294967232  ;;  %p266_p7 = scmp.lt.s32.totalorder %s1947_s16, 1  ;;  %p1346_p8 = scmp.ne.s32.totalorder %s1943_s15, 0 }
  0x53   : > { %s2514_s16 = smov (!%p266_p7, %s1947_s16), 1  ;;  %275 = sbr.rel (%p1346_p8) target bundleno = 93 (0x5d), region = 48 }
  0x54   : > { %s1455_s27 = sshll.u32 %s2514_s16, 6 }
  0x55   : > { %s2164_s6 = scalar_lea.vmem %s2439_s3, %s1455_s27 }
  0x58   : > { %v1966_v0 = vmov 0.0  }
  0x59   : > { %276 = vst [vmem:[%s2164_s6] sm:$0xff] %v1966_v0  ;;  %277 = vst [vmem:[%s2164_s6 + $0x8] sm:$0xff] %v1966_v0 }
  0x5a   : > { %278 = vst [vmem:[%s2164_s6 + $0x10] sm:$0xff] %v1966_v0  ;;  %279 = vst [vmem:[%s2164_s6 + $0x18] sm:$0xff] %v1966_v0 }
  0x5b   : > { %280 = vst [vmem:[%s2164_s6 + $0x20] sm:$0xff] %v1966_v0  ;;  %281 = vst [vmem:[%s2164_s6 + $0x28] sm:$0xff] %v1966_v0 }
  0x5c   : > { %282 = vst [vmem:[%s2164_s6 + $0x30] sm:$0xff] %v1966_v0  ;;  %283 = vst [vmem:[%s2164_s6 + $0x38] sm:$0xff] %v1966_v0 }
  0x5d PF: > { %v1763_v1 = vld [vmem:[#allocation4 + $0x38] sm:$0xff]   ;;  %v1764_v2 = vld [vmem:[#allocation4 + $0x30] sm:$0xff]   ;;  %v1765_v3 = vld [vmem:[#allocation4 + $0x28] sm:$0xff]   ;;  %v893_v41 = vlaneseq  ;;  %v2444_v49 = vmov 1.0|1.0   ;;  %v2468_v61 = vmov 0 }
  0x5e   : > { %1576 = vmatprep.subr.bf16.mxu0 %v1763_v1  ;;  %1656 = vmatprep.subr.bf16.mxu1 %v1763_v1  ;;  %v1766_v4 = vld [vmem:[#allocation4 + $0x20] sm:$0xff]   ;;  %v1767_v6 = vld [vmem:[#allocation4 + $0x18] sm:$0xff]   ;;  %v1768_v7 = vld [vmem:[#allocation4 + $0x10] sm:$0xff]   ;;  %v2470_v62 = vmov 0 }
  0x5f   : > { %1577 = vmatpush3.bf16.msra.mxu0 %v1763_v1  ;;  %1664 = vmatpush3.bf16.msra.mxu1 %v1763_v1  ;;  %v1771_v5 = vld [vmem:[%s2142_s10] sm:$0xff]   ;;  %v1769_v8 = vld [vmem:[#allocation4 + $0x8] sm:$0xff]   ;;  %v1773_v12 = vld [vmem:[%s2142_s10 + $0x10] sm:$0xff]   ;;  %v894_v42 = vshrl.u32 %v893_v41, 7 }
  0x60   : > { %1578 = vmatprep.subr.bf16.mxu0 %v1764_v2  ;;  %1657 = vmatprep.subr.bf16.mxu1 %v1764_v2  ;;  %v1770_v9 = vld [vmem:[#allocation4] sm:$0xff]   ;;  %v1772_v11 = vld [vmem:[%s2142_s10 + $0x8] sm:$0xff]   ;;  %v1791_v14 = vld [vmem:[%s2142_s10 + $0xd0] sm:$0xff]  }
  0x61   : > { %1592 = vmatprep.mubr.bf16.mxu0 %v1771_v5  ;;  %v1787_v10 = vld [vmem:[%s2142_s10 + $0xc0] sm:$0xff]   ;;  %v1788_v13 = vld [vmem:[%s2142_s10 + $0xc8] sm:$0xff]   ;;  %v1774_v15 = vld [vmem:[%s2142_s10 + $0x18] sm:$0xff]   ;;  %v909_v43 = vsub.s32 1, %v894_v42  ;;  %v905_v45 = vsub.s32 0, %v894_v42  ;;  %v895_v46 = vadd.s32 8, %v894_v42 }
  0x62   : > { %1640 = vmatprep.mubr.bf16.mxu1 %v1787_v10  ;;  %v1775_v16 = vld [vmem:[%s2142_s10 + $0x20] sm:$0xff]   ;;  %v1792_v17 = vld [vmem:[%s2142_s10 + $0xd8] sm:$0xff]   ;;  %v1776_v19 = vld [vmem:[%s2142_s10 + $0x28] sm:$0xff]   ;;  %v896_v51 = vadd.s32 16, %v894_v42  ;;  %v897_v52 = vadd.s32 24, %v894_v42  ;;  %v898_v55 = vadd.s32 32, %v894_v42 }
  0x63   : > { %1579 = vmatpush3.bf16.msra.mxu0 %v1764_v2  ;;  %1665 = vmatpush3.bf16.msra.mxu1 %v1764_v2  ;;  %v1795_v18 = vld [vmem:[%s2142_s10 + $0xe0] sm:$0xff]   ;;  %v1796_v20 = vld [vmem:[%s2142_s10 + $0xe8] sm:$0xff]   ;;  %v1777_v21 = vld [vmem:[%s2142_s10 + $0x30] sm:$0xff]   ;;  %v899_v56 = vadd.s32 40, %v894_v42  ;;  %v900_v59 = vadd.s32 48, %v894_v42  ;;  %v901_v60 = vadd.s32 56, %v894_v42 }
  0x64   : > { %1580 = vmatprep.subr.bf16.mxu0 %v1765_v3  ;;  %1658 = vmatprep.subr.bf16.mxu1 %v1765_v3  ;;  %v1799_v22 = vld [vmem:[%s2142_s10 + $0xf0] sm:$0xff]   ;;  %v1778_v23 = vld [vmem:[%s2142_s10 + $0x38] sm:$0xff]   ;;  %v1779_v25 = vld [vmem:[%s2142_s10 + $0x40] sm:$0xff]   ;;  %v917_v63 = vsub.s32 3, %v894_v42  ;;  %v913_v0 = vsub.s32 2, %v894_v42 }
  0x65   : > { %v1800_v24 = vld [vmem:[%s2142_s10 + $0xf8] sm:$0xff]   ;;  %v1780_v26 = vld [vmem:[%s2142_s10 + $0x48] sm:$0xff]   ;;  %v1781_v27 = vld [vmem:[%s2142_s10 + $0x50] sm:$0xff]  }
  0x66   : > { %v1782_v28 = vld [vmem:[%s2142_s10 + $0x58] sm:$0xff]   ;;  %v1783_v29 = vld [vmem:[%s2142_s10 + $0x60] sm:$0xff]   ;;  %v1784_v30 = vld [vmem:[%s2142_s10 + $0x68] sm:$0xff]  }
  0x67   : > { %1581 = vmatpush3.bf16.msra.mxu0 %v1765_v3  ;;  %1666 = vmatpush3.bf16.msra.mxu1 %v1765_v3  ;;  %v1785_v31 = vld [vmem:[%s2142_s10 + $0x70] sm:$0xff]   ;;  %v1786_v32 = vld [vmem:[%s2142_s10 + $0x78] sm:$0xff]   ;;  %v1789_v33 = vld [vmem:[%s2142_s10 + $0x80] sm:$0xff]  }
  0x68   : > { %1582 = vmatprep.subr.bf16.mxu0 %v1766_v4  ;;  %1659 = vmatprep.subr.bf16.mxu1 %v1766_v4  ;;  %v1790_v34 = vld [vmem:[%s2142_s10 + $0x88] sm:$0xff]   ;;  %v1793_v35 = vld [vmem:[%s2142_s10 + $0x90] sm:$0xff]   ;;  %v1794_v36 = vld [vmem:[%s2142_s10 + $0x98] sm:$0xff]  }
  0x69   : > { %v1797_v37 = vld [vmem:[%s2142_s10 + $0xa0] sm:$0xff]   ;;  %v1798_v38 = vld [vmem:[%s2142_s10 + $0xa8] sm:$0xff]   ;;  %v1801_v39 = vld [vmem:[%s2142_s10 + $0xb0] sm:$0xff]  }
  0x6a   : > { %v1802_v40 = vld [vmem:[%s2142_s10 + $0xb8] sm:$0xff]   ;;  %v902_v44 = vld [vmem:[%s232_s26] sm:$0xf] }
  0x6b   : > { %1583 = vmatpush3.bf16.msra.mxu0 %v1766_v4  ;;  %1667 = vmatpush3.bf16.msra.mxu1 %v1766_v4  ;;  %v910_v47 = vrot.slane %v902_v44, %v909_v43  ;;  %v906_v48 = vrot.slane %v902_v44, %v905_v45  ;;  %v918_v1 = vrot.slane %v902_v44, %v917_v63 }
  0x6c   : > { %1584 = vmatprep.subr.bf16.mxu0 %v1767_v6  ;;  %1660 = vmatprep.subr.bf16.mxu1 %v1767_v6  ;;  %v914_v2 = vrot.slane %v902_v44, %v913_v0 }
  0x6d   : > { %vm920_vm0 = vcmp.eq.s32.totalorder %v894_v42, %v910_v47  ;;  %vm924_vm1 = vcmp.eq.s32.totalorder %v895_v46, %v910_v47  ;;  %vm919_vm3 = vcmp.eq.s32.totalorder %v894_v42, %v906_v48  ;;  %vm923_vm4 = vcmp.eq.s32.totalorder %v895_v46, %v906_v48 }
  0x6e   : > { %vm1419_vm2 = vmpackc.low %vm924_vm1, %vm920_vm0  ;;  %vm928_vm6 = vcmp.eq.s32.totalorder %v896_v51, %v910_v47  ;;  %vm932_vm7 = vcmp.eq.s32.totalorder %v897_v52, %v910_v47  ;;  %vm927_vm9 = vcmp.eq.s32.totalorder %v896_v51, %v906_v48  ;;  %vm931_vm10 = vcmp.eq.s32.totalorder %v897_v52, %v906_v48 }
  0x6f   : > { %1585 = vmatpush3.bf16.msra.mxu0 %v1767_v6  ;;  %1668 = vmatpush3.bf16.msra.mxu1 %v1767_v6  ;;  %vm2210_vm5 = vmpackc.low %vm923_vm4, %vm919_vm3  ;;  %vm936_vm12 = vcmp.eq.s32.totalorder %v898_v55, %v910_v47  ;;  %vm940_vm13 = vcmp.eq.s32.totalorder %v899_v56, %v910_v47  ;;  %vm935_vm15 = vcmp.eq.s32.totalorder %v898_v55, %v906_v48 }
  0x70   : > { %1586 = vmatprep.subr.bf16.mxu0 %v1768_v7  ;;  %1661 = vmatprep.subr.bf16.mxu1 %v1768_v7  ;;  %vm2214_vm8 = vmpackc.low %vm932_vm7, %vm928_vm6  ;;  %vm939_vm0 = vcmp.eq.s32.totalorder %v899_v56, %v906_v48  ;;  %vm948_vm3 = vcmp.eq.s32.totalorder %v901_v60, %v910_v47  ;;  %vm943_vm6 = vcmp.eq.s32.totalorder %v900_v59, %v906_v48 }
  0x71   : > { %vm2218_vm11 = vmpackc.low %vm931_vm10, %vm927_vm9  ;;  %vm947_vm7 = vcmp.eq.s32.totalorder %v901_v60, %v906_v48  ;;  %vm922_vm10 = vcmp.eq.s32.totalorder %v894_v42, %v918_v1 }
  0x72   : > { %vm2222_vm14 = vmpackc.low %vm940_vm13, %vm936_vm12  ;;  %vm926_vm12 = vcmp.eq.s32.totalorder %v895_v46, %v918_v1 }
  0x73   : > { %1587 = vmatpush3.bf16.msra.mxu0 %v1768_v7  ;;  %1669 = vmatpush3.bf16.msra.mxu1 %v1768_v7  ;;  %vm2226_vm1 = vmpackc.low %vm939_vm0, %vm935_vm15  ;;  %vm921_vm15 = vcmp.eq.s32.totalorder %v894_v42, %v914_v2  ;;  %vm925_vm0 = vcmp.eq.s32.totalorder %v895_v46, %v914_v2 }
  0x74   : > { %1588 = vmatprep.subr.bf16.mxu0 %v1769_v8  ;;  %1662 = vmatprep.subr.bf16.mxu1 %v1769_v8  ;;  %vm2234_vm9 = vmpackc.low %vm947_vm7, %vm943_vm6  ;;  %vm934_vm6 = vcmp.eq.s32.totalorder %v897_v52, %v918_v1 }
  0x75   : > { %v2471_v62 = vsel %vm2234_vm9, 4294967295, %v2470_v62  ;;  %vm2238_vm13 = vmpackc.low %vm926_vm12, %vm922_vm10  ;;  %vm929_vm9 = vcmp.eq.s32.totalorder %v896_v51, %v914_v2  ;;  %vm938_vm12 = vcmp.eq.s32.totalorder %v898_v55, %v918_v1 }
  0x77   : > { %1589 = vmatpush3.bf16.msra.mxu0 %v1769_v8  ;;  %1670 = vmatpush3.bf16.msra.mxu1 %v1769_v8 }
  0x78   : > { %1590 = vmatprep.subr.bf16.mxu0 %v1770_v9  ;;  %1663 = vmatprep.subr.bf16.mxu1 %v1770_v9 }
  0x7b   : > { %1591 = vmatpush3.bf16.msra.mxu0 %v1770_v9  ;;  %1671 = vmatpush3.bf16.msra.mxu1 %v1770_v9 }
  0x7e   : > { %1593 = vmatmul.mubr.bf16.vlgmr.msra.gmra.mxu0 %v1772_v11  ;;  %1641 = vmatmul.mubr.bf16.vlgmr.msra.gmra.mxu1 %v1788_v13 }
  0x7f   : > { %1596 = vmatprep.mubr.bf16.mxu0 %v1773_v12  ;;  %1644 = vmatprep.mubr.bf16.mxu1 %v1791_v14 }
  0x86   : > { %1597 = vmatmul.mubr.bf16.gmra.mxu0 %v1774_v15  ;;  %1645 = vmatmul.mubr.bf16.gmra.mxu1 %v1792_v17  ;;  %v2482_v15 = vmov 0 }
  0x87   : > { %1600 = vmatprep.mubr.bf16.mxu0 %v1775_v16  ;;  %1648 = vmatprep.mubr.bf16.mxu1 %v1795_v18 }
  0x8e   : > { %1601 = vmatmul.mubr.bf16.gmra.mxu0 %v1776_v19  ;;  %1649 = vmatmul.mubr.bf16.gmra.mxu1 %v1796_v20 }
  0x8f   : > { %1604 = vmatprep.mubr.bf16.mxu0 %v1777_v21  ;;  %1652 = vmatprep.mubr.bf16.mxu1 %v1799_v22  ;;  %v2484_v22 = vmov 0 }
  0x96   : > { %1605 = vmatmul.mubr.bf16.gmra.mxu0 %v1778_v23  ;;  %1653 = vmatmul.mubr.bf16.gmra.mxu1 %v1800_v24  ;;  %v2487_v23 = vmov 0 }
  0x97   : > { %1608 = vmatprep.mubr.bf16.mxu0 %v1779_v25  ;;  %1420 = vmatprep.mubr.msk.bf16.mxu1 %vm1419_vm2, %v2444_v49  ;;  %vm944_vm2 = vcmp.eq.s32.totalorder %v900_v59, %v910_v47 }
  0x98   : > { %vm2230_vm4 = vmpackc.low %vm948_vm3, %vm944_vm2  ;;  %vm930_vm3 = vcmp.eq.s32.totalorder %v896_v51, %v918_v1 }
  0x99   : > { %v2469_v61 = vsel %vm2230_vm4, 4294967295, %v2468_v61  ;;  %vm2242_vm2 = vmpackc.low %vm925_vm0, %vm921_vm15  ;;  %vm933_vm4 = vcmp.eq.s32.totalorder %v897_v52, %v914_v2  ;;  %vm942_vm15 = vcmp.eq.s32.totalorder %v899_v56, %v918_v1  ;;  %vm941_vm0 = vcmp.eq.s32.totalorder %v899_v56, %v914_v2 }
  0x9a   : > { %vm2248_vm7 = vmpackc.low %vm934_vm6, %vm930_vm3  ;;  %vm946_vm6 = vcmp.eq.s32.totalorder %v900_v59, %v918_v1 }
  0x9b   : > { %vm2252_vm10 = vmpackc.low %vm933_vm4, %vm929_vm9  ;;  %vm937_vm9 = vcmp.eq.s32.totalorder %v898_v55, %v914_v2 }
  0x9c   : > { %vm2268_vm4 = vmpackc.low %vm942_vm15, %vm938_vm12  ;;  %vm950_vm12 = vcmp.eq.s32.totalorder %v901_v60, %v918_v1 }
  0x9d   : > { %vm2272_vm3 = vmpackc.low %vm941_vm0, %vm937_vm9  ;;  %vm945_vm9 = vcmp.eq.s32.totalorder %v900_v59, %v914_v2  ;;  %vm949_vm0 = vcmp.eq.s32.totalorder %v901_v60, %v914_v2 }
  0x9e   : > { %1609 = vmatmul.mubr.bf16.gmra.mxu0 %v1780_v26  ;;  %v2483_v15 = vsel %vm2272_vm3, 4294967295, %v2482_v15  ;;  %vm2286_vm15 = vmpackc.low %vm950_vm12, %vm946_vm6 }
  0x9f   : > { %1612 = vmatprep.mubr.bf16.mxu0 %v1781_v27  ;;  %v2485_v22 = vsel %vm2286_vm15, 4294967295, %v2484_v22  ;;  %vm2290_vm3 = vmpackc.low %vm949_vm0, %vm945_vm9 }
  0xa0   : > { %2486 = vst [vmem:[#allocation10_spill] sm:$0xff] %v2485_v22  ;;  %v2488_v23 = vsel %vm2290_vm3, 4294967295, %v2487_v23 }
  0xa1   : > { %2489 = vst [vmem:[#allocation11_spill] sm:$0xff] %v2488_v23 }
  0xa6   : > { %1613 = vmatmul.mubr.bf16.gmra.mxu0 %v1782_v28 }
  0xa7   : > { %1616 = vmatprep.mubr.bf16.mxu0 %v1783_v29 }
  0xae   : > { %1617 = vmatmul.mubr.bf16.gmra.mxu0 %v1784_v30 }
  0xaf   : > { %1620 = vmatprep.mubr.bf16.mxu0 %v1785_v31 }
  0xb6   : > { %1621 = vmatmul.mubr.bf16.gmra.mxu0 %v1786_v32 }
  0xb7   : > { %1624 = vmatprep.mubr.bf16.mxu0 %v1789_v33 }
  0xbe   : > { %1625 = vmatmul.mubr.bf16.gmra.mxu0 %v1790_v34 }
  0xbf   : > { %1628 = vmatprep.mubr.bf16.mxu0 %v1793_v35 }
  0xc6   : > { %1629 = vmatmul.mubr.bf16.gmra.mxu0 %v1794_v36 }
  0xc7   : > { %1632 = vmatprep.mubr.bf16.mxu0 %v1797_v37 }
  0xce   : > { %1633 = vmatmul.mubr.bf16.gmra.mxu0 %v1798_v38 }
  0xcf   : > { %1636 = vmatprep.mubr.bf16.mxu0 %v1801_v39 }
  0xd6   : > { %1637 = vmatmul.mubr.bf16.gmra.mxu0 %v1802_v40 }
 0x13e   : > { %v2246_v5 = vpop.f32.mrf.mxu0  ;;  %v2296_v32 = vpop.f32.mrf.mxu1 }
 0x140   : > { %v2256_v8 = vpop.f32.mrf.mxu0  ;;  %v2300_v35 = vpop.f32.mrf.mxu1 }
 0x142   : > { %v2258_v9 = vpop.f32.mrf.mxu0  ;;  %v2304_v38 = vpop.f32.mrf.mxu1 }
 0x143   : > { %v1056_v57 = vpack.c.bf16 %v2304_v38, %v2296_v32 }
 0x144   : > { %v2262_v11 = vpop.f32.mrf.mxu0  ;;  %v2306_v41 = vpop.f32.mrf.mxu1 }
 0x146   : > { %v2266_v13 = vpop.f32.mrf.mxu0  ;;  %v2308_v44 = vpop.f32.mrf.mxu1 }
 0x148   : > { %v2276_v16 = vpop.f32.mrf.mxu0  ;;  %v2310_v47 = vpop.f32.mrf.mxu1 }
 0x14a   : > { %v2278_v17 = vpop.f32.mrf.mxu0  ;;  %v2312_v52 = vpop.f32.mrf.mxu1 }
 0x14b   : > { %v1058_v53 = vpack.c.bf16 %v2312_v52, %v2308_v44  ;;  %v1055_v44 = vpack.c.bf16 %v2306_v41, %v2300_v35 }
 0x14c   : > { %v2282_v19 = vpop.f32.mrf.mxu0  ;;  %v2314_v59 = vpop.f32.mrf.mxu1 }
 0x14e   : > { %v1602_v21 = vpop.f32.mrf.mxu0  ;;  %v1650_v49 = vpop.f32.mrf.mxu1 }
 0x150   : > { %v670_v24 = vpop.f32.mrf.mxu0  ;;  %v862_v23 = vpop.f32.mrf.mxu1 }
 0x152   : > { %v1603_v25 = vpop.f32.mrf.mxu0 }
 0x153   : > { %v1036_v22 = vpack.c.bf16 %v1603_v25, %v1602_v21 }
 0x154   : > { %v673_v26 = vpop.f32.mrf.mxu0 }
 0x156   : > { %v1606_v27 = vpop.f32.mrf.mxu0 }
 0x158   : > { %v686_v28 = vpop.f32.mrf.mxu0 }
 0x15a   : > { %v1607_v29 = vpop.f32.mrf.mxu0 }
 0x15b   : > { %v1038_v63 = vpack.c.bf16 %v1607_v29, %v1606_v27 }
 0x15c   : > { %v689_v30 = vpop.f32.mrf.mxu0 }
 0x15d   : > { %v1037_v12 = vpack.c.bf16 %v689_v30, %v686_v28 }
 0x15e   : > { %v2294_v31 = vpop.f32.mrf.mxu0 }
 0x160   : > { %v2298_v33 = vpop.f32.mrf.mxu0 }
 0x162   : > { %v1611_v34 = vpop.f32.mrf.mxu0 }
 0x164   : > { %v2302_v36 = vpop.f32.mrf.mxu0 }
 0x166   : > { %v1614_v37 = vpop.f32.mrf.mxu0 }
 0x168   : > { %v718_v39 = vpop.f32.mrf.mxu0 }
 0x16a   : > { %v1615_v40 = vpop.f32.mrf.mxu0 }
 0x16c   : > { %v721_v42 = vpop.f32.mrf.mxu0 }
 0x16e   : > { %v1618_v43 = vpop.f32.mrf.mxu0 }
 0x170   : > { %v734_v45 = vpop.f32.mrf.mxu0 }
 0x172   : > { %v1619_v46 = vpop.f32.mrf.mxu0 }
 0x173   : > { %v1044_v20 = vpack.c.bf16 %v1619_v46, %v1618_v43  ;;  %v1041_v46 = vpack.c.bf16 %v721_v42, %v718_v39  ;;  %v1039_v39 = vpack.c.bf16 %v2302_v36, %v2298_v33  ;;  %v2494_v33 = vmov 1.0|1.0  }
 0x174   : > { %v737_v48 = vpop.f32.mrf.mxu0 }
 0x175   : > { %v1043_v27 = vpack.c.bf16 %v737_v48, %v734_v45 }
 0x176   : > { %v1622_v51 = vpop.f32.mrf.mxu0 }
 0x178   : > { %v750_v55 = vpop.f32.mrf.mxu0 }
 0x17a   : > { %v1623_v56 = vpop.f32.mrf.mxu0 }
 0x17b   : > { %v1046_v60 = vpack.c.bf16 %v1623_v56, %v1622_v51  ;;  %v1035_v56 = vpack.c.bf16 %v673_v26, %v670_v24  ;;  %v2491_v26 = vpack.c.bf16 %v2282_v19, %v2276_v16  ;;  %v2493_v16 = vpack.c.bf16 %v2262_v11, %v2256_v8 }
 0x17c   : > { %v753_v0 = vpop.f32.mrf.mxu0 }
 0x17d   : > { %v1045_v1 = vpack.c.bf16 %v753_v0, %v750_v55  ;;  %1496 = vmatprep.subr.bf16.mxu1 %v1046_v60  ;;  %v1651_v55 = vpop.f32.mrf.mxu1 }
 0x17e   : > { %v2316_v2 = vpop.f32.mrf.mxu0  ;;  %1497 = vmatpush3.bf16.msra.mxu1 %v1038_v63  ;;  %v1042_v63 = vpack.c.bf16 %v1615_v40, %v1614_v37 }
 0x17f   : > { %1498 = vmatprep.subr.bf16.mxu1 %v1045_v1  ;;  %v865_v30 = vpop.f32.mrf.mxu1 }
 0x180   : > { %v2318_v10 = vpop.f32.mrf.mxu0  ;;  %v1059_v11 = vpack.c.bf16 %v865_v30, %v862_v23  ;;  %v1057_v23 = vpack.c.bf16 %v2314_v59, %v2310_v47 }
 0x181   : > { %v1654_v21 = vpop.f32.mrf.mxu1 }
 0x182   : > { %v2320_v18 = vpop.f32.mrf.mxu0  ;;  %1499 = vmatpush3.bf16.msra.mxu1 %v1037_v12 }
 0x183   : > { %1500 = vmatprep.subr.bf16.mxu1 %v1044_v20  ;;  %v2490_v20 = vpack.c.bf16 %v2278_v17, %v2266_v13  ;;  %v878_v24 = vpop.f32.mrf.mxu1  ;;  %v2492_v13 = vpack.c.bf16 %v2258_v9, %v2246_v5  ;;  %v1060_v9 = vpack.c.bf16 %v1651_v55, %v1650_v49  ;;  %v1048_v36 = vpack.c.bf16 %v2320_v18, %v2316_v2 }
 0x184   : > { %v2322_v51 = vpop.f32.mrf.mxu0 }
 0x185   : > { %v1655_v40 = vpop.f32.mrf.mxu1  ;;  %v1047_v58 = vpack.c.bf16 %v2322_v51, %v2318_v10 }
 0x186   : > { %v1630_v29 = vpop.f32.mrf.mxu0  ;;  %1501 = vmatpush3.bf16.msra.mxu1 %v1036_v22  ;;  %v1040_v22 = vpack.c.bf16 %v1611_v34, %v2294_v31  ;;  %v1062_v31 = vpack.c.bf16 %v1655_v40, %v1654_v21 }
 0x187   : > { %1502 = vmatprep.subr.bf16.mxu1 %v1043_v27  ;;  %v881_v34 = vpop.f32.mrf.mxu1 }
 0x188   : > { %v782_v60 = vpop.f32.mrf.mxu0  ;;  %v1061_v0 = vpack.c.bf16 %v881_v34, %v878_v24 }
 0x18a   : > { %v1631_v28 = vpop.f32.mrf.mxu0  ;;  %1503 = vmatpush3.bf16.msra.mxu1 %v1035_v56  ;;  %v1193_v56 = vld [vmem:[%s2164_s6] sm:$0xff] }
 0x18b   : > { %1504 = vmatprep.subr.bf16.mxu1 %v1042_v63  ;;  %v1050_v49 = vpack.c.bf16 %v1631_v28, %v1630_v29 }
 0x18c   : > { %v785_v43 = vpop.f32.mrf.mxu0 }
 0x18d   : > { %v1049_v54 = vpack.c.bf16 %v785_v43, %v782_v60 }
 0x18e   : > { %v1634_v12 = vpop.f32.mrf.mxu0  ;;  %1505 = vmatpush3.bf16.msra.mxu1 %v2490_v20 }
 0x18f   : > { %1506 = vmatprep.subr.bf16.mxu1 %v1041_v46 }
 0x190   : > { %v798_v25 = vpop.f32.mrf.mxu0 }
 0x192   : > { %v1635_v45 = vpop.f32.mrf.mxu0  ;;  %1507 = vmatpush3.bf16.msra.mxu1 %v2491_v26  ;;  %v1195_v26 = vld [vmem:[%s2164_s6 + $0x10] sm:$0xff] }
 0x193   : > { %1508 = vmatprep.subr.bf16.mxu1 %v1040_v22  ;;  %v1052_v8 = vpack.c.bf16 %v1635_v45, %v1634_v12  ;;  %v1194_v12 = vld [vmem:[%s2164_s6 + $0x8] sm:$0xff] }
 0x194   : > { %v801_v37 = vpop.f32.mrf.mxu0 }
 0x195   : > { %v1051_v50 = vpack.c.bf16 %v801_v37, %v798_v25 }
 0x196   : > { %v1638_v42 = vpop.f32.mrf.mxu0  ;;  %1509 = vmatpush3.bf16.msra.mxu1 %v2492_v13 }
 0x197   : > { %1510 = vmatprep.subr.bf16.mxu1 %v1039_v39 }
 0x198   : > { %v814_v17 = vpop.f32.mrf.mxu0 }
 0x19a   : > { %v1639_v48 = vpop.f32.mrf.mxu0  ;;  %1511 = vmatpush3.bf16.msra.mxu1 %v2493_v16 }
 0x19b   : > { %v1054_v19 = vpack.c.bf16 %v1639_v48, %v1638_v42  ;;  %1536 = vmatprep.subr.bf16.mxu1 %v1062_v31  ;;  %v1196_v31 = vld [vmem:[%s2164_s6 + $0x18] sm:$0xff] }
 0x19c   : > { %v817_v1 = vpop.f32.mrf.mxu0 }
 0x19d   : > { %1422 = vmatmul.mubr.msk.bf16.vlgmr.msra.gmra.mxu1 %vm2210_vm5, %v2494_v33  ;;  %v1053_v5 = vpack.c.bf16 %v817_v1, %v814_v17  ;;  %vm2495_vm5 = vnez %v2469_v61  ;;  %v1199_v61 = vld [vmem:[%s2164_s6 + $0x30] sm:$0xff] }
 0x19e   : > { %1537 = vmatpush3.bf16.msra.mxu1 %v1054_v19  ;;  %1424 = vmatprep.mubr.msk.bf16.mxu1 %vm2214_vm8, %v2494_v33  ;;  %vm2496_vm8 = vnez %v2471_v62 }
 0x19f   : > { %1538 = vmatprep.subr.bf16.mxu1 %v1061_v0 }
 0x1a2   : > { %1539 = vmatpush3.bf16.msra.mxu1 %v1053_v5 }
 0x1a3   : > { %1540 = vmatprep.subr.bf16.mxu1 %v1060_v9 }
 0x1a5   : > { %1426 = vmatmul.mubr.msk.bf16.gmra.mxu1 %vm2218_vm11, %v2494_v33  ;;  %vm2497_vm11 = vnez %v2483_v15 }
 0x1a6   : > { %1541 = vmatpush3.bf16.msra.mxu1 %v1052_v8  ;;  %1428 = vmatprep.mubr.msk.bf16.mxu1 %vm2222_vm14, %v2494_v33 }
 0x1a7   : > { %1542 = vmatprep.subr.bf16.mxu1 %v1059_v11 }
 0x1aa   : > { %1543 = vmatpush3.bf16.msra.mxu1 %v1051_v50 }
 0x1ab   : > { %1544 = vmatprep.subr.bf16.mxu1 %v1058_v53 }
 0x1ad   : > { %1430 = vmatmul.mubr.msk.bf16.gmra.mxu1 %vm2226_vm1, %v2494_v33 }
 0x1ae   : > { %1545 = vmatpush3.bf16.msra.mxu1 %v1050_v49  ;;  %1432 = vmatprep.mubr.msk.bf16.mxu1 %vm2495_vm5, %v2494_v33  ;;  %v1198_v49 = vld [vmem:[%s2164_s6 + $0x28] sm:$0xff] }
 0x1af   : > { %1546 = vmatprep.subr.bf16.mxu1 %v1057_v23 }
 0x1b2   : > { %1547 = vmatpush3.bf16.msra.mxu1 %v1049_v54 }
 0x1b3   : > { %1548 = vmatprep.subr.bf16.mxu1 %v1056_v57 }
 0x1b5   : > { %1434 = vmatmul.mubr.msk.bf16.gmra.mxu1 %vm2496_vm8, %v2494_v33 }
 0x1b6   : > { %1549 = vmatpush3.bf16.msra.mxu1 %v1048_v36  ;;  %1436 = vmatprep.mubr.msk.bf16.mxu1 %vm2238_vm13, %v2494_v33 }
 0x1b7   : > { %1550 = vmatprep.subr.bf16.mxu1 %v1055_v44 }
 0x1ba   : > { %1551 = vmatpush3.bf16.msra.mxu1 %v1047_v58 }
 0x1bd   : > { %1438 = vmatmul.mubr.msk.bf16.vlgmr.msra.gmra.mxu1 %vm2242_vm2, %v2494_v33 }
 0x1be   : > { %1440 = vmatprep.mubr.msk.bf16.mxu1 %vm2248_vm7, %v2494_v33 }
 0x1c5   : > { %1442 = vmatmul.mubr.msk.bf16.gmra.mxu1 %vm2252_vm10, %v2494_v33 }
 0x1c6   : > { %1444 = vmatprep.mubr.msk.bf16.mxu1 %vm2268_vm4, %v2494_v33 }
 0x1cd   : > { %1446 = vmatmul.mubr.msk.bf16.gmra.mxu1 %vm2497_vm11, %v2494_v33 }
 0x1ce   : > { %1448 = vmatprep.mubr.msk.bf16.mxu1 %vm2286_vm15, %v2494_v33 }
 0x1d5   : > { %1450 = vmatmul.mubr.msk.bf16.gmra.mxu1 %vm2290_vm3, %v2494_v33  ;;  %v1197_v33 = vld [vmem:[%s2164_s6 + $0x20] sm:$0xff] }
 0x25d   : > { %v1512_v3 = vpop.f32.mrf.mxu1 }
 0x25f   : > { %v1513_v4 = vpop.f32.mrf.mxu1 }
 0x260   : > { %v1514_v29 = vadd.f32 %v1513_v4, %v1512_v3 }
 0x261   : > { %v1515_v6 = vpop.f32.mrf.mxu1 }
 0x263   : > { %v1516_v7 = vpop.f32.mrf.mxu1 }
 0x264   : > { %v1517_v30 = vadd.f32 %v1516_v7, %v1515_v6 }
 0x265   : > { %v1518_v10 = vpop.f32.mrf.mxu1 }
 0x267   : > { %v1519_v14 = vpop.f32.mrf.mxu1 }
 0x268   : > { %v1520_v22 = vadd.f32 %v1519_v14, %v1518_v10  ;;  %v1200_v14 = vld [vmem:[%s2164_s6 + $0x38] sm:$0xff] }
 0x269   : > { %v1521_v18 = vpop.f32.mrf.mxu1 }
 0x26b   : > { %v1522_v32 = vpop.f32.mrf.mxu1 }
 0x26c   : > { %v1523_v42 = vadd.f32 %v1522_v32, %v1521_v18 }
 0x26d   : > { %v1524_v35 = vpop.f32.mrf.mxu1 }
 0x26f   : > { %v1525_v15 = vpop.f32.mrf.mxu1 }
 0x270   : > { %v1526_v19 = vadd.f32 %v1525_v15, %v1524_v35 }
 0x271   : > { %v1527_v38 = vpop.f32.mrf.mxu1 }
 0x273   : > { %v1528_v41 = vpop.f32.mrf.mxu1 }
 0x274   : > { %v1529_v11 = vadd.f32 %v1528_v41, %v1527_v38 }
 0x275   : > { %v1530_v47 = vpop.f32.mrf.mxu1 }
 0x277   : > { %v1531_v52 = vpop.f32.mrf.mxu1 }
 0x278   : > { %v1532_v36 = vadd.f32 %v1531_v52, %v1530_v47 }
 0x279   : > { %v1533_v59 = vpop.f32.mrf.mxu1 }
 0x27b   : > { %v1534_v2 = vpop.f32.mrf.mxu1 }
 0x27c   : > { %v1535_v6 = vadd.f32 %v1534_v2, %v1533_v59 }
 0x27d   : > { %v1552_v51 = vpop.f32.mrf.mxu1 }
 0x27f   : > { %v1553_v27 = vpop.f32.mrf.mxu1 }
 0x280   : > { %v1554_v55 = vadd.f32 %v1553_v27, %v1552_v51 }
 0x281   : > { %v1555_v60 = vpop.f32.mrf.mxu1 }
 0x282   : > { %v1163_v63 = vadd.f32 %v1554_v55, %v1514_v29 }
 0x283   : > { %v1556_v28 = vpop.f32.mrf.mxu1 }
 0x284   : > { %v1201_v43 = vadd.f32 %v1193_v56, %v1163_v63  ;;  %v1557_v46 = vadd.f32 %v1556_v28, %v1555_v60 }
 0x285   : > { %v1558_v20 = vpop.f32.mrf.mxu1 }
 0x286   : > { %1209 = vst [vmem:[%s2164_s6] sm:$0xff] %v1201_v43  ;;  %v1166_v21 = vadd.f32 %v1557_v46, %v1517_v30 }
 0x287   : > { %v1559_v25 = vpop.f32.mrf.mxu1 }
 0x288   : > { %v1202_v45 = vadd.f32 %v1194_v12, %v1166_v21  ;;  %v1560_v24 = vadd.f32 %v1559_v25, %v1558_v20 }
 0x289   : > { %v1561_v37 = vpop.f32.mrf.mxu1 }
 0x28a   : > { %1210 = vst [vmem:[%s2164_s6 + $0x8] sm:$0xff] %v1202_v45  ;;  %v1171_v39 = vadd.f32 %v1560_v24, %v1520_v22 }
 0x28b   : > { %v1562_v40 = vpop.f32.mrf.mxu1 }
 0x28c   : > { %v1203_v13 = vadd.f32 %v1195_v26, %v1171_v39  ;;  %v1563_v17 = vadd.f32 %v1562_v40, %v1561_v37 }
 0x28d   : > { %v1564_v34 = vpop.f32.mrf.mxu1 }
 0x28e   : > { %1211 = vst [vmem:[%s2164_s6 + $0x10] sm:$0xff] %v1203_v13  ;;  %v1174_v48 = vadd.f32 %v1563_v17, %v1523_v42 }
 0x28f   : > { %v1565_v16 = vpop.f32.mrf.mxu1 }
 0x290   : > { %v1204_v0 = vadd.f32 %v1196_v31, %v1174_v48  ;;  %v1566_v1 = vadd.f32 %v1565_v16, %v1564_v34 }
 0x291   : > { %v1567_v5 = vpop.f32.mrf.mxu1 }
 0x292   : > { %1212 = vst [vmem:[%s2164_s6 + $0x18] sm:$0xff] %v1204_v0  ;;  %v1179_v9 = vadd.f32 %v1566_v1, %v1526_v19 }
 0x293   : > { %v1568_v8 = vpop.f32.mrf.mxu1 }
 0x294   : > { %v1205_v50 = vadd.f32 %v1197_v33, %v1179_v9  ;;  %v1569_v53 = vadd.f32 %v1568_v8, %v1567_v5 }
 0x295   : > { %v1570_v23 = vpop.f32.mrf.mxu1 }
 0x296   : > { %1213 = vst [vmem:[%s2164_s6 + $0x20] sm:$0xff] %v1205_v50  ;;  %v1182_v54 = vadd.f32 %v1569_v53, %v1529_v11 }
 0x297   : > { %v1571_v57 = vpop.f32.mrf.mxu1 }
 0x298   : > { %v1206_v44 = vadd.f32 %v1198_v49, %v1182_v54  ;;  %v1572_v58 = vadd.f32 %v1571_v57, %v1570_v23 }
 0x299   : > { %v1573_v62 = vpop.f32.mrf.mxu1 }
 0x29a   : > { %1214 = vst [vmem:[%s2164_s6 + $0x28] sm:$0xff] %v1206_v44  ;;  %v1187_v3 = vadd.f32 %v1572_v58, %v1532_v36 }
 0x29b   : > { %v1574_v4 = vpop.f32.mrf.mxu1 }
 0x29c   : > { %v1207_v7 = vadd.f32 %v1199_v61, %v1187_v3  ;;  %v1575_v10 = vadd.f32 %v1574_v4, %v1573_v62 }
 0x29e   : > { %1215 = vst [vmem:[%s2164_s6 + $0x30] sm:$0xff] %v1207_v7  ;;  %v1190_v18 = vadd.f32 %v1575_v10, %v1535_v6 }
 0x2a0   : > { %v1208_v32 = vadd.f32 %v1200_v14, %v1190_v18 }
 0x2a2   : > { %1216 = vst [vmem:[%s2164_s6 + $0x38] sm:$0xff] %v1208_v32 }
 0x2a3 PF: > { %s17_s19 = sadd.s32 1, %s1959_s19   ;;  %s2500_s12 = smov %s1935_s13 }
 0x2a4   : > { %p14_p3 = scmp.ge.s32.totalorder %s17_s19, 8   ;;  %s2501_s13 = smov %s1939_s14 }
 0x2a5   : > { %s2502_s14 = smov %s2060_s11  ;;  %s2503_s15 = smov %s1951_s17 }
 0x2a6   : > { %s2504_s16 = smov %s1955_s18  ;;  %s2505_s17 = smov %s2508_s20 }
 0x2a7   : > { %s2506_s18 = smov %s2512_s21  ;;  %16 = sbr.rel (!%p14_p3) target bundleno = 6 (0x6), region = 91 }
 0x2ac   :  { %1238 = vsyncpa [#allocation3], 1 }
 0x2ad   :  { %1240 = vsyncpa [#allocation3 + $0x1], 1 }
 0x2ae   :  { %1241 = vsyncpa [#allocation5], 1 }

// kernel: wtagnn_forward_padded.13
= control target key start
LH: loop header
LB: loop body
LE: loop exit
PB: predicated region body
PF: predicated region fallthrough
CT: control target
= control target key end

     0   :  { %v525_v1 = vmov 0   ;;  %s696_s1 = inlined_call_operand.vmem [shape: bf16[128,128], index: 1, kind: input, shape index: {}]   ;;  %s697_s0 = inlined_call_operand.vmem [shape: bf16[64,128], index: 0, kind: input, shape index: {}]   ;;  %s698_s4 = inlined_call_operand.vmem [shape: f32[64,1], index: 4, kind: input, shape index: {}]   ;;  %s699_s3 = inlined_call_operand.vmem [shape: f32[2,64,128], index: 3, kind: input, shape index: {}]   ;;  %s700_s6 = inlined_call_operand.vmem [shape: bf16[64,128], index: 6, kind: output, shape index: {1}]   ;;  %s701_s2 = inlined_call_operand.vmem [shape: f32[1,128], index: 2, kind: input, shape index: {}]   ;;  %s702_s5 = inlined_call_operand.vmem [shape: bf16[64,128], index: 5, kind: output, shape index: {0}]  }
   0x1   :  { %v513_v0 = vld [vmem:[%s696_s1 + $0x38] sm:$0xff]   ;;  %512 = vset.pattern.permute.xlu1 %v525_v1  ;;  %511 = vset.pattern.permute.xlu0 %v525_v1  ;;  %v514_v2 = vld [vmem:[%s696_s1 + $0x30] sm:$0xff]   ;;  %v515_v3 = vld [vmem:[%s696_s1 + $0x28] sm:$0xff]  }
   0x2   :  { %470 = vmatprep.subr.bf16.mxu0 %v513_v0  ;;  %494 = vmatprep.subr.bf16.mxu1 %v513_v0  ;;  %v516_v4 = vld [vmem:[%s696_s1 + $0x20] sm:$0xff]   ;;  %v522_v6 = vld [vmem:[%s697_s0 + $0x10] sm:$0xff]   ;;  %v517_v7 = vld [vmem:[%s696_s1 + $0x18] sm:$0xff]  }
   0x3   :  { %471 = vmatpush3.bf16.msra.mxu0 %v513_v0  ;;  %502 = vmatpush3.bf16.msra.mxu1 %v513_v0  ;;  %v521_v5 = vld [vmem:[%s697_s0] sm:$0xff]   ;;  %v265_v8 = vld [vmem:[%s698_s4 + $0x10] sm:$0xff]  ;;  %v266_v10 = vld [vmem:[%s698_s4 + $0x18] sm:$0xff] }
   0x4   :  { %472 = vmatprep.subr.bf16.mxu0 %v514_v2  ;;  %495 = vmatprep.subr.bf16.mxu1 %v514_v2  ;;  %v263_v9 = vld [vmem:[%s698_s4] sm:$0xff]  ;;  %v264_v11 = vld [vmem:[%s698_s4 + $0x8] sm:$0xff]  ;;  %v518_v12 = vld [vmem:[%s696_s1 + $0x10] sm:$0xff]  }
   0x5   :  { %486 = vmatprep.mubr.bf16.mxu0 %v521_v5  ;;  %490 = vmatprep.mubr.bf16.mxu1 %v522_v6  ;;  %v268_v13 = vld [vmem:[%s698_s4 + $0x28] sm:$0xff]  ;;  %v267_v14 = vld [vmem:[%s698_s4 + $0x20] sm:$0xff]  ;;  %v270_v16 = vld [vmem:[%s698_s4 + $0x38] sm:$0xff] }
   0x6   :  { %283 = vperm.xlu1 %512, %v265_v8   ;;  %273 = vperm.xlu0 %511, %v263_v9   ;;  %v519_v15 = vld [vmem:[%s696_s1 + $0x8] sm:$0xff]   ;;  %v269_v17 = vld [vmem:[%s698_s4 + $0x30] sm:$0xff]  ;;  %v520_v18 = vld [vmem:[%s696_s1] sm:$0xff]  }
   0x7   :  { %473 = vmatpush3.bf16.msra.mxu0 %v514_v2  ;;  %503 = vmatpush3.bf16.msra.mxu1 %v514_v2  ;;  %v523_v19 = vld [vmem:[%s697_s0 + $0x8] sm:$0xff]   ;;  %v524_v20 = vld [vmem:[%s697_s0 + $0x18] sm:$0xff]   ;;  %v241_v21 = vld [vmem:[%s699_s3 + $0x10] sm:$0xff] }
   0x8   :  { %474 = vmatprep.subr.bf16.mxu0 %v515_v3  ;;  %496 = vmatprep.subr.bf16.mxu1 %v515_v3  ;;  %v249_v22 = vld [vmem:[%s699_s3 + $0x50] sm:$0xff]  ;;  %v239_v23 = vld [vmem:[%s699_s3] sm:$0xff]  ;;  %v242_v25 = vld [vmem:[%s699_s3 + $0x18] sm:$0xff] }
   0x9   :  { %v247_v24 = vld [vmem:[%s699_s3 + $0x40] sm:$0xff]  ;;  %v250_v26 = vld [vmem:[%s699_s3 + $0x58] sm:$0xff]  ;;  %v257_v27 = vadd.f32 %v249_v22, %v241_v21  ;;  %v240_v28 = vld [vmem:[%s699_s3 + $0x8] sm:$0xff] }
   0xa   :  { %288 = vperm.xlu1 %512, %v266_v10   ;;  %278 = vperm.xlu0 %511, %v264_v11   ;;  %v248_v29 = vld [vmem:[%s699_s3 + $0x48] sm:$0xff]  ;;  %v255_v31 = vadd.f32 %v247_v24, %v239_v23  ;;  %v258_v33 = vadd.f32 %v250_v26, %v242_v25  ;;  %v243_v38 = vld [vmem:[%s699_s3 + $0x20] sm:$0xff]  ;;  %v246_v47 = vld [vmem:[%s699_s3 + $0x38] sm:$0xff] }
   0xb   :  { %475 = vmatpush3.bf16.msra.mxu0 %v515_v3  ;;  %504 = vmatpush3.bf16.msra.mxu1 %v515_v3  ;;  %v256_v34 = vadd.f32 %v248_v29, %v240_v28  ;;  %v244_v35 = vld [vmem:[%s699_s3 + $0x28] sm:$0xff]  ;;  %v251_v39 = vld [vmem:[%s699_s3 + $0x60] sm:$0xff]  ;;  %v254_v48 = vld [vmem:[%s699_s3 + $0x78] sm:$0xff] }
   0xc   :  { %476 = vmatprep.subr.bf16.mxu0 %v516_v4  ;;  %497 = vmatprep.subr.bf16.mxu1 %v516_v4  ;;  %v252_v36 = vld [vmem:[%s699_s3 + $0x68] sm:$0xff]  ;;  %v259_v46 = vadd.f32 %v251_v39, %v243_v38  ;;  %v245_v50 = vld [vmem:[%s699_s3 + $0x30] sm:$0xff]  ;;  %v262_v56 = vadd.f32 %v254_v48, %v246_v47  ;;  %v367_v1 = vld [vmem:[%s701_s2] ss:$0 sm:$0xff] }
   0xd   :  { %v260_v44 = vadd.f32 %v252_v36, %v244_v35  ;;  %v253_v51 = vld [vmem:[%s699_s3 + $0x70] sm:$0xff] }
   0xe   :  { %298 = vperm.xlu1 %512, %v268_v13   ;;  %293 = vperm.xlu0 %511, %v267_v14   ;;  %v261_v58 = vadd.f32 %v253_v51, %v245_v50 }
   0xf   :  { %477 = vmatpush3.bf16.msra.mxu0 %v516_v4  ;;  %505 = vmatpush3.bf16.msra.mxu1 %v516_v4 }
  0x10   :  { %478 = vmatprep.subr.bf16.mxu0 %v517_v7  ;;  %498 = vmatprep.subr.bf16.mxu1 %v517_v7 }
  0x12   :  { %308 = vperm.xlu1 %512, %v270_v16   ;;  %303 = vperm.xlu0 %511, %v269_v17  }
  0x13   :  { %479 = vmatpush3.bf16.msra.mxu0 %v517_v7  ;;  %506 = vmatpush3.bf16.msra.mxu1 %v517_v7 }
  0x14   :  { %480 = vmatprep.subr.bf16.mxu0 %v518_v12  ;;  %499 = vmatprep.subr.bf16.mxu1 %v518_v12 }
  0x17   :  { %481 = vmatpush3.bf16.msra.mxu0 %v518_v12  ;;  %507 = vmatpush3.bf16.msra.mxu1 %v518_v12 }
  0x18   :  { %482 = vmatprep.subr.bf16.mxu0 %v519_v15  ;;  %500 = vmatprep.subr.bf16.mxu1 %v519_v15 }
  0x1b   :  { %483 = vmatpush3.bf16.msra.mxu0 %v519_v15  ;;  %508 = vmatpush3.bf16.msra.mxu1 %v519_v15 }
  0x1c   :  { %484 = vmatprep.subr.bf16.mxu0 %v520_v18  ;;  %501 = vmatprep.subr.bf16.mxu1 %v520_v18 }
  0x1f   :  { %485 = vmatpush3.bf16.msra.mxu0 %v520_v18  ;;  %509 = vmatpush3.bf16.msra.mxu1 %v520_v18 }
  0x22   :  { %487 = vmatmul.mubr.bf16.vlgmr.msra.gmra.mxu0 %v523_v19  ;;  %491 = vmatmul.mubr.bf16.vlgmr.msra.gmra.mxu1 %v524_v20 }
  0x81   :  { %v284_v30 = vpop.permute.xlu1 %283  ;;  %v274_v32 = vpop.permute.xlu0 %273 }
  0x82   :  { %v313_v37 = vmul.f32 %v284_v30, %v257_v27  ;;  %v311_v40 = vmul.f32 %v274_v32, %v255_v31 }
  0x85   :  { %v289_v41 = vpop.permute.xlu1 %288  ;;  %v279_v43 = vpop.permute.xlu0 %278 }
  0x86   :  { %v314_v42 = vmul.f32 %v289_v41, %v258_v33  ;;  %v312_v45 = vmul.f32 %v279_v43, %v256_v34 }
  0x88   :  { %v440_v49 = vpack.c.bf16 %v314_v42, %v313_v37  ;;  %v435_v52 = vpack.c.bf16 %v312_v45, %v311_v40 }
  0x89   :  { %v299_v53 = vpop.permute.xlu1 %298  ;;  %v294_v55 = vpop.permute.xlu0 %293 }
  0x8a   :  { %455 = vst [vmem:[%s700_s6 + $0x8] sm:$0xff] %v440_v49   ;;  %v316_v54 = vmul.f32 %v299_v53, %v260_v44  ;;  %436 = vst [vmem:[%s700_s6] sm:$0xff] %v435_v52   ;;  %v315_v57 = vmul.f32 %v294_v55, %v259_v46 }
  0x8c   :  { %v445_v59 = vpack.c.bf16 %v316_v54, %v315_v57 }
  0x8d   :  { %v309_v60 = vpop.permute.xlu1 %308  ;;  %v304_v62 = vpop.permute.xlu0 %303 }
  0x8e   :  { %v318_v61 = vmul.f32 %v309_v60, %v262_v56  ;;  %456 = vst [vmem:[%s700_s6 + $0x10] sm:$0xff] %v445_v59   ;;  %v317_v63 = vmul.f32 %v304_v62, %v261_v58 }
  0x90   :  { %v450_v0 = vpack.c.bf16 %v318_v61, %v317_v63 }
  0x92   :  { %457 = vst [vmem:[%s700_s6 + $0x18] sm:$0xff] %v450_v0  }
  0xe2   :  { %v488_v2 = vpop.f32.mrf.mxu0  ;;  %v492_v3 = vpop.f32.mrf.mxu1 }
  0xe3   :  { %v169_v4 = vadd.f32 %v488_v2, %v367_v1  ;;  %v185_v5 = vadd.f32 %v492_v3, %v367_v1 }
  0xe4   :  { %v160_v6 = vpop.f32.mrf.mxu0  ;;  %v176_v7 = vpop.f32.mrf.mxu1 }
  0xe5   :  { %v161_v8 = vadd.f32 %v367_v1, %v160_v6  ;;  %v177_v9 = vadd.f32 %v367_v1, %v176_v7  ;;  %v193_v14 = vmax.f32 %v169_v4, 0.0  ;;  %v197_v15 = vmax.f32 %v185_v5, 0.0 }
  0xe6   :  { %v489_v10 = vpop.f32.mrf.mxu0  ;;  %v493_v11 = vpop.f32.mrf.mxu1 }
  0xe7   :  { %v172_v12 = vadd.f32 %v489_v10, %v367_v1  ;;  %v188_v13 = vadd.f32 %v493_v11, %v367_v1  ;;  %v191_v22 = vmax.f32 %v161_v8, 0.0  ;;  %v195_v23 = vmax.f32 %v177_v9, 0.0 }
  0xe8   :  { %v163_v16 = vpop.f32.mrf.mxu0  ;;  %v179_v17 = vpop.f32.mrf.mxu1 }
  0xe9   :  { %v194_v18 = vmax.f32 %v172_v12, 0.0  ;;  %v198_v19 = vmax.f32 %v188_v13, 0.0  ;;  %v164_v20 = vadd.f32 %v367_v1, %v163_v16  ;;  %v180_v21 = vadd.f32 %v367_v1, %v179_v17 }
  0xeb   :  { %v420_v24 = vpack.c.bf16 %v194_v18, %v193_v14  ;;  %v430_v25 = vpack.c.bf16 %v198_v19, %v197_v15  ;;  %v192_v26 = vmax.f32 %v164_v20, 0.0  ;;  %v196_v27 = vmax.f32 %v180_v21, 0.0 }
  0xed   :  { %452 = vst [vmem:[%s702_s5 + $0x8] sm:$0xff] %v420_v24   ;;  %454 = vst [vmem:[%s702_s5 + $0x18] sm:$0xff] %v430_v25   ;;  %v415_v28 = vpack.c.bf16 %v192_v26, %v191_v22  ;;  %v425_v29 = vpack.c.bf16 %v196_v27, %v195_v23 }
  0xef   :  { %416 = vst [vmem:[%s702_s5] sm:$0xff] %v415_v28   ;;  %453 = vst [vmem:[%s702_s5 + $0x10] sm:$0xff] %v425_v29  }

// kernel: wtagnn_forward_padded.12
= control target key start
LH: loop header
LB: loop body
LE: loop exit
PB: predicated region body
PF: predicated region fallthrough
CT: control target
= control target key end

     0   :  { %s1731_s12 = smov 0   ;;  %s1733_s13 = smov 0   ;;  %s2068_s0 = inlined_call_operand.vmem [shape: bf16[3072,128], index: 0, kind: input, shape index: {}]   ;;  %s2069_s1 = inlined_call_operand.vmem [shape: bf16[128,128], index: 1, kind: input, shape index: {}]   ;;  %s2070_s2 = inlined_call_operand.vmem [shape: s32[1,3072], index: 2, kind: input, shape index: {}]   ;;  %s2071_s3 = inlined_call_operand.vmem [shape: f32[2,64,128], index: 3, kind: output, shape index: {}]  }
   0x1   :  { %s1735_s14 = smov 0   ;;  %s1737_s15 = smov 0  }
   0x2   :  { %s1739_s16 = smov 0  }
   0x3 LB: > { %s22_s17 = sadd.s32 1, %s1699_s14  ;;  %s25_s18 = sadd.s32 1, %s1703_s15  ;;  %s1707_s16 = sphi %s1739_s16, %s13_s16   ;;  %s1703_s15 = sphi %s1737_s15, %s2121_s15   ;;  %s1699_s14 = sphi %s1735_s14, %s2120_s14   ;;  %s1695_s13 = sphi %s1733_s13, %s2119_s13   ;;  %s1691_s12 = sphi %s1731_s12, %s2118_s12  }
   0x4   : > { %p23_p0 = scmp.ge.s32.totalorder %s22_s17, 3  ;;  %p1257_p1 = scmp.ge.s32.totalorder %s1707_s16, 1 }
   0x5   : > { %p176_p2 = scmp.lt.s32.totalorder %s1707_s16, 7 }
   0x6   : > { %s2123_s17 = smov (%p23_p0, %s22_s17), 0  ;;  %s2125_s18 = smov (!%p23_p0, %s25_s18), %s1703_s15 }
   0x7   : > { %p177_p3 = pnand %p1257_p1, %p176_p2  ;;  %p27_p4 = scmp.ge.s32.totalorder %s2125_s18, 2 }
   0x9   : > { %s2127_s18 = smov (%p27_p4, %s2125_s18), 0  ;;  %180 = sbr.rel (%p177_p3) target bundleno = 611 (0x263), region = 32 }
   0xe   : > { %s208_s19 = smul.u32 3, %s1695_s13  ;;  %p227_p5 = scmp.lt.s32.totalorder %s1695_s13, 1 }
   0xf   : > { %p1263_p8 = scmp.ne.s32.totalorder %s1691_s12, 0 }
  0x10   : > { %s209_s20 = sadd.s32 %s1691_s12, %s208_s19  ;;  %s2129_s13 = smov (!%p227_p5, %s1695_s13), 1 }
  0x11   : > { %s1258_s21 = sshll.u32 %s209_s20, 6  ;;  %s1260_s22 = sshll.u32 %s209_s20, 2 }
  0x12   : > { %p211_p6 = scmp.lt.s32.totalorder %s1258_s21, 383  ;;  %p221_p7 = scmp.lt.s32.totalorder %s1260_s22, 23 }
  0x13   : > { %s1370_s24 = sshll.u32 %s2129_s13, 6  ;;  %236 = sbr.rel (%p1263_p8) target bundleno = 29 (0x1d), region = 36 }
  0x14   : > { %s2131_s21 = smov (!%p211_p6, %s1258_s21), 383  ;;  %s2133_s22 = smov (!%p221_p7, %s1260_s22), 23 }
  0x15   : > { %s1259_s23 = sshll.u32 %s2131_s21, 2  ;;  %s223_s30 = scalar_lea.vmem %s2070_s2, %s2133_s22 }
  0x16   : > { %s1769_s27 = scalar_lea.vmem %s2068_s0, %s1259_s23  ;;  %s1778_s6 = scalar_lea.vmem %s2071_s3, %s1370_s24 }
  0x18   : > { %v1709_v0 = vmov 0.0  }
  0x19   : > { %237 = vst [vmem:[%s1778_s6] sm:$0xff] %v1709_v0  ;;  %238 = vst [vmem:[%s1778_s6 + $0x8] sm:$0xff] %v1709_v0 }
  0x1a   : > { %239 = vst [vmem:[%s1778_s6 + $0x10] sm:$0xff] %v1709_v0  ;;  %240 = vst [vmem:[%s1778_s6 + $0x18] sm:$0xff] %v1709_v0 }
  0x1b   : > { %241 = vst [vmem:[%s1778_s6 + $0x20] sm:$0xff] %v1709_v0  ;;  %242 = vst [vmem:[%s1778_s6 + $0x28] sm:$0xff] %v1709_v0 }
  0x1c   : > { %243 = vst [vmem:[%s1778_s6 + $0x30] sm:$0xff] %v1709_v0  ;;  %244 = vst [vmem:[%s1778_s6 + $0x38] sm:$0xff] %v1709_v0 }
  0x1d PF: > { %v1629_v1 = vld [vmem:[%s2069_s1 + $0x38] sm:$0xff]   ;;  %v1630_v2 = vld [vmem:[%s2069_s1 + $0x30] sm:$0xff]   ;;  %v1631_v3 = vld [vmem:[%s2069_s1 + $0x28] sm:$0xff]   ;;  %v854_v41 = vlaneseq  ;;  %v2072_v49 = vmov 1.0|1.0   ;;  %v2086_v61 = vmov 0 }
  0x1e   : > { %1491 = vmatprep.subr.bf16.mxu0 %v1629_v1  ;;  %1571 = vmatprep.subr.bf16.mxu1 %v1629_v1  ;;  %v1632_v4 = vld [vmem:[%s2069_s1 + $0x20] sm:$0xff]   ;;  %v1633_v6 = vld [vmem:[%s2069_s1 + $0x18] sm:$0xff]   ;;  %v1634_v7 = vld [vmem:[%s2069_s1 + $0x10] sm:$0xff]   ;;  %v2088_v62 = vmov 0 }
  0x1f   : > { %1492 = vmatpush3.bf16.msra.mxu0 %v1629_v1  ;;  %1579 = vmatpush3.bf16.msra.mxu1 %v1629_v1  ;;  %v1637_v5 = vld [vmem:[%s1769_s27] sm:$0xff]   ;;  %v1635_v8 = vld [vmem:[%s2069_s1 + $0x8] sm:$0xff]   ;;  %v1639_v12 = vld [vmem:[%s1769_s27 + $0x10] sm:$0xff]   ;;  %v855_v42 = vshrl.u32 %v854_v41, 7 }
  0x20   : > { %1493 = vmatprep.subr.bf16.mxu0 %v1630_v2  ;;  %1572 = vmatprep.subr.bf16.mxu1 %v1630_v2  ;;  %v1636_v9 = vld [vmem:[%s2069_s1] sm:$0xff]   ;;  %v1638_v11 = vld [vmem:[%s1769_s27 + $0x8] sm:$0xff]   ;;  %v1657_v14 = vld [vmem:[%s1769_s27 + $0xd0] sm:$0xff]  }
  0x21   : > { %1507 = vmatprep.mubr.bf16.mxu0 %v1637_v5  ;;  %v1653_v10 = vld [vmem:[%s1769_s27 + $0xc0] sm:$0xff]   ;;  %v1654_v13 = vld [vmem:[%s1769_s27 + $0xc8] sm:$0xff]   ;;  %v1640_v15 = vld [vmem:[%s1769_s27 + $0x18] sm:$0xff]   ;;  %v870_v43 = vsub.s32 1, %v855_v42  ;;  %v866_v45 = vsub.s32 0, %v855_v42  ;;  %v856_v46 = vadd.s32 8, %v855_v42 }
  0x22   : > { %1555 = vmatprep.mubr.bf16.mxu1 %v1653_v10  ;;  %v1641_v16 = vld [vmem:[%s1769_s27 + $0x20] sm:$0xff]   ;;  %v1658_v17 = vld [vmem:[%s1769_s27 + $0xd8] sm:$0xff]   ;;  %v1642_v19 = vld [vmem:[%s1769_s27 + $0x28] sm:$0xff]   ;;  %v857_v51 = vadd.s32 16, %v855_v42  ;;  %v858_v52 = vadd.s32 24, %v855_v42  ;;  %v859_v55 = vadd.s32 32, %v855_v42 }
  0x23   : > { %1494 = vmatpush3.bf16.msra.mxu0 %v1630_v2  ;;  %1580 = vmatpush3.bf16.msra.mxu1 %v1630_v2  ;;  %v1661_v18 = vld [vmem:[%s1769_s27 + $0xe0] sm:$0xff]   ;;  %v1662_v20 = vld [vmem:[%s1769_s27 + $0xe8] sm:$0xff]   ;;  %v1643_v21 = vld [vmem:[%s1769_s27 + $0x30] sm:$0xff]   ;;  %v860_v56 = vadd.s32 40, %v855_v42  ;;  %v861_v59 = vadd.s32 48, %v855_v42  ;;  %v862_v60 = vadd.s32 56, %v855_v42 }
  0x24   : > { %1495 = vmatprep.subr.bf16.mxu0 %v1631_v3  ;;  %1573 = vmatprep.subr.bf16.mxu1 %v1631_v3  ;;  %v1665_v22 = vld [vmem:[%s1769_s27 + $0xf0] sm:$0xff]   ;;  %v1644_v23 = vld [vmem:[%s1769_s27 + $0x38] sm:$0xff]   ;;  %v1645_v25 = vld [vmem:[%s1769_s27 + $0x40] sm:$0xff]   ;;  %v878_v63 = vsub.s32 3, %v855_v42  ;;  %v874_v0 = vsub.s32 2, %v855_v42 }
  0x25   : > { %v1666_v24 = vld [vmem:[%s1769_s27 + $0xf8] sm:$0xff]   ;;  %v1646_v26 = vld [vmem:[%s1769_s27 + $0x48] sm:$0xff]   ;;  %v1647_v27 = vld [vmem:[%s1769_s27 + $0x50] sm:$0xff]  }
  0x26   : > { %v1648_v28 = vld [vmem:[%s1769_s27 + $0x58] sm:$0xff]   ;;  %v1649_v29 = vld [vmem:[%s1769_s27 + $0x60] sm:$0xff]   ;;  %v1650_v30 = vld [vmem:[%s1769_s27 + $0x68] sm:$0xff]  }
  0x27   : > { %1496 = vmatpush3.bf16.msra.mxu0 %v1631_v3  ;;  %1581 = vmatpush3.bf16.msra.mxu1 %v1631_v3  ;;  %v1651_v31 = vld [vmem:[%s1769_s27 + $0x70] sm:$0xff]   ;;  %v1652_v32 = vld [vmem:[%s1769_s27 + $0x78] sm:$0xff]   ;;  %v1655_v33 = vld [vmem:[%s1769_s27 + $0x80] sm:$0xff]  }
  0x28   : > { %1497 = vmatprep.subr.bf16.mxu0 %v1632_v4  ;;  %1574 = vmatprep.subr.bf16.mxu1 %v1632_v4  ;;  %v1656_v34 = vld [vmem:[%s1769_s27 + $0x88] sm:$0xff]   ;;  %v1659_v35 = vld [vmem:[%s1769_s27 + $0x90] sm:$0xff]   ;;  %v1660_v36 = vld [vmem:[%s1769_s27 + $0x98] sm:$0xff]  }
  0x29   : > { %v1663_v37 = vld [vmem:[%s1769_s27 + $0xa0] sm:$0xff]   ;;  %v1664_v38 = vld [vmem:[%s1769_s27 + $0xa8] sm:$0xff]   ;;  %v1667_v39 = vld [vmem:[%s1769_s27 + $0xb0] sm:$0xff]  }
  0x2a   : > { %v1668_v40 = vld [vmem:[%s1769_s27 + $0xb8] sm:$0xff]   ;;  %v863_v44 = vld [vmem:[%s223_s30] sm:$0xf] }
  0x2b   : > { %1498 = vmatpush3.bf16.msra.mxu0 %v1632_v4  ;;  %1582 = vmatpush3.bf16.msra.mxu1 %v1632_v4  ;;  %v871_v47 = vrot.slane %v863_v44, %v870_v43  ;;  %v867_v48 = vrot.slane %v863_v44, %v866_v45  ;;  %v879_v1 = vrot.slane %v863_v44, %v878_v63 }
  0x2c   : > { %1499 = vmatprep.subr.bf16.mxu0 %v1633_v6  ;;  %1575 = vmatprep.subr.bf16.mxu1 %v1633_v6  ;;  %v875_v2 = vrot.slane %v863_v44, %v874_v0 }
  0x2d   : > { %vm881_vm0 = vcmp.eq.s32.totalorder %v855_v42, %v871_v47  ;;  %vm885_vm1 = vcmp.eq.s32.totalorder %v856_v46, %v871_v47  ;;  %vm880_vm3 = vcmp.eq.s32.totalorder %v855_v42, %v867_v48  ;;  %vm884_vm4 = vcmp.eq.s32.totalorder %v856_v46, %v867_v48 }
  0x2e   : > { %vm1336_vm2 = vmpackc.low %vm885_vm1, %vm881_vm0  ;;  %vm889_vm6 = vcmp.eq.s32.totalorder %v857_v51, %v871_v47  ;;  %vm893_vm7 = vcmp.eq.s32.totalorder %v858_v52, %v871_v47  ;;  %vm888_vm9 = vcmp.eq.s32.totalorder %v857_v51, %v867_v48  ;;  %vm892_vm10 = vcmp.eq.s32.totalorder %v858_v52, %v867_v48 }
  0x2f   : > { %1500 = vmatpush3.bf16.msra.mxu0 %v1633_v6  ;;  %1583 = vmatpush3.bf16.msra.mxu1 %v1633_v6  ;;  %vm1851_vm5 = vmpackc.low %vm884_vm4, %vm880_vm3  ;;  %vm897_vm12 = vcmp.eq.s32.totalorder %v859_v55, %v871_v47  ;;  %vm901_vm13 = vcmp.eq.s32.totalorder %v860_v56, %v871_v47  ;;  %vm896_vm15 = vcmp.eq.s32.totalorder %v859_v55, %v867_v48 }
  0x30   : > { %1501 = vmatprep.subr.bf16.mxu0 %v1634_v7  ;;  %1576 = vmatprep.subr.bf16.mxu1 %v1634_v7  ;;  %vm1855_vm8 = vmpackc.low %vm893_vm7, %vm889_vm6  ;;  %vm900_vm0 = vcmp.eq.s32.totalorder %v860_v56, %v867_v48  ;;  %vm909_vm3 = vcmp.eq.s32.totalorder %v862_v60, %v871_v47  ;;  %vm904_vm6 = vcmp.eq.s32.totalorder %v861_v59, %v867_v48 }
  0x31   : > { %vm1859_vm11 = vmpackc.low %vm892_vm10, %vm888_vm9  ;;  %vm908_vm7 = vcmp.eq.s32.totalorder %v862_v60, %v867_v48  ;;  %vm883_vm10 = vcmp.eq.s32.totalorder %v855_v42, %v879_v1 }
  0x32   : > { %vm1863_vm14 = vmpackc.low %vm901_vm13, %vm897_vm12  ;;  %vm887_vm12 = vcmp.eq.s32.totalorder %v856_v46, %v879_v1 }
  0x33   : > { %1502 = vmatpush3.bf16.msra.mxu0 %v1634_v7  ;;  %1584 = vmatpush3.bf16.msra.mxu1 %v1634_v7  ;;  %vm1867_vm1 = vmpackc.low %vm900_vm0, %vm896_vm15  ;;  %vm882_vm15 = vcmp.eq.s32.totalorder %v855_v42, %v875_v2  ;;  %vm886_vm0 = vcmp.eq.s32.totalorder %v856_v46, %v875_v2 }
  0x34   : > { %1503 = vmatprep.subr.bf16.mxu0 %v1635_v8  ;;  %1577 = vmatprep.subr.bf16.mxu1 %v1635_v8  ;;  %vm1875_vm9 = vmpackc.low %vm908_vm7, %vm904_vm6  ;;  %vm895_vm6 = vcmp.eq.s32.totalorder %v858_v52, %v879_v1 }
  0x35   : > { %v2089_v62 = vsel %vm1875_vm9, 4294967295, %v2088_v62  ;;  %vm1879_vm13 = vmpackc.low %vm887_vm12, %vm883_vm10  ;;  %vm890_vm9 = vcmp.eq.s32.totalorder %v857_v51, %v875_v2  ;;  %vm899_vm12 = vcmp.eq.s32.totalorder %v859_v55, %v879_v1 }
  0x37   : > { %1504 = vmatpush3.bf16.msra.mxu0 %v1635_v8  ;;  %1585 = vmatpush3.bf16.msra.mxu1 %v1635_v8 }
  0x38   : > { %1505 = vmatprep.subr.bf16.mxu0 %v1636_v9  ;;  %1578 = vmatprep.subr.bf16.mxu1 %v1636_v9 }
  0x3b   : > { %1506 = vmatpush3.bf16.msra.mxu0 %v1636_v9  ;;  %1586 = vmatpush3.bf16.msra.mxu1 %v1636_v9 }
  0x3e   : > { %1508 = vmatmul.mubr.bf16.vlgmr.msra.gmra.mxu0 %v1638_v11  ;;  %1556 = vmatmul.mubr.bf16.vlgmr.msra.gmra.mxu1 %v1654_v13 }
  0x3f   : > { %1511 = vmatprep.mubr.bf16.mxu0 %v1639_v12  ;;  %1559 = vmatprep.mubr.bf16.mxu1 %v1657_v14 }
  0x46   : > { %1512 = vmatmul.mubr.bf16.gmra.mxu0 %v1640_v15  ;;  %1560 = vmatmul.mubr.bf16.gmra.mxu1 %v1658_v17  ;;  %v2100_v15 = vmov 0 }
  0x47   : > { %1515 = vmatprep.mubr.bf16.mxu0 %v1641_v16  ;;  %1563 = vmatprep.mubr.bf16.mxu1 %v1661_v18 }
  0x4e   : > { %1516 = vmatmul.mubr.bf16.gmra.mxu0 %v1642_v19  ;;  %1564 = vmatmul.mubr.bf16.gmra.mxu1 %v1662_v20 }
  0x4f   : > { %1519 = vmatprep.mubr.bf16.mxu0 %v1643_v21  ;;  %1567 = vmatprep.mubr.bf16.mxu1 %v1665_v22  ;;  %v2102_v22 = vmov 0 }
  0x56   : > { %1520 = vmatmul.mubr.bf16.gmra.mxu0 %v1644_v23  ;;  %1568 = vmatmul.mubr.bf16.gmra.mxu1 %v1666_v24  ;;  %v2105_v23 = vmov 0 }
  0x57   : > { %1523 = vmatprep.mubr.bf16.mxu0 %v1645_v25  ;;  %1337 = vmatprep.mubr.msk.bf16.mxu1 %vm1336_vm2, %v2072_v49  ;;  %vm905_vm2 = vcmp.eq.s32.totalorder %v861_v59, %v871_v47 }
  0x58   : > { %vm1871_vm4 = vmpackc.low %vm909_vm3, %vm905_vm2  ;;  %vm891_vm3 = vcmp.eq.s32.totalorder %v857_v51, %v879_v1 }
  0x59   : > { %v2087_v61 = vsel %vm1871_vm4, 4294967295, %v2086_v61  ;;  %vm1883_vm2 = vmpackc.low %vm886_vm0, %vm882_vm15  ;;  %vm894_vm4 = vcmp.eq.s32.totalorder %v858_v52, %v875_v2  ;;  %vm903_vm15 = vcmp.eq.s32.totalorder %v860_v56, %v879_v1  ;;  %vm902_vm0 = vcmp.eq.s32.totalorder %v860_v56, %v875_v2 }
  0x5a   : > { %vm1889_vm7 = vmpackc.low %vm895_vm6, %vm891_vm3  ;;  %vm907_vm6 = vcmp.eq.s32.totalorder %v861_v59, %v879_v1 }
  0x5b   : > { %vm1893_vm10 = vmpackc.low %vm894_vm4, %vm890_vm9  ;;  %vm898_vm9 = vcmp.eq.s32.totalorder %v859_v55, %v875_v2 }
  0x5c   : > { %vm1909_vm4 = vmpackc.low %vm903_vm15, %vm899_vm12  ;;  %vm911_vm12 = vcmp.eq.s32.totalorder %v862_v60, %v879_v1 }
  0x5d   : > { %vm1913_vm3 = vmpackc.low %vm902_vm0, %vm898_vm9  ;;  %vm906_vm9 = vcmp.eq.s32.totalorder %v861_v59, %v875_v2  ;;  %vm910_vm0 = vcmp.eq.s32.totalorder %v862_v60, %v875_v2 }
  0x5e   : > { %1524 = vmatmul.mubr.bf16.gmra.mxu0 %v1646_v26  ;;  %v2101_v15 = vsel %vm1913_vm3, 4294967295, %v2100_v15  ;;  %vm1927_vm15 = vmpackc.low %vm911_vm12, %vm907_vm6 }
  0x5f   : > { %1527 = vmatprep.mubr.bf16.mxu0 %v1647_v27  ;;  %v2103_v22 = vsel %vm1927_vm15, 4294967295, %v2102_v22  ;;  %vm1931_vm3 = vmpackc.low %vm910_vm0, %vm906_vm9 }
  0x60   : > { %2104 = vst [vmem:[#allocation2_spill] sm:$0xff] %v2103_v22  ;;  %v2106_v23 = vsel %vm1931_vm3, 4294967295, %v2105_v23 }
  0x61   : > { %2107 = vst [vmem:[#allocation3_spill] sm:$0xff] %v2106_v23 }
  0x66   : > { %1528 = vmatmul.mubr.bf16.gmra.mxu0 %v1648_v28 }
  0x67   : > { %1531 = vmatprep.mubr.bf16.mxu0 %v1649_v29 }
  0x6e   : > { %1532 = vmatmul.mubr.bf16.gmra.mxu0 %v1650_v30 }
  0x6f   : > { %1535 = vmatprep.mubr.bf16.mxu0 %v1651_v31 }
  0x76   : > { %1536 = vmatmul.mubr.bf16.gmra.mxu0 %v1652_v32 }
  0x77   : > { %1539 = vmatprep.mubr.bf16.mxu0 %v1655_v33 }
  0x7e   : > { %1540 = vmatmul.mubr.bf16.gmra.mxu0 %v1656_v34 }
  0x7f   : > { %1543 = vmatprep.mubr.bf16.mxu0 %v1659_v35 }
  0x86   : > { %1544 = vmatmul.mubr.bf16.gmra.mxu0 %v1660_v36 }
  0x87   : > { %1547 = vmatprep.mubr.bf16.mxu0 %v1663_v37 }
  0x8e   : > { %1548 = vmatmul.mubr.bf16.gmra.mxu0 %v1664_v38 }
  0x8f   : > { %1551 = vmatprep.mubr.bf16.mxu0 %v1667_v39 }
  0x96   : > { %1552 = vmatmul.mubr.bf16.gmra.mxu0 %v1668_v40 }
  0xfe   : > { %v1887_v5 = vpop.f32.mrf.mxu0  ;;  %v1937_v32 = vpop.f32.mrf.mxu1 }
 0x100   : > { %v1897_v8 = vpop.f32.mrf.mxu0  ;;  %v1941_v35 = vpop.f32.mrf.mxu1 }
 0x102   : > { %v1899_v9 = vpop.f32.mrf.mxu0  ;;  %v1945_v38 = vpop.f32.mrf.mxu1 }
 0x103   : > { %v1017_v57 = vpack.c.bf16 %v1945_v38, %v1937_v32 }
 0x104   : > { %v1903_v11 = vpop.f32.mrf.mxu0  ;;  %v1947_v41 = vpop.f32.mrf.mxu1 }
 0x106   : > { %v1907_v13 = vpop.f32.mrf.mxu0  ;;  %v1949_v44 = vpop.f32.mrf.mxu1 }
 0x108   : > { %v1917_v16 = vpop.f32.mrf.mxu0  ;;  %v1951_v47 = vpop.f32.mrf.mxu1 }
 0x10a   : > { %v1919_v17 = vpop.f32.mrf.mxu0  ;;  %v1953_v52 = vpop.f32.mrf.mxu1 }
 0x10b   : > { %v1019_v53 = vpack.c.bf16 %v1953_v52, %v1949_v44  ;;  %v1016_v44 = vpack.c.bf16 %v1947_v41, %v1941_v35 }
 0x10c   : > { %v1923_v19 = vpop.f32.mrf.mxu0  ;;  %v1955_v59 = vpop.f32.mrf.mxu1 }
 0x10e   : > { %v1517_v21 = vpop.f32.mrf.mxu0  ;;  %v1565_v49 = vpop.f32.mrf.mxu1 }
 0x110   : > { %v631_v24 = vpop.f32.mrf.mxu0  ;;  %v823_v23 = vpop.f32.mrf.mxu1 }
 0x112   : > { %v1518_v25 = vpop.f32.mrf.mxu0 }
 0x113   : > { %v997_v22 = vpack.c.bf16 %v1518_v25, %v1517_v21 }
 0x114   : > { %v634_v26 = vpop.f32.mrf.mxu0 }
 0x116   : > { %v1521_v27 = vpop.f32.mrf.mxu0 }
 0x118   : > { %v647_v28 = vpop.f32.mrf.mxu0 }
 0x11a   : > { %v1522_v29 = vpop.f32.mrf.mxu0 }
 0x11b   : > { %v999_v63 = vpack.c.bf16 %v1522_v29, %v1521_v27 }
 0x11c   : > { %v650_v30 = vpop.f32.mrf.mxu0 }
 0x11d   : > { %v998_v12 = vpack.c.bf16 %v650_v30, %v647_v28 }
 0x11e   : > { %v1935_v31 = vpop.f32.mrf.mxu0 }
 0x120   : > { %v1939_v33 = vpop.f32.mrf.mxu0 }
 0x122   : > { %v1526_v34 = vpop.f32.mrf.mxu0 }
 0x124   : > { %v1943_v36 = vpop.f32.mrf.mxu0 }
 0x126   : > { %v1529_v37 = vpop.f32.mrf.mxu0 }
 0x128   : > { %v679_v39 = vpop.f32.mrf.mxu0 }
 0x12a   : > { %v1530_v40 = vpop.f32.mrf.mxu0 }
 0x12c   : > { %v682_v42 = vpop.f32.mrf.mxu0 }
 0x12e   : > { %v1533_v43 = vpop.f32.mrf.mxu0 }
 0x130   : > { %v695_v45 = vpop.f32.mrf.mxu0 }
 0x132   : > { %v1534_v46 = vpop.f32.mrf.mxu0 }
 0x133   : > { %v1005_v20 = vpack.c.bf16 %v1534_v46, %v1533_v43  ;;  %v1002_v46 = vpack.c.bf16 %v682_v42, %v679_v39  ;;  %v1000_v39 = vpack.c.bf16 %v1943_v36, %v1939_v33  ;;  %v2112_v33 = vmov 1.0|1.0  }
 0x134   : > { %v698_v48 = vpop.f32.mrf.mxu0 }
 0x135   : > { %v1004_v27 = vpack.c.bf16 %v698_v48, %v695_v45 }
 0x136   : > { %v1537_v51 = vpop.f32.mrf.mxu0 }
 0x138   : > { %v711_v55 = vpop.f32.mrf.mxu0 }
 0x13a   : > { %v1538_v56 = vpop.f32.mrf.mxu0 }
 0x13b   : > { %v1007_v60 = vpack.c.bf16 %v1538_v56, %v1537_v51  ;;  %v996_v56 = vpack.c.bf16 %v634_v26, %v631_v24  ;;  %v2109_v26 = vpack.c.bf16 %v1923_v19, %v1917_v16  ;;  %v2111_v16 = vpack.c.bf16 %v1903_v11, %v1897_v8 }
 0x13c   : > { %v714_v0 = vpop.f32.mrf.mxu0 }
 0x13d   : > { %v1006_v1 = vpack.c.bf16 %v714_v0, %v711_v55  ;;  %1411 = vmatprep.subr.bf16.mxu1 %v1007_v60  ;;  %v1566_v55 = vpop.f32.mrf.mxu1 }
 0x13e   : > { %v1957_v2 = vpop.f32.mrf.mxu0  ;;  %1412 = vmatpush3.bf16.msra.mxu1 %v999_v63  ;;  %v1003_v63 = vpack.c.bf16 %v1530_v40, %v1529_v37 }
 0x13f   : > { %1413 = vmatprep.subr.bf16.mxu1 %v1006_v1  ;;  %v826_v30 = vpop.f32.mrf.mxu1 }
 0x140   : > { %v1959_v10 = vpop.f32.mrf.mxu0  ;;  %v1020_v11 = vpack.c.bf16 %v826_v30, %v823_v23  ;;  %v1018_v23 = vpack.c.bf16 %v1955_v59, %v1951_v47 }
 0x141   : > { %v1569_v21 = vpop.f32.mrf.mxu1 }
 0x142   : > { %v1961_v18 = vpop.f32.mrf.mxu0  ;;  %1414 = vmatpush3.bf16.msra.mxu1 %v998_v12 }
 0x143   : > { %1415 = vmatprep.subr.bf16.mxu1 %v1005_v20  ;;  %v2108_v20 = vpack.c.bf16 %v1919_v17, %v1907_v13  ;;  %v839_v24 = vpop.f32.mrf.mxu1  ;;  %v2110_v13 = vpack.c.bf16 %v1899_v9, %v1887_v5  ;;  %v1021_v9 = vpack.c.bf16 %v1566_v55, %v1565_v49  ;;  %v1009_v36 = vpack.c.bf16 %v1961_v18, %v1957_v2 }
 0x144   : > { %v1963_v51 = vpop.f32.mrf.mxu0 }
 0x145   : > { %v1570_v40 = vpop.f32.mrf.mxu1  ;;  %v1008_v58 = vpack.c.bf16 %v1963_v51, %v1959_v10 }
 0x146   : > { %v1545_v29 = vpop.f32.mrf.mxu0  ;;  %1416 = vmatpush3.bf16.msra.mxu1 %v997_v22  ;;  %v1001_v22 = vpack.c.bf16 %v1526_v34, %v1935_v31  ;;  %v1023_v31 = vpack.c.bf16 %v1570_v40, %v1569_v21 }
 0x147   : > { %1417 = vmatprep.subr.bf16.mxu1 %v1004_v27  ;;  %v842_v34 = vpop.f32.mrf.mxu1 }
 0x148   : > { %v743_v60 = vpop.f32.mrf.mxu0  ;;  %v1022_v0 = vpack.c.bf16 %v842_v34, %v839_v24 }
 0x14a   : > { %v1546_v28 = vpop.f32.mrf.mxu0  ;;  %1418 = vmatpush3.bf16.msra.mxu1 %v996_v56  ;;  %v1154_v56 = vld [vmem:[%s1778_s6] sm:$0xff] }
 0x14b   : > { %1419 = vmatprep.subr.bf16.mxu1 %v1003_v63  ;;  %v1011_v49 = vpack.c.bf16 %v1546_v28, %v1545_v29 }
 0x14c   : > { %v746_v43 = vpop.f32.mrf.mxu0 }
 0x14d   : > { %v1010_v54 = vpack.c.bf16 %v746_v43, %v743_v60 }
 0x14e   : > { %v1549_v12 = vpop.f32.mrf.mxu0  ;;  %1420 = vmatpush3.bf16.msra.mxu1 %v2108_v20 }
 0x14f   : > { %1421 = vmatprep.subr.bf16.mxu1 %v1002_v46 }
 0x150   : > { %v759_v25 = vpop.f32.mrf.mxu0 }
 0x152   : > { %v1550_v45 = vpop.f32.mrf.mxu0  ;;  %1422 = vmatpush3.bf16.msra.mxu1 %v2109_v26  ;;  %v1156_v26 = vld [vmem:[%s1778_s6 + $0x10] sm:$0xff] }
 0x153   : > { %1423 = vmatprep.subr.bf16.mxu1 %v1001_v22  ;;  %v1013_v8 = vpack.c.bf16 %v1550_v45, %v1549_v12  ;;  %v1155_v12 = vld [vmem:[%s1778_s6 + $0x8] sm:$0xff] }
 0x154   : > { %v762_v37 = vpop.f32.mrf.mxu0 }
 0x155   : > { %v1012_v50 = vpack.c.bf16 %v762_v37, %v759_v25 }
 0x156   : > { %v1553_v42 = vpop.f32.mrf.mxu0  ;;  %1424 = vmatpush3.bf16.msra.mxu1 %v2110_v13 }
 0x157   : > { %1425 = vmatprep.subr.bf16.mxu1 %v1000_v39 }
 0x158   : > { %v775_v17 = vpop.f32.mrf.mxu0 }
 0x15a   : > { %v1554_v48 = vpop.f32.mrf.mxu0  ;;  %1426 = vmatpush3.bf16.msra.mxu1 %v2111_v16 }
 0x15b   : > { %v1015_v19 = vpack.c.bf16 %v1554_v48, %v1553_v42  ;;  %1451 = vmatprep.subr.bf16.mxu1 %v1023_v31  ;;  %v1157_v31 = vld [vmem:[%s1778_s6 + $0x18] sm:$0xff] }
 0x15c   : > { %v778_v1 = vpop.f32.mrf.mxu0 }
 0x15d   : > { %1339 = vmatmul.mubr.msk.bf16.vlgmr.msra.gmra.mxu1 %vm1851_vm5, %v2112_v33  ;;  %v1014_v5 = vpack.c.bf16 %v778_v1, %v775_v17  ;;  %vm2113_vm5 = vnez %v2087_v61  ;;  %v1160_v61 = vld [vmem:[%s1778_s6 + $0x30] sm:$0xff] }
 0x15e   : > { %1452 = vmatpush3.bf16.msra.mxu1 %v1015_v19  ;;  %1341 = vmatprep.mubr.msk.bf16.mxu1 %vm1855_vm8, %v2112_v33  ;;  %vm2114_vm8 = vnez %v2089_v62 }
 0x15f   : > { %1453 = vmatprep.subr.bf16.mxu1 %v1022_v0 }
 0x162   : > { %1454 = vmatpush3.bf16.msra.mxu1 %v1014_v5 }
 0x163   : > { %1455 = vmatprep.subr.bf16.mxu1 %v1021_v9 }
 0x165   : > { %1343 = vmatmul.mubr.msk.bf16.gmra.mxu1 %vm1859_vm11, %v2112_v33  ;;  %vm2115_vm11 = vnez %v2101_v15 }
 0x166   : > { %1456 = vmatpush3.bf16.msra.mxu1 %v1013_v8  ;;  %1345 = vmatprep.mubr.msk.bf16.mxu1 %vm1863_vm14, %v2112_v33 }
 0x167   : > { %1457 = vmatprep.subr.bf16.mxu1 %v1020_v11 }
 0x16a   : > { %1458 = vmatpush3.bf16.msra.mxu1 %v1012_v50 }
 0x16b   : > { %1459 = vmatprep.subr.bf16.mxu1 %v1019_v53 }
 0x16d   : > { %1347 = vmatmul.mubr.msk.bf16.gmra.mxu1 %vm1867_vm1, %v2112_v33 }
 0x16e   : > { %1460 = vmatpush3.bf16.msra.mxu1 %v1011_v49  ;;  %1349 = vmatprep.mubr.msk.bf16.mxu1 %vm2113_vm5, %v2112_v33  ;;  %v1159_v49 = vld [vmem:[%s1778_s6 + $0x28] sm:$0xff] }
 0x16f   : > { %1461 = vmatprep.subr.bf16.mxu1 %v1018_v23 }
 0x172   : > { %1462 = vmatpush3.bf16.msra.mxu1 %v1010_v54 }
 0x173   : > { %1463 = vmatprep.subr.bf16.mxu1 %v1017_v57 }
 0x175   : > { %1351 = vmatmul.mubr.msk.bf16.gmra.mxu1 %vm2114_vm8, %v2112_v33 }
 0x176   : > { %1464 = vmatpush3.bf16.msra.mxu1 %v1009_v36  ;;  %1353 = vmatprep.mubr.msk.bf16.mxu1 %vm1879_vm13, %v2112_v33 }
 0x177   : > { %1465 = vmatprep.subr.bf16.mxu1 %v1016_v44 }
 0x17a   : > { %1466 = vmatpush3.bf16.msra.mxu1 %v1008_v58 }
 0x17d   : > { %1355 = vmatmul.mubr.msk.bf16.vlgmr.msra.gmra.mxu1 %vm1883_vm2, %v2112_v33 }
 0x17e   : > { %1357 = vmatprep.mubr.msk.bf16.mxu1 %vm1889_vm7, %v2112_v33 }
 0x185   : > { %1359 = vmatmul.mubr.msk.bf16.gmra.mxu1 %vm1893_vm10, %v2112_v33 }
 0x186   : > { %1361 = vmatprep.mubr.msk.bf16.mxu1 %vm1909_vm4, %v2112_v33 }
 0x18d   : > { %1363 = vmatmul.mubr.msk.bf16.gmra.mxu1 %vm2115_vm11, %v2112_v33 }
 0x18e   : > { %1365 = vmatprep.mubr.msk.bf16.mxu1 %vm1927_vm15, %v2112_v33 }
 0x195   : > { %1367 = vmatmul.mubr.msk.bf16.gmra.mxu1 %vm1931_vm3, %v2112_v33  ;;  %v1158_v33 = vld [vmem:[%s1778_s6 + $0x20] sm:$0xff] }
 0x21d   : > { %v1427_v3 = vpop.f32.mrf.mxu1 }
 0x21f   : > { %v1428_v4 = vpop.f32.mrf.mxu1 }
 0x220   : > { %v1429_v29 = vadd.f32 %v1428_v4, %v1427_v3 }
 0x221   : > { %v1430_v6 = vpop.f32.mrf.mxu1 }
 0x223   : > { %v1431_v7 = vpop.f32.mrf.mxu1 }
 0x224   : > { %v1432_v30 = vadd.f32 %v1431_v7, %v1430_v6 }
 0x225   : > { %v1433_v10 = vpop.f32.mrf.mxu1 }
 0x227   : > { %v1434_v14 = vpop.f32.mrf.mxu1 }
 0x228   : > { %v1435_v22 = vadd.f32 %v1434_v14, %v1433_v10  ;;  %v1161_v14 = vld [vmem:[%s1778_s6 + $0x38] sm:$0xff] }
 0x229   : > { %v1436_v18 = vpop.f32.mrf.mxu1 }
 0x22b   : > { %v1437_v32 = vpop.f32.mrf.mxu1 }
 0x22c   : > { %v1438_v42 = vadd.f32 %v1437_v32, %v1436_v18 }
 0x22d   : > { %v1439_v35 = vpop.f32.mrf.mxu1 }
 0x22f   : > { %v1440_v15 = vpop.f32.mrf.mxu1 }
 0x230   : > { %v1441_v19 = vadd.f32 %v1440_v15, %v1439_v35 }
 0x231   : > { %v1442_v38 = vpop.f32.mrf.mxu1 }
 0x233   : > { %v1443_v41 = vpop.f32.mrf.mxu1 }
 0x234   : > { %v1444_v11 = vadd.f32 %v1443_v41, %v1442_v38 }
 0x235   : > { %v1445_v47 = vpop.f32.mrf.mxu1 }
 0x237   : > { %v1446_v52 = vpop.f32.mrf.mxu1 }
 0x238   : > { %v1447_v36 = vadd.f32 %v1446_v52, %v1445_v47 }
 0x239   : > { %v1448_v59 = vpop.f32.mrf.mxu1 }
 0x23b   : > { %v1449_v2 = vpop.f32.mrf.mxu1 }
 0x23c   : > { %v1450_v6 = vadd.f32 %v1449_v2, %v1448_v59 }
 0x23d   : > { %v1467_v51 = vpop.f32.mrf.mxu1 }
 0x23f   : > { %v1468_v27 = vpop.f32.mrf.mxu1 }
 0x240   : > { %v1469_v55 = vadd.f32 %v1468_v27, %v1467_v51 }
 0x241   : > { %v1470_v60 = vpop.f32.mrf.mxu1 }
 0x242   : > { %v1124_v63 = vadd.f32 %v1469_v55, %v1429_v29 }
 0x243   : > { %v1471_v28 = vpop.f32.mrf.mxu1 }
 0x244   : > { %v1162_v43 = vadd.f32 %v1154_v56, %v1124_v63  ;;  %v1472_v46 = vadd.f32 %v1471_v28, %v1470_v60 }
 0x245   : > { %v1473_v20 = vpop.f32.mrf.mxu1 }
 0x246   : > { %1170 = vst [vmem:[%s1778_s6] sm:$0xff] %v1162_v43  ;;  %v1127_v21 = vadd.f32 %v1472_v46, %v1432_v30 }
 0x247   : > { %v1474_v25 = vpop.f32.mrf.mxu1 }
 0x248   : > { %v1163_v45 = vadd.f32 %v1155_v12, %v1127_v21  ;;  %v1475_v24 = vadd.f32 %v1474_v25, %v1473_v20 }
 0x249   : > { %v1476_v37 = vpop.f32.mrf.mxu1 }
 0x24a   : > { %1171 = vst [vmem:[%s1778_s6 + $0x8] sm:$0xff] %v1163_v45  ;;  %v1132_v39 = vadd.f32 %v1475_v24, %v1435_v22 }
 0x24b   : > { %v1477_v40 = vpop.f32.mrf.mxu1 }
 0x24c   : > { %v1164_v13 = vadd.f32 %v1156_v26, %v1132_v39  ;;  %v1478_v17 = vadd.f32 %v1477_v40, %v1476_v37 }
 0x24d   : > { %v1479_v34 = vpop.f32.mrf.mxu1 }
 0x24e   : > { %1172 = vst [vmem:[%s1778_s6 + $0x10] sm:$0xff] %v1164_v13  ;;  %v1135_v48 = vadd.f32 %v1478_v17, %v1438_v42 }
 0x24f   : > { %v1480_v16 = vpop.f32.mrf.mxu1 }
 0x250   : > { %v1165_v0 = vadd.f32 %v1157_v31, %v1135_v48  ;;  %v1481_v1 = vadd.f32 %v1480_v16, %v1479_v34 }
 0x251   : > { %v1482_v5 = vpop.f32.mrf.mxu1 }
 0x252   : > { %1173 = vst [vmem:[%s1778_s6 + $0x18] sm:$0xff] %v1165_v0  ;;  %v1140_v9 = vadd.f32 %v1481_v1, %v1441_v19 }
 0x253   : > { %v1483_v8 = vpop.f32.mrf.mxu1 }
 0x254   : > { %v1166_v50 = vadd.f32 %v1158_v33, %v1140_v9  ;;  %v1484_v53 = vadd.f32 %v1483_v8, %v1482_v5 }
 0x255   : > { %v1485_v23 = vpop.f32.mrf.mxu1 }
 0x256   : > { %1174 = vst [vmem:[%s1778_s6 + $0x20] sm:$0xff] %v1166_v50  ;;  %v1143_v54 = vadd.f32 %v1484_v53, %v1444_v11 }
 0x257   : > { %v1486_v57 = vpop.f32.mrf.mxu1 }
 0x258   : > { %v1167_v44 = vadd.f32 %v1159_v49, %v1143_v54  ;;  %v1487_v58 = vadd.f32 %v1486_v57, %v1485_v23 }
 0x259   : > { %v1488_v62 = vpop.f32.mrf.mxu1 }
 0x25a   : > { %1175 = vst [vmem:[%s1778_s6 + $0x28] sm:$0xff] %v1167_v44  ;;  %v1148_v3 = vadd.f32 %v1487_v58, %v1447_v36 }
 0x25b   : > { %v1489_v4 = vpop.f32.mrf.mxu1 }
 0x25c   : > { %v1168_v7 = vadd.f32 %v1160_v61, %v1148_v3  ;;  %v1490_v10 = vadd.f32 %v1489_v4, %v1488_v62 }
 0x25e   : > { %1176 = vst [vmem:[%s1778_s6 + $0x30] sm:$0xff] %v1168_v7  ;;  %v1151_v18 = vadd.f32 %v1490_v10, %v1450_v6 }
 0x260   : > { %v1169_v32 = vadd.f32 %v1161_v14, %v1151_v18 }
 0x262   : > { %1177 = vst [vmem:[%s1778_s6 + $0x38] sm:$0xff] %v1169_v32 }
 0x263 PF: > { %s13_s16 = sadd.s32 1, %s1707_s16   ;;  %s2118_s12 = smov %s1699_s14 }
 0x264   : > { %p10_p9 = scmp.ge.s32.totalorder %s13_s16, 8   ;;  %s2119_s13 = smov %s1703_s15 }
 0x265   : > { %s2120_s14 = smov %s2123_s17  ;;  %s2121_s15 = smov %s2127_s18 }
 0x266   :  { %12 = sbr.rel (!%p10_p9) target bundleno = 3 (0x3), region = 69 }

// kernel: wtagnn_forward_padded.16
= control target key start
LH: loop header
LB: loop body
LE: loop exit
PB: predicated region body
PF: predicated region fallthrough
CT: control target
= control target key end

     0   :  { %v517_v1 = vmov 0   ;;  %s688_s1 = inlined_call_operand.vmem [shape: bf16[128,128], index: 1, kind: input, shape index: {}]   ;;  %s689_s0 = inlined_call_operand.vmem [shape: bf16[64,128], index: 0, kind: input, shape index: {}]   ;;  %s690_s4 = inlined_call_operand.vmem [shape: f32[64,1], index: 4, kind: input, shape index: {}]   ;;  %s691_s3 = inlined_call_operand.vmem [shape: f32[2,64,128], index: 3, kind: input, shape index: {}]   ;;  %s692_s6 = inlined_call_operand.vmem [shape: bf16[64,128], index: 6, kind: output, shape index: {1}]   ;;  %s693_s2 = inlined_call_operand.vmem [shape: f32[1,128], index: 2, kind: input, shape index: {}]   ;;  %s694_s5 = inlined_call_operand.vmem [shape: bf16[64,128], index: 5, kind: output, shape index: {0}]  }
   0x1   :  { %v505_v0 = vld [vmem:[%s688_s1 + $0x38] sm:$0xff]   ;;  %504 = vset.pattern.permute.xlu1 %v517_v1  ;;  %503 = vset.pattern.permute.xlu0 %v517_v1  ;;  %v506_v2 = vld [vmem:[%s688_s1 + $0x30] sm:$0xff]   ;;  %v507_v3 = vld [vmem:[%s688_s1 + $0x28] sm:$0xff]  }
   0x2   :  { %462 = vmatprep.subr.bf16.mxu0 %v505_v0  ;;  %486 = vmatprep.subr.bf16.mxu1 %v505_v0  ;;  %v508_v4 = vld [vmem:[%s688_s1 + $0x20] sm:$0xff]   ;;  %v514_v6 = vld [vmem:[%s689_s0 + $0x10] sm:$0xff]   ;;  %v509_v7 = vld [vmem:[%s688_s1 + $0x18] sm:$0xff]  }
   0x3   :  { %463 = vmatpush3.bf16.msra.mxu0 %v505_v0  ;;  %494 = vmatpush3.bf16.msra.mxu1 %v505_v0  ;;  %v513_v5 = vld [vmem:[%s689_s0] sm:$0xff]   ;;  %v257_v8 = vld [vmem:[%s690_s4 + $0x10] sm:$0xff]  ;;  %v258_v10 = vld [vmem:[%s690_s4 + $0x18] sm:$0xff] }
   0x4   :  { %464 = vmatprep.subr.bf16.mxu0 %v506_v2  ;;  %487 = vmatprep.subr.bf16.mxu1 %v506_v2  ;;  %v255_v9 = vld [vmem:[%s690_s4] sm:$0xff]  ;;  %v256_v11 = vld [vmem:[%s690_s4 + $0x8] sm:$0xff]  ;;  %v510_v12 = vld [vmem:[%s688_s1 + $0x10] sm:$0xff]  }
   0x5   :  { %478 = vmatprep.mubr.bf16.mxu0 %v513_v5  ;;  %482 = vmatprep.mubr.bf16.mxu1 %v514_v6  ;;  %v260_v13 = vld [vmem:[%s690_s4 + $0x28] sm:$0xff]  ;;  %v259_v14 = vld [vmem:[%s690_s4 + $0x20] sm:$0xff]  ;;  %v262_v16 = vld [vmem:[%s690_s4 + $0x38] sm:$0xff] }
   0x6   :  { %275 = vperm.xlu1 %504, %v257_v8   ;;  %265 = vperm.xlu0 %503, %v255_v9   ;;  %v511_v15 = vld [vmem:[%s688_s1 + $0x8] sm:$0xff]   ;;  %v261_v17 = vld [vmem:[%s690_s4 + $0x30] sm:$0xff]  ;;  %v512_v18 = vld [vmem:[%s688_s1] sm:$0xff]  }
   0x7   :  { %465 = vmatpush3.bf16.msra.mxu0 %v506_v2  ;;  %495 = vmatpush3.bf16.msra.mxu1 %v506_v2  ;;  %v515_v19 = vld [vmem:[%s689_s0 + $0x8] sm:$0xff]   ;;  %v516_v20 = vld [vmem:[%s689_s0 + $0x18] sm:$0xff]   ;;  %v233_v21 = vld [vmem:[%s691_s3 + $0x10] sm:$0xff] }
   0x8   :  { %466 = vmatprep.subr.bf16.mxu0 %v507_v3  ;;  %488 = vmatprep.subr.bf16.mxu1 %v507_v3  ;;  %v241_v22 = vld [vmem:[%s691_s3 + $0x50] sm:$0xff]  ;;  %v231_v23 = vld [vmem:[%s691_s3] sm:$0xff]  ;;  %v234_v25 = vld [vmem:[%s691_s3 + $0x18] sm:$0xff] }
   0x9   :  { %v239_v24 = vld [vmem:[%s691_s3 + $0x40] sm:$0xff]  ;;  %v242_v26 = vld [vmem:[%s691_s3 + $0x58] sm:$0xff]  ;;  %v249_v27 = vadd.f32 %v241_v22, %v233_v21  ;;  %v232_v28 = vld [vmem:[%s691_s3 + $0x8] sm:$0xff] }
   0xa   :  { %280 = vperm.xlu1 %504, %v258_v10   ;;  %270 = vperm.xlu0 %503, %v256_v11   ;;  %v240_v29 = vld [vmem:[%s691_s3 + $0x48] sm:$0xff]  ;;  %v247_v31 = vadd.f32 %v239_v24, %v231_v23  ;;  %v250_v33 = vadd.f32 %v242_v26, %v234_v25  ;;  %v235_v38 = vld [vmem:[%s691_s3 + $0x20] sm:$0xff]  ;;  %v238_v47 = vld [vmem:[%s691_s3 + $0x38] sm:$0xff] }
   0xb   :  { %467 = vmatpush3.bf16.msra.mxu0 %v507_v3  ;;  %496 = vmatpush3.bf16.msra.mxu1 %v507_v3  ;;  %v248_v34 = vadd.f32 %v240_v29, %v232_v28  ;;  %v236_v35 = vld [vmem:[%s691_s3 + $0x28] sm:$0xff]  ;;  %v243_v39 = vld [vmem:[%s691_s3 + $0x60] sm:$0xff]  ;;  %v246_v48 = vld [vmem:[%s691_s3 + $0x78] sm:$0xff] }
   0xc   :  { %468 = vmatprep.subr.bf16.mxu0 %v508_v4  ;;  %489 = vmatprep.subr.bf16.mxu1 %v508_v4  ;;  %v244_v36 = vld [vmem:[%s691_s3 + $0x68] sm:$0xff]  ;;  %v251_v46 = vadd.f32 %v243_v39, %v235_v38  ;;  %v237_v50 = vld [vmem:[%s691_s3 + $0x30] sm:$0xff]  ;;  %v254_v56 = vadd.f32 %v246_v48, %v238_v47  ;;  %v359_v3 = vld [vmem:[%s693_s2] ss:$0 sm:$0xff] }
   0xd   :  { %v252_v44 = vadd.f32 %v244_v36, %v236_v35  ;;  %v245_v51 = vld [vmem:[%s691_s3 + $0x70] sm:$0xff] }
   0xe   :  { %290 = vperm.xlu1 %504, %v260_v13   ;;  %285 = vperm.xlu0 %503, %v259_v14   ;;  %v253_v58 = vadd.f32 %v245_v51, %v237_v50 }
   0xf   :  { %469 = vmatpush3.bf16.msra.mxu0 %v508_v4  ;;  %497 = vmatpush3.bf16.msra.mxu1 %v508_v4 }
  0x10   :  { %470 = vmatprep.subr.bf16.mxu0 %v509_v7  ;;  %490 = vmatprep.subr.bf16.mxu1 %v509_v7 }
  0x12   :  { %300 = vperm.xlu1 %504, %v262_v16   ;;  %295 = vperm.xlu0 %503, %v261_v17  }
  0x13   :  { %471 = vmatpush3.bf16.msra.mxu0 %v509_v7  ;;  %498 = vmatpush3.bf16.msra.mxu1 %v509_v7 }
  0x14   :  { %472 = vmatprep.subr.bf16.mxu0 %v510_v12  ;;  %491 = vmatprep.subr.bf16.mxu1 %v510_v12 }
  0x17   :  { %473 = vmatpush3.bf16.msra.mxu0 %v510_v12  ;;  %499 = vmatpush3.bf16.msra.mxu1 %v510_v12 }
  0x18   :  { %474 = vmatprep.subr.bf16.mxu0 %v511_v15  ;;  %492 = vmatprep.subr.bf16.mxu1 %v511_v15 }
  0x1b   :  { %475 = vmatpush3.bf16.msra.mxu0 %v511_v15  ;;  %500 = vmatpush3.bf16.msra.mxu1 %v511_v15 }
  0x1c   :  { %476 = vmatprep.subr.bf16.mxu0 %v512_v18  ;;  %493 = vmatprep.subr.bf16.mxu1 %v512_v18 }
  0x1f   :  { %477 = vmatpush3.bf16.msra.mxu0 %v512_v18  ;;  %501 = vmatpush3.bf16.msra.mxu1 %v512_v18 }
  0x22   :  { %479 = vmatmul.mubr.bf16.vlgmr.msra.gmra.mxu0 %v515_v19  ;;  %483 = vmatmul.mubr.bf16.vlgmr.msra.gmra.mxu1 %v516_v20 }
  0x81   :  { %v276_v30 = vpop.permute.xlu1 %275  ;;  %v266_v32 = vpop.permute.xlu0 %265 }
  0x82   :  { %v305_v37 = vmul.f32 %v276_v30, %v249_v27  ;;  %v303_v40 = vmul.f32 %v266_v32, %v247_v31 }
  0x85   :  { %v281_v41 = vpop.permute.xlu1 %280  ;;  %v271_v43 = vpop.permute.xlu0 %270 }
  0x86   :  { %v306_v42 = vmul.f32 %v281_v41, %v250_v33  ;;  %v304_v45 = vmul.f32 %v271_v43, %v248_v34 }
  0x88   :  { %v432_v49 = vpack.c.bf16 %v306_v42, %v305_v37  ;;  %v427_v52 = vpack.c.bf16 %v304_v45, %v303_v40 }
  0x89   :  { %v291_v53 = vpop.permute.xlu1 %290  ;;  %v286_v55 = vpop.permute.xlu0 %285 }
  0x8a   :  { %447 = vst [vmem:[%s692_s6 + $0x8] sm:$0xff] %v432_v49   ;;  %v308_v54 = vmul.f32 %v291_v53, %v252_v44  ;;  %428 = vst [vmem:[%s692_s6] sm:$0xff] %v427_v52   ;;  %v307_v57 = vmul.f32 %v286_v55, %v251_v46 }
  0x8c   :  { %v437_v59 = vpack.c.bf16 %v308_v54, %v307_v57 }
  0x8d   :  { %v301_v60 = vpop.permute.xlu1 %300  ;;  %v296_v62 = vpop.permute.xlu0 %295 }
  0x8e   :  { %v310_v61 = vmul.f32 %v301_v60, %v254_v56  ;;  %448 = vst [vmem:[%s692_s6 + $0x10] sm:$0xff] %v437_v59   ;;  %v309_v63 = vmul.f32 %v296_v62, %v253_v58 }
  0x90   :  { %v442_v0 = vpack.c.bf16 %v310_v61, %v309_v63 }
  0x92   :  { %449 = vst [vmem:[%s692_s6 + $0x18] sm:$0xff] %v442_v0  }
  0xe2   :  { %v480_v1 = vpop.f32.mrf.mxu0  ;;  %v484_v2 = vpop.f32.mrf.mxu1 }
  0xe3   :  { %v169_v8 = vadd.f32 %v480_v1, %v359_v3  ;;  %v185_v9 = vadd.f32 %v484_v2, %v359_v3 }
  0xe4   :  { %v160_v4 = vpop.f32.mrf.mxu0  ;;  %v176_v5 = vpop.f32.mrf.mxu1 }
  0xe5   :  { %v161_v12 = vadd.f32 %v359_v3, %v160_v4  ;;  %v177_v13 = vadd.f32 %v359_v3, %v176_v5 }
  0xe6   :  { %v481_v6 = vpop.f32.mrf.mxu0  ;;  %v485_v7 = vpop.f32.mrf.mxu1 }
  0xe7   :  { %v172_v10 = vadd.f32 %v481_v6, %v359_v3  ;;  %v188_v11 = vadd.f32 %v485_v7, %v359_v3 }
  0xe8   :  { %v163_v14 = vpop.f32.mrf.mxu0  ;;  %v179_v15 = vpop.f32.mrf.mxu1 }
  0xe9   :  { %v412_v16 = vpack.c.bf16 %v172_v10, %v169_v8  ;;  %v422_v17 = vpack.c.bf16 %v188_v11, %v185_v9  ;;  %v164_v18 = vadd.f32 %v359_v3, %v163_v14  ;;  %v180_v19 = vadd.f32 %v359_v3, %v179_v15 }
  0xeb   :  { %444 = vst [vmem:[%s694_s5 + $0x8] sm:$0xff] %v412_v16   ;;  %446 = vst [vmem:[%s694_s5 + $0x18] sm:$0xff] %v422_v17   ;;  %v407_v20 = vpack.c.bf16 %v164_v18, %v161_v12  ;;  %v417_v21 = vpack.c.bf16 %v180_v19, %v177_v13 }
  0xed   :  { %408 = vst [vmem:[%s694_s5] sm:$0xff] %v407_v20   ;;  %445 = vst [vmem:[%s694_s5 + $0x10] sm:$0xff] %v417_v21  }

// kernel: wtagnn_forward_padded.11
= control target key start
LH: loop header
LB: loop body
LE: loop exit
PB: predicated region body
PF: predicated region fallthrough
CT: control target
= control target key end

     0   :  { %s5499_s30 = smov 0   ;;  %s6596_s0 = inlined_call_operand.vmem [shape: bf16[3072,128], index: 0, kind: input, shape index: {}]   ;;  %s6597_s1 = inlined_call_operand.vmem [shape: bf16[128,128], index: 1, kind: input, shape index: {}]   ;;  %s6598_s2 = inlined_call_operand.vmem [shape: bf16[64,128], index: 2, kind: input, shape index: {}]   ;;  %s6599_s3 = inlined_call_operand.vmem [shape: bf16[64,128], index: 3, kind: input, shape index: {}]   ;;  %s6600_s4 = inlined_call_operand.vmem [shape: s32[3072,1], index: 4, kind: input, shape index: {}]   ;;  %s6601_s5 = inlined_call_operand.vmem [shape: s32[3072,1], index: 5, kind: input, shape index: {}]   ;;  %s6602_s6 = inlined_call_operand.vmem [shape: bf16[128,128], index: 6, kind: input, shape index: {}]   ;;  %s6603_s7 = inlined_call_operand.vmem [shape: bf16[128,128], index: 7, kind: input, shape index: {}]   ;;  %s6604_s8 = inlined_call_operand.vmem [shape: f32[1,128], index: 8, kind: input, shape index: {}]   ;;  %s6605_s9 = inlined_call_operand.vmem [shape: bf16[3072,128], index: 9, kind: output, shape index: {}]  }
   0x1 LB: > { %s4188_s10 = sadd.s32 4294967295, %s5445_s30   ;;  %p4192_p0 = scmp.ge.s32.totalorder %s5445_s30, 1  ;;  %s5445_s30 = sphi %s5499_s30, %s19_s30  }
   0x2   : > { %p310_p1 = scmp.lt.s32.totalorder %s5445_s30, 7 }
   0x4   : > { %p311_p2 = pnand %p4192_p0, %p310_p1 }
   0x5   : > { %s4193_s11 = sshll.u32 (!%p311_p2), %s4188_s10, 6 }
   0x6   : > { %314 = sbr.rel (%p311_p2) target bundleno = 938 (0x3aa), region = 56  ;;  %p357_p3 = scmp.lt.s32.totalorder (!%p311_p2), %s4193_s11, 383 }
   0xb   : > { %v5447_v0 = vmov 0   ;;  %s6607_s11 = smov (!%p357_p3, %s4193_s11), 383  ;;  %v5375_v15 = vld [vmem:[%s6598_s2 + $0x18] sm:$0xff]   ;;  %v5376_v16 = vld [vmem:[%s6598_s2 + $0x10] sm:$0xff]   ;;  %v5377_v21 = vld [vmem:[%s6598_s2 + $0x8] sm:$0xff]   ;;  %vm1487_vm6 = vcmask 523264  }
   0xc   : > { %5374 = vset.pattern.permute.xlu1 %v5447_v0  ;;  %5373 = vset.pattern.permute.xlu0 %v5447_v0  ;;  %s4196_s12 = sshll.u32 %s6607_s11, 3  ;;  %v5378_v24 = vld [vmem:[%s6598_s2] sm:$0xff]  }
   0xd   : > { %s5513_s15 = scalar_lea.vmem %s6600_s4, %s4196_s12  ;;  %s5522_s18 = scalar_lea.vmem %s6601_s5, %s4196_s12  ;;  %4971 = vmatprep.subr.bf16.mxu0 %v5375_v15  ;;  %5355 = vmatprep.subr.bf16.mxu1 %v5375_v15 }
   0xe   : > { %v495_v1 = vld [vmem:[%s5513_s15 + $0x100] sm:$0xff]  ;;  %v496_v3 = vld [vmem:[%s5513_s15 + $0x108] sm:$0xff]  ;;  %v466_v9 = vld [vmem:[%s5513_s15 + $0x18] sm:$0xff]  ;;  %4972 = vmatpush3.bf16.msra.mxu0 %v5375_v15  ;;  %5359 = vmatpush3.bf16.msra.mxu1 %v5375_v15  ;;  %v5448_v15 = vmov 0.0   ;;  %s4194_s12 = sshll.u32 %s6607_s11, 2 }
   0xf   : > { %v463_v2 = vld [vmem:[%s5513_s15] sm:$0xff]  ;;  %624 = vperm.xlu1 %5374, %v495_v1   ;;  %v464_v4 = vld [vmem:[%s5513_s15 + $0x8] sm:$0xff]  ;;  %v465_v10 = vld [vmem:[%s5513_s15 + $0x10] sm:$0xff]  ;;  %4973 = vmatprep.subr.bf16.mxu0 %v5376_v16  ;;  %s5898_s17 = scalar_lea.vmem %s6596_s0, %s4194_s12  ;;  %s6418_s20 = scalar_lea.vmem %s6605_s9, %s4194_s12 }
  0x10   : > { %528 = vperm.xlu0 %5373, %v463_v2   ;;  %v944_v5 = vld [vmem:[%s5522_s18 + $0x8] sm:$0xff]  ;;  %v943_v6 = vld [vmem:[%s5522_s18] sm:$0xff]  ;;  %v498_v11 = vld [vmem:[%s5513_s15 + $0x118] sm:$0xff]  ;;  %5356 = vmatprep.subr.bf16.mxu1 %v5376_v16 }
  0x11   : > { %v976_v7 = vld [vmem:[%s5522_s18 + $0x108] sm:$0xff]  ;;  %v975_v8 = vld [vmem:[%s5522_s18 + $0x100] sm:$0xff]  ;;  %v497_v12 = vld [vmem:[%s5513_s15 + $0x110] sm:$0xff] }
  0x12   : > { %v946_v13 = vld [vmem:[%s5522_s18 + $0x18] sm:$0xff]  ;;  %v945_v14 = vld [vmem:[%s5522_s18 + $0x10] sm:$0xff]  ;;  %v468_v19 = vld [vmem:[%s5513_s15 + $0x28] sm:$0xff]  ;;  %4974 = vmatpush3.bf16.msra.mxu0 %v5376_v16  ;;  %5360 = vmatpush3.bf16.msra.mxu1 %v5376_v16 }
  0x13   : > { %627 = vperm.xlu1 %5374, %v496_v3   ;;  %v978_v17 = vld [vmem:[%s5522_s18 + $0x118] sm:$0xff]  ;;  %v977_v18 = vld [vmem:[%s5522_s18 + $0x110] sm:$0xff]  ;;  %v467_v20 = vld [vmem:[%s5513_s15 + $0x20] sm:$0xff]  ;;  %4975 = vmatprep.subr.bf16.mxu0 %v5377_v21 }
  0x14   : > { %531 = vperm.xlu0 %5373, %v464_v4   ;;  %v500_v22 = vld [vmem:[%s5513_s15 + $0x128] sm:$0xff]  ;;  %v499_v23 = vld [vmem:[%s5513_s15 + $0x120] sm:$0xff]  ;;  %5357 = vmatprep.subr.bf16.mxu1 %v5377_v21  ;;  %v470_v29 = vld [vmem:[%s5513_s15 + $0x38] sm:$0xff] }
  0x15   : > { %v948_v25 = vld [vmem:[%s5522_s18 + $0x28] sm:$0xff]  ;;  %v947_v26 = vld [vmem:[%s5522_s18 + $0x20] sm:$0xff]  ;;  %v469_v30 = vld [vmem:[%s5513_s15 + $0x30] sm:$0xff] }
  0x16   : > { %4976 = vmatpush3.bf16.msra.mxu0 %v5377_v21  ;;  %5361 = vmatpush3.bf16.msra.mxu1 %v5377_v21  ;;  %v980_v27 = vld [vmem:[%s5522_s18 + $0x128] sm:$0xff]  ;;  %v979_v28 = vld [vmem:[%s5522_s18 + $0x120] sm:$0xff]  ;;  %v502_v31 = vld [vmem:[%s5513_s15 + $0x138] sm:$0xff] }
  0x17   : > { %1011 = vperm.xlu1 %5374, %v944_v5   ;;  %4977 = vmatprep.subr.bf16.mxu0 %v5378_v24  ;;  %v501_v32 = vld [vmem:[%s5513_s15 + $0x130] sm:$0xff]  ;;  %v950_v33 = vld [vmem:[%s5522_s18 + $0x38] sm:$0xff]  ;;  %v472_v37 = vld [vmem:[%s5513_s15 + $0x48] sm:$0xff]  ;;  %v461_v5 = vlaneseq }
  0x18   : > { %1008 = vperm.xlu0 %5373, %v943_v6   ;;  %5358 = vmatprep.subr.bf16.mxu1 %v5378_v24  ;;  %v949_v34 = vld [vmem:[%s5522_s18 + $0x30] sm:$0xff]  ;;  %v982_v35 = vld [vmem:[%s5522_s18 + $0x138] sm:$0xff]  ;;  %v471_v38 = vld [vmem:[%s5513_s15 + $0x40] sm:$0xff] }
  0x19   : > { %v981_v36 = vld [vmem:[%s5522_s18 + $0x130] sm:$0xff]  ;;  %v504_v39 = vld [vmem:[%s5513_s15 + $0x148] sm:$0xff]  ;;  %v503_v40 = vld [vmem:[%s5513_s15 + $0x140] sm:$0xff] }
  0x1a   : > { %4978 = vmatpush3.bf16.msra.mxu0 %v5378_v24  ;;  %5362 = vmatpush3.bf16.msra.mxu1 %v5378_v24  ;;  %v952_v41 = vld [vmem:[%s5522_s18 + $0x48] sm:$0xff]  ;;  %v951_v42 = vld [vmem:[%s5522_s18 + $0x40] sm:$0xff]  ;;  %v474_v45 = vld [vmem:[%s5513_s15 + $0x58] sm:$0xff] }
  0x1b   : > { %1107 = vperm.xlu1 %5374, %v976_v7   ;;  %v984_v43 = vld [vmem:[%s5522_s18 + $0x148] sm:$0xff]  ;;  %v983_v44 = vld [vmem:[%s5522_s18 + $0x140] sm:$0xff]  ;;  %v473_v46 = vld [vmem:[%s5513_s15 + $0x50] sm:$0xff] }
  0x1c   : > { %1104 = vperm.xlu0 %5373, %v975_v8   ;;  %v506_v47 = vld [vmem:[%s5513_s15 + $0x158] sm:$0xff]  ;;  %v505_v48 = vld [vmem:[%s5513_s15 + $0x150] sm:$0xff]  ;;  %v476_v53 = vld [vmem:[%s5513_s15 + $0x68] sm:$0xff] }
  0x1d   : > { %v954_v49 = vld [vmem:[%s5522_s18 + $0x58] sm:$0xff]  ;;  %v953_v50 = vld [vmem:[%s5522_s18 + $0x50] sm:$0xff]  ;;  %v475_v54 = vld [vmem:[%s5513_s15 + $0x60] sm:$0xff] }
  0x1e   : > { %v986_v51 = vld [vmem:[%s5522_s18 + $0x158] sm:$0xff]  ;;  %v985_v52 = vld [vmem:[%s5522_s18 + $0x150] sm:$0xff]  ;;  %v508_v55 = vld [vmem:[%s5513_s15 + $0x168] sm:$0xff] }
  0x1f   : > { %537 = vperm.xlu1 %5374, %v466_v9   ;;  %v507_v56 = vld [vmem:[%s5513_s15 + $0x160] sm:$0xff]  ;;  %v956_v57 = vld [vmem:[%s5522_s18 + $0x68] sm:$0xff]  ;;  %v478_v61 = vld [vmem:[%s5513_s15 + $0x78] sm:$0xff] }
  0x20   : > { %534 = vperm.xlu0 %5373, %v465_v10   ;;  %v955_v58 = vld [vmem:[%s5522_s18 + $0x60] sm:$0xff]  ;;  %v988_v59 = vld [vmem:[%s5522_s18 + $0x168] sm:$0xff]  ;;  %v477_v62 = vld [vmem:[%s5513_s15 + $0x70] sm:$0xff]  ;;  %v5598_v10 = vand.u32 127, %v461_v5 }
  0x21   : > { %v987_v60 = vld [vmem:[%s5522_s18 + $0x160] sm:$0xff]  ;;  %v510_v63 = vld [vmem:[%s5513_s15 + $0x178] sm:$0xff]  ;;  %v509_v0 = vld [vmem:[%s5513_s15 + $0x170] sm:$0xff] }
  0x22   : > { %v958_v1 = vld [vmem:[%s5522_s18 + $0x78] sm:$0xff]  ;;  %v957_v2 = vld [vmem:[%s5522_s18 + $0x70] sm:$0xff]  ;;  %v480_v8 = vld [vmem:[%s5513_s15 + $0x88] sm:$0xff] }
  0x23   : > { %633 = vperm.xlu1 %5374, %v498_v11   ;;  %v990_v3 = vld [vmem:[%s5522_s18 + $0x178] sm:$0xff]  ;;  %v989_v4 = vld [vmem:[%s5522_s18 + $0x170] sm:$0xff]  ;;  %v479_v9 = vld [vmem:[%s5513_s15 + $0x80] sm:$0xff] }
  0x24   : > { %630 = vperm.xlu0 %5373, %v497_v12  }
  0x27   : > { %1017 = vperm.xlu1 %5374, %v946_v13   ;;  %v512_v13 = vld [vmem:[%s5513_s15 + $0x188] sm:$0xff] }
  0x28   : > { %1014 = vperm.xlu0 %5373, %v945_v14   ;;  %v511_v14 = vld [vmem:[%s5513_s15 + $0x180] sm:$0xff] }
  0x2b   : > { %1113 = vperm.xlu1 %5374, %v978_v17  }
  0x2c   : > { %1110 = vperm.xlu0 %5373, %v977_v18  }
  0x2f   : > { %543 = vperm.xlu1 %5374, %v468_v19  }
  0x30   : > { %540 = vperm.xlu0 %5373, %v467_v20  }
  0x33   : > { %639 = vperm.xlu1 %5374, %v500_v22   ;;  %v960_v22 = vld [vmem:[%s5522_s18 + $0x88] sm:$0xff] }
  0x34   : > { %636 = vperm.xlu0 %5373, %v499_v23   ;;  %v959_v23 = vld [vmem:[%s5522_s18 + $0x80] sm:$0xff] }
  0x37   : > { %1023 = vperm.xlu1 %5374, %v948_v25  }
  0x38   : > { %1020 = vperm.xlu0 %5373, %v947_v26  }
  0x3b   : > { %1119 = vperm.xlu1 %5374, %v980_v27  }
  0x3c   : > { %1116 = vperm.xlu0 %5373, %v979_v28  }
  0x3f   : > { %549 = vperm.xlu1 %5374, %v470_v29  }
  0x40   : > { %546 = vperm.xlu0 %5373, %v469_v30  }
  0x43   : > { %645 = vperm.xlu1 %5374, %v502_v31  }
  0x44   : > { %642 = vperm.xlu0 %5373, %v501_v32  }
  0x47   : > { %1029 = vperm.xlu1 %5374, %v950_v33   ;;  %v992_v33 = vld [vmem:[%s5522_s18 + $0x188] sm:$0xff] }
  0x48   : > { %1026 = vperm.xlu0 %5373, %v949_v34   ;;  %v991_v34 = vld [vmem:[%s5522_s18 + $0x180] sm:$0xff] }
  0x4b   : > { %1125 = vperm.xlu1 %5374, %v982_v35  }
  0x4c   : > { %1122 = vperm.xlu0 %5373, %v981_v36  }
  0x4f   : > { %555 = vperm.xlu1 %5374, %v472_v37  }
  0x50   : > { %552 = vperm.xlu0 %5373, %v471_v38  }
  0x53   : > { %651 = vperm.xlu1 %5374, %v504_v39  }
  0x54   : > { %648 = vperm.xlu0 %5373, %v503_v40   ;;  %v482_v40 = vld [vmem:[%s5513_s15 + $0x98] sm:$0xff] }
  0x57   : > { %1035 = vperm.xlu1 %5374, %v952_v41   ;;  %v481_v41 = vld [vmem:[%s5513_s15 + $0x90] sm:$0xff] }
  0x58   : > { %1032 = vperm.xlu0 %5373, %v951_v42  }
  0x5b   : > { %1131 = vperm.xlu1 %5374, %v984_v43  }
  0x5c   : > { %1128 = vperm.xlu0 %5373, %v983_v44   ;;  %v514_v44 = vld [vmem:[%s5513_s15 + $0x198] sm:$0xff] }
  0x5f   : > { %561 = vperm.xlu1 %5374, %v474_v45   ;;  %v513_v45 = vld [vmem:[%s5513_s15 + $0x190] sm:$0xff] }
  0x60   : > { %558 = vperm.xlu0 %5373, %v473_v46  }
  0x63   : > { %657 = vperm.xlu1 %5374, %v506_v47  }
  0x64   : > { %654 = vperm.xlu0 %5373, %v505_v48  }
  0x67   : > { %1041 = vperm.xlu1 %5374, %v954_v49  }
  0x68   : > { %1038 = vperm.xlu0 %5373, %v953_v50  }
  0x6b   : > { %1137 = vperm.xlu1 %5374, %v986_v51  }
  0x6c   : > { %1134 = vperm.xlu0 %5373, %v985_v52   ;;  %v962_v52 = vld [vmem:[%s5522_s18 + $0x98] sm:$0xff] }
  0x6f   : > { %567 = vperm.xlu1 %5374, %v476_v53   ;;  %v961_v53 = vld [vmem:[%s5522_s18 + $0x90] sm:$0xff] }
  0x70   : > { %564 = vperm.xlu0 %5373, %v475_v54  }
  0x73   : > { %663 = vperm.xlu1 %5374, %v508_v55  }
  0x74   : > { %660 = vperm.xlu0 %5373, %v507_v56  }
  0x77   : > { %1047 = vperm.xlu1 %5374, %v956_v57  }
  0x78   : > { %1044 = vperm.xlu0 %5373, %v955_v58  }
  0x7b   : > { %1143 = vperm.xlu1 %5374, %v988_v59  }
  0x7c   : > { %1140 = vperm.xlu0 %5373, %v987_v60  }
  0x7f   : > { %573 = vperm.xlu1 %5374, %v478_v61  }
  0x80   : > { %570 = vperm.xlu0 %5373, %v477_v62  }
  0x83   : > { %669 = vperm.xlu1 %5374, %v510_v63   ;;  %v994_v63 = vld [vmem:[%s5522_s18 + $0x198] sm:$0xff] }
  0x84   : > { %666 = vperm.xlu0 %5373, %v509_v0   ;;  %v993_v0 = vld [vmem:[%s5522_s18 + $0x190] sm:$0xff] }
  0x87   : > { %1053 = vperm.xlu1 %5374, %v958_v1  }
  0x88   : > { %1050 = vperm.xlu0 %5373, %v957_v2  }
  0x8a   : > { %v625_v6 = vpop.permute.xlu1 %624 }
  0x8b   : > { %v529_v7 = vpop.permute.xlu0 %528  ;;  %1149 = vperm.xlu1 %5374, %v990_v3   ;;  %vm751_vm5 = vcmp.eq.s32.totalorder %v5598_v10, %v625_v6  ;;  %v484_v6 = vld [vmem:[%s5513_s15 + $0xa8] sm:$0xff] }
  0x8c   : > { %1146 = vperm.xlu0 %5373, %v989_v4   ;;  %vm719_vm1 = vcmp.eq.s32.totalorder %v5598_v10, %v529_v7  ;;  %v4233_v30 = vsel %vm751_vm5, 1.0, %v5448_v15  ;;  %v483_v7 = vld [vmem:[%s5513_s15 + $0xa0] sm:$0xff] }
  0x8d   : > { %v4201_v19 = vsel %vm719_vm1, 1.0, %v5448_v15 }
  0x8e   : > { %v628_v11 = vpop.permute.xlu1 %627 }
  0x8f   : > { %v532_v12 = vpop.permute.xlu0 %531  ;;  %579 = vperm.xlu1 %5374, %v480_v8   ;;  %vm752_vm2 = vcmp.eq.s32.totalorder %v5598_v10, %v628_v11  ;;  %v516_v11 = vld [vmem:[%s5513_s15 + $0x1a8] sm:$0xff] }
  0x90   : > { %vm720_vm0 = vcmp.eq.s32.totalorder %v5598_v10, %v532_v12  ;;  %576 = vperm.xlu0 %5373, %v479_v9   ;;  %v4234_v26 = vsel %vm752_vm2, 1.0, %v5448_v15  ;;  %v515_v12 = vld [vmem:[%s5513_s15 + $0x1a0] sm:$0xff] }
  0x91   : > { %v4202_v16 = vsel %vm720_vm0, 1.0, %v5448_v15  ;;  %v927_v35 = vpack.c.bf16 %v4234_v26, %v4233_v30 }
  0x92   : > { %v1012_v17 = vpop.permute.xlu1 %1011  ;;  %v911_v24 = vpack.c.bf16 %v4202_v16, %v4201_v19 }
  0x93   : > { %v1009_v18 = vpop.permute.xlu0 %1008  ;;  %vm1200_vm3 = vcmp.eq.s32.totalorder %v5598_v10, %v1012_v17  ;;  %675 = vperm.xlu1 %5374, %v512_v13  }
  0x94   : > { %vm1199_vm4 = vcmp.eq.s32.totalorder %v5598_v10, %v1009_v18  ;;  %672 = vperm.xlu0 %5373, %v511_v14   ;;  %v4266_v20 = vsel %vm1200_vm3, 1.0, %v5448_v15 }
  0x95   : > { %v4265_v21 = vsel %vm1199_vm4, 1.0, %v5448_v15 }
  0x96   : > { %v5614_v25 = vpack.c.bf16 %v4266_v20, %v4265_v21  ;;  %v1108_v27 = vpop.permute.xlu1 %1107  ;;  %v964_v20 = vld [vmem:[%s5522_s18 + $0xa8] sm:$0xff]  ;;  %v963_v21 = vld [vmem:[%s5522_s18 + $0xa0] sm:$0xff] }
  0x97   : > { %v1105_v28 = vpop.permute.xlu0 %1104  ;;  %vm1232_vm7 = vcmp.eq.s32.totalorder %v5598_v10, %v1108_v27  ;;  %1059 = vperm.xlu1 %5374, %v960_v22  }
  0x98   : > { %vm1231_vm8 = vcmp.eq.s32.totalorder %v5598_v10, %v1105_v28  ;;  %1056 = vperm.xlu0 %5373, %v959_v23   ;;  %v1423_v29 = vadd.bf16 %v5614_v25, %v911_v24  ;;  %v4298_v31 = vsel %vm1232_vm7, 1.0, %v5448_v15 }
  0x99   : > { %v4297_v32 = vsel %vm1231_vm8, 1.0, %v5448_v15 }
  0x9a   : > { %4979 = vmatprep.mubr.msk.bf16.mxu0 %vm1487_vm6, %v1423_v29  ;;  %v5626_v36 = vpack.c.bf16 %v4298_v31, %v4297_v32  ;;  %v538_v37 = vpop.permute.xlu1 %537  ;;  %v996_v32 = vld [vmem:[%s5522_s18 + $0x1a8] sm:$0xff] }
  0x9b   : > { %v535_v38 = vpop.permute.xlu0 %534  ;;  %1155 = vperm.xlu1 %5374, %v992_v33   ;;  %vm722_vm9 = vcmp.eq.s32.totalorder %v5598_v10, %v538_v37  ;;  %v995_v33 = vld [vmem:[%s5522_s18 + $0x1a0] sm:$0xff] }
  0x9c   : > { %1152 = vperm.xlu0 %5373, %v991_v34   ;;  %v1439_v39 = vadd.bf16 %v5626_v36, %v927_v35  ;;  %vm721_vm10 = vcmp.eq.s32.totalorder %v5598_v10, %v535_v38  ;;  %v4204_v46 = vsel %vm722_vm9, 1.0, %v5448_v15 }
  0x9d   : > { %v4203_v47 = vsel %vm721_vm10, 1.0, %v5448_v15 }
  0x9e   : > { %5011 = vmatprep.mubr.msk.bf16.mxu1 %vm1487_vm6, %v1439_v39  ;;  %v634_v42 = vpop.permute.xlu1 %633  ;;  %v912_v54 = vpack.c.bf16 %v4204_v46, %v4203_v47 }
  0x9f   : > { %v631_v43 = vpop.permute.xlu0 %630  ;;  %585 = vperm.xlu1 %5374, %v482_v40   ;;  %vm754_vm11 = vcmp.eq.s32.totalorder %v5598_v10, %v634_v42  ;;  %v486_v40 = vld [vmem:[%s5513_s15 + $0xb8] sm:$0xff] }
  0xa0   : > { %582 = vperm.xlu0 %5373, %v481_v41   ;;  %vm753_vm12 = vcmp.eq.s32.totalorder %v5598_v10, %v631_v43  ;;  %v4236_v56 = vsel %vm754_vm11, 1.0, %v5448_v15  ;;  %v485_v41 = vld [vmem:[%s5513_s15 + $0xb0] sm:$0xff] }
  0xa1   : > { %v4235_v57 = vsel %vm753_vm12, 1.0, %v5448_v15 }
  0xa2   : > { %v1018_v48 = vpop.permute.xlu1 %1017  ;;  %v928_v1 = vpack.c.bf16 %v4236_v56, %v4235_v57 }
  0xa3   : > { %v1015_v49 = vpop.permute.xlu0 %1014  ;;  %vm1202_vm13 = vcmp.eq.s32.totalorder %v5598_v10, %v1018_v48  ;;  %681 = vperm.xlu1 %5374, %v514_v44   ;;  %v518_v44 = vld [vmem:[%s5513_s15 + $0x1b8] sm:$0xff] }
  0xa4   : > { %vm1201_vm14 = vcmp.eq.s32.totalorder %v5598_v10, %v1015_v49  ;;  %678 = vperm.xlu0 %5373, %v513_v45   ;;  %v4268_v50 = vsel %vm1202_vm13, 1.0, %v5448_v15  ;;  %v517_v45 = vld [vmem:[%s5513_s15 + $0x1b0] sm:$0xff] }
  0xa5   : > { %v4267_v51 = vsel %vm1201_vm14, 1.0, %v5448_v15 }
  0xa6   : > { %v5646_v55 = vpack.c.bf16 %v4268_v50, %v4267_v51  ;;  %v1114_v58 = vpop.permute.xlu1 %1113 }
  0xa7   : > { %v1111_v59 = vpop.permute.xlu0 %1110  ;;  %vm1234_vm15 = vcmp.eq.s32.totalorder %v5598_v10, %v1114_v58  ;;  %1065 = vperm.xlu1 %5374, %v962_v52   ;;  %v966_v52 = vld [vmem:[%s5522_s18 + $0xb8] sm:$0xff] }
  0xa8   : > { %v1424_v60 = vadd.bf16 %v5646_v55, %v912_v54  ;;  %vm1233_vm0 = vcmp.eq.s32.totalorder %v5598_v10, %v1111_v59  ;;  %1062 = vperm.xlu0 %5373, %v961_v53   ;;  %v4300_v61 = vsel %vm1234_vm15, 1.0, %v5448_v15  ;;  %v965_v53 = vld [vmem:[%s5522_s18 + $0xb0] sm:$0xff] }
  0xa9   : > { %v4299_v62 = vsel %vm1233_vm0, 1.0, %v5448_v15 }
  0xaa   : > { %v5657_v2 = vpack.c.bf16 %v4300_v61, %v4299_v62  ;;  %4980 = vmatmul.mubr.msk.bf16.vlgmr.msra.gmra.mxu0 %vm1487_vm6, %v1424_v60  ;;  %v544_v3 = vpop.permute.xlu1 %543 }
  0xab   : > { %v541_v4 = vpop.permute.xlu0 %540  ;;  %1161 = vperm.xlu1 %5374, %v994_v63   ;;  %vm724_vm1 = vcmp.eq.s32.totalorder %v5598_v10, %v544_v3 }
  0xac   : > { %v1440_v5 = vadd.bf16 %v5657_v2, %v928_v1  ;;  %1158 = vperm.xlu0 %5373, %v993_v0   ;;  %vm723_vm2 = vcmp.eq.s32.totalorder %v5598_v10, %v541_v4  ;;  %v4206_v13 = vsel %vm724_vm1, 1.0, %v5448_v15  ;;  %v998_v0 = vld [vmem:[%s5522_s18 + $0x1b8] sm:$0xff]  ;;  %v997_v1 = vld [vmem:[%s5522_s18 + $0x1b0] sm:$0xff] }
  0xad   : > { %v4205_v14 = vsel %vm723_vm2, 1.0, %v5448_v15 }
  0xae   : > { %5012 = vmatmul.mubr.msk.bf16.vlgmr.msra.gmra.mxu1 %vm1487_vm6, %v1440_v5  ;;  %v640_v8 = vpop.permute.xlu1 %639  ;;  %v913_v22 = vpack.c.bf16 %v4206_v13, %v4205_v14  ;;  %v520_v13 = vld [vmem:[%s5513_s15 + $0x1c8] sm:$0xff]  ;;  %v519_v14 = vld [vmem:[%s5513_s15 + $0x1c0] sm:$0xff] }
  0xaf   : > { %v637_v9 = vpop.permute.xlu0 %636  ;;  %591 = vperm.xlu1 %5374, %v484_v6   ;;  %vm756_vm3 = vcmp.eq.s32.totalorder %v5598_v10, %v640_v8  ;;  %v488_v8 = vld [vmem:[%s5513_s15 + $0xc8] sm:$0xff] }
  0xb0   : > { %588 = vperm.xlu0 %5373, %v483_v7   ;;  %vm755_vm4 = vcmp.eq.s32.totalorder %v5598_v10, %v637_v9  ;;  %v4238_v24 = vsel %vm756_vm3, 1.0, %v5448_v15  ;;  %v487_v9 = vld [vmem:[%s5513_s15 + $0xc0] sm:$0xff] }
  0xb1   : > { %v4237_v26 = vsel %vm755_vm4, 1.0, %v5448_v15 }
  0xb2   : > { %v1024_v16 = vpop.permute.xlu1 %1023  ;;  %v929_v34 = vpack.c.bf16 %v4238_v24, %v4237_v26  ;;  %v967_v24 = vld [vmem:[%s5522_s18 + $0xc0] sm:$0xff] }
  0xb3   : > { %v1021_v17 = vpop.permute.xlu0 %1020  ;;  %vm1204_vm5 = vcmp.eq.s32.totalorder %v5598_v10, %v1024_v16  ;;  %687 = vperm.xlu1 %5374, %v516_v11  }
  0xb4   : > { %vm1203_vm7 = vcmp.eq.s32.totalorder %v5598_v10, %v1021_v17  ;;  %684 = vperm.xlu0 %5373, %v515_v12   ;;  %v4270_v18 = vsel %vm1204_vm5, 1.0, %v5448_v15 }
  0xb5   : > { %v4269_v19 = vsel %vm1203_vm7, 1.0, %v5448_v15 }
  0xb6   : > { %v5678_v23 = vpack.c.bf16 %v4270_v18, %v4269_v19  ;;  %v1120_v27 = vpop.permute.xlu1 %1119 }
  0xb7   : > { %v1117_v28 = vpop.permute.xlu0 %1116  ;;  %vm1236_vm8 = vcmp.eq.s32.totalorder %v5598_v10, %v1120_v27  ;;  %1071 = vperm.xlu1 %5374, %v964_v20  }
  0xb8   : > { %v1425_v29 = vadd.bf16 %v5678_v23, %v913_v22  ;;  %vm1235_vm9 = vcmp.eq.s32.totalorder %v5598_v10, %v1117_v28  ;;  %1068 = vperm.xlu0 %5373, %v963_v21   ;;  %v4302_v30 = vsel %vm1236_vm8, 1.0, %v5448_v15  ;;  %v968_v22 = vld [vmem:[%s5522_s18 + $0xc8] sm:$0xff] }
  0xb9   : > { %v4301_v31 = vsel %vm1235_vm9, 1.0, %v5448_v15 }
  0xba   : > { %v5689_v35 = vpack.c.bf16 %v4302_v30, %v4301_v31  ;;  %4983 = vmatprep.mubr.msk.bf16.mxu0 %vm1487_vm6, %v1425_v29  ;;  %v550_v37 = vpop.permute.xlu1 %549 }
  0xbb   : > { %v547_v38 = vpop.permute.xlu0 %546  ;;  %1167 = vperm.xlu1 %5374, %v996_v32   ;;  %vm726_vm10 = vcmp.eq.s32.totalorder %v5598_v10, %v550_v37 }
  0xbc   : > { %v1441_v39 = vadd.bf16 %v5689_v35, %v929_v34  ;;  %1164 = vperm.xlu0 %5373, %v995_v33   ;;  %vm725_vm11 = vcmp.eq.s32.totalorder %v5598_v10, %v547_v38  ;;  %v4208_v46 = vsel %vm726_vm10, 1.0, %v5448_v15  ;;  %v5379_v33 = vld [vmem:[%s6599_s3 + $0x18] sm:$0xff]  }
  0xbd   : > { %v4207_v47 = vsel %vm725_vm11, 1.0, %v5448_v15  ;;  %v5380_v34 = vld [vmem:[%s6597_s1 + $0x38] sm:$0xff]   ;;  %5043 = vmatprep.subr.bf16.mxu1 %v5379_v33 }
  0xbe   : > { %5015 = vmatprep.mubr.msk.bf16.mxu1 %vm1487_vm6, %v1441_v39  ;;  %v646_v42 = vpop.permute.xlu1 %645  ;;  %v914_v54 = vpack.c.bf16 %v4208_v46, %v4207_v47  ;;  %v1000_v39 = vld [vmem:[%s5522_s18 + $0x1c8] sm:$0xff]  ;;  %5115 = vmatprep.subr.bf16.mxu0 %v5380_v34  ;;  %v490_v46 = vld [vmem:[%s5513_s15 + $0xd8] sm:$0xff]  ;;  %v489_v47 = vld [vmem:[%s5513_s15 + $0xd0] sm:$0xff] }
  0xbf   : > { %v643_v43 = vpop.permute.xlu0 %642  ;;  %597 = vperm.xlu1 %5374, %v486_v40   ;;  %vm758_vm12 = vcmp.eq.s32.totalorder %v5598_v10, %v646_v42  ;;  %v999_v40 = vld [vmem:[%s5522_s18 + $0x1c0] sm:$0xff]  ;;  %5044 = vmatpush3.bf16.msra.mxu1 %v5379_v33 }
  0xc0   : > { %594 = vperm.xlu0 %5373, %v485_v41   ;;  %vm757_vm13 = vcmp.eq.s32.totalorder %v5598_v10, %v643_v43  ;;  %v4240_v57 = vsel %vm758_vm12, 1.0, %v5448_v15  ;;  %5116 = vmatpush3.bf16.msra.mxu0 %v5380_v34 }
  0xc1   : > { %v4239_v58 = vsel %vm757_vm13, 1.0, %v5448_v15 }
  0xc2   : > { %v1030_v48 = vpop.permute.xlu1 %1029  ;;  %v930_v3 = vpack.c.bf16 %v4240_v57, %v4239_v58 }
  0xc3   : > { %v1027_v49 = vpop.permute.xlu0 %1026  ;;  %vm1206_vm14 = vcmp.eq.s32.totalorder %v5598_v10, %v1030_v48  ;;  %693 = vperm.xlu1 %5374, %v518_v44   ;;  %v5381_v48 = vld [vmem:[%s6597_s1 + $0x30] sm:$0xff]  }
  0xc4   : > { %vm1205_vm15 = vcmp.eq.s32.totalorder %v5598_v10, %v1027_v49  ;;  %690 = vperm.xlu0 %5373, %v517_v45   ;;  %v4272_v50 = vsel %vm1206_vm14, 1.0, %v5448_v15  ;;  %5117 = vmatprep.subr.bf16.mxu0 %v5381_v48 }
  0xc5   : > { %v4271_v51 = vsel %vm1205_vm15, 1.0, %v5448_v15  ;;  %5118 = vmatpush3.bf16.msra.mxu0 %v5381_v48 }
  0xc6   : > { %v5710_v56 = vpack.c.bf16 %v4272_v50, %v4271_v51  ;;  %v1126_v59 = vpop.permute.xlu1 %1125  ;;  %v522_v51 = vld [vmem:[%s5513_s15 + $0x1d8] sm:$0xff] }
  0xc7   : > { %v1123_v60 = vpop.permute.xlu0 %1122  ;;  %vm1238_vm0 = vcmp.eq.s32.totalorder %v5598_v10, %v1126_v59  ;;  %1077 = vperm.xlu1 %5374, %v966_v52   ;;  %v521_v52 = vld [vmem:[%s5513_s15 + $0x1d0] sm:$0xff] }
  0xc8   : > { %v1426_v61 = vadd.bf16 %v5710_v56, %v914_v54  ;;  %vm1237_vm1 = vcmp.eq.s32.totalorder %v5598_v10, %v1123_v60  ;;  %1074 = vperm.xlu0 %5373, %v965_v53   ;;  %v4304_v62 = vsel %vm1238_vm0, 1.0, %v5448_v15 }
  0xc9   : > { %v4303_v63 = vsel %vm1237_vm1, 1.0, %v5448_v15 }
  0xca   : > { %v5721_v4 = vpack.c.bf16 %v4304_v62, %v4303_v63  ;;  %4984 = vmatmul.mubr.msk.bf16.gmra.mxu0 %vm1487_vm6, %v1426_v61  ;;  %v556_v5 = vpop.permute.xlu1 %555  ;;  %v970_v61 = vld [vmem:[%s5522_s18 + $0xd8] sm:$0xff]  ;;  %v969_v62 = vld [vmem:[%s5522_s18 + $0xd0] sm:$0xff] }
  0xcb   : > { %v553_v6 = vpop.permute.xlu0 %552  ;;  %1173 = vperm.xlu1 %5374, %v998_v0   ;;  %vm728_vm2 = vcmp.eq.s32.totalorder %v5598_v10, %v556_v5 }
  0xcc   : > { %v1442_v7 = vadd.bf16 %v5721_v4, %v930_v3  ;;  %1170 = vperm.xlu0 %5373, %v997_v1   ;;  %vm727_vm3 = vcmp.eq.s32.totalorder %v5598_v10, %v553_v6  ;;  %v4210_v16 = vsel %vm728_vm2, 1.0, %v5448_v15 }
  0xcd   : > { %v4209_v17 = vsel %vm727_vm3, 1.0, %v5448_v15 }
  0xce   : > { %5016 = vmatmul.mubr.msk.bf16.gmra.mxu1 %vm1487_vm6, %v1442_v7  ;;  %v652_v11 = vpop.permute.xlu1 %651  ;;  %v915_v26 = vpack.c.bf16 %v4210_v16, %v4209_v17 }
  0xcf   : > { %v649_v12 = vpop.permute.xlu0 %648  ;;  %603 = vperm.xlu1 %5374, %v488_v8   ;;  %vm760_vm4 = vcmp.eq.s32.totalorder %v5598_v10, %v652_v11  ;;  %v5382_v8 = vld [vmem:[%s6599_s3 + $0x10] sm:$0xff]  }
  0xd0   : > { %600 = vperm.xlu0 %5373, %v487_v9   ;;  %vm759_vm5 = vcmp.eq.s32.totalorder %v5598_v10, %v649_v12  ;;  %v4242_v28 = vsel %vm760_vm4, 1.0, %v5448_v15  ;;  %v5383_v9 = vld [vmem:[%s6597_s1 + $0x28] sm:$0xff]   ;;  %5045 = vmatprep.subr.bf16.mxu1 %v5382_v8 }
  0xd1   : > { %v4241_v29 = vsel %vm759_vm5, 1.0, %v5448_v15  ;;  %5119 = vmatprep.subr.bf16.mxu0 %v5383_v9  ;;  %5046 = vmatpush3.bf16.msra.mxu1 %v5382_v8 }
  0xd2   : > { %v1036_v18 = vpop.permute.xlu1 %1035  ;;  %v931_v41 = vpack.c.bf16 %v4242_v28, %v4241_v29  ;;  %5120 = vmatpush3.bf16.msra.mxu0 %v5383_v9  ;;  %v524_v29 = vld [vmem:[%s5513_s15 + $0x1e8] sm:$0xff] }
  0xd3   : > { %v1033_v19 = vpop.permute.xlu0 %1032  ;;  %vm1208_vm7 = vcmp.eq.s32.totalorder %v5598_v10, %v1036_v18  ;;  %699 = vperm.xlu1 %5374, %v520_v13   ;;  %v1002_v13 = vld [vmem:[%s5522_s18 + $0x1d8] sm:$0xff] }
  0xd4   : > { %vm1207_vm8 = vcmp.eq.s32.totalorder %v5598_v10, %v1033_v19  ;;  %696 = vperm.xlu0 %5373, %v519_v14   ;;  %v4274_v20 = vsel %vm1208_vm7, 1.0, %v5448_v15  ;;  %v1001_v14 = vld [vmem:[%s5522_s18 + $0x1d0] sm:$0xff] }
  0xd5   : > { %v4273_v21 = vsel %vm1207_vm8, 1.0, %v5448_v15 }
  0xd6   : > { %v5742_v27 = vpack.c.bf16 %v4274_v20, %v4273_v21  ;;  %v1132_v30 = vpop.permute.xlu1 %1131  ;;  %v492_v21 = vld [vmem:[%s5513_s15 + $0xe8] sm:$0xff] }
  0xd7   : > { %v1129_v31 = vpop.permute.xlu0 %1128  ;;  %vm1240_vm9 = vcmp.eq.s32.totalorder %v5598_v10, %v1132_v30  ;;  %1083 = vperm.xlu1 %5374, %v968_v22   ;;  %v491_v22 = vld [vmem:[%s5513_s15 + $0xe0] sm:$0xff] }
  0xd8   : > { %v1427_v32 = vadd.bf16 %v5742_v27, %v915_v26  ;;  %vm1239_vm10 = vcmp.eq.s32.totalorder %v5598_v10, %v1129_v31  ;;  %1080 = vperm.xlu0 %5373, %v967_v24   ;;  %v4306_v37 = vsel %vm1240_vm9, 1.0, %v5448_v15  ;;  %v5384_v24 = vld [vmem:[%s6597_s1 + $0x20] sm:$0xff]  }
  0xd9   : > { %v4305_v38 = vsel %vm1239_vm10, 1.0, %v5448_v15  ;;  %v523_v30 = vld [vmem:[%s5513_s15 + $0x1e0] sm:$0xff]  ;;  %5121 = vmatprep.subr.bf16.mxu0 %v5384_v24 }
  0xda   : > { %v5759_v42 = vpack.c.bf16 %v4306_v37, %v4305_v38  ;;  %4987 = vmatprep.mubr.msk.bf16.mxu0 %vm1487_vm6, %v1427_v32  ;;  %v562_v43 = vpop.permute.xlu1 %561  ;;  %5122 = vmatpush3.bf16.msra.mxu0 %v5384_v24 }
  0xdb   : > { %v559_v44 = vpop.permute.xlu0 %558  ;;  %1179 = vperm.xlu1 %5374, %v1000_v39   ;;  %vm730_vm11 = vcmp.eq.s32.totalorder %v5598_v10, %v562_v43  ;;  %v972_v39 = vld [vmem:[%s5522_s18 + $0xe8] sm:$0xff] }
  0xdc   : > { %v1443_v45 = vadd.bf16 %v5759_v42, %v931_v41  ;;  %1176 = vperm.xlu0 %5373, %v999_v40   ;;  %vm729_vm12 = vcmp.eq.s32.totalorder %v5598_v10, %v559_v44  ;;  %v4212_v53 = vsel %vm730_vm11, 1.0, %v5448_v15  ;;  %v971_v40 = vld [vmem:[%s5522_s18 + $0xe0] sm:$0xff] }
  0xdd   : > { %v4211_v54 = vsel %vm729_vm12, 1.0, %v5448_v15 }
  0xde   : > { %5019 = vmatprep.mubr.msk.bf16.mxu1 %vm1487_vm6, %v1443_v45  ;;  %v658_v49 = vpop.permute.xlu1 %657  ;;  %v916_v63 = vpack.c.bf16 %v4212_v53, %v4211_v54  ;;  %v1004_v53 = vld [vmem:[%s5522_s18 + $0x1e8] sm:$0xff]  ;;  %v1003_v54 = vld [vmem:[%s5522_s18 + $0x1e0] sm:$0xff] }
  0xdf   : > { %v655_v50 = vpop.permute.xlu0 %654  ;;  %609 = vperm.xlu1 %5374, %v490_v46   ;;  %vm762_vm13 = vcmp.eq.s32.totalorder %v5598_v10, %v658_v49  ;;  %v5385_v49 = vld [vmem:[%s6599_s3 + $0x8] sm:$0xff]  }
  0xe0   : > { %606 = vperm.xlu0 %5373, %v489_v47   ;;  %vm761_vm14 = vcmp.eq.s32.totalorder %v5598_v10, %v655_v50  ;;  %v4244_v1 = vsel %vm762_vm13, 1.0, %v5448_v15  ;;  %v5386_v50 = vld [vmem:[%s6597_s1 + $0x18] sm:$0xff]   ;;  %5047 = vmatprep.subr.bf16.mxu1 %v5385_v49 }
  0xe1   : > { %v4243_v3 = vsel %vm761_vm14, 1.0, %v5448_v15  ;;  %5123 = vmatprep.subr.bf16.mxu0 %v5386_v50  ;;  %5048 = vmatpush3.bf16.msra.mxu1 %v5385_v49 }
  0xe2   : > { %v1042_v57 = vpop.permute.xlu1 %1041  ;;  %v932_v16 = vpack.c.bf16 %v4244_v1, %v4243_v3  ;;  %5124 = vmatpush3.bf16.msra.mxu0 %v5386_v50  ;;  %v5387_v1 = vld [vmem:[%s6597_s1 + $0x10] sm:$0xff]  }
  0xe3   : > { %v1039_v58 = vpop.permute.xlu0 %1038  ;;  %vm1210_vm15 = vcmp.eq.s32.totalorder %v5598_v10, %v1042_v57  ;;  %705 = vperm.xlu1 %5374, %v522_v51   ;;  %5125 = vmatprep.subr.bf16.mxu0 %v5387_v1 }
  0xe4   : > { %vm1209_vm0 = vcmp.eq.s32.totalorder %v5598_v10, %v1039_v58  ;;  %702 = vperm.xlu0 %5373, %v521_v52   ;;  %v4276_v59 = vsel %vm1210_vm15, 1.0, %v5448_v15 }
  0xe5   : > { %v4275_v60 = vsel %vm1209_vm0, 1.0, %v5448_v15 }
  0xe6   : > { %v5783_v0 = vpack.c.bf16 %v4276_v59, %v4275_v60  ;;  %v1138_v5 = vpop.permute.xlu1 %1137  ;;  %5126 = vmatpush3.bf16.msra.mxu0 %v5387_v1 }
  0xe7   : > { %v1135_v6 = vpop.permute.xlu0 %1134  ;;  %vm1242_vm1 = vcmp.eq.s32.totalorder %v5598_v10, %v1138_v5  ;;  %1089 = vperm.xlu1 %5374, %v970_v61  }
  0xe8   : > { %v1428_v7 = vadd.bf16 %v5783_v0, %v916_v63  ;;  %vm1241_vm2 = vcmp.eq.s32.totalorder %v5598_v10, %v1135_v6  ;;  %1086 = vperm.xlu0 %5373, %v969_v62   ;;  %v4308_v11 = vsel %vm1242_vm1, 1.0, %v5448_v15  ;;  %v494_v62 = vld [vmem:[%s5513_s15 + $0xf8] sm:$0xff]  ;;  %v493_v63 = vld [vmem:[%s5513_s15 + $0xf0] sm:$0xff] }
  0xe9   : > { %v4307_v12 = vsel %vm1241_vm2, 1.0, %v5448_v15  ;;  %v526_v6 = vld [vmem:[%s5513_s15 + $0x1f8] sm:$0xff] }
  0xea   : > { %v5800_v17 = vpack.c.bf16 %v4308_v11, %v4307_v12  ;;  %4988 = vmatmul.mubr.msk.bf16.gmra.mxu0 %vm1487_vm6, %v1428_v7  ;;  %v568_v18 = vpop.permute.xlu1 %567  ;;  %v525_v7 = vld [vmem:[%s5513_s15 + $0x1f0] sm:$0xff] }
  0xeb   : > { %v565_v19 = vpop.permute.xlu0 %564  ;;  %1185 = vperm.xlu1 %5374, %v1002_v13   ;;  %vm732_vm3 = vcmp.eq.s32.totalorder %v5598_v10, %v568_v18  ;;  %v973_v18 = vld [vmem:[%s5522_s18 + $0xf0] sm:$0xff] }
  0xec   : > { %v1444_v20 = vadd.bf16 %v5800_v17, %v932_v16  ;;  %1182 = vperm.xlu0 %5373, %v1001_v14   ;;  %vm731_vm4 = vcmp.eq.s32.totalorder %v5598_v10, %v565_v19  ;;  %v4214_v31 = vsel %vm732_vm3, 1.0, %v5448_v15  ;;  %v974_v16 = vld [vmem:[%s5522_s18 + $0xf8] sm:$0xff] }
  0xed   : > { %v4213_v32 = vsel %vm731_vm4, 1.0, %v5448_v15 }
  0xee   : > { %5020 = vmatmul.mubr.msk.bf16.gmra.mxu1 %vm1487_vm6, %v1444_v20  ;;  %v664_v26 = vpop.permute.xlu1 %663  ;;  %v917_v41 = vpack.c.bf16 %v4214_v31, %v4213_v32 }
  0xef   : > { %v661_v28 = vpop.permute.xlu0 %660  ;;  %615 = vperm.xlu1 %5374, %v492_v21   ;;  %vm764_vm5 = vcmp.eq.s32.totalorder %v5598_v10, %v664_v26 }
  0xf0   : > { %612 = vperm.xlu0 %5373, %v491_v22   ;;  %vm763_vm7 = vcmp.eq.s32.totalorder %v5598_v10, %v661_v28  ;;  %v4246_v44 = vsel %vm764_vm5, 1.0, %v5448_v15 }
  0xf1   : > { %v4245_v45 = vsel %vm763_vm7, 1.0, %v5448_v15 }
  0xf2   : > { %v1048_v33 = vpop.permute.xlu1 %1047  ;;  %v933_v57 = vpack.c.bf16 %v4246_v44, %v4245_v45  ;;  %v5390_v44 = vld [vmem:[%s6597_s1] sm:$0xff]  }
  0xf3   : > { %v1045_v34 = vpop.permute.xlu0 %1044  ;;  %vm1212_vm8 = vcmp.eq.s32.totalorder %v5598_v10, %v1048_v33  ;;  %711 = vperm.xlu1 %5374, %v524_v29   ;;  %v5388_v29 = vld [vmem:[%s6599_s3] sm:$0xff]   ;;  %v1006_v33 = vld [vmem:[%s5522_s18 + $0x1f8] sm:$0xff] }
  0xf4   : > { %vm1211_vm9 = vcmp.eq.s32.totalorder %v5598_v10, %v1045_v34  ;;  %708 = vperm.xlu0 %5373, %v523_v30   ;;  %v4278_v37 = vsel %vm1212_vm8, 1.0, %v5448_v15  ;;  %v5389_v30 = vld [vmem:[%s6597_s1 + $0x8] sm:$0xff]   ;;  %v1005_v34 = vld [vmem:[%s5522_s18 + $0x1f0] sm:$0xff]  ;;  %5049 = vmatprep.subr.bf16.mxu1 %v5388_v29 }
  0xf5   : > { %v4277_v38 = vsel %vm1211_vm9, 1.0, %v5448_v15  ;;  %5127 = vmatprep.subr.bf16.mxu0 %v5389_v30  ;;  %5050 = vmatpush3.bf16.msra.mxu1 %v5388_v29 }
  0xf6   : > { %v5824_v43 = vpack.c.bf16 %v4278_v37, %v4277_v38  ;;  %v1144_v46 = vpop.permute.xlu1 %1143  ;;  %5128 = vmatpush3.bf16.msra.mxu0 %v5389_v30 }
  0xf7   : > { %v1141_v47 = vpop.permute.xlu0 %1140  ;;  %vm1244_vm10 = vcmp.eq.s32.totalorder %v5598_v10, %v1144_v46  ;;  %1095 = vperm.xlu1 %5374, %v972_v39   ;;  %5129 = vmatprep.subr.bf16.mxu0 %v5390_v44 }
  0xf8   : > { %v1429_v48 = vadd.bf16 %v5824_v43, %v917_v41  ;;  %vm1243_vm11 = vcmp.eq.s32.totalorder %v5598_v10, %v1141_v47  ;;  %1092 = vperm.xlu0 %5373, %v971_v40   ;;  %v4310_v51 = vsel %vm1244_vm10, 1.0, %v5448_v15 }
  0xf9   : > { %v4309_v52 = vsel %vm1243_vm11, 1.0, %v5448_v15 }
  0xfa   : > { %v5841_v58 = vpack.c.bf16 %v4310_v51, %v4309_v52  ;;  %4991 = vmatprep.mubr.msk.bf16.mxu0 %vm1487_vm6, %v1429_v48  ;;  %v574_v59 = vpop.permute.xlu1 %573  ;;  %5130 = vmatpush3.bf16.msra.mxu0 %v5390_v44 }
  0xfb   : > { %v571_v60 = vpop.permute.xlu0 %570  ;;  %1191 = vperm.xlu1 %5374, %v1004_v53   ;;  %vm734_vm12 = vcmp.eq.s32.totalorder %v5598_v10, %v574_v59 }
  0xfc   : > { %v1445_v61 = vadd.bf16 %v5841_v58, %v933_v57  ;;  %1188 = vperm.xlu0 %5373, %v1003_v54   ;;  %vm733_vm13 = vcmp.eq.s32.totalorder %v5598_v10, %v571_v60  ;;  %v4216_v8 = vsel %vm734_vm12, 1.0, %v5448_v15 }
  0xfd   : > { %v4215_v9 = vsel %vm733_vm13, 1.0, %v5448_v15 }
  0xfe   : > { %5023 = vmatprep.mubr.msk.bf16.mxu1 %vm1487_vm6, %v1445_v61  ;;  %v670_v3 = vpop.permute.xlu1 %669  ;;  %v918_v19 = vpack.c.bf16 %v4216_v8, %v4215_v9 }
  0xff   : > { %v667_v5 = vpop.permute.xlu0 %666  ;;  %621 = vperm.xlu1 %5374, %v494_v62   ;;  %vm766_vm14 = vcmp.eq.s32.totalorder %v5598_v10, %v670_v3 }
 0x100   : > { %618 = vperm.xlu0 %5373, %v493_v63   ;;  %vm765_vm15 = vcmp.eq.s32.totalorder %v5598_v10, %v667_v5  ;;  %v4248_v21 = vsel %vm766_vm14, 1.0, %v5448_v15 }
 0x101   : > { %v4247_v22 = vsel %vm765_vm15, 1.0, %v5448_v15 }
 0x102   : > { %v1054_v11 = vpop.permute.xlu1 %1053  ;;  %v934_v37 = vpack.c.bf16 %v4248_v21, %v4247_v22 }
 0x103   : > { %v1051_v12 = vpop.permute.xlu0 %1050  ;;  %vm1214_vm0 = vcmp.eq.s32.totalorder %v5598_v10, %v1054_v11  ;;  %717 = vperm.xlu1 %5374, %v526_v6  }
 0x104   : > { %vm1213_vm1 = vcmp.eq.s32.totalorder %v5598_v10, %v1051_v12  ;;  %714 = vperm.xlu0 %5373, %v525_v7   ;;  %v4280_v13 = vsel %vm1214_vm0, 1.0, %v5448_v15 }
 0x105   : > { %v4279_v14 = vsel %vm1213_vm1, 1.0, %v5448_v15 }
 0x106   : > { %v5865_v20 = vpack.c.bf16 %v4280_v13, %v4279_v14  ;;  %v1150_v24 = vpop.permute.xlu1 %1149 }
 0x107   : > { %v1147_v26 = vpop.permute.xlu0 %1146  ;;  %vm1246_vm2 = vcmp.eq.s32.totalorder %v5598_v10, %v1150_v24  ;;  %1101 = vperm.xlu1 %5374, %v974_v16  }
 0x108   : > { %v1430_v28 = vadd.bf16 %v5865_v20, %v918_v19  ;;  %vm1245_vm3 = vcmp.eq.s32.totalorder %v5598_v10, %v1147_v26  ;;  %1098 = vperm.xlu0 %5373, %v973_v18   ;;  %v4312_v31 = vsel %vm1246_vm2, 1.0, %v5448_v15 }
 0x109   : > { %v4311_v32 = vsel %vm1245_vm3, 1.0, %v5448_v15 }
 0x10a   : > { %v5882_v38 = vpack.c.bf16 %v4312_v31, %v4311_v32  ;;  %4992 = vmatmul.mubr.msk.bf16.gmra.mxu0 %vm1487_vm6, %v1430_v28  ;;  %v580_v39 = vpop.permute.xlu1 %579 }
 0x10b   : > { %v577_v40 = vpop.permute.xlu0 %576  ;;  %1197 = vperm.xlu1 %5374, %v1006_v33   ;;  %vm736_vm4 = vcmp.eq.s32.totalorder %v5598_v10, %v580_v39 }
 0x10c   : > { %v1446_v41 = vadd.bf16 %v5882_v38, %v934_v37  ;;  %1194 = vperm.xlu0 %5373, %v1005_v34   ;;  %vm735_vm5 = vcmp.eq.s32.totalorder %v5598_v10, %v577_v40  ;;  %v4218_v47 = vsel %vm736_vm4, 1.0, %v5448_v15 }
 0x10d   : > { %v4217_v48 = vsel %vm735_vm5, 1.0, %v5448_v15 }
 0x10e   : > { %5024 = vmatmul.mubr.msk.bf16.gmra.mxu1 %vm1487_vm6, %v1446_v41  ;;  %v676_v45 = vpop.permute.xlu1 %675  ;;  %v919_v53 = vpack.c.bf16 %v4218_v47, %v4217_v48 }
 0x10f   : > { %v673_v46 = vpop.permute.xlu0 %672  ;;  %vm768_vm7 = vcmp.eq.s32.totalorder %v5598_v10, %v676_v45 }
 0x110   : > { %vm767_vm8 = vcmp.eq.s32.totalorder %v5598_v10, %v673_v46  ;;  %v4250_v57 = vsel %vm768_vm7, 1.0, %v5448_v15 }
 0x111   : > { %v4249_v59 = vsel %vm767_vm8, 1.0, %v5448_v15 }
 0x112   : > { %v1060_v49 = vpop.permute.xlu1 %1059  ;;  %v935_v3 = vpack.c.bf16 %v4250_v57, %v4249_v59 }
 0x113   : > { %v1057_v50 = vpop.permute.xlu0 %1056  ;;  %vm1216_vm9 = vcmp.eq.s32.totalorder %v5598_v10, %v1060_v49 }
 0x114   : > { %vm1215_vm10 = vcmp.eq.s32.totalorder %v5598_v10, %v1057_v50  ;;  %v4282_v51 = vsel %vm1216_vm9, 1.0, %v5448_v15 }
 0x115   : > { %v4281_v52 = vsel %vm1215_vm10, 1.0, %v5448_v15 }
 0x116   : > { %v5908_v54 = vpack.c.bf16 %v4282_v51, %v4281_v52  ;;  %v1156_v60 = vpop.permute.xlu1 %1155 }
 0x117   : > { %v1153_v61 = vpop.permute.xlu0 %1152  ;;  %vm1248_vm11 = vcmp.eq.s32.totalorder %v5598_v10, %v1156_v60 }
 0x118   : > { %v1431_v62 = vadd.bf16 %v5908_v54, %v919_v53  ;;  %vm1247_vm12 = vcmp.eq.s32.totalorder %v5598_v10, %v1153_v61  ;;  %v4314_v63 = vsel %vm1248_vm11, 1.0, %v5448_v15 }
 0x119   : > { %v4313_v1 = vsel %vm1247_vm12, 1.0, %v5448_v15 }
 0x11a   : > { %v5917_v5 = vpack.c.bf16 %v4314_v63, %v4313_v1  ;;  %4995 = vmatprep.mubr.msk.bf16.mxu0 %vm1487_vm6, %v1431_v62  ;;  %v586_v6 = vpop.permute.xlu1 %585 }
 0x11b   : > { %v583_v7 = vpop.permute.xlu0 %582  ;;  %vm738_vm13 = vcmp.eq.s32.totalorder %v5598_v10, %v586_v6 }
 0x11c   : > { %v1447_v8 = vadd.bf16 %v5917_v5, %v935_v3  ;;  %vm737_vm14 = vcmp.eq.s32.totalorder %v5598_v10, %v583_v7  ;;  %v4220_v12 = vsel %vm738_vm13, 1.0, %v5448_v15 }
 0x11d   : > { %v4219_v13 = vsel %vm737_vm14, 1.0, %v5448_v15 }
 0x11e   : > { %5027 = vmatprep.mubr.msk.bf16.mxu1 %vm1487_vm6, %v1447_v8  ;;  %v682_v9 = vpop.permute.xlu1 %681  ;;  %v920_v21 = vpack.c.bf16 %v4220_v12, %v4219_v13 }
 0x11f   : > { %v679_v11 = vpop.permute.xlu0 %678  ;;  %vm770_vm15 = vcmp.eq.s32.totalorder %v5598_v10, %v682_v9 }
 0x120   : > { %vm769_vm0 = vcmp.eq.s32.totalorder %v5598_v10, %v679_v11  ;;  %v4252_v24 = vsel %vm770_vm15, 1.0, %v5448_v15 }
 0x121   : > { %v4251_v26 = vsel %vm769_vm0, 1.0, %v5448_v15 }
 0x122   : > { %v1066_v14 = vpop.permute.xlu1 %1065  ;;  %v936_v33 = vpack.c.bf16 %v4252_v24, %v4251_v26 }
 0x123   : > { %v1063_v16 = vpop.permute.xlu0 %1062  ;;  %vm1218_vm1 = vcmp.eq.s32.totalorder %v5598_v10, %v1066_v14 }
 0x124   : > { %vm1217_vm2 = vcmp.eq.s32.totalorder %v5598_v10, %v1063_v16  ;;  %v4284_v18 = vsel %vm1218_vm1, 1.0, %v5448_v15 }
 0x125   : > { %v4283_v19 = vsel %vm1217_vm2, 1.0, %v5448_v15 }
 0x126   : > { %v5932_v22 = vpack.c.bf16 %v4284_v18, %v4283_v19  ;;  %v1162_v28 = vpop.permute.xlu1 %1161 }
 0x127   : > { %v1159_v29 = vpop.permute.xlu0 %1158  ;;  %vm1250_vm3 = vcmp.eq.s32.totalorder %v5598_v10, %v1162_v28 }
 0x128   : > { %v1432_v30 = vadd.bf16 %v5932_v22, %v920_v21  ;;  %vm1249_vm4 = vcmp.eq.s32.totalorder %v5598_v10, %v1159_v29  ;;  %v4316_v31 = vsel %vm1250_vm3, 1.0, %v5448_v15 }
 0x129   : > { %v4315_v32 = vsel %vm1249_vm4, 1.0, %v5448_v15 }
 0x12a   : > { %v5941_v34 = vpack.c.bf16 %v4316_v31, %v4315_v32  ;;  %4996 = vmatmul.mubr.msk.bf16.gmra.mxu0 %vm1487_vm6, %v1432_v30  ;;  %v592_v37 = vpop.permute.xlu1 %591 }
 0x12b   : > { %v589_v39 = vpop.permute.xlu0 %588  ;;  %vm740_vm5 = vcmp.eq.s32.totalorder %v5598_v10, %v592_v37 }
 0x12c   : > { %v1448_v40 = vadd.bf16 %v5941_v34, %v936_v33  ;;  %vm739_vm7 = vcmp.eq.s32.totalorder %v5598_v10, %v589_v39  ;;  %v4222_v45 = vsel %vm740_vm5, 1.0, %v5448_v15 }
 0x12d   : > { %v4221_v46 = vsel %vm739_vm7, 1.0, %v5448_v15 }
 0x12e   : > { %5028 = vmatmul.mubr.msk.bf16.gmra.mxu1 %vm1487_vm6, %v1448_v40  ;;  %v688_v41 = vpop.permute.xlu1 %687  ;;  %v921_v51 = vpack.c.bf16 %v4222_v45, %v4221_v46 }
 0x12f   : > { %v685_v44 = vpop.permute.xlu0 %684  ;;  %vm772_vm8 = vcmp.eq.s32.totalorder %v5598_v10, %v688_v41 }
 0x130   : > { %vm771_vm9 = vcmp.eq.s32.totalorder %v5598_v10, %v685_v44  ;;  %v4254_v53 = vsel %vm772_vm8, 1.0, %v5448_v15 }
 0x131   : > { %v4253_v57 = vsel %vm771_vm9, 1.0, %v5448_v15 }
 0x132   : > { %v1072_v47 = vpop.permute.xlu1 %1071  ;;  %v937_v1 = vpack.c.bf16 %v4254_v53, %v4253_v57 }
 0x133   : > { %v1069_v48 = vpop.permute.xlu0 %1068  ;;  %vm1220_vm10 = vcmp.eq.s32.totalorder %v5598_v10, %v1072_v47 }
 0x134   : > { %vm1219_vm11 = vcmp.eq.s32.totalorder %v5598_v10, %v1069_v48  ;;  %v4286_v49 = vsel %vm1220_vm10, 1.0, %v5448_v15 }
 0x135   : > { %v4285_v50 = vsel %vm1219_vm11, 1.0, %v5448_v15 }
 0x136   : > { %v5956_v52 = vpack.c.bf16 %v4286_v49, %v4285_v50  ;;  %v1168_v59 = vpop.permute.xlu1 %1167 }
 0x137   : > { %v1165_v60 = vpop.permute.xlu0 %1164  ;;  %vm1252_vm12 = vcmp.eq.s32.totalorder %v5598_v10, %v1168_v59 }
 0x138   : > { %v1433_v61 = vadd.bf16 %v5956_v52, %v921_v51  ;;  %vm1251_vm13 = vcmp.eq.s32.totalorder %v5598_v10, %v1165_v60  ;;  %v4318_v62 = vsel %vm1252_vm12, 1.0, %v5448_v15 }
 0x139   : > { %v4317_v63 = vsel %vm1251_vm13, 1.0, %v5448_v15 }
 0x13a   : > { %v5965_v3 = vpack.c.bf16 %v4318_v62, %v4317_v63  ;;  %4999 = vmatprep.mubr.msk.bf16.mxu0 %vm1487_vm6, %v1433_v61  ;;  %v598_v6 = vpop.permute.xlu1 %597 }
 0x13b   : > { %v595_v7 = vpop.permute.xlu0 %594  ;;  %vm742_vm14 = vcmp.eq.s32.totalorder %v5598_v10, %v598_v6 }
 0x13c   : > { %v1449_v8 = vadd.bf16 %v5965_v3, %v937_v1  ;;  %vm741_vm15 = vcmp.eq.s32.totalorder %v5598_v10, %v595_v7  ;;  %v4224_v12 = vsel %vm742_vm14, 1.0, %v5448_v15 }
 0x13d   : > { %v4223_v13 = vsel %vm741_vm15, 1.0, %v5448_v15 }
 0x13e   : > { %5031 = vmatprep.mubr.msk.bf16.mxu1 %vm1487_vm6, %v1449_v8  ;;  %v694_v9 = vpop.permute.xlu1 %693  ;;  %v922_v21 = vpack.c.bf16 %v4224_v12, %v4223_v13 }
 0x13f   : > { %v691_v11 = vpop.permute.xlu0 %690  ;;  %vm774_vm0 = vcmp.eq.s32.totalorder %v5598_v10, %v694_v9 }
 0x140   : > { %vm773_vm1 = vcmp.eq.s32.totalorder %v5598_v10, %v691_v11  ;;  %v4256_v26 = vsel %vm774_vm0, 1.0, %v5448_v15 }
 0x141   : > { %v4255_v28 = vsel %vm773_vm1, 1.0, %v5448_v15 }
 0x142   : > { %v1078_v14 = vpop.permute.xlu1 %1077  ;;  %v938_v37 = vpack.c.bf16 %v4256_v26, %v4255_v28 }
 0x143   : > { %v1075_v16 = vpop.permute.xlu0 %1074  ;;  %vm1222_vm2 = vcmp.eq.s32.totalorder %v5598_v10, %v1078_v14 }
 0x144   : > { %vm1221_vm3 = vcmp.eq.s32.totalorder %v5598_v10, %v1075_v16  ;;  %v4288_v18 = vsel %vm1222_vm2, 1.0, %v5448_v15 }
 0x145   : > { %v4287_v19 = vsel %vm1221_vm3, 1.0, %v5448_v15 }
 0x146   : > { %v5980_v24 = vpack.c.bf16 %v4288_v18, %v4287_v19  ;;  %v1174_v29 = vpop.permute.xlu1 %1173  ;;  %v6021_v18 = vld [vmem:[%s6603_s7 + $0x38] sm:$0xff]  }
 0x147   : > { %v1171_v30 = vpop.permute.xlu0 %1170  ;;  %vm1254_vm4 = vcmp.eq.s32.totalorder %v5598_v10, %v1174_v29  ;;  %v6026_v19 = vld [vmem:[%s6602_s6 + $0x38] sm:$0xff]   ;;  %5195 = vmatprep.subr.bf16.mxu1 %v6021_v18 }
 0x148   : > { %v1434_v31 = vadd.bf16 %v5980_v24, %v922_v21  ;;  %vm1253_vm5 = vcmp.eq.s32.totalorder %v5598_v10, %v1171_v30  ;;  %v4320_v32 = vsel %vm1254_vm4, 1.0, %v5448_v15  ;;  %5275 = vmatprep.subr.bf16.mxu0 %v6026_v19 }
 0x149   : > { %v4319_v33 = vsel %vm1253_vm5, 1.0, %v5448_v15 }
 0x14a   : > { %v5989_v39 = vpack.c.bf16 %v4320_v32, %v4319_v33  ;;  %5000 = vmatmul.mubr.msk.bf16.gmra.mxu0 %vm1487_vm6, %v1434_v31  ;;  %v604_v40 = vpop.permute.xlu1 %603 }
 0x14b   : > { %v601_v41 = vpop.permute.xlu0 %600  ;;  %vm744_vm7 = vcmp.eq.s32.totalorder %v5598_v10, %v604_v40 }
 0x14c   : > { %v1450_v44 = vadd.bf16 %v5989_v39, %v938_v37  ;;  %vm743_vm8 = vcmp.eq.s32.totalorder %v5598_v10, %v601_v41  ;;  %v4226_v47 = vsel %vm744_vm7, 1.0, %v5448_v15 }
 0x14d   : > { %v4225_v48 = vsel %vm743_vm8, 1.0, %v5448_v15 }
 0x14e   : > { %5032 = vmatmul.mubr.msk.bf16.gmra.mxu1 %vm1487_vm6, %v1450_v44  ;;  %v700_v45 = vpop.permute.xlu1 %699  ;;  %v923_v57 = vpack.c.bf16 %v4226_v47, %v4225_v48 }
 0x14f   : > { %v697_v46 = vpop.permute.xlu0 %696  ;;  %vm776_vm9 = vcmp.eq.s32.totalorder %v5598_v10, %v700_v45 }
 0x150   : > { %vm775_vm10 = vcmp.eq.s32.totalorder %v5598_v10, %v697_v46  ;;  %v4258_v60 = vsel %vm776_vm9, 1.0, %v5448_v15 }
 0x151   : > { %v4257_v61 = vsel %vm775_vm10, 1.0, %v5448_v15 }
 0x152   : > { %v1084_v49 = vpop.permute.xlu1 %1083  ;;  %v939_v8 = vpack.c.bf16 %v4258_v60, %v4257_v61 }
 0x153   : > { %v1081_v50 = vpop.permute.xlu0 %1080  ;;  %vm1224_vm11 = vcmp.eq.s32.totalorder %v5598_v10, %v1084_v49 }
 0x154   : > { %vm1223_vm12 = vcmp.eq.s32.totalorder %v5598_v10, %v1081_v50  ;;  %v4290_v51 = vsel %vm1224_vm11, 1.0, %v5448_v15 }
 0x155   : > { %v4289_v53 = vsel %vm1223_vm12, 1.0, %v5448_v15 }
 0x156   : > { %v6004_v59 = vpack.c.bf16 %v4290_v51, %v4289_v53  ;;  %v1180_v62 = vpop.permute.xlu1 %1179 }
 0x157   : > { %v1177_v63 = vpop.permute.xlu0 %1176  ;;  %vm1256_vm13 = vcmp.eq.s32.totalorder %v5598_v10, %v1180_v62 }
 0x158   : > { %v1435_v1 = vadd.bf16 %v6004_v59, %v923_v57  ;;  %vm1255_vm14 = vcmp.eq.s32.totalorder %v5598_v10, %v1177_v63  ;;  %v4322_v6 = vsel %vm1256_vm13, 1.0, %v5448_v15 }
 0x159   : > { %v4321_v7 = vsel %vm1255_vm14, 1.0, %v5448_v15 }
 0x15a   : > { %v6013_v9 = vpack.c.bf16 %v4322_v6, %v4321_v7  ;;  %5003 = vmatprep.mubr.msk.bf16.mxu0 %vm1487_vm6, %v1435_v1  ;;  %v610_v11 = vpop.permute.xlu1 %609 }
 0x15b   : > { %v607_v12 = vpop.permute.xlu0 %606  ;;  %vm746_vm15 = vcmp.eq.s32.totalorder %v5598_v10, %v610_v11 }
 0x15c   : > { %v1451_v13 = vadd.bf16 %v6013_v9, %v939_v8  ;;  %vm745_vm0 = vcmp.eq.s32.totalorder %v5598_v10, %v607_v12  ;;  %v4228_v21 = vsel %vm746_vm15, 1.0, %v5448_v15 }
 0x15d   : > { %v4227_v26 = vsel %vm745_vm0, 1.0, %v5448_v15 }
 0x15e   : > { %5035 = vmatprep.mubr.msk.bf16.mxu1 %vm1487_vm6, %v1451_v13  ;;  %v706_v14 = vpop.permute.xlu1 %705  ;;  %v924_v32 = vpack.c.bf16 %v4228_v21, %v4227_v26 }
 0x15f   : > { %v703_v16 = vpop.permute.xlu0 %702  ;;  %vm778_vm1 = vcmp.eq.s32.totalorder %v5598_v10, %v706_v14 }
 0x160   : > { %vm777_vm2 = vcmp.eq.s32.totalorder %v5598_v10, %v703_v16  ;;  %v4260_v37 = vsel %vm778_vm1, 1.0, %v5448_v15 }
 0x161   : > { %v4259_v40 = vsel %vm777_vm2, 1.0, %v5448_v15 }
 0x162   : > { %v1090_v28 = vpop.permute.xlu1 %1089  ;;  %v940_v48 = vpack.c.bf16 %v4260_v37, %v4259_v40 }
 0x163   : > { %v1087_v29 = vpop.permute.xlu0 %1086  ;;  %vm1226_vm3 = vcmp.eq.s32.totalorder %v5598_v10, %v1090_v28 }
 0x164   : > { %vm1225_vm4 = vcmp.eq.s32.totalorder %v5598_v10, %v1087_v29  ;;  %v4292_v30 = vsel %vm1226_vm3, 1.0, %v5448_v15 }
 0x165   : > { %v4291_v31 = vsel %vm1225_vm4, 1.0, %v5448_v15 }
 0x166   : > { %v6040_v33 = vpack.c.bf16 %v4292_v30, %v4291_v31  ;;  %v1186_v41 = vpop.permute.xlu1 %1185 }
 0x167   : > { %v1183_v44 = vpop.permute.xlu0 %1182  ;;  %vm1258_vm5 = vcmp.eq.s32.totalorder %v5598_v10, %v1186_v41 }
 0x168   : > { %v1436_v45 = vadd.bf16 %v6040_v33, %v924_v32  ;;  %vm1257_vm7 = vcmp.eq.s32.totalorder %v5598_v10, %v1183_v44  ;;  %v4324_v46 = vsel %vm1258_vm5, 1.0, %v5448_v15 }
 0x169   : > { %v4323_v47 = vsel %vm1257_vm7, 1.0, %v5448_v15 }
 0x16a   : > { %v6049_v49 = vpack.c.bf16 %v4324_v46, %v4323_v47  ;;  %5004 = vmatmul.mubr.msk.bf16.gmra.mxu0 %vm1487_vm6, %v1436_v45  ;;  %v616_v50 = vpop.permute.xlu1 %615 }
 0x16b   : > { %v613_v51 = vpop.permute.xlu0 %612  ;;  %vm748_vm8 = vcmp.eq.s32.totalorder %v5598_v10, %v616_v50 }
 0x16c   : > { %v1452_v53 = vadd.bf16 %v6049_v49, %v940_v48  ;;  %vm747_vm9 = vcmp.eq.s32.totalorder %v5598_v10, %v613_v51  ;;  %v4230_v61 = vsel %vm748_vm8, 1.0, %v5448_v15 }
 0x16d   : > { %v4229_v62 = vsel %vm747_vm9, 1.0, %v5448_v15 }
 0x16e   : > { %5036 = vmatmul.mubr.msk.bf16.gmra.mxu1 %vm1487_vm6, %v1452_v53  ;;  %v712_v57 = vpop.permute.xlu1 %711  ;;  %v925_v8 = vpack.c.bf16 %v4230_v61, %v4229_v62 }
 0x16f   : > { %v709_v60 = vpop.permute.xlu0 %708  ;;  %vm780_vm10 = vcmp.eq.s32.totalorder %v5598_v10, %v712_v57 }
 0x170   : > { %vm779_vm11 = vcmp.eq.s32.totalorder %v5598_v10, %v709_v60  ;;  %v4262_v12 = vsel %vm780_vm10, 1.0, %v5448_v15 }
 0x171   : > { %v4261_v13 = vsel %vm779_vm11, 1.0, %v5448_v15 }
 0x172   : > { %v1096_v63 = vpop.permute.xlu1 %1095  ;;  %v941_v29 = vpack.c.bf16 %v4262_v12, %v4261_v13 }
 0x173   : > { %v1093_v1 = vpop.permute.xlu0 %1092  ;;  %vm1228_vm12 = vcmp.eq.s32.totalorder %v5598_v10, %v1096_v63  ;;  %v5391_v63 = vld [vmem:[%s5898_s17] sm:$0xff]  }
 0x174   : > { %vm1227_vm13 = vcmp.eq.s32.totalorder %v5598_v10, %v1093_v1  ;;  %v4294_v6 = vsel %vm1228_vm12, 1.0, %v5448_v15 }
 0x175   : > { %v4293_v7 = vsel %vm1227_vm13, 1.0, %v5448_v15 }
 0x176   : > { %v6064_v11 = vpack.c.bf16 %v4294_v6, %v4293_v7  ;;  %v1192_v14 = vpop.permute.xlu1 %1191 }
 0x177   : > { %v1189_v16 = vpop.permute.xlu0 %1188  ;;  %vm1260_vm14 = vcmp.eq.s32.totalorder %v5598_v10, %v1192_v14  ;;  %v5392_v14 = vld [vmem:[%s5898_s17 + $0x8] sm:$0xff]  }
 0x178   : > { %v1437_v21 = vadd.bf16 %v6064_v11, %v925_v8  ;;  %vm1259_vm15 = vcmp.eq.s32.totalorder %v5598_v10, %v1189_v16  ;;  %v4326_v26 = vsel %vm1260_vm14, 1.0, %v5448_v15  ;;  %v5418_v16 = vld [vmem:[%s6603_s7 + $0x30] sm:$0xff]  }
 0x179   : > { %v4325_v28 = vsel %vm1259_vm15, 1.0, %v5448_v15 }
 0x17a   : > { %v6073_v30 = vpack.c.bf16 %v4326_v26, %v4325_v28  ;;  %5007 = vmatprep.mubr.msk.bf16.mxu0 %vm1487_vm6, %v1437_v21  ;;  %v622_v31 = vpop.permute.xlu1 %621  ;;  %v5425_v21 = vld [vmem:[%s6602_s6 + $0x28] sm:$0xff]   ;;  %v5395_v26 = vld [vmem:[%s5898_s17 + $0x20] sm:$0xff]   ;;  %v5397_v28 = vld [vmem:[%s5898_s17 + $0x30] sm:$0xff]  }
 0x17b   : > { %v619_v32 = vpop.permute.xlu0 %618  ;;  %vm750_vm0 = vcmp.eq.s32.totalorder %v5598_v10, %v622_v31  ;;  %v5428_v31 = vld [vmem:[%s6603_s7 + $0x18] sm:$0xff]  }
 0x17c   : > { %v1453_v37 = vadd.bf16 %v6073_v30, %v941_v29  ;;  %vm749_vm1 = vcmp.eq.s32.totalorder %v5598_v10, %v619_v32  ;;  %v4232_v44 = vsel %vm750_vm0, 1.0, %v5448_v15  ;;  %v5435_v29 = vld [vmem:[%s6602_s6 + $0x18] sm:$0xff]   ;;  %v5399_v32 = vld [vmem:[%s5898_s17 + $0x40] sm:$0xff]  }
 0x17d   : > { %v4231_v45 = vsel %vm749_vm1, 1.0, %v5448_v15 }
 0x17e   : > { %5039 = vmatprep.mubr.msk.bf16.mxu1 %vm1487_vm6, %v1453_v37  ;;  %v718_v40 = vpop.permute.xlu1 %717  ;;  %v926_v51 = vpack.c.bf16 %v4232_v44, %v4231_v45  ;;  %v5432_v37 = vld [vmem:[%s6603_s7 + $0x8] sm:$0xff]  }
 0x17f   : > { %v715_v41 = vpop.permute.xlu0 %714  ;;  %vm782_vm2 = vcmp.eq.s32.totalorder %v5598_v10, %v718_v40  ;;  %v5401_v40 = vld [vmem:[%s5898_s17 + $0x50] sm:$0xff]   ;;  %v5404_v44 = vld [vmem:[%s5898_s17 + $0x68] sm:$0xff]  }
 0x180   : > { %vm781_vm3 = vcmp.eq.s32.totalorder %v5598_v10, %v715_v41  ;;  %v4264_v57 = vsel %vm782_vm2, 1.0, %v5448_v15  ;;  %v5436_v41 = vld [vmem:[%s6602_s6 + $0x10] sm:$0xff]   ;;  %v5437_v45 = vld [vmem:[%s6602_s6 + $0x8] sm:$0xff]  }
 0x181   : > { %v4263_v60 = vsel %vm781_vm3, 1.0, %v5448_v15 }
 0x182   : > { %v1102_v46 = vpop.permute.xlu1 %1101  ;;  %v942_v8 = vpack.c.bf16 %v4264_v57, %v4263_v60  ;;  %v5416_v57 = vld [vmem:[%s5898_s17 + $0xb8] sm:$0xff]  }
 0x183   : > { %v1099_v47 = vpop.permute.xlu0 %1098  ;;  %vm1230_vm4 = vcmp.eq.s32.totalorder %v5598_v10, %v1102_v46  ;;  %v5409_v46 = vld [vmem:[%s5898_s17 + $0x90] sm:$0xff]  }
 0x184   : > { %vm1229_vm5 = vcmp.eq.s32.totalorder %v5598_v10, %v1099_v47  ;;  %v4296_v48 = vsel %vm1230_vm4, 1.0, %v5448_v15  ;;  %v5410_v47 = vld [vmem:[%s5898_s17 + $0x98] sm:$0xff]  }
 0x185   : > { %v4295_v50 = vsel %vm1229_vm5, 1.0, %v5448_v15 }
 0x186   : > { %v6088_v53 = vpack.c.bf16 %v4296_v48, %v4295_v50  ;;  %v1198_v61 = vpop.permute.xlu1 %1197 }
 0x187   : > { %v1195_v62 = vpop.permute.xlu0 %1194  ;;  %vm1262_vm7 = vcmp.eq.s32.totalorder %v5598_v10, %v1198_v61 }
 0x188   : > { %v1438_v1 = vadd.bf16 %v6088_v53, %v926_v51  ;;  %vm1261_vm8 = vcmp.eq.s32.totalorder %v5598_v10, %v1195_v62  ;;  %v4328_v6 = vsel %vm1262_vm7, 1.0, %v5448_v15  ;;  %v5393_v10 = vld [vmem:[%s5898_s17 + $0x10] sm:$0xff]   ;;  %v5414_v51 = vld [vmem:[%s5898_s17 + $0xa8] sm:$0xff]  }
 0x189   : > { %v4327_v7 = vsel %vm1261_vm8, 1.0, %v5448_v15  ;;  %v5419_v15 = vld [vmem:[%s6602_s6 + $0x30] sm:$0xff]   ;;  %v5420_v62 = vld [vmem:[%s5898_s17 + $0xc8] sm:$0xff]  }
 0x18a   : > { %v6098_v12 = vpack.c.bf16 %v4328_v6, %v4327_v7  ;;  %5008 = vmatmul.mubr.msk.bf16.gmra.mxu0 %vm1487_vm6, %v1438_v1 }
 0x18b   : > { %5131 = vmatprep.mubr.bf16.mxu0 %v5391_v63 }
 0x18c   : > { %v1454_v13 = vadd.bf16 %v6098_v12, %v942_v8 }
 0x18e   : > { %5040 = vmatmul.mubr.msk.bf16.gmra.mxu1 %vm1487_vm6, %v1454_v13 }
 0x18f   : > { %5051 = vmatprep.mubr.msk.bf16.mxu1 %vm1487_vm6, %v5614_v25  ;;  %v5394_v25 = vld [vmem:[%s5898_s17 + $0x18] sm:$0xff]  }
 0x192   : > { %5132 = vmatmul.mubr.bf16.vlgmr.msra.gmra.mxu0 %v5392_v14 }
 0x193   : > { %5135 = vmatprep.mubr.bf16.mxu0 %v5393_v10  ;;  %5276 = vmatpush3.bf16.msra.mxu0 %v6026_v19  ;;  %v5423_v19 = vld [vmem:[%s6603_s7 + $0x28] sm:$0xff]  }
 0x194   : > { %5277 = vmatprep.subr.bf16.mxu0 %v5419_v15 }
 0x196   : > { %5052 = vmatmul.mubr.msk.bf16.vlgmr.msra.gmra.mxu1 %vm1487_vm6, %v5646_v55  ;;  %v5433_v55 = vld [vmem:[%s6602_s6 + $0x20] sm:$0xff]  }
 0x197   : > { %5055 = vmatprep.mubr.msk.bf16.mxu1 %vm1487_vm6, %v5678_v23  ;;  %5196 = vmatpush3.bf16.msra.mxu1 %v6021_v18  ;;  %v5427_v23 = vld [vmem:[%s6603_s7 + $0x20] sm:$0xff]   ;;  %v5396_v18 = vld [vmem:[%s5898_s17 + $0x28] sm:$0xff]  }
 0x198   : > { %5197 = vmatprep.subr.bf16.mxu1 %v5418_v16  ;;  %5278 = vmatpush3.bf16.msra.mxu0 %v5419_v15 }
 0x199   : > { %5279 = vmatprep.subr.bf16.mxu0 %v5425_v21 }
 0x19a   : > { %5136 = vmatmul.mubr.bf16.gmra.mxu0 %v5394_v25 }
 0x19b   : > { %5139 = vmatprep.mubr.bf16.mxu0 %v5395_v26  ;;  %5198 = vmatpush3.bf16.msra.mxu1 %v5418_v16 }
 0x19c   : > { %5199 = vmatprep.subr.bf16.mxu1 %v5423_v19  ;;  %5280 = vmatpush3.bf16.msra.mxu0 %v5425_v21 }
 0x19d   : > { %5281 = vmatprep.subr.bf16.mxu0 %v5433_v55 }
 0x19e   : > { %5056 = vmatmul.mubr.msk.bf16.gmra.mxu1 %vm1487_vm6, %v5710_v56  ;;  %v5431_v56 = vld [vmem:[%s6603_s7 + $0x10] sm:$0xff]  }
 0x19f   : > { %5059 = vmatprep.mubr.msk.bf16.mxu1 %vm1487_vm6, %v5742_v27  ;;  %5200 = vmatpush3.bf16.msra.mxu1 %v5423_v19  ;;  %v5398_v27 = vld [vmem:[%s5898_s17 + $0x38] sm:$0xff]  }
 0x1a0   : > { %5201 = vmatprep.subr.bf16.mxu1 %v5427_v23  ;;  %5282 = vmatpush3.bf16.msra.mxu0 %v5433_v55  ;;  %v5430_v19 = vld [vmem:[%s5898_s17 + $0xf8] sm:$0xff]  }
 0x1a1   : > { %5283 = vmatprep.subr.bf16.mxu0 %v5435_v29 }
 0x1a2   : > { %5140 = vmatmul.mubr.bf16.gmra.mxu0 %v5396_v18 }
 0x1a3   : > { %5143 = vmatprep.mubr.bf16.mxu0 %v5397_v28  ;;  %5202 = vmatpush3.bf16.msra.mxu1 %v5427_v23 }
 0x1a4   : > { %5203 = vmatprep.subr.bf16.mxu1 %v5428_v31  ;;  %5284 = vmatpush3.bf16.msra.mxu0 %v5435_v29 }
 0x1a5   : > { %5285 = vmatprep.subr.bf16.mxu0 %v5436_v41 }
 0x1a6   : > { %5060 = vmatmul.mubr.msk.bf16.gmra.mxu1 %vm1487_vm6, %v5783_v0  ;;  %v5434_v0 = vld [vmem:[%s6603_s7] sm:$0xff]  }
 0x1a7   : > { %5063 = vmatprep.mubr.msk.bf16.mxu1 %vm1487_vm6, %v5824_v43  ;;  %5204 = vmatpush3.bf16.msra.mxu1 %v5428_v31  ;;  %v5400_v43 = vld [vmem:[%s5898_s17 + $0x48] sm:$0xff]  }
 0x1a8   : > { %5205 = vmatprep.subr.bf16.mxu1 %v5431_v56  ;;  %5286 = vmatpush3.bf16.msra.mxu0 %v5436_v41 }
 0x1a9   : > { %5287 = vmatprep.subr.bf16.mxu0 %v5437_v45 }
 0x1aa   : > { %5144 = vmatmul.mubr.bf16.gmra.mxu0 %v5398_v27 }
 0x1ab   : > { %5147 = vmatprep.mubr.bf16.mxu0 %v5399_v32  ;;  %5206 = vmatpush3.bf16.msra.mxu1 %v5431_v56 }
 0x1ac   : > { %5207 = vmatprep.subr.bf16.mxu1 %v5432_v37  ;;  %5288 = vmatpush3.bf16.msra.mxu0 %v5437_v45 }
 0x1ae   : > { %5064 = vmatmul.mubr.msk.bf16.gmra.mxu1 %vm1487_vm6, %v5865_v20  ;;  %v5402_v20 = vld [vmem:[%s5898_s17 + $0x58] sm:$0xff]  }
 0x1af   : > { %5067 = vmatprep.mubr.msk.bf16.mxu1 %vm1487_vm6, %v5908_v54  ;;  %5208 = vmatpush3.bf16.msra.mxu1 %v5432_v37  ;;  %v5403_v54 = vld [vmem:[%s5898_s17 + $0x60] sm:$0xff]  }
 0x1b0   : > { %5209 = vmatprep.subr.bf16.mxu1 %v5434_v0 }
 0x1b2   : > { %5148 = vmatmul.mubr.bf16.gmra.mxu0 %v5400_v43 }
 0x1b3   : > { %5151 = vmatprep.mubr.bf16.mxu0 %v5401_v40  ;;  %5210 = vmatpush3.bf16.msra.mxu1 %v5434_v0 }
 0x1b6   : > { %5068 = vmatmul.mubr.msk.bf16.gmra.mxu1 %vm1487_vm6, %v5932_v22  ;;  %v5405_v22 = vld [vmem:[%s5898_s17 + $0x70] sm:$0xff]  }
 0x1b7   : > { %5071 = vmatprep.mubr.msk.bf16.mxu1 %vm1487_vm6, %v5956_v52  ;;  %v5406_v52 = vld [vmem:[%s5898_s17 + $0x78] sm:$0xff]  }
 0x1ba   : > { %5152 = vmatmul.mubr.bf16.gmra.mxu0 %v5402_v20 }
 0x1bb   : > { %5155 = vmatprep.mubr.bf16.mxu0 %v5403_v54 }
 0x1be   : > { %5072 = vmatmul.mubr.msk.bf16.gmra.mxu1 %vm1487_vm6, %v5980_v24  ;;  %v5407_v24 = vld [vmem:[%s5898_s17 + $0x80] sm:$0xff]  }
 0x1bf   : > { %5075 = vmatprep.mubr.msk.bf16.mxu1 %vm1487_vm6, %v6004_v59  ;;  %v5408_v59 = vld [vmem:[%s5898_s17 + $0x88] sm:$0xff]  }
 0x1c2   : > { %5156 = vmatmul.mubr.bf16.gmra.mxu0 %v5404_v44 }
 0x1c3   : > { %5159 = vmatprep.mubr.bf16.mxu0 %v5405_v22 }
 0x1c6   : > { %5076 = vmatmul.mubr.msk.bf16.gmra.mxu1 %vm1487_vm6, %v6040_v33  ;;  %v5438_v33 = vld [vmem:[%s6602_s6] sm:$0xff]  }
 0x1c7   : > { %5079 = vmatprep.mubr.msk.bf16.mxu1 %vm1487_vm6, %v6064_v11  ;;  %5289 = vmatprep.subr.bf16.mxu0 %v5438_v33  ;;  %v6199_v11 = vpop.f32.mrf.mxu0 }
 0x1c8   : > { %5290 = vmatpush3.bf16.msra.mxu0 %v5438_v33  ;;  %v1875_v27 = vmul.f32 0.5, %v6199_v11 }
 0x1c9   : > { %v1618_v48 = vpop.f32.mrf.mxu0 }
 0x1ca   : > { %5160 = vmatmul.mubr.bf16.gmra.mxu0 %v5406_v52  ;;  %v1873_v23 = vmul.f32 0.5, %v1618_v48 }
 0x1cb   : > { %5163 = vmatprep.mubr.bf16.mxu0 %v5407_v24  ;;  %v6207_v50 = vpop.f32.mrf.mxu0 }
 0x1ce   : > { %5080 = vmatmul.mubr.msk.bf16.gmra.mxu1 %vm1487_vm6, %v6088_v53  ;;  %v1621_v53 = vpop.f32.mrf.mxu0 }
 0x1cf   : > { %5083 = vmatprep.mubr.msk.bf16.mxu1 %vm1487_vm6, %v5626_v36  ;;  %v5411_v36 = vld [vmem:[%s5898_s17 + $0xa0] sm:$0xff]  }
 0x1d2   : > { %5164 = vmatmul.mubr.bf16.gmra.mxu0 %v5408_v59 }
 0x1d3   : > { %5167 = vmatprep.mubr.bf16.mxu0 %v5409_v46 }
 0x1d6   : > { %5084 = vmatmul.mubr.msk.bf16.gmra.mxu1 %vm1487_vm6, %v5657_v2  ;;  %v5415_v2 = vld [vmem:[%s5898_s17 + $0xb0] sm:$0xff]  }
 0x1d7   : > { %5087 = vmatprep.mubr.msk.bf16.mxu1 %vm1487_vm6, %v5689_v35  ;;  %v6215_v35 = vpop.f32.mrf.mxu0 }
 0x1d8   : > { %v1879_v44 = vmul.f32 0.5, %v6215_v35 }
 0x1d9   : > { %v1634_v60 = vpop.f32.mrf.mxu0 }
 0x1da   : > { %5168 = vmatmul.mubr.bf16.gmra.mxu0 %v5410_v47  ;;  %v1877_v37 = vmul.f32 0.5, %v1634_v60 }
 0x1db   : > { %5171 = vmatprep.mubr.bf16.mxu0 %v5411_v36  ;;  %v4986_v61 = vpop.f32.mrf.mxu0 }
 0x1de   : > { %5088 = vmatmul.mubr.msk.bf16.gmra.mxu1 %vm1487_vm6, %v5721_v4  ;;  %v5417_v4 = vld [vmem:[%s5898_s17 + $0xc0] sm:$0xff]  }
 0x1df   : > { %5091 = vmatprep.mubr.msk.bf16.mxu1 %vm1487_vm6, %v5759_v42  ;;  %v6223_v42 = vpop.f32.mrf.mxu1 }
 0x1e1   : > { %v6231_v63 = vpop.f32.mrf.mxu1 }
 0x1e2   : > { %5172 = vmatmul.mubr.bf16.gmra.mxu0 %v5414_v51 }
 0x1e3   : > { %5175 = vmatprep.mubr.bf16.mxu0 %v5415_v2  ;;  %v6235_v6 = vpop.f32.mrf.mxu1 }
 0x1e5   : > { %v6243_v8 = vpop.f32.mrf.mxu1 }
 0x1e6   : > { %5092 = vmatmul.mubr.msk.bf16.gmra.mxu1 %vm1487_vm6, %v5800_v17  ;;  %v5421_v17 = vld [vmem:[%s5898_s17 + $0xd0] sm:$0xff]  }
 0x1e7   : > { %5095 = vmatprep.mubr.msk.bf16.mxu1 %vm1487_vm6, %v5841_v58  ;;  %v1637_v58 = vpop.f32.mrf.mxu0  ;;  %v6245_v13 = vpop.f32.mrf.mxu1 }
 0x1e9   : > { %v6233_v1 = vpop.f32.mrf.mxu0  ;;  %v6247_v10 = vpop.f32.mrf.mxu1 }
 0x1ea   : > { %5176 = vmatmul.mubr.bf16.gmra.mxu0 %v5416_v57  ;;  %v1883_v48 = vmul.f32 0.5, %v6233_v1 }
 0x1eb   : > { %5179 = vmatprep.mubr.bf16.mxu0 %v5417_v4  ;;  %v1650_v7 = vpop.f32.mrf.mxu0  ;;  %v6255_v21 = vpop.f32.mrf.mxu1 }
 0x1ec   : > { %v1881_v52 = vmul.f32 0.5, %v1650_v7 }
 0x1ed   : > { %v4990_v14 = vpop.f32.mrf.mxu0  ;;  %v6257_v26 = vpop.f32.mrf.mxu1 }
 0x1ee   : > { %5096 = vmatmul.mubr.msk.bf16.gmra.mxu1 %vm1487_vm6, %v5882_v38  ;;  %v5422_v38 = vld [vmem:[%s5898_s17 + $0xd8] sm:$0xff]   ;;  %v1884_v11 = vmul.f32 0.5, %v4990_v14 }
 0x1ef   : > { %5099 = vmatprep.mubr.msk.bf16.mxu1 %vm1487_vm6, %v5917_v5  ;;  %v5424_v5 = vld [vmem:[%s5898_s17 + $0xe0] sm:$0xff]   ;;  %v1653_v15 = vpop.f32.mrf.mxu0 }
 0x1f0   : > { %v1882_v54 = vmul.f32 0.5, %v1653_v15  ;;  %v2936_v2 = vpack.c.bf16 %v1884_v11, %v1883_v48 }
 0x1f1   : > { %v4993_v16 = vpop.f32.mrf.mxu0 }
 0x1f2   : > { %5180 = vmatmul.mubr.bf16.gmra.mxu0 %v5420_v62  ;;  %v2935_v46 = vpack.c.bf16 %v1882_v54, %v1881_v52 }
 0x1f3   : > { %5183 = vmatprep.mubr.bf16.mxu0 %v5421_v17  ;;  %v1666_v25 = vpop.f32.mrf.mxu0  ;;  %v1887_v17 = vmul.f32 0.5, %v4993_v16 }
 0x1f4   : > { %v1885_v51 = vmul.f32 0.5, %v1666_v25 }
 0x1f5   : > { %v4994_v55 = vpop.f32.mrf.mxu0 }
 0x1f6   : > { %5100 = vmatmul.mubr.msk.bf16.gmra.mxu1 %vm1487_vm6, %v5941_v34  ;;  %v5426_v34 = vld [vmem:[%s5898_s17 + $0xe8] sm:$0xff]   ;;  %v1888_v4 = vmul.f32 0.5, %v4994_v55 }
 0x1f7   : > { %5103 = vmatprep.mubr.msk.bf16.mxu1 %vm1487_vm6, %v5965_v3  ;;  %v5429_v3 = vld [vmem:[%s5898_s17 + $0xf0] sm:$0xff]   ;;  %v1669_v28 = vpop.f32.mrf.mxu0 }
 0x1f8   : > { %v1886_v36 = vmul.f32 0.5, %v1669_v28 }
 0x1f9   : > { %v4997_v31 = vpop.f32.mrf.mxu0 }
 0x1fa   : > { %5184 = vmatmul.mubr.bf16.gmra.mxu0 %v5422_v38  ;;  %v2937_v57 = vpack.c.bf16 %v1886_v36, %v1885_v51  ;;  %v2938_v38 = vpack.c.bf16 %v1888_v4, %v1887_v17  ;;  %v1891_v25 = vmul.f32 0.5, %v4997_v31  ;;  %v1905_v17 = vmul.f32 0.5, %v6231_v63 }
 0x1fb   : > { %5187 = vmatprep.mubr.bf16.mxu0 %v5424_v5  ;;  %v1682_v32 = vpop.f32.mrf.mxu0 }
 0x1fc   : > { %v1889_v7 = vmul.f32 0.5, %v1682_v32 }
 0x1fd   : > { %v4998_v20 = vpop.f32.mrf.mxu0 }
 0x1fe   : > { %5104 = vmatmul.mubr.msk.bf16.gmra.mxu1 %vm1487_vm6, %v5989_v39  ;;  %v6264_v39 = vpop.f32.mrf.mxu1  ;;  %v1892_v15 = vmul.f32 0.5, %v4998_v20 }
 0x1ff   : > { %5107 = vmatprep.mubr.msk.bf16.mxu1 %vm1487_vm6, %v6013_v9  ;;  %v1874_v9 = vmul.f32 0.5, %v1621_v53  ;;  %v1685_v45 = vpop.f32.mrf.mxu0 }
 0x200   : > { %v6266_v18 = vpop.f32.mrf.mxu1  ;;  %v1890_v62 = vmul.f32 0.5, %v1685_v45 }
 0x201   : > { %v2931_v29 = vpack.c.bf16 %v1874_v9, %v1873_v23  ;;  %v2940_v23 = vpack.c.bf16 %v1892_v15, %v1891_v25 }
 0x202   : > { %5188 = vmatmul.mubr.bf16.gmra.mxu0 %v5426_v34  ;;  %v6271_v56 = vpop.f32.mrf.mxu1  ;;  %v2939_v5 = vpack.c.bf16 %v1890_v62, %v1889_v7 }
 0x203   : > { %5191 = vmatprep.mubr.bf16.mxu0 %v5429_v3 }
 0x204   : > { %v6274_v43 = vpop.f32.mrf.mxu1 }
 0x206   : > { %5108 = vmatmul.mubr.msk.bf16.gmra.mxu1 %vm1487_vm6, %v6049_v49  ;;  %v1876_v49 = vmul.f32 0.5, %v6207_v50  ;;  %v6276_v41 = vpop.f32.mrf.mxu1 }
 0x207   : > { %5111 = vmatprep.mubr.msk.bf16.mxu1 %vm1487_vm6, %v6073_v30  ;;  %v1878_v30 = vmul.f32 0.5, %v1637_v58 }
 0x208   : > { %v2932_v0 = vpack.c.bf16 %v1876_v49, %v1875_v27  ;;  %v6279_v22 = vpop.f32.mrf.mxu1 }
 0x209   : > { %v2933_v40 = vpack.c.bf16 %v1878_v30, %v1877_v37 }
 0x20a   : > { %5192 = vmatmul.mubr.bf16.gmra.mxu0 %v5430_v19  ;;  %v5001_v59 = vpop.f32.mrf.mxu0  ;;  %v6281_v33 = vpop.f32.mrf.mxu1 }
 0x20b   : > { %v1895_v27 = vmul.f32 0.5, %v5001_v59 }
 0x20c   : > { %v1698_v47 = vpop.f32.mrf.mxu0  ;;  %v6284_v50 = vpop.f32.mrf.mxu1 }
 0x20d   : > { %v1893_v9 = vmul.f32 0.5, %v1698_v47 }
 0x20e   : > { %5112 = vmatmul.mubr.msk.bf16.gmra.mxu1 %vm1487_vm6, %v6098_v12  ;;  %v1880_v12 = vmul.f32 0.5, %v4986_v61  ;;  %v6286_v53 = vpop.f32.mrf.mxu1  ;;  %v5002_v35 = vpop.f32.mrf.mxu0 }
 0x20f   : > { %5211 = vmatprep.mubr.bf16.mxu1 %v2931_v29  ;;  %v1896_v49 = vmul.f32 0.5, %v5002_v35 }
 0x210   : > { %v2934_v24 = vpack.c.bf16 %v1880_v12, %v1879_v44  ;;  %v6288_v60 = vpop.f32.mrf.mxu1  ;;  %v1701_v61 = vpop.f32.mrf.mxu0 }
 0x211   : > { %v1894_v3 = vmul.f32 0.5, %v1701_v61 }
 0x212   : > { %v6290_v1 = vpop.f32.mrf.mxu1 }
 0x213   : > { %v2941_v16 = vpack.c.bf16 %v1894_v3, %v1893_v9  ;;  %v1910_v9 = vmul.f32 0.5, %v6257_v26  ;;  %v1912_v26 = vmul.f32 0.5, %v6255_v21 }
 0x214   : > { %v6292_v34 = vpop.f32.mrf.mxu1 }
 0x216   : > { %5212 = vmatmul.mubr.bf16.vlgmr.msra.gmra.mxu1 %v2932_v0  ;;  %v6294_v19 = vpop.f32.mrf.mxu1  ;;  %v2942_v0 = vpack.c.bf16 %v1896_v49, %v1895_v27 }
 0x217   : > { %5215 = vmatprep.mubr.bf16.mxu1 %v2933_v40 }
 0x218   : > { %v6296_v28 = vpop.f32.mrf.mxu1 }
 0x21a   : > { %v6298_v32 = vpop.f32.mrf.mxu1 }
 0x21c   : > { %v6300_v31 = vpop.f32.mrf.mxu1 }
 0x21e   : > { %5216 = vmatmul.mubr.bf16.gmra.mxu1 %v2934_v24 }
 0x21f   : > { %5219 = vmatprep.mubr.bf16.mxu1 %v2935_v46 }
 0x226   : > { %5220 = vmatmul.mubr.bf16.gmra.mxu1 %v2936_v2  ;;  %v1906_v2 = vmul.f32 0.5, %v6243_v8  ;;  %v1908_v8 = vmul.f32 0.5, %v6235_v6 }
 0x227   : > { %5223 = vmatprep.mubr.bf16.mxu1 %v2937_v57 }
 0x22a   : > { %v5005_v58 = vpop.f32.mrf.mxu0 }
 0x22b   : > { %v1899_v54 = vmul.f32 0.5, %v5005_v58 }
 0x22c   : > { %v1714_v14 = vpop.f32.mrf.mxu0 }
 0x22d   : > { %v1897_v37 = vmul.f32 0.5, %v1714_v14  ;;  %v2947_v14 = vpack.c.bf16 %v1906_v2, %v1905_v17 }
 0x22e   : > { %5224 = vmatmul.mubr.bf16.gmra.mxu1 %v2938_v38  ;;  %v5006_v55 = vpop.f32.mrf.mxu0  ;;  %v6302_v12 = vpop.f32.mrf.mxu1 }
 0x22f   : > { %5227 = vmatprep.mubr.bf16.mxu1 %v2939_v5  ;;  %v1900_v20 = vmul.f32 0.5, %v5006_v55 }
 0x230   : > { %v1717_v29 = vpop.f32.mrf.mxu0  ;;  %v6304_v45 = vpop.f32.mrf.mxu1 }
 0x231   : > { %v1898_v30 = vmul.f32 0.5, %v1717_v29  ;;  %v2944_v44 = vpack.c.bf16 %v1900_v20, %v1899_v54  ;;  %v1909_v29 = vmul.f32 0.5, %v6247_v10  ;;  %v1914_v10 = vmul.f32 0.5, %v6274_v43 }
 0x232   : > { %v6306_v52 = vpop.f32.mrf.mxu1 }
 0x233   : > { %v2943_v40 = vpack.c.bf16 %v1898_v30, %v1897_v37 }
 0x234   : > { %v6308_v59 = vpop.f32.mrf.mxu1 }
 0x236   : > { %5228 = vmatmul.mubr.bf16.gmra.mxu1 %v2940_v23  ;;  %v1907_v23 = vmul.f32 0.5, %v6223_v42 }
 0x237   : > { %5231 = vmatprep.mubr.bf16.mxu1 %v2941_v16 }
 0x238   : > { %v2948_v49 = vpack.c.bf16 %v1908_v8, %v1907_v23 }
 0x23e   : > { %5232 = vmatmul.mubr.bf16.gmra.mxu1 %v2942_v0  ;;  %v2949_v0 = vpack.c.bf16 %v1910_v9, %v1909_v29 }
 0x23f   : > { %5235 = vmatprep.mubr.bf16.mxu1 %v2943_v40 }
 0x246   : > { %5236 = vmatmul.mubr.bf16.gmra.mxu1 %v2944_v44 }
 0x24a   : > { %v5009_v24 = vpop.f32.mrf.mxu0 }
 0x24b   : > { %v1903_v4 = vmul.f32 0.5, %v5009_v24 }
 0x24c   : > { %v1730_v46 = vpop.f32.mrf.mxu0 }
 0x24d   : > { %v1901_v35 = vmul.f32 0.5, %v1730_v46 }
 0x24e   : > { %v5010_v11 = vpop.f32.mrf.mxu0  ;;  %v6310_v47 = vpop.f32.mrf.mxu1 }
 0x24f   : > { %v1904_v36 = vmul.f32 0.5, %v5010_v11 }
 0x250   : > { %v1733_v48 = vpop.f32.mrf.mxu0  ;;  %v6312_v51 = vpop.f32.mrf.mxu1 }
 0x251   : > { %v1902_v57 = vmul.f32 0.5, %v1733_v48  ;;  %v2946_v7 = vpack.c.bf16 %v1904_v36, %v1903_v4  ;;  %v1911_v36 = vmul.f32 0.5, %v6245_v13  ;;  %v1916_v13 = vmul.f32 0.5, %v6271_v56 }
 0x252   : > { %v6315_v61 = vpop.f32.mrf.mxu1  ;;  %v5133_v62 = vpop.f32.mrf.mxu0 }
 0x253   : > { %v2945_v58 = vpack.c.bf16 %v1902_v57, %v1901_v35  ;;  %v1913_v35 = vmul.f32 0.5, %v6266_v18  ;;  %v2950_v57 = vpack.c.bf16 %v1912_v26, %v1911_v36  ;;  %v1918_v18 = vmul.f32 0.5, %v6284_v50 }
 0x254   : > { %v6318_v38 = vpop.f32.mrf.mxu1  ;;  %v2628_v5 = vpop.f32.mrf.mxu0 }
 0x255   : > { %5239 = vmatprep.mubr.bf16.mxu1 %v2945_v58  ;;  %v2951_v58 = vpack.c.bf16 %v1914_v10, %v1913_v35 }
 0x256   : > { %v5053_v15 = vpop.f32.mrf.mxu1  ;;  %v5134_v3 = vpop.f32.mrf.mxu0  ;;  %5240 = vmatmul.mubr.bf16.gmra.mxu1 %v2946_v7 }
 0x257   : > { %5243 = vmatprep.mubr.bf16.mxu1 %v2947_v14  ;;  %v2637_v54 = vadd.f32 %v5133_v62, %v5053_v15 }
 0x258   : > { %v2099_v25 = vpop.f32.mrf.mxu1  ;;  %v2631_v55 = vpop.f32.mrf.mxu0 }
 0x259   : > { %v2629_v40 = vadd.f32 %v2628_v5, %v2099_v25 }
 0x25a   : > { %v5054_v63 = vpop.f32.mrf.mxu1  ;;  %v5137_v16 = vpop.f32.mrf.mxu0 }
 0x25b   : > { %v2640_v30 = vadd.f32 %v5134_v3, %v5054_v63  ;;  %v1917_v63 = vmul.f32 0.5, %v6279_v22  ;;  %v1922_v22 = vmul.f32 0.5, %v6292_v34 }
 0x25c   : > { %v2102_v27 = vpop.f32.mrf.mxu1  ;;  %v2644_v37 = vpop.f32.mrf.mxu0 }
 0x25d   : > { %v2632_v20 = vadd.f32 %v2631_v55, %v2102_v27  ;;  %v2884_v42 = vpack.c.bf16 %v2640_v30, %v2637_v54  ;;  %v1915_v55 = vmul.f32 0.5, %v6264_v39  ;;  %v2953_v27 = vpack.c.bf16 %v1918_v18, %v1917_v63 }
 0x25e   : > { %v5057_v44 = vpop.f32.mrf.mxu1  ;;  %v5138_v6 = vpop.f32.mrf.mxu0  ;;  %5244 = vmatmul.mubr.bf16.gmra.mxu1 %v2948_v49  ;;  %v1920_v39 = vmul.f32 0.5, %v6281_v33 }
 0x25f   : > { %v2883_v24 = vpack.c.bf16 %v2632_v20, %v2629_v40  ;;  %5247 = vmatprep.mubr.bf16.mxu1 %v2949_v0  ;;  %v2653_v5 = vadd.f32 %v5137_v16, %v5057_v44  ;;  %v2952_v16 = vpack.c.bf16 %v1916_v13, %v1915_v55 }
 0x260   : > { %v2115_v46 = vpop.f32.mrf.mxu1  ;;  %v2647_v11 = vpop.f32.mrf.mxu0 }
 0x261   : > { %5291 = vmatprep.mubr.bf16.mxu0 %v2883_v24  ;;  %v2645_v7 = vadd.f32 %v2644_v37, %v2115_v46  ;;  %v1919_v24 = vmul.f32 0.5, %v6276_v41  ;;  %v1921_v46 = vmul.f32 0.5, %v6288_v60  ;;  %v1924_v41 = vmul.f32 0.5, %v6290_v1 }
 0x262   : > { %v5058_v48 = vpop.f32.mrf.mxu1  ;;  %v5141_v2 = vpop.f32.mrf.mxu0  ;;  %5292 = vmatmul.mubr.bf16.vlgmr.msra.gmra.mxu0 %v2884_v42  ;;  %v1926_v60 = vmul.f32 0.5, %v6300_v31 }
 0x263   : > { %v2656_v4 = vadd.f32 %v5138_v6, %v5058_v48 }
 0x264   : > { %v2118_v62 = vpop.f32.mrf.mxu1  ;;  %v2660_v17 = vpop.f32.mrf.mxu0 }
 0x265   : > { %v2648_v21 = vadd.f32 %v2647_v11, %v2118_v62  ;;  %v2886_v3 = vpack.c.bf16 %v2656_v4, %v2653_v5  ;;  %v2954_v11 = vpack.c.bf16 %v1920_v39, %v1919_v24 }
 0x266   : > { %v5061_v14 = vpop.f32.mrf.mxu1  ;;  %v5142_v15 = vpop.f32.mrf.mxu0  ;;  %5248 = vmatmul.mubr.bf16.gmra.mxu1 %v2950_v57 }
 0x267   : > { %v2885_v43 = vpack.c.bf16 %v2648_v21, %v2645_v7  ;;  %5251 = vmatprep.mubr.bf16.mxu1 %v2951_v58  ;;  %v2669_v0 = vadd.f32 %v5141_v2, %v5061_v14  ;;  %v2955_v2 = vpack.c.bf16 %v1922_v22, %v1921_v46  ;;  %v1923_v21 = vmul.f32 0.5, %v6286_v53 }
 0x268   : > { %v2131_v8 = vpop.f32.mrf.mxu1  ;;  %v2663_v25 = vpop.f32.mrf.mxu0  ;;  %v1928_v53 = vmul.f32 0.5, %v6298_v32 }
 0x269   : > { %5295 = vmatprep.mubr.bf16.mxu0 %v2885_v43  ;;  %v2661_v37 = vadd.f32 %v2660_v17, %v2131_v8  ;;  %v2956_v43 = vpack.c.bf16 %v1924_v41, %v1923_v21 }
 0x26a   : > { %v5062_v9 = vpop.f32.mrf.mxu1  ;;  %v5145_v23 = vpop.f32.mrf.mxu0  ;;  %5296 = vmatmul.mubr.bf16.gmra.mxu0 %v2886_v3 }
 0x26b   : > { %v2672_v29 = vadd.f32 %v5142_v15, %v5062_v9  ;;  %v1925_v15 = vmul.f32 0.5, %v6296_v28  ;;  %v1930_v28 = vmul.f32 0.5, %v6308_v59 }
 0x26c   : > { %v2134_v49 = vpop.f32.mrf.mxu1  ;;  %v2676_v30 = vpop.f32.mrf.mxu0 }
 0x26d   : > { %v2664_v56 = vadd.f32 %v2663_v25, %v2134_v49  ;;  %v2888_v54 = vpack.c.bf16 %v2672_v29, %v2669_v0  ;;  %v2957_v25 = vpack.c.bf16 %v1926_v60, %v1925_v15  ;;  %v1927_v49 = vmul.f32 0.5, %v6294_v19 }
 0x26e   : > { %v5065_v40 = vpop.f32.mrf.mxu1  ;;  %v5146_v20 = vpop.f32.mrf.mxu0  ;;  %5252 = vmatmul.mubr.bf16.gmra.mxu1 %v2952_v16  ;;  %v1932_v19 = vmul.f32 0.5, %v6306_v52 }
 0x26f   : > { %v2887_v50 = vpack.c.bf16 %v2664_v56, %v2661_v37  ;;  %5255 = vmatprep.mubr.bf16.mxu1 %v2953_v27  ;;  %v2685_v57 = vadd.f32 %v5145_v23, %v5065_v40  ;;  %v1929_v37 = vmul.f32 0.5, %v6304_v45  ;;  %v2958_v56 = vpack.c.bf16 %v1928_v53, %v1927_v49 }
 0x270   : > { %v2147_v44 = vpop.f32.mrf.mxu1  ;;  %v2679_v6 = vpop.f32.mrf.mxu0  ;;  %v1934_v45 = vmul.f32 0.5, %v6318_v38 }
 0x271   : > { %5299 = vmatprep.mubr.bf16.mxu0 %v2887_v50  ;;  %v2677_v35 = vadd.f32 %v2676_v30, %v2147_v44  ;;  %v2959_v50 = vpack.c.bf16 %v1930_v28, %v1929_v37 }
 0x272   : > { %v5066_v26 = vpop.f32.mrf.mxu1  ;;  %v5149_v42 = vpop.f32.mrf.mxu0  ;;  %5300 = vmatmul.mubr.bf16.gmra.mxu0 %v2888_v54 }
 0x273   : > { %v2688_v10 = vadd.f32 %v5146_v20, %v5066_v26 }
 0x274   : > { %v2150_v36 = vpop.f32.mrf.mxu1  ;;  %v2692_v48 = vpop.f32.mrf.mxu0 }
 0x275   : > { %v2680_v33 = vadd.f32 %v2679_v6, %v2150_v36  ;;  %v2890_v17 = vpack.c.bf16 %v2688_v10, %v2685_v57  ;;  %v1933_v10 = vmul.f32 0.5, %v6312_v51  ;;  %v1935_v51 = vmul.f32 0.5, %v6310_v47 }
 0x276   : > { %v5069_v4 = vpop.f32.mrf.mxu1  ;;  %v5150_v62 = vpop.f32.mrf.mxu0  ;;  %5256 = vmatmul.mubr.bf16.gmra.mxu1 %v2954_v11 }
 0x277   : > { %v2889_v34 = vpack.c.bf16 %v2680_v33, %v2677_v35  ;;  %5259 = vmatprep.mubr.bf16.mxu1 %v2955_v2  ;;  %v2701_v55 = vadd.f32 %v5149_v42, %v5069_v4  ;;  %v1931_v42 = vmul.f32 0.5, %v6302_v12  ;;  %v2961_v33 = vpack.c.bf16 %v1934_v45, %v1933_v10 }
 0x278   : > { %v2163_v58 = vpop.f32.mrf.mxu1  ;;  %v2695_v7 = vpop.f32.mrf.mxu0  ;;  %v1936_v12 = vmul.f32 0.5, %v6315_v61 }
 0x279   : > { %5303 = vmatprep.mubr.bf16.mxu0 %v2889_v34  ;;  %v2693_v18 = vadd.f32 %v2692_v48, %v2163_v58  ;;  %v2960_v36 = vpack.c.bf16 %v1932_v19, %v1931_v42 }
 0x27a   : > { %v5070_v5 = vpop.f32.mrf.mxu1  ;;  %v5153_v14 = vpop.f32.mrf.mxu0  ;;  %5304 = vmatmul.mubr.bf16.gmra.mxu0 %v2890_v17  ;;  %v2962_v21 = vpack.c.bf16 %v1936_v12, %v1935_v51 }
 0x27b   : > { %v2704_v13 = vadd.f32 %v5150_v62, %v5070_v5 }
 0x27c   : > { %v2166_v3 = vpop.f32.mrf.mxu1  ;;  %v2708_v8 = vpop.f32.mrf.mxu0 }
 0x27d   : > { %v2696_v1 = vadd.f32 %v2695_v7, %v2166_v3  ;;  %v2892_v63 = vpack.c.bf16 %v2704_v13, %v2701_v55 }
 0x27e   : > { %v5073_v9 = vpop.f32.mrf.mxu1  ;;  %v5154_v23 = vpop.f32.mrf.mxu0  ;;  %5260 = vmatmul.mubr.bf16.gmra.mxu1 %v2956_v43 }
 0x27f   : > { %v2891_v31 = vpack.c.bf16 %v2696_v1, %v2693_v18  ;;  %5263 = vmatprep.mubr.bf16.mxu1 %v2957_v25  ;;  %v2717_v54 = vadd.f32 %v5153_v14, %v5073_v9 }
 0x280   : > { %v2179_v16 = vpop.f32.mrf.mxu1  ;;  %v2711_v29 = vpop.f32.mrf.mxu0 }
 0x281   : > { %5307 = vmatprep.mubr.bf16.mxu0 %v2891_v31  ;;  %v2709_v39 = vadd.f32 %v2708_v8, %v2179_v16 }
 0x282   : > { %v5074_v30 = vpop.f32.mrf.mxu1  ;;  %v5157_v27 = vpop.f32.mrf.mxu0  ;;  %5308 = vmatmul.mubr.bf16.gmra.mxu0 %v2892_v63 }
 0x283   : > { %v2720_v0 = vadd.f32 %v5154_v23, %v5074_v30 }
 0x284   : > { %v2182_v40 = vpop.f32.mrf.mxu1  ;;  %v2724_v20 = vpop.f32.mrf.mxu0 }
 0x285   : > { %v2712_v32 = vadd.f32 %v2711_v29, %v2182_v40  ;;  %v2894_v22 = vpack.c.bf16 %v2720_v0, %v2717_v54 }
 0x286   : > { %v5077_v44 = vpop.f32.mrf.mxu1  ;;  %v5158_v6 = vpop.f32.mrf.mxu0  ;;  %5264 = vmatmul.mubr.bf16.gmra.mxu1 %v2958_v56 }
 0x287   : > { %v2893_v59 = vpack.c.bf16 %v2712_v32, %v2709_v39  ;;  %5267 = vmatprep.mubr.bf16.mxu1 %v2959_v50  ;;  %v2733_v4 = vadd.f32 %v5157_v27, %v5077_v44 }
 0x288   : > { %v2195_v24 = vpop.f32.mrf.mxu1  ;;  %v2727_v26 = vpop.f32.mrf.mxu0 }
 0x289   : > { %5311 = vmatprep.mubr.bf16.mxu0 %v2893_v59  ;;  %v2725_v57 = vadd.f32 %v2724_v20, %v2195_v24 }
 0x28a   : > { %v5078_v46 = vpop.f32.mrf.mxu1  ;;  %v5161_v11 = vpop.f32.mrf.mxu0  ;;  %5312 = vmatmul.mubr.bf16.gmra.mxu0 %v2894_v22 }
 0x28b   : > { %v2736_v48 = vadd.f32 %v5158_v6, %v5078_v46 }
 0x28c   : > { %v2198_v2 = vpop.f32.mrf.mxu1  ;;  %v2740_v35 = vpop.f32.mrf.mxu0 }
 0x28d   : > { %v2728_v52 = vadd.f32 %v2727_v26, %v2198_v2  ;;  %v2896_v41 = vpack.c.bf16 %v2736_v48, %v2733_v4 }
 0x28e   : > { %v5081_v62 = vpop.f32.mrf.mxu1  ;;  %v5162_v34 = vpop.f32.mrf.mxu0  ;;  %5268 = vmatmul.mubr.bf16.gmra.mxu1 %v2960_v36 }
 0x28f   : > { %v2895_v38 = vpack.c.bf16 %v2728_v52, %v2725_v57  ;;  %5271 = vmatprep.mubr.bf16.mxu1 %v2961_v33  ;;  %v2749_v3 = vadd.f32 %v5161_v11, %v5081_v62 }
 0x290   : > { %v2211_v17 = vpop.f32.mrf.mxu1  ;;  %v2743_v58 = vpop.f32.mrf.mxu0 }
 0x291   : > { %5315 = vmatprep.mubr.bf16.mxu0 %v2895_v38  ;;  %v2741_v43 = vadd.f32 %v2740_v35, %v2211_v17 }
 0x292   : > { %v5082_v7 = vpop.f32.mrf.mxu1  ;;  %v5165_v60 = vpop.f32.mrf.mxu0  ;;  %5316 = vmatmul.mubr.bf16.gmra.mxu0 %v2896_v41 }
 0x293   : > { %v2752_v5 = vadd.f32 %v5162_v34, %v5082_v7 }
 0x294   : > { %v2214_v14 = vpop.f32.mrf.mxu1  ;;  %v2756_v15 = vpop.f32.mrf.mxu0 }
 0x295   : > { %v2744_v13 = vadd.f32 %v2743_v58, %v2214_v14  ;;  %v2898_v18 = vpack.c.bf16 %v2752_v5, %v2749_v3 }
 0x296   : > { %v5085_v8 = vpop.f32.mrf.mxu1  ;;  %v5166_v25 = vpop.f32.mrf.mxu0  ;;  %5272 = vmatmul.mubr.bf16.gmra.mxu1 %v2962_v21 }
 0x297   : > { %v2897_v61 = vpack.c.bf16 %v2744_v13, %v2741_v43  ;;  %v2765_v29 = vadd.f32 %v5165_v60, %v5085_v8 }
 0x298   : > { %v2227_v1 = vpop.f32.mrf.mxu1  ;;  %v2759_v55 = vpop.f32.mrf.mxu0 }
 0x299   : > { %5319 = vmatprep.mubr.bf16.mxu0 %v2897_v61  ;;  %v2757_v63 = vadd.f32 %v2756_v15, %v2227_v1 }
 0x29a   : > { %v5086_v9 = vpop.f32.mrf.mxu1  ;;  %v5169_v47 = vpop.f32.mrf.mxu0  ;;  %5320 = vmatmul.mubr.bf16.gmra.mxu0 %v2898_v18 }
 0x29b   : > { %v2768_v23 = vadd.f32 %v5166_v25, %v5086_v9 }
 0x29c   : > { %v2230_v31 = vpop.f32.mrf.mxu1  ;;  %v2772_v53 = vpop.f32.mrf.mxu0 }
 0x29d   : > { %v2760_v16 = vadd.f32 %v2759_v55, %v2230_v31  ;;  %v2900_v27 = vpack.c.bf16 %v2768_v23, %v2765_v29 }
 0x29e   : > { %v5089_v28 = vpop.f32.mrf.mxu1  ;;  %v5170_v49 = vpop.f32.mrf.mxu0 }
 0x29f   : > { %v2899_v30 = vpack.c.bf16 %v2760_v16, %v2757_v63  ;;  %v2781_v44 = vadd.f32 %v5169_v47, %v5089_v28 }
 0x2a0   : > { %v2243_v37 = vpop.f32.mrf.mxu1  ;;  %v2775_v56 = vpop.f32.mrf.mxu0 }
 0x2a1   : > { %5323 = vmatprep.mubr.bf16.mxu0 %v2899_v30  ;;  %v2773_v32 = vadd.f32 %v2772_v53, %v2243_v37 }
 0x2a2   : > { %v5090_v0 = vpop.f32.mrf.mxu1  ;;  %v5173_v40 = vpop.f32.mrf.mxu0  ;;  %5324 = vmatmul.mubr.bf16.gmra.mxu0 %v2900_v27 }
 0x2a3   : > { %v2784_v20 = vadd.f32 %v5170_v49, %v5090_v0 }
 0x2a4   : > { %v2246_v50 = vpop.f32.mrf.mxu1  ;;  %v2788_v39 = vpop.f32.mrf.mxu0 }
 0x2a5   : > { %v2776_v54 = vadd.f32 %v2775_v56, %v2246_v50  ;;  %v2902_v22 = vpack.c.bf16 %v2784_v20, %v2781_v44 }
 0x2a6   : > { %v5093_v6 = vpop.f32.mrf.mxu1  ;;  %v5174_v59 = vpop.f32.mrf.mxu0 }
 0x2a7   : > { %v2901_v19 = vpack.c.bf16 %v2776_v54, %v2773_v32  ;;  %v2797_v2 = vadd.f32 %v5173_v40, %v5093_v6 }
 0x2a8   : > { %v2259_v24 = vpop.f32.mrf.mxu1  ;;  %v2791_v26 = vpop.f32.mrf.mxu0 }
 0x2a9   : > { %5327 = vmatprep.mubr.bf16.mxu0 %v2901_v19  ;;  %v2789_v36 = vadd.f32 %v2788_v39, %v2259_v24 }
 0x2aa   : > { %v5094_v45 = vpop.f32.mrf.mxu1  ;;  %v5177_v42 = vpop.f32.mrf.mxu0  ;;  %5328 = vmatmul.mubr.bf16.gmra.mxu0 %v2902_v22 }
 0x2ab   : > { %v2800_v46 = vadd.f32 %v5174_v59, %v5094_v45 }
 0x2ac   : > { %v2262_v11 = vpop.f32.mrf.mxu1  ;;  %v2804_v10 = vpop.f32.mrf.mxu0 }
 0x2ad   : > { %v2792_v48 = vadd.f32 %v2791_v26, %v2262_v11  ;;  %v2904_v52 = vpack.c.bf16 %v2800_v46, %v2797_v2 }
 0x2ae   : > { %v5097_v35 = vpop.f32.mrf.mxu1  ;;  %v5178_v33 = vpop.f32.mrf.mxu0 }
 0x2af   : > { %v2903_v57 = vpack.c.bf16 %v2792_v48, %v2789_v36  ;;  %v2813_v7 = vadd.f32 %v5177_v42, %v5097_v35 }
 0x2b0   : > { %v2275_v4 = vpop.f32.mrf.mxu1  ;;  %v2807_v62 = vpop.f32.mrf.mxu0 }
 0x2b1   : > { %5331 = vmatprep.mubr.bf16.mxu0 %v2903_v57  ;;  %v2805_v58 = vadd.f32 %v2804_v10, %v2275_v4 }
 0x2b2   : > { %v5098_v34 = vpop.f32.mrf.mxu1  ;;  %v5181_v38 = vpop.f32.mrf.mxu0  ;;  %5332 = vmatmul.mubr.bf16.gmra.mxu0 %v2904_v52 }
 0x2b3   : > { %v2816_v12 = vadd.f32 %v5178_v33, %v5098_v34 }
 0x2b4   : > { %v2278_v41 = vpop.f32.mrf.mxu1  ;;  %v2820_v17 = vpop.f32.mrf.mxu0 }
 0x2b5   : > { %v2808_v51 = vadd.f32 %v2807_v62, %v2278_v41  ;;  %v2906_v14 = vpack.c.bf16 %v2816_v12, %v2813_v7 }
 0x2b6   : > { %v5101_v60 = vpop.f32.mrf.mxu1  ;;  %v5182_v21 = vpop.f32.mrf.mxu0 }
 0x2b7   : > { %v2905_v5 = vpack.c.bf16 %v2808_v51, %v2805_v58  ;;  %v2829_v55 = vadd.f32 %v5181_v38, %v5101_v60 }
 0x2b8   : > { %v2291_v15 = vpop.f32.mrf.mxu1  ;;  %v2823_v43 = vpop.f32.mrf.mxu0 }
 0x2b9   : > { %5335 = vmatprep.mubr.bf16.mxu0 %v2905_v5  ;;  %v2821_v18 = vadd.f32 %v2820_v17, %v2291_v15 }
 0x2ba   : > { %v5102_v13 = vpop.f32.mrf.mxu1  ;;  %v5185_v3 = vpop.f32.mrf.mxu0  ;;  %5336 = vmatmul.mubr.bf16.gmra.mxu0 %v2906_v14 }
 0x2bb   : > { %v2832_v8 = vadd.f32 %v5182_v21, %v5102_v13 }
 0x2bc   : > { %v2294_v25 = vpop.f32.mrf.mxu1  ;;  %v2836_v61 = vpop.f32.mrf.mxu0 }
 0x2bd   : > { %v2824_v1 = vadd.f32 %v2823_v43, %v2294_v25  ;;  %v2908_v31 = vpack.c.bf16 %v2832_v8, %v2829_v55 }
 0x2be   : > { %v5105_v9 = vpop.f32.mrf.mxu1  ;;  %v5186_v47 = vpop.f32.mrf.mxu0 }
 0x2bf   : > { %v2907_v23 = vpack.c.bf16 %v2824_v1, %v2821_v18  ;;  %v2845_v56 = vadd.f32 %v5185_v3, %v5105_v9 }
 0x2c0   : > { %v2307_v53 = vpop.f32.mrf.mxu1  ;;  %v2839_v63 = vpop.f32.mrf.mxu0 }
 0x2c1   : > { %5339 = vmatprep.mubr.bf16.mxu0 %v2907_v23  ;;  %v2837_v27 = vadd.f32 %v2836_v61, %v2307_v53 }
 0x2c2   : > { %v5106_v16 = vpop.f32.mrf.mxu1  ;;  %v5189_v29 = vpop.f32.mrf.mxu0  ;;  %5340 = vmatmul.mubr.bf16.gmra.mxu0 %v2908_v31 }
 0x2c3   : > { %v2848_v28 = vadd.f32 %v5186_v47, %v5106_v16 }
 0x2c4   : > { %v2310_v49 = vpop.f32.mrf.mxu1  ;;  %v2852_v30 = vpop.f32.mrf.mxu0 }
 0x2c5   : > { %v2840_v37 = vadd.f32 %v2839_v63, %v2310_v49  ;;  %v2910_v50 = vpack.c.bf16 %v2848_v28, %v2845_v56  ;;  %v6403_v56 = vld [vmem:[%s6604_s8] ss:$0 sm:$0xff] }
 0x2c6   : > { %v5109_v0 = vpop.f32.mrf.mxu1  ;;  %v5190_v40 = vpop.f32.mrf.mxu0 }
 0x2c7   : > { %v2909_v20 = vpack.c.bf16 %v2840_v37, %v2837_v27  ;;  %v2861_v26 = vadd.f32 %v5189_v29, %v5109_v0 }
 0x2c8   : > { %v2323_v39 = vpop.f32.mrf.mxu1  ;;  %v2855_v32 = vpop.f32.mrf.mxu0 }
 0x2c9   : > { %5343 = vmatprep.mubr.bf16.mxu0 %v2909_v20  ;;  %v2853_v22 = vadd.f32 %v2852_v30, %v2323_v39 }
 0x2ca   : > { %v5110_v54 = vpop.f32.mrf.mxu1  ;;  %v5193_v44 = vpop.f32.mrf.mxu0  ;;  %5344 = vmatmul.mubr.bf16.gmra.mxu0 %v2910_v50 }
 0x2cb   : > { %v2864_v6 = vadd.f32 %v5190_v40, %v5110_v54 }
 0x2cc   : > { %v2326_v59 = vpop.f32.mrf.mxu1  ;;  %v2868_v19 = vpop.f32.mrf.mxu0 }
 0x2cd   : > { %v2856_v24 = vadd.f32 %v2855_v32, %v2326_v59  ;;  %v2912_v46 = vpack.c.bf16 %v2864_v6, %v2861_v26 }
 0x2ce   : > { %v5113_v45 = vpop.f32.mrf.mxu1  ;;  %v5194_v11 = vpop.f32.mrf.mxu0 }
 0x2cf   : > { %v2911_v42 = vpack.c.bf16 %v2856_v24, %v2853_v22  ;;  %v2877_v52 = vadd.f32 %v5193_v44, %v5113_v45 }
 0x2d0   : > { %v2339_v10 = vpop.f32.mrf.mxu1  ;;  %v2871_v48 = vpop.f32.mrf.mxu0 }
 0x2d1   : > { %5347 = vmatprep.mubr.bf16.mxu0 %v2911_v42  ;;  %v2869_v33 = vadd.f32 %v2868_v19, %v2339_v10 }
 0x2d2   : > { %v5114_v36 = vpop.f32.mrf.mxu1  ;;  %5348 = vmatmul.mubr.bf16.gmra.mxu0 %v2912_v46 }
 0x2d3   : > { %v2880_v2 = vadd.f32 %v5194_v11, %v5114_v36 }
 0x2d4   : > { %v2342_v35 = vpop.f32.mrf.mxu1 }
 0x2d5   : > { %v2872_v57 = vadd.f32 %v2871_v48, %v2342_v35  ;;  %v2914_v34 = vpack.c.bf16 %v2880_v2, %v2877_v52 }
 0x2d6   : > { %v5213_v4 = vpop.f32.mrf.mxu1 }
 0x2d7   : > { %v2913_v62 = vpack.c.bf16 %v2872_v57, %v2869_v33 }
 0x2d8   : > { %v3061_v38 = vpop.f32.mrf.mxu1 }
 0x2d9   : > { %5351 = vmatprep.mubr.bf16.mxu0 %v2913_v62 }
 0x2da   : > { %v5214_v12 = vpop.f32.mrf.mxu1  ;;  %5352 = vmatmul.mubr.bf16.gmra.mxu0 %v2914_v34 }
 0x2dc   : > { %v3064_v41 = vpop.f32.mrf.mxu1 }
 0x2de   : > { %v5217_v17 = vpop.f32.mrf.mxu1 }
 0x2e0   : > { %v3077_v58 = vpop.f32.mrf.mxu1 }
 0x2e2   : > { %v5218_v51 = vpop.f32.mrf.mxu1 }
 0x2e4   : > { %v3080_v7 = vpop.f32.mrf.mxu1 }
 0x2e6   : > { %v6350_v60 = vpop.f32.mrf.mxu1 }
 0x2e8   : > { %v6352_v21 = vpop.f32.mrf.mxu1 }
 0x2ea   : > { %v6354_v5 = vpop.f32.mrf.mxu1 }
 0x2ec   : > { %v6356_v14 = vpop.f32.mrf.mxu1 }
 0x2ee   : > { %v6358_v15 = vpop.f32.mrf.mxu1 }
 0x2f0   : > { %v6360_v43 = vpop.f32.mrf.mxu1 }
 0x2f2   : > { %v6362_v13 = vpop.f32.mrf.mxu1 }
 0x2f4   : > { %v6364_v3 = vpop.f32.mrf.mxu1 }
 0x2f6   : > { %v6366_v8 = vpop.f32.mrf.mxu1 }
 0x2f8   : > { %v6368_v25 = vpop.f32.mrf.mxu1 }
 0x2fa   : > { %v6370_v61 = vpop.f32.mrf.mxu1 }
 0x2fc   : > { %v6372_v18 = vpop.f32.mrf.mxu1 }
 0x2fe   : > { %v6374_v1 = vpop.f32.mrf.mxu1 }
 0x300   : > { %v6376_v55 = vpop.f32.mrf.mxu1 }
 0x302   : > { %v6378_v9 = vpop.f32.mrf.mxu1 }
 0x304   : > { %v6380_v47 = vpop.f32.mrf.mxu1 }
 0x306   : > { %v6382_v23 = vpop.f32.mrf.mxu1 }
 0x308   : > { %v6384_v31 = vpop.f32.mrf.mxu1 }
 0x30a   : > { %v6386_v53 = vpop.f32.mrf.mxu1 }
 0x30c   : > { %v6388_v63 = vpop.f32.mrf.mxu1 }
 0x316   : > { %v6390_v16 = vpop.f32.mrf.mxu1 }
 0x318   : > { %v6392_v29 = vpop.f32.mrf.mxu1 }
 0x31a   : > { %v6394_v28 = vpop.f32.mrf.mxu1 }
 0x31c   : > { %v6396_v49 = vpop.f32.mrf.mxu1 }
 0x31e   : > { %v6398_v37 = vpop.f32.mrf.mxu1 }
 0x320   : > { %v6406_v32 = vpop.f32.mrf.mxu1 }
 0x322   : > { %v5293_v30 = vpop.f32.mrf.mxu0  ;;  %v6411_v42 = vpop.f32.mrf.mxu1 }
 0x323   : > { %v3407_v27 = vadd.f32 %v5293_v30, %v5213_v4 }
 0x324   : > { %v3398_v0 = vpop.f32.mrf.mxu0  ;;  %v6422_v52 = vpop.f32.mrf.mxu1 }
 0x325   : > { %v3399_v40 = vadd.f32 %v3398_v0, %v3061_v38  ;;  %v3662_v50 = vadd.f32 %v6403_v56, %v3407_v27 }
 0x326   : > { %v5294_v20 = vpop.f32.mrf.mxu0  ;;  %v6429_v27 = vpop.f32.mrf.mxu1 }
 0x327   : > { %v3410_v39 = vadd.f32 %v5294_v20, %v5214_v12  ;;  %v3660_v44 = vadd.f32 %v6403_v56, %v3399_v40  ;;  %v3726_v22 = vmax.f32 %v3662_v50, 0.0 }
 0x328   : > { %v3401_v54 = vpop.f32.mrf.mxu0 }
 0x329   : > { %v3663_v6 = vadd.f32 %v6403_v56, %v3410_v39  ;;  %v3402_v59 = vadd.f32 %v3401_v54, %v3064_v41  ;;  %v3724_v11 = vmax.f32 %v3660_v44, 0.0 }
 0x32a   : > { %v5297_v19 = vpop.f32.mrf.mxu0 }
 0x32b   : > { %v3727_v24 = vmax.f32 %v3663_v6, 0.0  ;;  %v3661_v26 = vadd.f32 %v6403_v56, %v3402_v59  ;;  %v3423_v45 = vadd.f32 %v5297_v19, %v5217_v17  ;;  %v6435_v6 = vpop.f32.mrf.mxu1 }
 0x32c   : > { %v3414_v46 = vpop.f32.mrf.mxu0 }
 0x32d   : > { %v4596_v10 = vpack.c.bf16 %v3727_v24, %v3726_v22  ;;  %v3725_v36 = vmax.f32 %v3661_v26, 0.0  ;;  %v3415_v48 = vadd.f32 %v3414_v46, %v3077_v58  ;;  %v3666_v33 = vadd.f32 %v6403_v56, %v3423_v45 }
 0x32e   : > { %v5298_v2 = vpop.f32.mrf.mxu0 }
 0x32f   : > { %4748 = vst [vmem:[%s6418_s20 + $0x8] sm:$0xff] %v4596_v10   ;;  %v4591_v35 = vpack.c.bf16 %v3725_v36, %v3724_v11  ;;  %v3426_v57 = vadd.f32 %v5298_v2, %v5218_v51  ;;  %v3664_v62 = vadd.f32 %v6403_v56, %v3415_v48  ;;  %v3730_v41 = vmax.f32 %v3666_v33, 0.0 }
 0x330   : > { %v3417_v4 = vpop.f32.mrf.mxu0 }
 0x331   : > { %4592 = vst [vmem:[%s6418_s20] sm:$0xff] %v4591_v35   ;;  %v3667_v34 = vadd.f32 %v6403_v56, %v3426_v57  ;;  %v3418_v38 = vadd.f32 %v3417_v4, %v3080_v7  ;;  %v3728_v0 = vmax.f32 %v3664_v62, 0.0 }
 0x332   : > { %v5301_v12 = vpop.f32.mrf.mxu0 }
 0x333   : > { %v3731_v17 = vmax.f32 %v3667_v34, 0.0  ;;  %v3665_v58 = vadd.f32 %v6403_v56, %v3418_v38  ;;  %v3439_v30 = vadd.f32 %v5301_v12, %v6350_v60 }
 0x334   : > { %v3430_v51 = vpop.f32.mrf.mxu0 }
 0x335   : > { %v4606_v40 = vpack.c.bf16 %v3731_v17, %v3730_v41  ;;  %v3729_v20 = vmax.f32 %v3665_v58, 0.0  ;;  %v3431_v50 = vadd.f32 %v3430_v51, %v6352_v21  ;;  %v3670_v7 = vadd.f32 %v6403_v56, %v3439_v30 }
 0x336   : > { %v5302_v39 = vpop.f32.mrf.mxu0 }
 0x337   : > { %4750 = vst [vmem:[%s6418_s20 + $0x18] sm:$0xff] %v4606_v40   ;;  %v4601_v54 = vpack.c.bf16 %v3729_v20, %v3728_v0  ;;  %v3442_v44 = vadd.f32 %v5302_v39, %v6354_v5  ;;  %v3668_v60 = vadd.f32 %v6403_v56, %v3431_v50  ;;  %v3734_v21 = vmax.f32 %v3670_v7, 0.0  ;;  %v6443_v5 = vpop.f32.mrf.mxu1 }
 0x338   : > { %v3433_v59 = vpop.f32.mrf.mxu0 }
 0x339   : > { %4749 = vst [vmem:[%s6418_s20 + $0x10] sm:$0xff] %v4601_v54   ;;  %v3671_v19 = vadd.f32 %v6403_v56, %v3442_v44  ;;  %v3434_v22 = vadd.f32 %v3433_v59, %v6356_v14  ;;  %v3732_v10 = vmax.f32 %v3668_v60, 0.0  ;;  %v6449_v4 = vpop.f32.mrf.mxu1 }
 0x33a   : > { %v5305_v24 = vpop.f32.mrf.mxu0 }
 0x33b   : > { %v3735_v26 = vmax.f32 %v3671_v19, 0.0  ;;  %v3669_v45 = vadd.f32 %v6403_v56, %v3434_v22  ;;  %v3455_v46 = vadd.f32 %v5305_v24, %v6358_v15 }
 0x33c   : > { %v3446_v11 = vpop.f32.mrf.mxu0 }
 0x33d   : > { %v4616_v36 = vpack.c.bf16 %v3735_v26, %v3734_v21  ;;  %v3733_v48 = vmax.f32 %v3669_v45, 0.0  ;;  %v3447_v2 = vadd.f32 %v3446_v11, %v6360_v43  ;;  %v3674_v14 = vadd.f32 %v6403_v56, %v3455_v46 }
 0x33e   : > { %v5306_v35 = vpop.f32.mrf.mxu0 }
 0x33f   : > { %4752 = vst [vmem:[%s6418_s20 + $0x28] sm:$0xff] %v4616_v36   ;;  %v4611_v33 = vpack.c.bf16 %v3733_v48, %v3732_v10  ;;  %v3458_v57 = vadd.f32 %v5306_v35, %v6362_v13  ;;  %v3672_v15 = vadd.f32 %v6403_v56, %v3447_v2  ;;  %v3738_v43 = vmax.f32 %v3674_v14, 0.0  ;;  %v6457_v13 = vpop.f32.mrf.mxu1 }
 0x340   : > { %v3449_v62 = vpop.f32.mrf.mxu0 }
 0x341   : > { %4751 = vst [vmem:[%s6418_s20 + $0x20] sm:$0xff] %v4611_v33   ;;  %v3675_v34 = vadd.f32 %v6403_v56, %v3458_v57  ;;  %v3450_v38 = vadd.f32 %v3449_v62, %v6364_v3  ;;  %v3736_v51 = vmax.f32 %v3672_v15, 0.0  ;;  %v6463_v7 = vpop.f32.mrf.mxu1 }
 0x342   : > { %v5309_v12 = vpop.f32.mrf.mxu0 }
 0x343   : > { %v3739_v41 = vmax.f32 %v3675_v34, 0.0  ;;  %v3673_v17 = vadd.f32 %v6403_v56, %v3450_v38  ;;  %v3471_v58 = vadd.f32 %v5309_v12, %v6366_v8 }
 0x344   : > { %v3462_v30 = vpop.f32.mrf.mxu0 }
 0x345   : > { %v4626_v0 = vpack.c.bf16 %v3739_v41, %v3738_v43  ;;  %v3737_v40 = vmax.f32 %v3673_v17, 0.0  ;;  %v3463_v20 = vadd.f32 %v3462_v30, %v6368_v25  ;;  %v3678_v3 = vadd.f32 %v6403_v56, %v3471_v58 }
 0x346   : > { %v5310_v50 = vpop.f32.mrf.mxu0 }
 0x347   : > { %4754 = vst [vmem:[%s6418_s20 + $0x38] sm:$0xff] %v4626_v0   ;;  %v4621_v39 = vpack.c.bf16 %v3737_v40, %v3736_v51  ;;  %v3474_v54 = vadd.f32 %v5310_v50, %v6370_v61  ;;  %v3676_v8 = vadd.f32 %v6403_v56, %v3463_v20  ;;  %v3742_v25 = vmax.f32 %v3678_v3, 0.0  ;;  %v6471_v61 = vpop.f32.mrf.mxu1 }
 0x348   : > { %v3465_v44 = vpop.f32.mrf.mxu0 }
 0x349   : > { %4753 = vst [vmem:[%s6418_s20 + $0x30] sm:$0xff] %v4621_v39   ;;  %v3679_v59 = vadd.f32 %v6403_v56, %v3474_v54  ;;  %v3466_v60 = vadd.f32 %v3465_v44, %v6372_v18  ;;  %v3740_v45 = vmax.f32 %v3676_v8, 0.0  ;;  %v6477_v35 = vpop.f32.mrf.mxu1 }
 0x34a   : > { %v5313_v19 = vpop.f32.mrf.mxu0 }
 0x34b   : > { %v3743_v22 = vmax.f32 %v3679_v59, 0.0  ;;  %v3677_v24 = vadd.f32 %v6403_v56, %v3466_v60  ;;  %v3487_v21 = vadd.f32 %v5313_v19, %v6374_v1 }
 0x34c   : > { %v3478_v26 = vpop.f32.mrf.mxu0 }
 0x34d   : > { %v4636_v46 = vpack.c.bf16 %v3743_v22, %v3742_v25  ;;  %v3741_v11 = vmax.f32 %v3677_v24, 0.0  ;;  %v3479_v10 = vadd.f32 %v3478_v26, %v6376_v55  ;;  %v3682_v18 = vadd.f32 %v6403_v56, %v3487_v21 }
 0x34e   : > { %v5314_v36 = vpop.f32.mrf.mxu0 }
 0x34f   : > { %4756 = vst [vmem:[%s6418_s20 + $0x48] sm:$0xff] %v4636_v46   ;;  %v4631_v48 = vpack.c.bf16 %v3741_v11, %v3740_v45  ;;  %v3490_v2 = vadd.f32 %v5314_v36, %v6378_v9  ;;  %v3680_v1 = vadd.f32 %v6403_v56, %v3479_v10  ;;  %v3746_v55 = vmax.f32 %v3682_v18, 0.0  ;;  %v6485_v9 = vpop.f32.mrf.mxu1 }
 0x350   : > { %v3481_v33 = vpop.f32.mrf.mxu0 }
 0x351   : > { %4755 = vst [vmem:[%s6418_s20 + $0x40] sm:$0xff] %v4631_v48   ;;  %v3683_v14 = vadd.f32 %v6403_v56, %v3490_v2  ;;  %v3482_v57 = vadd.f32 %v3481_v33, %v6380_v47  ;;  %v3744_v43 = vmax.f32 %v3680_v1, 0.0  ;;  %v6491_v40 = vpop.f32.mrf.mxu1 }
 0x352   : > { %v5317_v62 = vpop.f32.mrf.mxu0 }
 0x353   : > { %v3747_v15 = vmax.f32 %v3683_v14, 0.0  ;;  %v3681_v34 = vadd.f32 %v6403_v56, %v3482_v57  ;;  %v3503_v38 = vadd.f32 %v5317_v62, %v6382_v23 }
 0x354   : > { %v3494_v12 = vpop.f32.mrf.mxu0 }
 0x355   : > { %v4646_v41 = vpack.c.bf16 %v3747_v15, %v3746_v55  ;;  %v3745_v17 = vmax.f32 %v3681_v34, 0.0  ;;  %v3495_v58 = vadd.f32 %v3494_v12, %v6384_v31  ;;  %v3686_v47 = vadd.f32 %v6403_v56, %v3503_v38 }
 0x356   : > { %v5318_v30 = vpop.f32.mrf.mxu0 }
 0x357   : > { %4758 = vst [vmem:[%s6418_s20 + $0x58] sm:$0xff] %v4646_v41   ;;  %v4641_v51 = vpack.c.bf16 %v3745_v17, %v3744_v43  ;;  %v3506_v0 = vadd.f32 %v5318_v30, %v6386_v53  ;;  %v3684_v23 = vadd.f32 %v6403_v56, %v3495_v58  ;;  %v3750_v31 = vmax.f32 %v3686_v47, 0.0  ;;  %v6499_v53 = vpop.f32.mrf.mxu1 }
 0x358   : > { %v3497_v20 = vpop.f32.mrf.mxu0 }
 0x359   : > { %4757 = vst [vmem:[%s6418_s20 + $0x50] sm:$0xff] %v4641_v51   ;;  %v3687_v50 = vadd.f32 %v6403_v56, %v3506_v0  ;;  %v3498_v39 = vadd.f32 %v3497_v20, %v6388_v63  ;;  %v3748_v60 = vmax.f32 %v3684_v23, 0.0  ;;  %v6505_v45 = vpop.f32.mrf.mxu1 }
 0x35a   : > { %v5321_v3 = vpop.f32.mrf.mxu0 }
 0x35b   : > { %v3751_v54 = vmax.f32 %v3687_v50, 0.0  ;;  %v3685_v44 = vadd.f32 %v6403_v56, %v3498_v39  ;;  %v3519_v8 = vadd.f32 %v5321_v3, %v6390_v16 }
 0x35c   : > { %v3510_v59 = vpop.f32.mrf.mxu0 }
 0x35d   : > { %v4656_v19 = vpack.c.bf16 %v3751_v54, %v3750_v31  ;;  %v3749_v25 = vmax.f32 %v3685_v44, 0.0  ;;  %v3511_v22 = vadd.f32 %v3510_v59, %v6392_v29  ;;  %v3690_v63 = vadd.f32 %v6403_v56, %v3519_v8 }
 0x35e   : > { %v5322_v24 = vpop.f32.mrf.mxu0 }
 0x35f   : > { %4760 = vst [vmem:[%s6418_s20 + $0x68] sm:$0xff] %v4656_v19   ;;  %v4651_v21 = vpack.c.bf16 %v3749_v25, %v3748_v60  ;;  %v3522_v26 = vadd.f32 %v5322_v24, %v6394_v28  ;;  %v3688_v16 = vadd.f32 %v6403_v56, %v3511_v22  ;;  %v3754_v29 = vmax.f32 %v3690_v63, 0.0  ;;  %v6513_v28 = vpop.f32.mrf.mxu1 }
 0x360   : > { %v3513_v46 = vpop.f32.mrf.mxu0 }
 0x361   : > { %4759 = vst [vmem:[%s6418_s20 + $0x60] sm:$0xff] %v4651_v21   ;;  %v3691_v11 = vadd.f32 %v6403_v56, %v3522_v26  ;;  %v3514_v10 = vadd.f32 %v3513_v46, %v6396_v49  ;;  %v3752_v1 = vmax.f32 %v3688_v16, 0.0  ;;  %v6519_v38 = vpop.f32.mrf.mxu1 }
 0x362   : > { %v5325_v36 = vpop.f32.mrf.mxu0 }
 0x363   : > { %v3755_v48 = vmax.f32 %v3691_v11, 0.0  ;;  %v3689_v18 = vadd.f32 %v6403_v56, %v3514_v10  ;;  %v3535_v2 = vadd.f32 %v5325_v36, %v6398_v37 }
 0x364   : > { %v3526_v33 = vpop.f32.mrf.mxu0 }
 0x365   : > { %v4666_v14 = vpack.c.bf16 %v3755_v48, %v3754_v29  ;;  %v3753_v57 = vmax.f32 %v3689_v18, 0.0  ;;  %v3527_v62 = vadd.f32 %v3526_v33, %v6406_v32  ;;  %v3694_v49 = vadd.f32 %v6403_v56, %v3535_v2 }
 0x366   : > { %v5326_v55 = vpop.f32.mrf.mxu0 }
 0x367   : > { %4762 = vst [vmem:[%s6418_s20 + $0x78] sm:$0xff] %v4666_v14   ;;  %v4661_v15 = vpack.c.bf16 %v3753_v57, %v3752_v1  ;;  %v3538_v34 = vadd.f32 %v5326_v55, %v6411_v42  ;;  %v3692_v37 = vadd.f32 %v6403_v56, %v3527_v62  ;;  %v3758_v32 = vmax.f32 %v3694_v49, 0.0  ;;  %v6527_v42 = vpop.f32.mrf.mxu1 }
 0x368   : > { %v3529_v12 = vpop.f32.mrf.mxu0 }
 0x369   : > { %4761 = vst [vmem:[%s6418_s20 + $0x70] sm:$0xff] %v4661_v15   ;;  %v3695_v43 = vadd.f32 %v6403_v56, %v3538_v34  ;;  %v3530_v41 = vadd.f32 %v3529_v12, %v6422_v52  ;;  %v3756_v0 = vmax.f32 %v3692_v37, 0.0  ;;  %v6533_v54 = vpop.f32.mrf.mxu1 }
 0x36a   : > { %v5329_v17 = vpop.f32.mrf.mxu0 }
 0x36b   : > { %v3759_v58 = vmax.f32 %v3695_v43, 0.0  ;;  %v3693_v30 = vadd.f32 %v6403_v56, %v3530_v41  ;;  %v3551_v51 = vadd.f32 %v5329_v17, %v6429_v27 }
 0x36c   : > { %v3542_v47 = vpop.f32.mrf.mxu0 }
 0x36d   : > { %v4676_v20 = vpack.c.bf16 %v3759_v58, %v3758_v32  ;;  %v3757_v23 = vmax.f32 %v3693_v30, 0.0  ;;  %v3543_v50 = vadd.f32 %v3542_v47, %v6435_v6  ;;  %v3698_v52 = vadd.f32 %v6403_v56, %v3551_v51 }
 0x36e   : > { %v5330_v39 = vpop.f32.mrf.mxu0 }
 0x36f   : > { %4764 = vst [vmem:[%s6418_s20 + $0x88] sm:$0xff] %v4676_v20   ;;  %v4671_v3 = vpack.c.bf16 %v3757_v23, %v3756_v0  ;;  %v3554_v31 = vadd.f32 %v5330_v39, %v6443_v5  ;;  %v3696_v27 = vadd.f32 %v6403_v56, %v3543_v50  ;;  %v3762_v6 = vmax.f32 %v3698_v52, 0.0  ;;  %v6541_v5 = vpop.f32.mrf.mxu1 }
 0x370   : > { %v3545_v44 = vpop.f32.mrf.mxu0 }
 0x371   : > { %4763 = vst [vmem:[%s6418_s20 + $0x80] sm:$0xff] %v4671_v3   ;;  %v3699_v8 = vadd.f32 %v6403_v56, %v3554_v31  ;;  %v3546_v59 = vadd.f32 %v3545_v44, %v6449_v4  ;;  %v3760_v21 = vmax.f32 %v3696_v27, 0.0  ;;  %v3269_v36 = vpop.f32.mrf.mxu1 }
 0x372   : > { %v5333_v60 = vpop.f32.mrf.mxu0 }
 0x373   : > { %v3763_v19 = vmax.f32 %v3699_v8, 0.0  ;;  %v3697_v25 = vadd.f32 %v6403_v56, %v3546_v59  ;;  %v3567_v22 = vadd.f32 %v5333_v60, %v6457_v13  ;;  %v5266_v57 = vpop.f32.mrf.mxu1 }
 0x374   : > { %v3558_v24 = vpop.f32.mrf.mxu0 }
 0x375   : > { %v4686_v63 = vpack.c.bf16 %v3763_v19, %v3762_v6  ;;  %v3761_v26 = vmax.f32 %v3697_v25, 0.0  ;;  %v3559_v46 = vadd.f32 %v3558_v24, %v6463_v7  ;;  %v3702_v4 = vadd.f32 %v6403_v56, %v3567_v22  ;;  %v3272_v43 = vpop.f32.mrf.mxu1 }
 0x376   : > { %v5334_v16 = vpop.f32.mrf.mxu0 }
 0x377   : > { %4766 = vst [vmem:[%s6418_s20 + $0x98] sm:$0xff] %v4686_v63   ;;  %v4681_v11 = vpack.c.bf16 %v3761_v26, %v3760_v21  ;;  %v3570_v10 = vadd.f32 %v5334_v16, %v6471_v61  ;;  %v3700_v13 = vadd.f32 %v6403_v56, %v3559_v46  ;;  %v3766_v33 = vmax.f32 %v3702_v4, 0.0  ;;  %v5269_v0 = vpop.f32.mrf.mxu1 }
 0x378   : > { %v3561_v29 = vpop.f32.mrf.mxu0 }
 0x379   : > { %4765 = vst [vmem:[%s6418_s20 + $0x90] sm:$0xff] %v4681_v11   ;;  %v3703_v48 = vadd.f32 %v6403_v56, %v3570_v10  ;;  %v3562_v18 = vadd.f32 %v3561_v29, %v6477_v35  ;;  %v3764_v62 = vmax.f32 %v3700_v13, 0.0  ;;  %v3285_v44 = vpop.f32.mrf.mxu1 }
 0x37a   : > { %v5337_v2 = vpop.f32.mrf.mxu0 }
 0x37b   : > { %v3767_v7 = vmax.f32 %v3703_v48, 0.0  ;;  %v3701_v1 = vadd.f32 %v6403_v56, %v3562_v18  ;;  %v3583_v14 = vadd.f32 %v5337_v2, %v6485_v9  ;;  %v5270_v22 = vpop.f32.mrf.mxu1 }
 0x37c   : > { %v3574_v61 = vpop.f32.mrf.mxu0 }
 0x37d   : > { %v4696_v55 = vpack.c.bf16 %v3767_v7, %v3766_v33  ;;  %v3765_v15 = vmax.f32 %v3701_v1, 0.0  ;;  %v3575_v49 = vadd.f32 %v3574_v61, %v6491_v40  ;;  %v3706_v35 = vadd.f32 %v6403_v56, %v3583_v14  ;;  %v3288_v4 = vpop.f32.mrf.mxu1 }
 0x37e   : > { %v5338_v34 = vpop.f32.mrf.mxu0 }
 0x37f   : > { %4768 = vst [vmem:[%s6418_s20 + $0xa8] sm:$0xff] %v4696_v55   ;;  %v4691_v12 = vpack.c.bf16 %v3765_v15, %v3764_v62  ;;  %v3586_v37 = vadd.f32 %v5338_v34, %v6499_v53  ;;  %v3704_v9 = vadd.f32 %v6403_v56, %v3575_v49  ;;  %v3770_v30 = vmax.f32 %v3706_v35, 0.0  ;;  %v5273_v7 = vpop.f32.mrf.mxu1 }
 0x380   : > { %v3577_v41 = vpop.f32.mrf.mxu0 }
 0x381   : > { %4767 = vst [vmem:[%s6418_s20 + $0xa0] sm:$0xff] %v4691_v12   ;;  %v3707_v17 = vadd.f32 %v6403_v56, %v3586_v37  ;;  %v3578_v32 = vadd.f32 %v3577_v41, %v6505_v45  ;;  %v3768_v20 = vmax.f32 %v3704_v9, 0.0  ;;  %v3301_v12 = vpop.f32.mrf.mxu1 }
 0x382   : > { %v5341_v58 = vpop.f32.mrf.mxu0 }
 0x383   : > { %v3771_v40 = vmax.f32 %v3707_v17, 0.0  ;;  %v3705_v51 = vadd.f32 %v6403_v56, %v3578_v32  ;;  %v3599_v47 = vadd.f32 %v5341_v58, %v6513_v28 }
 0x384   : > { %v3590_v53 = vpop.f32.mrf.mxu0 }
 0x385   : > { %v4706_v23 = vpack.c.bf16 %v3771_v40, %v3770_v30  ;;  %v3769_v50 = vmax.f32 %v3705_v51, 0.0  ;;  %v3591_v39 = vadd.f32 %v3590_v53, %v6519_v38  ;;  %v3710_v45 = vadd.f32 %v6403_v56, %v3599_v47  ;;  %v5274_v40 = vpop.f32.mrf.mxu1 }
 0x386   : > { %v5342_v3 = vpop.f32.mrf.mxu0 }
 0x387   : > { %4770 = vst [vmem:[%s6418_s20 + $0xb8] sm:$0xff] %v4706_v23   ;;  %v4701_v52 = vpack.c.bf16 %v3769_v50, %v3768_v20  ;;  %v3602_v31 = vadd.f32 %v5342_v3, %v6527_v42  ;;  %v3708_v28 = vadd.f32 %v6403_v56, %v3591_v39  ;;  %v3774_v6 = vmax.f32 %v3710_v45, 0.0 }
 0x388   : > { %v3593_v27 = vpop.f32.mrf.mxu0 }
 0x389   : > { %4769 = vst [vmem:[%s6418_s20 + $0xb0] sm:$0xff] %v4701_v52   ;;  %v3711_v8 = vadd.f32 %v6403_v56, %v3602_v31  ;;  %v3594_v59 = vadd.f32 %v3593_v27, %v6533_v54  ;;  %v3772_v24 = vmax.f32 %v3708_v28, 0.0  ;;  %v3304_v52 = vpop.f32.mrf.mxu1 }
 0x38a   : > { %v5345_v60 = vpop.f32.mrf.mxu0 }
 0x38b   : > { %v3775_v38 = vmax.f32 %v3711_v8, 0.0  ;;  %v3709_v19 = vadd.f32 %v6403_v56, %v3594_v59  ;;  %v3615_v25 = vadd.f32 %v5345_v60, %v6541_v5 }
 0x38c   : > { %v3606_v42 = vpop.f32.mrf.mxu0 }
 0x38d   : > { %v4716_v21 = vpack.c.bf16 %v3775_v38, %v3774_v6  ;;  %v3773_v63 = vmax.f32 %v3709_v19, 0.0  ;;  %v3607_v26 = vadd.f32 %v3606_v42, %v3269_v36  ;;  %v3714_v11 = vadd.f32 %v6403_v56, %v3615_v25 }
 0x38e   : > { %v5346_v46 = vpop.f32.mrf.mxu0 }
 0x38f   : > { %4772 = vst [vmem:[%s6418_s20 + $0xc8] sm:$0xff] %v4716_v21   ;;  %v4711_v16 = vpack.c.bf16 %v3773_v63, %v3772_v24  ;;  %v3618_v54 = vadd.f32 %v5346_v46, %v5266_v57  ;;  %v3712_v29 = vadd.f32 %v6403_v56, %v3607_v26  ;;  %v3778_v18 = vmax.f32 %v3714_v11, 0.0 }
 0x390   : > { %v3609_v10 = vpop.f32.mrf.mxu0 }
 0x391   : > { %4771 = vst [vmem:[%s6418_s20 + $0xc0] sm:$0xff] %v4711_v16   ;;  %v3715_v5 = vadd.f32 %v6403_v56, %v3618_v54  ;;  %v3610_v13 = vadd.f32 %v3609_v10, %v3272_v43  ;;  %v3776_v14 = vmax.f32 %v3712_v29, 0.0 }
 0x392   : > { %v5349_v48 = vpop.f32.mrf.mxu0 }
 0x393   : > { %v3779_v2 = vmax.f32 %v3715_v5, 0.0  ;;  %v3713_v36 = vadd.f32 %v6403_v56, %v3610_v13  ;;  %v3631_v33 = vadd.f32 %v5349_v48, %v5269_v0 }
 0x394   : > { %v3622_v1 = vpop.f32.mrf.mxu0 }
 0x395   : > { %v4726_v57 = vpack.c.bf16 %v3779_v2, %v3778_v18  ;;  %v3777_v61 = vmax.f32 %v3713_v36, 0.0  ;;  %v3623_v62 = vadd.f32 %v3622_v1, %v3285_v44  ;;  %v3718_v49 = vadd.f32 %v6403_v56, %v3631_v33 }
 0x396   : > { %v5350_v55 = vpop.f32.mrf.mxu0 }
 0x397   : > { %4774 = vst [vmem:[%s6418_s20 + $0xd8] sm:$0xff] %v4726_v57   ;;  %v4721_v15 = vpack.c.bf16 %v3777_v61, %v3776_v14  ;;  %v3634_v34 = vadd.f32 %v5350_v55, %v5270_v22  ;;  %v3716_v37 = vadd.f32 %v6403_v56, %v3623_v62  ;;  %v3782_v17 = vmax.f32 %v3718_v49, 0.0 }
 0x398   : > { %v3625_v35 = vpop.f32.mrf.mxu0 }
 0x399   : > { %4773 = vst [vmem:[%s6418_s20 + $0xd0] sm:$0xff] %v4721_v15   ;;  %v3719_v43 = vadd.f32 %v6403_v56, %v3634_v34  ;;  %v3626_v41 = vadd.f32 %v3625_v35, %v3288_v4  ;;  %v3780_v47 = vmax.f32 %v3716_v37, 0.0 }
 0x39a   : > { %v5353_v9 = vpop.f32.mrf.mxu0 }
 0x39b   : > { %v3783_v32 = vmax.f32 %v3719_v43, 0.0  ;;  %v3717_v58 = vadd.f32 %v6403_v56, %v3626_v41  ;;  %v3647_v30 = vadd.f32 %v5353_v9, %v5273_v7 }
 0x39c   : > { %v3638_v51 = vpop.f32.mrf.mxu0 }
 0x39d   : > { %v4736_v0 = vpack.c.bf16 %v3783_v32, %v3782_v17  ;;  %v3781_v53 = vmax.f32 %v3717_v58, 0.0  ;;  %v3639_v20 = vadd.f32 %v3638_v51, %v3301_v12  ;;  %v3722_v39 = vadd.f32 %v6403_v56, %v3647_v30 }
 0x39e   : > { %v5354_v23 = vpop.f32.mrf.mxu0 }
 0x39f   : > { %4776 = vst [vmem:[%s6418_s20 + $0xe8] sm:$0xff] %v4736_v0   ;;  %v4731_v50 = vpack.c.bf16 %v3781_v53, %v3780_v47  ;;  %v3650_v3 = vadd.f32 %v5354_v23, %v5274_v40  ;;  %v3720_v31 = vadd.f32 %v6403_v56, %v3639_v20  ;;  %v3786_v28 = vmax.f32 %v3722_v39, 0.0 }
 0x3a0   : > { %v3641_v45 = vpop.f32.mrf.mxu0 }
 0x3a1   : > { %4775 = vst [vmem:[%s6418_s20 + $0xe0] sm:$0xff] %v4731_v50   ;;  %v3723_v44 = vadd.f32 %v6403_v56, %v3650_v3  ;;  %v3642_v27 = vadd.f32 %v3641_v45, %v3304_v52  ;;  %v3784_v60 = vmax.f32 %v3720_v31, 0.0 }
 0x3a3   : > { %v3787_v8 = vmax.f32 %v3723_v44, 0.0  ;;  %v3721_v59 = vadd.f32 %v6403_v56, %v3642_v27 }
 0x3a5   : > { %v4746_v6 = vpack.c.bf16 %v3787_v8, %v3786_v28  ;;  %v3785_v38 = vmax.f32 %v3721_v59, 0.0 }
 0x3a7   : > { %4778 = vst [vmem:[%s6418_s20 + $0xf8] sm:$0xff] %v4746_v6   ;;  %v4741_v19 = vpack.c.bf16 %v3785_v38, %v3784_v60 }
 0x3a9   : > { %4777 = vst [vmem:[%s6418_s20 + $0xf0] sm:$0xff] %v4741_v19  }
 0x3aa PF: > { %s19_s30 = sadd.s32 1, %s5445_s30  }
 0x3ab   : > { %p16_p4 = scmp.ge.s32.totalorder %s19_s30, 8  }
 0x3ad   :  { %18 = sbr.rel (!%p16_p4) target bundleno = 1 (0x1), region = 92 }

// kernel: wtagnn_forward_padded.17
= control target key start
LH: loop header
LB: loop body
LE: loop exit
PB: predicated region body
PF: predicated region fallthrough
CT: control target
= control target key end

     0   :  { %14 = vsyncpa [#allocation3], 0  ;;  %s6718_s0 = inlined_call_operand.vmem [shape: bf16[3072,128], index: 0, kind: input, shape index: {}]   ;;  %s6719_s1 = inlined_call_operand.vmem [shape: bf16[128,128], index: 1, kind: input, shape index: {}]   ;;  %s6720_s2 = inlined_call_operand.vmem [shape: bf16[64,128], index: 2, kind: input, shape index: {}]   ;;  %s6721_s3 = inlined_call_operand.vmem [shape: bf16[64,128], index: 3, kind: input, shape index: {}]   ;;  %s6722_s4 = inlined_call_operand.vmem [shape: s32[3072,1], index: 4, kind: input, shape index: {}]   ;;  %s6723_s5 = inlined_call_operand.vmem [shape: s32[3072,1], index: 5, kind: input, shape index: {}]   ;;  %s6724_s6 = inlined_call_operand.vmem [shape: bf16[128,128], index: 6, kind: input, shape index: {}]   ;;  %s6725_s7 = inlined_call_operand.vmem [shape: bf16[128,128], index: 7, kind: input, shape index: {}]   ;;  %s6726_s8 = inlined_call_operand.vmem [shape: f32[1,128], index: 8, kind: input, shape index: {}]   ;;  %s6727_s9 = inlined_call_operand.hbm [shape: bf16[3072,128], index: 9, kind: output, shape index: {}]  }
   0x1   :  { %16 = vsyncpa [#allocation3 + $0x1], 0  ;;  %s5545_s30 = smov 0   ;;  %s5547_s10 = smov 0  }
   0x2   :  { %s5549_s11 = smov 0   ;;  %s5551_s12 = smov 0  }
   0x3 LB: > { %s5566_s13 = sadd.s32 4294967295, %s5488_s12   ;;  %s4142_s14 = sadd.s32 4294967294, %s5488_s12   ;;  %s5488_s12 = sphi %s5551_s12, %s6733_s12   ;;  %s5484_s11 = sphi %s5549_s11, %s6732_s11   ;;  %s5480_s10 = sphi %s5547_s10, %s6731_s10   ;;  %s5476_s30 = sphi %s5545_s30, %s6730_s30  }
   0x4   : > { %s5570_s15 = sadd.s32 1, %s5488_s12   ;;  %s233_s16 = sadd.s32 1, %s5484_s11 }
   0x5   : > { %s230_s17 = ssub.s32 %s5488_s12, %s5570_s15  ;;  %p243_p0 = scmp.ne.s32.totalorder %s5484_s11, %s5480_s10 }
   0x6   : > { %p231_p1 = scmp.eq.s32.totalorder %s230_s17, 0  ;;  %p244_p2 = scmp.eq.s32.totalorder %s5566_s13, 5 }
   0x7   : > { %p249_p3 = scmp.ne.s32.totalorder %s5480_s10, %s5476_s30  ;;  %p250_p4 = scmp.eq.s32.totalorder %s4142_s14, 5 }
   0x8   : > { %s5581_s18 = scalar_select %p231_p1, %s5484_s11, %s233_s16  }
   0x9   : > { %p5583_p5 = por %p244_p2, %p243_p0  ;;  %p5587_p6 = por %p250_p4, %p249_p3 }
   0xa   : > { %p4145_p7 = scmp.ge.s32.totalorder %s5488_s12, 1  ;;  %p313_p8 = scmp.lt.s32.totalorder %s5488_s12, 7 }
   0xc   : > { %p314_p9 = pnand %p4145_p7, %p313_p8 }
   0xd   : > { %s4147_s21 = sshll.u32 (!%p314_p9), %s5566_s13, 6  ;;  %s4543_s27 = sshll.u32 (!%p314_p9), %s5566_s13, 12 }
   0xe   : > { %317 = sbr.rel (%p314_p9) target bundleno = 957 (0x3bd), region = 56  ;;  %p360_p10 = scmp.lt.s32.totalorder (!%p314_p9), %s4147_s21, 383 }
   0xf   : > { %s6670_s17 = scalar_lea.hbm (!%p314_p9), %s6727_s9, %s4543_s27 }
  0x13   : > { %v5490_v0 = vmov 0   ;;  %s6735_s21 = smov (!%p360_p10, %s4147_s21), 383  ;;  %v5364_v15 = vld [vmem:[%s6720_s2 + $0x18] sm:$0xff]   ;;  %v5365_v16 = vld [vmem:[%s6720_s2 + $0x10] sm:$0xff]   ;;  %v5366_v21 = vld [vmem:[%s6720_s2 + $0x8] sm:$0xff]   ;;  %vm1485_vm6 = vcmask 523264  }
  0x14   : > { %5363 = vset.pattern.permute.xlu1 %v5490_v0  ;;  %5362 = vset.pattern.permute.xlu0 %v5490_v0  ;;  %s4150_s22 = sshll.u32 %s6735_s21, 3  ;;  %v5367_v24 = vld [vmem:[%s6720_s2] sm:$0xff]  }
  0x15   : > { %s5600_s25 = scalar_lea.vmem %s6722_s4, %s4150_s22  ;;  %s5609_s28 = scalar_lea.vmem %s6723_s5, %s4150_s22  ;;  %4927 = vmatprep.subr.bf16.mxu0 %v5364_v15  ;;  %5311 = vmatprep.subr.bf16.mxu1 %v5364_v15 }
  0x16   : > { %v493_v1 = vld [vmem:[%s5600_s25 + $0x100] sm:$0xff]  ;;  %v494_v3 = vld [vmem:[%s5600_s25 + $0x108] sm:$0xff]  ;;  %v464_v9 = vld [vmem:[%s5600_s25 + $0x18] sm:$0xff]  ;;  %4928 = vmatpush3.bf16.msra.mxu0 %v5364_v15  ;;  %5315 = vmatpush3.bf16.msra.mxu1 %v5364_v15  ;;  %v5491_v15 = vmov 0.0   ;;  %s5492_s22 = smov [#allocation2]  }
  0x17   : > { %v461_v2 = vld [vmem:[%s5600_s25] sm:$0xff]  ;;  %622 = vperm.xlu1 %5363, %v493_v1   ;;  %v462_v4 = vld [vmem:[%s5600_s25 + $0x8] sm:$0xff]  ;;  %v463_v10 = vld [vmem:[%s5600_s25 + $0x10] sm:$0xff]  ;;  %4929 = vmatprep.subr.bf16.mxu0 %v5365_v16  ;;  %s5432_s23 = sshll.u32 %s5492_s22, 4  ;;  %s5433_s23 = int_to_ptr.vmem [resolvable:$false] %s5432_s23 }
  0x18   : > { %526 = vperm.xlu0 %5362, %v461_v2   ;;  %v942_v5 = vld [vmem:[%s5609_s28 + $0x8] sm:$0xff]  ;;  %v941_v6 = vld [vmem:[%s5609_s28] sm:$0xff]  ;;  %v496_v11 = vld [vmem:[%s5600_s25 + $0x118] sm:$0xff]  ;;  %5312 = vmatprep.subr.bf16.mxu1 %v5365_v16 }
  0x19   : > { %v974_v7 = vld [vmem:[%s5609_s28 + $0x108] sm:$0xff]  ;;  %v973_v8 = vld [vmem:[%s5609_s28 + $0x100] sm:$0xff]  ;;  %v495_v12 = vld [vmem:[%s5600_s25 + $0x110] sm:$0xff] }
  0x1a   : > { %v944_v13 = vld [vmem:[%s5609_s28 + $0x18] sm:$0xff]  ;;  %v943_v14 = vld [vmem:[%s5609_s28 + $0x10] sm:$0xff]  ;;  %v466_v19 = vld [vmem:[%s5600_s25 + $0x28] sm:$0xff]  ;;  %4930 = vmatpush3.bf16.msra.mxu0 %v5365_v16  ;;  %5316 = vmatpush3.bf16.msra.mxu1 %v5365_v16 }
  0x1b   : > { %625 = vperm.xlu1 %5363, %v494_v3   ;;  %v976_v17 = vld [vmem:[%s5609_s28 + $0x118] sm:$0xff]  ;;  %v975_v18 = vld [vmem:[%s5609_s28 + $0x110] sm:$0xff]  ;;  %v465_v20 = vld [vmem:[%s5600_s25 + $0x20] sm:$0xff]  ;;  %4931 = vmatprep.subr.bf16.mxu0 %v5366_v21 }
  0x1c   : > { %529 = vperm.xlu0 %5362, %v462_v4   ;;  %v498_v22 = vld [vmem:[%s5600_s25 + $0x128] sm:$0xff]  ;;  %v497_v23 = vld [vmem:[%s5600_s25 + $0x120] sm:$0xff]  ;;  %5313 = vmatprep.subr.bf16.mxu1 %v5366_v21  ;;  %v468_v29 = vld [vmem:[%s5600_s25 + $0x38] sm:$0xff] }
  0x1d   : > { %v946_v25 = vld [vmem:[%s5609_s28 + $0x28] sm:$0xff]  ;;  %v945_v26 = vld [vmem:[%s5609_s28 + $0x20] sm:$0xff]  ;;  %v467_v30 = vld [vmem:[%s5600_s25 + $0x30] sm:$0xff] }
  0x1e   : > { %4932 = vmatpush3.bf16.msra.mxu0 %v5366_v21  ;;  %5317 = vmatpush3.bf16.msra.mxu1 %v5366_v21  ;;  %v978_v27 = vld [vmem:[%s5609_s28 + $0x128] sm:$0xff]  ;;  %v977_v28 = vld [vmem:[%s5609_s28 + $0x120] sm:$0xff]  ;;  %v500_v31 = vld [vmem:[%s5600_s25 + $0x138] sm:$0xff] }
  0x1f   : > { %1009 = vperm.xlu1 %5363, %v942_v5   ;;  %4933 = vmatprep.subr.bf16.mxu0 %v5367_v24  ;;  %v499_v32 = vld [vmem:[%s5600_s25 + $0x130] sm:$0xff]  ;;  %v948_v33 = vld [vmem:[%s5609_s28 + $0x38] sm:$0xff]  ;;  %v470_v37 = vld [vmem:[%s5600_s25 + $0x48] sm:$0xff]  ;;  %v459_v5 = vlaneseq }
  0x20   : > { %1006 = vperm.xlu0 %5362, %v941_v6   ;;  %5314 = vmatprep.subr.bf16.mxu1 %v5367_v24  ;;  %v947_v34 = vld [vmem:[%s5609_s28 + $0x30] sm:$0xff]  ;;  %v980_v35 = vld [vmem:[%s5609_s28 + $0x138] sm:$0xff]  ;;  %v469_v38 = vld [vmem:[%s5600_s25 + $0x40] sm:$0xff] }
  0x21   : > { %v979_v36 = vld [vmem:[%s5609_s28 + $0x130] sm:$0xff]  ;;  %v502_v39 = vld [vmem:[%s5600_s25 + $0x148] sm:$0xff]  ;;  %v501_v40 = vld [vmem:[%s5600_s25 + $0x140] sm:$0xff] }
  0x22   : > { %4934 = vmatpush3.bf16.msra.mxu0 %v5367_v24  ;;  %5318 = vmatpush3.bf16.msra.mxu1 %v5367_v24  ;;  %v950_v41 = vld [vmem:[%s5609_s28 + $0x48] sm:$0xff]  ;;  %v949_v42 = vld [vmem:[%s5609_s28 + $0x40] sm:$0xff]  ;;  %v472_v45 = vld [vmem:[%s5600_s25 + $0x58] sm:$0xff] }
  0x23   : > { %1105 = vperm.xlu1 %5363, %v974_v7   ;;  %v982_v43 = vld [vmem:[%s5609_s28 + $0x148] sm:$0xff]  ;;  %v981_v44 = vld [vmem:[%s5609_s28 + $0x140] sm:$0xff]  ;;  %v471_v46 = vld [vmem:[%s5600_s25 + $0x50] sm:$0xff] }
  0x24   : > { %1102 = vperm.xlu0 %5362, %v973_v8   ;;  %v504_v47 = vld [vmem:[%s5600_s25 + $0x158] sm:$0xff]  ;;  %v503_v48 = vld [vmem:[%s5600_s25 + $0x150] sm:$0xff]  ;;  %v474_v53 = vld [vmem:[%s5600_s25 + $0x68] sm:$0xff] }
  0x25   : > { %v952_v49 = vld [vmem:[%s5609_s28 + $0x58] sm:$0xff]  ;;  %v951_v50 = vld [vmem:[%s5609_s28 + $0x50] sm:$0xff]  ;;  %v473_v54 = vld [vmem:[%s5600_s25 + $0x60] sm:$0xff] }
  0x26   : > { %v984_v51 = vld [vmem:[%s5609_s28 + $0x158] sm:$0xff]  ;;  %v983_v52 = vld [vmem:[%s5609_s28 + $0x150] sm:$0xff]  ;;  %v506_v55 = vld [vmem:[%s5600_s25 + $0x168] sm:$0xff] }
  0x27   : > { %535 = vperm.xlu1 %5363, %v464_v9   ;;  %v505_v56 = vld [vmem:[%s5600_s25 + $0x160] sm:$0xff]  ;;  %v954_v57 = vld [vmem:[%s5609_s28 + $0x68] sm:$0xff]  ;;  %v476_v61 = vld [vmem:[%s5600_s25 + $0x78] sm:$0xff] }
  0x28   : > { %532 = vperm.xlu0 %5362, %v463_v10   ;;  %v953_v58 = vld [vmem:[%s5609_s28 + $0x60] sm:$0xff]  ;;  %v986_v59 = vld [vmem:[%s5609_s28 + $0x168] sm:$0xff]  ;;  %v475_v62 = vld [vmem:[%s5600_s25 + $0x70] sm:$0xff]  ;;  %v5685_v10 = vand.u32 127, %v459_v5 }
  0x29   : > { %v985_v60 = vld [vmem:[%s5609_s28 + $0x160] sm:$0xff]  ;;  %v508_v63 = vld [vmem:[%s5600_s25 + $0x178] sm:$0xff]  ;;  %v507_v0 = vld [vmem:[%s5600_s25 + $0x170] sm:$0xff] }
  0x2a   : > { %v956_v1 = vld [vmem:[%s5609_s28 + $0x78] sm:$0xff]  ;;  %v955_v2 = vld [vmem:[%s5609_s28 + $0x70] sm:$0xff]  ;;  %v478_v8 = vld [vmem:[%s5600_s25 + $0x88] sm:$0xff] }
  0x2b   : > { %631 = vperm.xlu1 %5363, %v496_v11   ;;  %v988_v3 = vld [vmem:[%s5609_s28 + $0x178] sm:$0xff]  ;;  %v987_v4 = vld [vmem:[%s5609_s28 + $0x170] sm:$0xff]  ;;  %v477_v9 = vld [vmem:[%s5600_s25 + $0x80] sm:$0xff] }
  0x2c   : > { %628 = vperm.xlu0 %5362, %v495_v12  }
  0x2f   : > { %1015 = vperm.xlu1 %5363, %v944_v13   ;;  %v510_v13 = vld [vmem:[%s5600_s25 + $0x188] sm:$0xff] }
  0x30   : > { %1012 = vperm.xlu0 %5362, %v943_v14   ;;  %v509_v14 = vld [vmem:[%s5600_s25 + $0x180] sm:$0xff] }
  0x33   : > { %1111 = vperm.xlu1 %5363, %v976_v17  }
  0x34   : > { %1108 = vperm.xlu0 %5362, %v975_v18  }
  0x37   : > { %541 = vperm.xlu1 %5363, %v466_v19  }
  0x38   : > { %538 = vperm.xlu0 %5362, %v465_v20  }
  0x3b   : > { %637 = vperm.xlu1 %5363, %v498_v22   ;;  %v958_v22 = vld [vmem:[%s5609_s28 + $0x88] sm:$0xff] }
  0x3c   : > { %634 = vperm.xlu0 %5362, %v497_v23   ;;  %v957_v23 = vld [vmem:[%s5609_s28 + $0x80] sm:$0xff] }
  0x3f   : > { %1021 = vperm.xlu1 %5363, %v946_v25  }
  0x40   : > { %1018 = vperm.xlu0 %5362, %v945_v26  }
  0x43   : > { %1117 = vperm.xlu1 %5363, %v978_v27  }
  0x44   : > { %1114 = vperm.xlu0 %5362, %v977_v28  }
  0x47   : > { %547 = vperm.xlu1 %5363, %v468_v29  }
  0x48   : > { %544 = vperm.xlu0 %5362, %v467_v30  }
  0x4b   : > { %643 = vperm.xlu1 %5363, %v500_v31  }
  0x4c   : > { %640 = vperm.xlu0 %5362, %v499_v32  }
  0x4f   : > { %1027 = vperm.xlu1 %5363, %v948_v33   ;;  %v990_v33 = vld [vmem:[%s5609_s28 + $0x188] sm:$0xff] }
  0x50   : > { %1024 = vperm.xlu0 %5362, %v947_v34   ;;  %v989_v34 = vld [vmem:[%s5609_s28 + $0x180] sm:$0xff] }
  0x53   : > { %1123 = vperm.xlu1 %5363, %v980_v35  }
  0x54   : > { %1120 = vperm.xlu0 %5362, %v979_v36  }
  0x57   : > { %553 = vperm.xlu1 %5363, %v470_v37  }
  0x58   : > { %550 = vperm.xlu0 %5362, %v469_v38  }
  0x5b   : > { %649 = vperm.xlu1 %5363, %v502_v39  }
  0x5c   : > { %646 = vperm.xlu0 %5362, %v501_v40   ;;  %v480_v40 = vld [vmem:[%s5600_s25 + $0x98] sm:$0xff] }
  0x5f   : > { %1033 = vperm.xlu1 %5363, %v950_v41   ;;  %v479_v41 = vld [vmem:[%s5600_s25 + $0x90] sm:$0xff] }
  0x60   : > { %1030 = vperm.xlu0 %5362, %v949_v42  }
  0x63   : > { %1129 = vperm.xlu1 %5363, %v982_v43  }
  0x64   : > { %1126 = vperm.xlu0 %5362, %v981_v44   ;;  %v512_v44 = vld [vmem:[%s5600_s25 + $0x198] sm:$0xff] }
  0x67   : > { %559 = vperm.xlu1 %5363, %v472_v45   ;;  %v511_v45 = vld [vmem:[%s5600_s25 + $0x190] sm:$0xff] }
  0x68   : > { %556 = vperm.xlu0 %5362, %v471_v46  }
  0x6b   : > { %655 = vperm.xlu1 %5363, %v504_v47  }
  0x6c   : > { %652 = vperm.xlu0 %5362, %v503_v48  }
  0x6f   : > { %1039 = vperm.xlu1 %5363, %v952_v49  }
  0x70   : > { %1036 = vperm.xlu0 %5362, %v951_v50  }
  0x73   : > { %1135 = vperm.xlu1 %5363, %v984_v51  }
  0x74   : > { %1132 = vperm.xlu0 %5362, %v983_v52   ;;  %v960_v52 = vld [vmem:[%s5609_s28 + $0x98] sm:$0xff] }
  0x77   : > { %565 = vperm.xlu1 %5363, %v474_v53   ;;  %v959_v53 = vld [vmem:[%s5609_s28 + $0x90] sm:$0xff] }
  0x78   : > { %562 = vperm.xlu0 %5362, %v473_v54  }
  0x7b   : > { %661 = vperm.xlu1 %5363, %v506_v55  }
  0x7c   : > { %658 = vperm.xlu0 %5362, %v505_v56  }
  0x7f   : > { %1045 = vperm.xlu1 %5363, %v954_v57  }
  0x80   : > { %1042 = vperm.xlu0 %5362, %v953_v58  }
  0x83   : > { %1141 = vperm.xlu1 %5363, %v986_v59  }
  0x84   : > { %1138 = vperm.xlu0 %5362, %v985_v60  }
  0x87   : > { %571 = vperm.xlu1 %5363, %v476_v61  }
  0x88   : > { %568 = vperm.xlu0 %5362, %v475_v62  }
  0x8b   : > { %667 = vperm.xlu1 %5363, %v508_v63   ;;  %v992_v63 = vld [vmem:[%s5609_s28 + $0x198] sm:$0xff] }
  0x8c   : > { %664 = vperm.xlu0 %5362, %v507_v0   ;;  %v991_v0 = vld [vmem:[%s5609_s28 + $0x190] sm:$0xff] }
  0x8f   : > { %1051 = vperm.xlu1 %5363, %v956_v1  }
  0x90   : > { %1048 = vperm.xlu0 %5362, %v955_v2  }
  0x92   : > { %v623_v6 = vpop.permute.xlu1 %622 }
  0x93   : > { %v527_v7 = vpop.permute.xlu0 %526  ;;  %1147 = vperm.xlu1 %5363, %v988_v3   ;;  %vm749_vm5 = vcmp.eq.s32.totalorder %v5685_v10, %v623_v6  ;;  %v482_v6 = vld [vmem:[%s5600_s25 + $0xa8] sm:$0xff] }
  0x94   : > { %1144 = vperm.xlu0 %5362, %v987_v4   ;;  %vm717_vm1 = vcmp.eq.s32.totalorder %v5685_v10, %v527_v7  ;;  %v4185_v30 = vsel %vm749_vm5, 1.0, %v5491_v15  ;;  %v481_v7 = vld [vmem:[%s5600_s25 + $0xa0] sm:$0xff] }
  0x95   : > { %v4153_v19 = vsel %vm717_vm1, 1.0, %v5491_v15 }
  0x96   : > { %v626_v11 = vpop.permute.xlu1 %625 }
  0x97   : > { %v530_v12 = vpop.permute.xlu0 %529  ;;  %577 = vperm.xlu1 %5363, %v478_v8   ;;  %vm750_vm2 = vcmp.eq.s32.totalorder %v5685_v10, %v626_v11  ;;  %v514_v11 = vld [vmem:[%s5600_s25 + $0x1a8] sm:$0xff] }
  0x98   : > { %vm718_vm0 = vcmp.eq.s32.totalorder %v5685_v10, %v530_v12  ;;  %574 = vperm.xlu0 %5362, %v477_v9   ;;  %v4186_v26 = vsel %vm750_vm2, 1.0, %v5491_v15  ;;  %v513_v12 = vld [vmem:[%s5600_s25 + $0x1a0] sm:$0xff] }
  0x99   : > { %v4154_v16 = vsel %vm718_vm0, 1.0, %v5491_v15  ;;  %v925_v35 = vpack.c.bf16 %v4186_v26, %v4185_v30 }
  0x9a   : > { %v1010_v17 = vpop.permute.xlu1 %1009  ;;  %v909_v24 = vpack.c.bf16 %v4154_v16, %v4153_v19 }
  0x9b   : > { %v1007_v18 = vpop.permute.xlu0 %1006  ;;  %vm1198_vm3 = vcmp.eq.s32.totalorder %v5685_v10, %v1010_v17  ;;  %673 = vperm.xlu1 %5363, %v510_v13  }
  0x9c   : > { %vm1197_vm4 = vcmp.eq.s32.totalorder %v5685_v10, %v1007_v18  ;;  %670 = vperm.xlu0 %5362, %v509_v14   ;;  %v4218_v20 = vsel %vm1198_vm3, 1.0, %v5491_v15 }
  0x9d   : > { %v4217_v21 = vsel %vm1197_vm4, 1.0, %v5491_v15 }
  0x9e   : > { %v5701_v25 = vpack.c.bf16 %v4218_v20, %v4217_v21  ;;  %v1106_v27 = vpop.permute.xlu1 %1105  ;;  %v962_v20 = vld [vmem:[%s5609_s28 + $0xa8] sm:$0xff]  ;;  %v961_v21 = vld [vmem:[%s5609_s28 + $0xa0] sm:$0xff] }
  0x9f   : > { %v1103_v28 = vpop.permute.xlu0 %1102  ;;  %vm1230_vm7 = vcmp.eq.s32.totalorder %v5685_v10, %v1106_v27  ;;  %1057 = vperm.xlu1 %5363, %v958_v22  }
  0xa0   : > { %vm1229_vm8 = vcmp.eq.s32.totalorder %v5685_v10, %v1103_v28  ;;  %1054 = vperm.xlu0 %5362, %v957_v23   ;;  %v1421_v29 = vadd.bf16 %v5701_v25, %v909_v24  ;;  %v4250_v31 = vsel %vm1230_vm7, 1.0, %v5491_v15 }
  0xa1   : > { %v4249_v32 = vsel %vm1229_vm8, 1.0, %v5491_v15 }
  0xa2   : > { %4935 = vmatprep.mubr.msk.bf16.mxu0 %vm1485_vm6, %v1421_v29  ;;  %v5713_v36 = vpack.c.bf16 %v4250_v31, %v4249_v32  ;;  %v536_v37 = vpop.permute.xlu1 %535  ;;  %v994_v32 = vld [vmem:[%s5609_s28 + $0x1a8] sm:$0xff] }
  0xa3   : > { %v533_v38 = vpop.permute.xlu0 %532  ;;  %1153 = vperm.xlu1 %5363, %v990_v33   ;;  %vm720_vm9 = vcmp.eq.s32.totalorder %v5685_v10, %v536_v37  ;;  %v993_v33 = vld [vmem:[%s5609_s28 + $0x1a0] sm:$0xff] }
  0xa4   : > { %1150 = vperm.xlu0 %5362, %v989_v34   ;;  %v1437_v39 = vadd.bf16 %v5713_v36, %v925_v35  ;;  %vm719_vm10 = vcmp.eq.s32.totalorder %v5685_v10, %v533_v38  ;;  %v4156_v46 = vsel %vm720_vm9, 1.0, %v5491_v15 }
  0xa5   : > { %v4155_v47 = vsel %vm719_vm10, 1.0, %v5491_v15 }
  0xa6   : > { %4967 = vmatprep.mubr.msk.bf16.mxu1 %vm1485_vm6, %v1437_v39  ;;  %v632_v42 = vpop.permute.xlu1 %631  ;;  %v910_v54 = vpack.c.bf16 %v4156_v46, %v4155_v47 }
  0xa7   : > { %v629_v43 = vpop.permute.xlu0 %628  ;;  %583 = vperm.xlu1 %5363, %v480_v40   ;;  %vm752_vm11 = vcmp.eq.s32.totalorder %v5685_v10, %v632_v42  ;;  %v484_v40 = vld [vmem:[%s5600_s25 + $0xb8] sm:$0xff] }
  0xa8   : > { %580 = vperm.xlu0 %5362, %v479_v41   ;;  %vm751_vm12 = vcmp.eq.s32.totalorder %v5685_v10, %v629_v43  ;;  %v4188_v56 = vsel %vm752_vm11, 1.0, %v5491_v15  ;;  %v483_v41 = vld [vmem:[%s5600_s25 + $0xb0] sm:$0xff] }
  0xa9   : > { %v4187_v57 = vsel %vm751_vm12, 1.0, %v5491_v15 }
  0xaa   : > { %v1016_v48 = vpop.permute.xlu1 %1015  ;;  %v926_v1 = vpack.c.bf16 %v4188_v56, %v4187_v57 }
  0xab   : > { %v1013_v49 = vpop.permute.xlu0 %1012  ;;  %vm1200_vm13 = vcmp.eq.s32.totalorder %v5685_v10, %v1016_v48  ;;  %679 = vperm.xlu1 %5363, %v512_v44   ;;  %v516_v44 = vld [vmem:[%s5600_s25 + $0x1b8] sm:$0xff] }
  0xac   : > { %vm1199_vm14 = vcmp.eq.s32.totalorder %v5685_v10, %v1013_v49  ;;  %676 = vperm.xlu0 %5362, %v511_v45   ;;  %v4220_v50 = vsel %vm1200_vm13, 1.0, %v5491_v15  ;;  %v515_v45 = vld [vmem:[%s5600_s25 + $0x1b0] sm:$0xff] }
  0xad   : > { %v4219_v51 = vsel %vm1199_vm14, 1.0, %v5491_v15 }
  0xae   : > { %v5733_v55 = vpack.c.bf16 %v4220_v50, %v4219_v51  ;;  %v1112_v58 = vpop.permute.xlu1 %1111 }
  0xaf   : > { %v1109_v59 = vpop.permute.xlu0 %1108  ;;  %vm1232_vm15 = vcmp.eq.s32.totalorder %v5685_v10, %v1112_v58  ;;  %1063 = vperm.xlu1 %5363, %v960_v52   ;;  %v964_v52 = vld [vmem:[%s5609_s28 + $0xb8] sm:$0xff] }
  0xb0   : > { %v1422_v60 = vadd.bf16 %v5733_v55, %v910_v54  ;;  %vm1231_vm0 = vcmp.eq.s32.totalorder %v5685_v10, %v1109_v59  ;;  %1060 = vperm.xlu0 %5362, %v959_v53   ;;  %v4252_v61 = vsel %vm1232_vm15, 1.0, %v5491_v15  ;;  %v963_v53 = vld [vmem:[%s5609_s28 + $0xb0] sm:$0xff] }
  0xb1   : > { %v4251_v62 = vsel %vm1231_vm0, 1.0, %v5491_v15 }
  0xb2   : > { %v5744_v2 = vpack.c.bf16 %v4252_v61, %v4251_v62  ;;  %4936 = vmatmul.mubr.msk.bf16.vlgmr.msra.gmra.mxu0 %vm1485_vm6, %v1422_v60  ;;  %v542_v3 = vpop.permute.xlu1 %541 }
  0xb3   : > { %v539_v4 = vpop.permute.xlu0 %538  ;;  %1159 = vperm.xlu1 %5363, %v992_v63   ;;  %vm722_vm1 = vcmp.eq.s32.totalorder %v5685_v10, %v542_v3 }
  0xb4   : > { %v1438_v5 = vadd.bf16 %v5744_v2, %v926_v1  ;;  %1156 = vperm.xlu0 %5362, %v991_v0   ;;  %vm721_vm2 = vcmp.eq.s32.totalorder %v5685_v10, %v539_v4  ;;  %v4158_v13 = vsel %vm722_vm1, 1.0, %v5491_v15  ;;  %v996_v0 = vld [vmem:[%s5609_s28 + $0x1b8] sm:$0xff]  ;;  %v995_v1 = vld [vmem:[%s5609_s28 + $0x1b0] sm:$0xff] }
  0xb5   : > { %v4157_v14 = vsel %vm721_vm2, 1.0, %v5491_v15 }
  0xb6   : > { %4968 = vmatmul.mubr.msk.bf16.vlgmr.msra.gmra.mxu1 %vm1485_vm6, %v1438_v5  ;;  %v638_v8 = vpop.permute.xlu1 %637  ;;  %v911_v22 = vpack.c.bf16 %v4158_v13, %v4157_v14  ;;  %v518_v13 = vld [vmem:[%s5600_s25 + $0x1c8] sm:$0xff]  ;;  %v517_v14 = vld [vmem:[%s5600_s25 + $0x1c0] sm:$0xff] }
  0xb7   : > { %v635_v9 = vpop.permute.xlu0 %634  ;;  %589 = vperm.xlu1 %5363, %v482_v6   ;;  %vm754_vm3 = vcmp.eq.s32.totalorder %v5685_v10, %v638_v8  ;;  %v486_v8 = vld [vmem:[%s5600_s25 + $0xc8] sm:$0xff] }
  0xb8   : > { %586 = vperm.xlu0 %5362, %v481_v7   ;;  %vm753_vm4 = vcmp.eq.s32.totalorder %v5685_v10, %v635_v9  ;;  %v4190_v24 = vsel %vm754_vm3, 1.0, %v5491_v15  ;;  %v485_v9 = vld [vmem:[%s5600_s25 + $0xc0] sm:$0xff] }
  0xb9   : > { %v4189_v26 = vsel %vm753_vm4, 1.0, %v5491_v15 }
  0xba   : > { %v1022_v16 = vpop.permute.xlu1 %1021  ;;  %v927_v34 = vpack.c.bf16 %v4190_v24, %v4189_v26  ;;  %v965_v24 = vld [vmem:[%s5609_s28 + $0xc0] sm:$0xff] }
  0xbb   : > { %v1019_v17 = vpop.permute.xlu0 %1018  ;;  %vm1202_vm5 = vcmp.eq.s32.totalorder %v5685_v10, %v1022_v16  ;;  %685 = vperm.xlu1 %5363, %v514_v11  }
  0xbc   : > { %vm1201_vm7 = vcmp.eq.s32.totalorder %v5685_v10, %v1019_v17  ;;  %682 = vperm.xlu0 %5362, %v513_v12   ;;  %v4222_v18 = vsel %vm1202_vm5, 1.0, %v5491_v15 }
  0xbd   : > { %v4221_v19 = vsel %vm1201_vm7, 1.0, %v5491_v15 }
  0xbe   : > { %v5765_v23 = vpack.c.bf16 %v4222_v18, %v4221_v19  ;;  %v1118_v27 = vpop.permute.xlu1 %1117 }
  0xbf   : > { %v1115_v28 = vpop.permute.xlu0 %1114  ;;  %vm1234_vm8 = vcmp.eq.s32.totalorder %v5685_v10, %v1118_v27  ;;  %1069 = vperm.xlu1 %5363, %v962_v20  }
  0xc0   : > { %v1423_v29 = vadd.bf16 %v5765_v23, %v911_v22  ;;  %vm1233_vm9 = vcmp.eq.s32.totalorder %v5685_v10, %v1115_v28  ;;  %1066 = vperm.xlu0 %5362, %v961_v21   ;;  %v4254_v30 = vsel %vm1234_vm8, 1.0, %v5491_v15  ;;  %v966_v22 = vld [vmem:[%s5609_s28 + $0xc8] sm:$0xff] }
  0xc1   : > { %v4253_v31 = vsel %vm1233_vm9, 1.0, %v5491_v15 }
  0xc2   : > { %v5776_v35 = vpack.c.bf16 %v4254_v30, %v4253_v31  ;;  %4939 = vmatprep.mubr.msk.bf16.mxu0 %vm1485_vm6, %v1423_v29  ;;  %v548_v37 = vpop.permute.xlu1 %547 }
  0xc3   : > { %v545_v38 = vpop.permute.xlu0 %544  ;;  %1165 = vperm.xlu1 %5363, %v994_v32   ;;  %vm724_vm10 = vcmp.eq.s32.totalorder %v5685_v10, %v548_v37 }
  0xc4   : > { %v1439_v39 = vadd.bf16 %v5776_v35, %v927_v34  ;;  %1162 = vperm.xlu0 %5362, %v993_v33   ;;  %vm723_vm11 = vcmp.eq.s32.totalorder %v5685_v10, %v545_v38  ;;  %v4160_v46 = vsel %vm724_vm10, 1.0, %v5491_v15  ;;  %v5368_v33 = vld [vmem:[%s6721_s3 + $0x18] sm:$0xff]  }
  0xc5   : > { %v4159_v47 = vsel %vm723_vm11, 1.0, %v5491_v15  ;;  %v5369_v34 = vld [vmem:[%s6719_s1 + $0x38] sm:$0xff]   ;;  %4999 = vmatprep.subr.bf16.mxu1 %v5368_v33 }
  0xc6   : > { %4971 = vmatprep.mubr.msk.bf16.mxu1 %vm1485_vm6, %v1439_v39  ;;  %v644_v42 = vpop.permute.xlu1 %643  ;;  %v912_v54 = vpack.c.bf16 %v4160_v46, %v4159_v47  ;;  %v998_v39 = vld [vmem:[%s5609_s28 + $0x1c8] sm:$0xff]  ;;  %5071 = vmatprep.subr.bf16.mxu0 %v5369_v34  ;;  %v488_v46 = vld [vmem:[%s5600_s25 + $0xd8] sm:$0xff]  ;;  %v487_v47 = vld [vmem:[%s5600_s25 + $0xd0] sm:$0xff] }
  0xc7   : > { %v641_v43 = vpop.permute.xlu0 %640  ;;  %595 = vperm.xlu1 %5363, %v484_v40   ;;  %vm756_vm12 = vcmp.eq.s32.totalorder %v5685_v10, %v644_v42  ;;  %v997_v40 = vld [vmem:[%s5609_s28 + $0x1c0] sm:$0xff]  ;;  %5000 = vmatpush3.bf16.msra.mxu1 %v5368_v33 }
  0xc8   : > { %592 = vperm.xlu0 %5362, %v483_v41   ;;  %vm755_vm13 = vcmp.eq.s32.totalorder %v5685_v10, %v641_v43  ;;  %v4192_v57 = vsel %vm756_vm12, 1.0, %v5491_v15  ;;  %5072 = vmatpush3.bf16.msra.mxu0 %v5369_v34 }
  0xc9   : > { %v4191_v58 = vsel %vm755_vm13, 1.0, %v5491_v15 }
  0xca   : > { %v1028_v48 = vpop.permute.xlu1 %1027  ;;  %v928_v3 = vpack.c.bf16 %v4192_v57, %v4191_v58 }
  0xcb   : > { %v1025_v49 = vpop.permute.xlu0 %1024  ;;  %vm1204_vm14 = vcmp.eq.s32.totalorder %v5685_v10, %v1028_v48  ;;  %691 = vperm.xlu1 %5363, %v516_v44   ;;  %v5370_v48 = vld [vmem:[%s6719_s1 + $0x30] sm:$0xff]  }
  0xcc   : > { %vm1203_vm15 = vcmp.eq.s32.totalorder %v5685_v10, %v1025_v49  ;;  %688 = vperm.xlu0 %5362, %v515_v45   ;;  %v4224_v50 = vsel %vm1204_vm14, 1.0, %v5491_v15  ;;  %5073 = vmatprep.subr.bf16.mxu0 %v5370_v48 }
  0xcd   : > { %v4223_v51 = vsel %vm1203_vm15, 1.0, %v5491_v15  ;;  %5074 = vmatpush3.bf16.msra.mxu0 %v5370_v48 }
  0xce   : > { %v5797_v56 = vpack.c.bf16 %v4224_v50, %v4223_v51  ;;  %v1124_v59 = vpop.permute.xlu1 %1123  ;;  %v520_v51 = vld [vmem:[%s5600_s25 + $0x1d8] sm:$0xff] }
  0xcf   : > { %v1121_v60 = vpop.permute.xlu0 %1120  ;;  %vm1236_vm0 = vcmp.eq.s32.totalorder %v5685_v10, %v1124_v59  ;;  %1075 = vperm.xlu1 %5363, %v964_v52   ;;  %v519_v52 = vld [vmem:[%s5600_s25 + $0x1d0] sm:$0xff] }
  0xd0   : > { %v1424_v61 = vadd.bf16 %v5797_v56, %v912_v54  ;;  %vm1235_vm1 = vcmp.eq.s32.totalorder %v5685_v10, %v1121_v60  ;;  %1072 = vperm.xlu0 %5362, %v963_v53   ;;  %v4256_v62 = vsel %vm1236_vm0, 1.0, %v5491_v15 }
  0xd1   : > { %v4255_v63 = vsel %vm1235_vm1, 1.0, %v5491_v15 }
  0xd2   : > { %v5808_v4 = vpack.c.bf16 %v4256_v62, %v4255_v63  ;;  %4940 = vmatmul.mubr.msk.bf16.gmra.mxu0 %vm1485_vm6, %v1424_v61  ;;  %v554_v5 = vpop.permute.xlu1 %553  ;;  %v968_v61 = vld [vmem:[%s5609_s28 + $0xd8] sm:$0xff]  ;;  %v967_v62 = vld [vmem:[%s5609_s28 + $0xd0] sm:$0xff] }
  0xd3   : > { %v551_v6 = vpop.permute.xlu0 %550  ;;  %1171 = vperm.xlu1 %5363, %v996_v0   ;;  %vm726_vm2 = vcmp.eq.s32.totalorder %v5685_v10, %v554_v5 }
  0xd4   : > { %v1440_v7 = vadd.bf16 %v5808_v4, %v928_v3  ;;  %1168 = vperm.xlu0 %5362, %v995_v1   ;;  %vm725_vm3 = vcmp.eq.s32.totalorder %v5685_v10, %v551_v6  ;;  %v4162_v16 = vsel %vm726_vm2, 1.0, %v5491_v15 }
  0xd5   : > { %v4161_v17 = vsel %vm725_vm3, 1.0, %v5491_v15 }
  0xd6   : > { %4972 = vmatmul.mubr.msk.bf16.gmra.mxu1 %vm1485_vm6, %v1440_v7  ;;  %v650_v11 = vpop.permute.xlu1 %649  ;;  %v913_v26 = vpack.c.bf16 %v4162_v16, %v4161_v17 }
  0xd7   : > { %v647_v12 = vpop.permute.xlu0 %646  ;;  %601 = vperm.xlu1 %5363, %v486_v8   ;;  %vm758_vm4 = vcmp.eq.s32.totalorder %v5685_v10, %v650_v11  ;;  %v5371_v8 = vld [vmem:[%s6721_s3 + $0x10] sm:$0xff]  }
  0xd8   : > { %598 = vperm.xlu0 %5362, %v485_v9   ;;  %vm757_vm5 = vcmp.eq.s32.totalorder %v5685_v10, %v647_v12  ;;  %v4194_v28 = vsel %vm758_vm4, 1.0, %v5491_v15  ;;  %v5372_v9 = vld [vmem:[%s6719_s1 + $0x28] sm:$0xff]   ;;  %5001 = vmatprep.subr.bf16.mxu1 %v5371_v8 }
  0xd9   : > { %v4193_v29 = vsel %vm757_vm5, 1.0, %v5491_v15  ;;  %5075 = vmatprep.subr.bf16.mxu0 %v5372_v9  ;;  %5002 = vmatpush3.bf16.msra.mxu1 %v5371_v8 }
  0xda   : > { %v1034_v18 = vpop.permute.xlu1 %1033  ;;  %v929_v41 = vpack.c.bf16 %v4194_v28, %v4193_v29  ;;  %5076 = vmatpush3.bf16.msra.mxu0 %v5372_v9  ;;  %v522_v29 = vld [vmem:[%s5600_s25 + $0x1e8] sm:$0xff] }
  0xdb   : > { %v1031_v19 = vpop.permute.xlu0 %1030  ;;  %vm1206_vm7 = vcmp.eq.s32.totalorder %v5685_v10, %v1034_v18  ;;  %697 = vperm.xlu1 %5363, %v518_v13   ;;  %v1000_v13 = vld [vmem:[%s5609_s28 + $0x1d8] sm:$0xff] }
  0xdc   : > { %vm1205_vm8 = vcmp.eq.s32.totalorder %v5685_v10, %v1031_v19  ;;  %694 = vperm.xlu0 %5362, %v517_v14   ;;  %v4226_v20 = vsel %vm1206_vm7, 1.0, %v5491_v15  ;;  %v999_v14 = vld [vmem:[%s5609_s28 + $0x1d0] sm:$0xff] }
  0xdd   : > { %v4225_v21 = vsel %vm1205_vm8, 1.0, %v5491_v15 }
  0xde   : > { %v5829_v27 = vpack.c.bf16 %v4226_v20, %v4225_v21  ;;  %v1130_v30 = vpop.permute.xlu1 %1129  ;;  %v490_v21 = vld [vmem:[%s5600_s25 + $0xe8] sm:$0xff] }
  0xdf   : > { %v1127_v31 = vpop.permute.xlu0 %1126  ;;  %vm1238_vm9 = vcmp.eq.s32.totalorder %v5685_v10, %v1130_v30  ;;  %1081 = vperm.xlu1 %5363, %v966_v22   ;;  %v489_v22 = vld [vmem:[%s5600_s25 + $0xe0] sm:$0xff] }
  0xe0   : > { %v1425_v32 = vadd.bf16 %v5829_v27, %v913_v26  ;;  %vm1237_vm10 = vcmp.eq.s32.totalorder %v5685_v10, %v1127_v31  ;;  %1078 = vperm.xlu0 %5362, %v965_v24   ;;  %v4258_v37 = vsel %vm1238_vm9, 1.0, %v5491_v15  ;;  %v5373_v24 = vld [vmem:[%s6719_s1 + $0x20] sm:$0xff]  }
  0xe1   : > { %v4257_v38 = vsel %vm1237_vm10, 1.0, %v5491_v15  ;;  %v521_v30 = vld [vmem:[%s5600_s25 + $0x1e0] sm:$0xff]  ;;  %5077 = vmatprep.subr.bf16.mxu0 %v5373_v24 }
  0xe2   : > { %v5846_v42 = vpack.c.bf16 %v4258_v37, %v4257_v38  ;;  %4943 = vmatprep.mubr.msk.bf16.mxu0 %vm1485_vm6, %v1425_v32  ;;  %v560_v43 = vpop.permute.xlu1 %559  ;;  %5078 = vmatpush3.bf16.msra.mxu0 %v5373_v24 }
  0xe3   : > { %v557_v44 = vpop.permute.xlu0 %556  ;;  %1177 = vperm.xlu1 %5363, %v998_v39   ;;  %vm728_vm11 = vcmp.eq.s32.totalorder %v5685_v10, %v560_v43  ;;  %v970_v39 = vld [vmem:[%s5609_s28 + $0xe8] sm:$0xff] }
  0xe4   : > { %v1441_v45 = vadd.bf16 %v5846_v42, %v929_v41  ;;  %1174 = vperm.xlu0 %5362, %v997_v40   ;;  %vm727_vm12 = vcmp.eq.s32.totalorder %v5685_v10, %v557_v44  ;;  %v4164_v53 = vsel %vm728_vm11, 1.0, %v5491_v15  ;;  %v969_v40 = vld [vmem:[%s5609_s28 + $0xe0] sm:$0xff] }
  0xe5   : > { %v4163_v54 = vsel %vm727_vm12, 1.0, %v5491_v15 }
  0xe6   : > { %4975 = vmatprep.mubr.msk.bf16.mxu1 %vm1485_vm6, %v1441_v45  ;;  %v656_v49 = vpop.permute.xlu1 %655  ;;  %v914_v63 = vpack.c.bf16 %v4164_v53, %v4163_v54  ;;  %v1002_v53 = vld [vmem:[%s5609_s28 + $0x1e8] sm:$0xff]  ;;  %v1001_v54 = vld [vmem:[%s5609_s28 + $0x1e0] sm:$0xff] }
  0xe7   : > { %v653_v50 = vpop.permute.xlu0 %652  ;;  %607 = vperm.xlu1 %5363, %v488_v46   ;;  %vm760_vm13 = vcmp.eq.s32.totalorder %v5685_v10, %v656_v49  ;;  %v5374_v49 = vld [vmem:[%s6721_s3 + $0x8] sm:$0xff]  }
  0xe8   : > { %604 = vperm.xlu0 %5362, %v487_v47   ;;  %vm759_vm14 = vcmp.eq.s32.totalorder %v5685_v10, %v653_v50  ;;  %v4196_v1 = vsel %vm760_vm13, 1.0, %v5491_v15  ;;  %v5375_v50 = vld [vmem:[%s6719_s1 + $0x18] sm:$0xff]   ;;  %5003 = vmatprep.subr.bf16.mxu1 %v5374_v49 }
  0xe9   : > { %v4195_v3 = vsel %vm759_vm14, 1.0, %v5491_v15  ;;  %5079 = vmatprep.subr.bf16.mxu0 %v5375_v50  ;;  %5004 = vmatpush3.bf16.msra.mxu1 %v5374_v49 }
  0xea   : > { %v1040_v57 = vpop.permute.xlu1 %1039  ;;  %v930_v16 = vpack.c.bf16 %v4196_v1, %v4195_v3  ;;  %5080 = vmatpush3.bf16.msra.mxu0 %v5375_v50  ;;  %v5376_v1 = vld [vmem:[%s6719_s1 + $0x10] sm:$0xff]  }
  0xeb   : > { %v1037_v58 = vpop.permute.xlu0 %1036  ;;  %vm1208_vm15 = vcmp.eq.s32.totalorder %v5685_v10, %v1040_v57  ;;  %703 = vperm.xlu1 %5363, %v520_v51   ;;  %5081 = vmatprep.subr.bf16.mxu0 %v5376_v1 }
  0xec   : > { %vm1207_vm0 = vcmp.eq.s32.totalorder %v5685_v10, %v1037_v58  ;;  %700 = vperm.xlu0 %5362, %v519_v52   ;;  %v4228_v59 = vsel %vm1208_vm15, 1.0, %v5491_v15 }
  0xed   : > { %v4227_v60 = vsel %vm1207_vm0, 1.0, %v5491_v15 }
  0xee   : > { %v5870_v0 = vpack.c.bf16 %v4228_v59, %v4227_v60  ;;  %v1136_v5 = vpop.permute.xlu1 %1135  ;;  %5082 = vmatpush3.bf16.msra.mxu0 %v5376_v1 }
  0xef   : > { %v1133_v6 = vpop.permute.xlu0 %1132  ;;  %vm1240_vm1 = vcmp.eq.s32.totalorder %v5685_v10, %v1136_v5  ;;  %1087 = vperm.xlu1 %5363, %v968_v61  }
  0xf0   : > { %v1426_v7 = vadd.bf16 %v5870_v0, %v914_v63  ;;  %vm1239_vm2 = vcmp.eq.s32.totalorder %v5685_v10, %v1133_v6  ;;  %1084 = vperm.xlu0 %5362, %v967_v62   ;;  %v4260_v11 = vsel %vm1240_vm1, 1.0, %v5491_v15  ;;  %v492_v62 = vld [vmem:[%s5600_s25 + $0xf8] sm:$0xff]  ;;  %v491_v63 = vld [vmem:[%s5600_s25 + $0xf0] sm:$0xff] }
  0xf1   : > { %v4259_v12 = vsel %vm1239_vm2, 1.0, %v5491_v15  ;;  %v524_v6 = vld [vmem:[%s5600_s25 + $0x1f8] sm:$0xff] }
  0xf2   : > { %v5887_v17 = vpack.c.bf16 %v4260_v11, %v4259_v12  ;;  %4944 = vmatmul.mubr.msk.bf16.gmra.mxu0 %vm1485_vm6, %v1426_v7  ;;  %v566_v18 = vpop.permute.xlu1 %565  ;;  %v523_v7 = vld [vmem:[%s5600_s25 + $0x1f0] sm:$0xff] }
  0xf3   : > { %v563_v19 = vpop.permute.xlu0 %562  ;;  %1183 = vperm.xlu1 %5363, %v1000_v13   ;;  %vm730_vm3 = vcmp.eq.s32.totalorder %v5685_v10, %v566_v18  ;;  %v971_v18 = vld [vmem:[%s5609_s28 + $0xf0] sm:$0xff] }
  0xf4   : > { %v1442_v20 = vadd.bf16 %v5887_v17, %v930_v16  ;;  %1180 = vperm.xlu0 %5362, %v999_v14   ;;  %vm729_vm4 = vcmp.eq.s32.totalorder %v5685_v10, %v563_v19  ;;  %v4166_v31 = vsel %vm730_vm3, 1.0, %v5491_v15  ;;  %v972_v16 = vld [vmem:[%s5609_s28 + $0xf8] sm:$0xff] }
  0xf5   : > { %v4165_v32 = vsel %vm729_vm4, 1.0, %v5491_v15 }
  0xf6   : > { %4976 = vmatmul.mubr.msk.bf16.gmra.mxu1 %vm1485_vm6, %v1442_v20  ;;  %v662_v26 = vpop.permute.xlu1 %661  ;;  %v915_v41 = vpack.c.bf16 %v4166_v31, %v4165_v32 }
  0xf7   : > { %v659_v28 = vpop.permute.xlu0 %658  ;;  %613 = vperm.xlu1 %5363, %v490_v21   ;;  %vm762_vm5 = vcmp.eq.s32.totalorder %v5685_v10, %v662_v26 }
  0xf8   : > { %610 = vperm.xlu0 %5362, %v489_v22   ;;  %vm761_vm7 = vcmp.eq.s32.totalorder %v5685_v10, %v659_v28  ;;  %v4198_v44 = vsel %vm762_vm5, 1.0, %v5491_v15 }
  0xf9   : > { %v4197_v45 = vsel %vm761_vm7, 1.0, %v5491_v15 }
  0xfa   : > { %v1046_v33 = vpop.permute.xlu1 %1045  ;;  %v931_v57 = vpack.c.bf16 %v4198_v44, %v4197_v45  ;;  %v5379_v44 = vld [vmem:[%s6719_s1] sm:$0xff]  }
  0xfb   : > { %v1043_v34 = vpop.permute.xlu0 %1042  ;;  %vm1210_vm8 = vcmp.eq.s32.totalorder %v5685_v10, %v1046_v33  ;;  %709 = vperm.xlu1 %5363, %v522_v29   ;;  %v5377_v29 = vld [vmem:[%s6721_s3] sm:$0xff]   ;;  %v1004_v33 = vld [vmem:[%s5609_s28 + $0x1f8] sm:$0xff] }
  0xfc   : > { %vm1209_vm9 = vcmp.eq.s32.totalorder %v5685_v10, %v1043_v34  ;;  %706 = vperm.xlu0 %5362, %v521_v30   ;;  %v4230_v37 = vsel %vm1210_vm8, 1.0, %v5491_v15  ;;  %v5378_v30 = vld [vmem:[%s6719_s1 + $0x8] sm:$0xff]   ;;  %v1003_v34 = vld [vmem:[%s5609_s28 + $0x1f0] sm:$0xff]  ;;  %5005 = vmatprep.subr.bf16.mxu1 %v5377_v29  ;;  %s4148_s28 = sshll.u32 %s6735_s21, 2  ;;  %s5434_s21 = scalar_lea.vmem %s5433_s23, 8192 }
  0xfd   : > { %v4229_v38 = vsel %vm1209_vm9, 1.0, %v5491_v15  ;;  %5083 = vmatprep.subr.bf16.mxu0 %v5378_v30  ;;  %5006 = vmatpush3.bf16.msra.mxu1 %v5377_v29  ;;  %s5983_s24 = scalar_lea.vmem %s6718_s0, %s4148_s28 }
  0xfe   : > { %v5911_v43 = vpack.c.bf16 %v4230_v37, %v4229_v38  ;;  %v1142_v46 = vpop.permute.xlu1 %1141  ;;  %5084 = vmatpush3.bf16.msra.mxu0 %v5378_v30 }
  0xff   : > { %v1139_v47 = vpop.permute.xlu0 %1138  ;;  %vm1242_vm10 = vcmp.eq.s32.totalorder %v5685_v10, %v1142_v46  ;;  %1093 = vperm.xlu1 %5363, %v970_v39   ;;  %5085 = vmatprep.subr.bf16.mxu0 %v5379_v44 }
 0x100   : > { %v1427_v48 = vadd.bf16 %v5911_v43, %v915_v41  ;;  %vm1241_vm11 = vcmp.eq.s32.totalorder %v5685_v10, %v1139_v47  ;;  %1090 = vperm.xlu0 %5362, %v969_v40   ;;  %v4262_v51 = vsel %vm1242_vm10, 1.0, %v5491_v15 }
 0x101   : > { %v4261_v52 = vsel %vm1241_vm11, 1.0, %v5491_v15 }
 0x102   : > { %v5928_v58 = vpack.c.bf16 %v4262_v51, %v4261_v52  ;;  %4947 = vmatprep.mubr.msk.bf16.mxu0 %vm1485_vm6, %v1427_v48  ;;  %v572_v59 = vpop.permute.xlu1 %571  ;;  %5086 = vmatpush3.bf16.msra.mxu0 %v5379_v44 }
 0x103   : > { %v569_v60 = vpop.permute.xlu0 %568  ;;  %1189 = vperm.xlu1 %5363, %v1002_v53   ;;  %vm732_vm12 = vcmp.eq.s32.totalorder %v5685_v10, %v572_v59 }
 0x104   : > { %v1443_v61 = vadd.bf16 %v5928_v58, %v931_v57  ;;  %1186 = vperm.xlu0 %5362, %v1001_v54   ;;  %vm731_vm13 = vcmp.eq.s32.totalorder %v5685_v10, %v569_v60  ;;  %v4168_v8 = vsel %vm732_vm12, 1.0, %v5491_v15 }
 0x105   : > { %v4167_v9 = vsel %vm731_vm13, 1.0, %v5491_v15 }
 0x106   : > { %4979 = vmatprep.mubr.msk.bf16.mxu1 %vm1485_vm6, %v1443_v61  ;;  %v668_v3 = vpop.permute.xlu1 %667  ;;  %v916_v19 = vpack.c.bf16 %v4168_v8, %v4167_v9 }
 0x107   : > { %v665_v5 = vpop.permute.xlu0 %664  ;;  %619 = vperm.xlu1 %5363, %v492_v62   ;;  %vm764_vm14 = vcmp.eq.s32.totalorder %v5685_v10, %v668_v3 }
 0x108   : > { %616 = vperm.xlu0 %5362, %v491_v63   ;;  %vm763_vm15 = vcmp.eq.s32.totalorder %v5685_v10, %v665_v5  ;;  %v4200_v21 = vsel %vm764_vm14, 1.0, %v5491_v15 }
 0x109   : > { %v4199_v22 = vsel %vm763_vm15, 1.0, %v5491_v15 }
 0x10a   : > { %v1052_v11 = vpop.permute.xlu1 %1051  ;;  %v932_v37 = vpack.c.bf16 %v4200_v21, %v4199_v22 }
 0x10b   : > { %v1049_v12 = vpop.permute.xlu0 %1048  ;;  %vm1212_vm0 = vcmp.eq.s32.totalorder %v5685_v10, %v1052_v11  ;;  %715 = vperm.xlu1 %5363, %v524_v6  }
 0x10c   : > { %vm1211_vm1 = vcmp.eq.s32.totalorder %v5685_v10, %v1049_v12  ;;  %712 = vperm.xlu0 %5362, %v523_v7   ;;  %v4232_v13 = vsel %vm1212_vm0, 1.0, %v5491_v15 }
 0x10d   : > { %v4231_v14 = vsel %vm1211_vm1, 1.0, %v5491_v15 }
 0x10e   : > { %v5952_v20 = vpack.c.bf16 %v4232_v13, %v4231_v14  ;;  %v1148_v24 = vpop.permute.xlu1 %1147 }
 0x10f   : > { %v1145_v26 = vpop.permute.xlu0 %1144  ;;  %vm1244_vm2 = vcmp.eq.s32.totalorder %v5685_v10, %v1148_v24  ;;  %1099 = vperm.xlu1 %5363, %v972_v16  }
 0x110   : > { %v1428_v28 = vadd.bf16 %v5952_v20, %v916_v19  ;;  %vm1243_vm3 = vcmp.eq.s32.totalorder %v5685_v10, %v1145_v26  ;;  %1096 = vperm.xlu0 %5362, %v971_v18   ;;  %v4264_v31 = vsel %vm1244_vm2, 1.0, %v5491_v15 }
 0x111   : > { %v4263_v32 = vsel %vm1243_vm3, 1.0, %v5491_v15 }
 0x112   : > { %v5969_v38 = vpack.c.bf16 %v4264_v31, %v4263_v32  ;;  %4948 = vmatmul.mubr.msk.bf16.gmra.mxu0 %vm1485_vm6, %v1428_v28  ;;  %v578_v39 = vpop.permute.xlu1 %577 }
 0x113   : > { %v575_v40 = vpop.permute.xlu0 %574  ;;  %1195 = vperm.xlu1 %5363, %v1004_v33   ;;  %vm734_vm4 = vcmp.eq.s32.totalorder %v5685_v10, %v578_v39 }
 0x114   : > { %v1444_v41 = vadd.bf16 %v5969_v38, %v932_v37  ;;  %1192 = vperm.xlu0 %5362, %v1003_v34   ;;  %vm733_vm5 = vcmp.eq.s32.totalorder %v5685_v10, %v575_v40  ;;  %v4170_v47 = vsel %vm734_vm4, 1.0, %v5491_v15 }
 0x115   : > { %v4169_v48 = vsel %vm733_vm5, 1.0, %v5491_v15 }
 0x116   : > { %4980 = vmatmul.mubr.msk.bf16.gmra.mxu1 %vm1485_vm6, %v1444_v41  ;;  %v674_v45 = vpop.permute.xlu1 %673  ;;  %v917_v53 = vpack.c.bf16 %v4170_v47, %v4169_v48 }
 0x117   : > { %v671_v46 = vpop.permute.xlu0 %670  ;;  %vm766_vm7 = vcmp.eq.s32.totalorder %v5685_v10, %v674_v45 }
 0x118   : > { %vm765_vm8 = vcmp.eq.s32.totalorder %v5685_v10, %v671_v46  ;;  %v4202_v57 = vsel %vm766_vm7, 1.0, %v5491_v15 }
 0x119   : > { %v4201_v59 = vsel %vm765_vm8, 1.0, %v5491_v15 }
 0x11a   : > { %v1058_v49 = vpop.permute.xlu1 %1057  ;;  %v933_v3 = vpack.c.bf16 %v4202_v57, %v4201_v59 }
 0x11b   : > { %v1055_v50 = vpop.permute.xlu0 %1054  ;;  %vm1214_vm9 = vcmp.eq.s32.totalorder %v5685_v10, %v1058_v49 }
 0x11c   : > { %vm1213_vm10 = vcmp.eq.s32.totalorder %v5685_v10, %v1055_v50  ;;  %v4234_v51 = vsel %vm1214_vm9, 1.0, %v5491_v15 }
 0x11d   : > { %v4233_v52 = vsel %vm1213_vm10, 1.0, %v5491_v15 }
 0x11e   : > { %v5993_v54 = vpack.c.bf16 %v4234_v51, %v4233_v52  ;;  %v1154_v60 = vpop.permute.xlu1 %1153 }
 0x11f   : > { %v1151_v61 = vpop.permute.xlu0 %1150  ;;  %vm1246_vm11 = vcmp.eq.s32.totalorder %v5685_v10, %v1154_v60 }
 0x120   : > { %v1429_v62 = vadd.bf16 %v5993_v54, %v917_v53  ;;  %vm1245_vm12 = vcmp.eq.s32.totalorder %v5685_v10, %v1151_v61  ;;  %v4266_v63 = vsel %vm1246_vm11, 1.0, %v5491_v15 }
 0x121   : > { %v4265_v1 = vsel %vm1245_vm12, 1.0, %v5491_v15 }
 0x122   : > { %v6002_v5 = vpack.c.bf16 %v4266_v63, %v4265_v1  ;;  %4951 = vmatprep.mubr.msk.bf16.mxu0 %vm1485_vm6, %v1429_v62  ;;  %v584_v6 = vpop.permute.xlu1 %583 }
 0x123   : > { %v581_v7 = vpop.permute.xlu0 %580  ;;  %vm736_vm13 = vcmp.eq.s32.totalorder %v5685_v10, %v584_v6 }
 0x124   : > { %v1445_v8 = vadd.bf16 %v6002_v5, %v933_v3  ;;  %vm735_vm14 = vcmp.eq.s32.totalorder %v5685_v10, %v581_v7  ;;  %v4172_v12 = vsel %vm736_vm13, 1.0, %v5491_v15 }
 0x125   : > { %v4171_v13 = vsel %vm735_vm14, 1.0, %v5491_v15 }
 0x126   : > { %4983 = vmatprep.mubr.msk.bf16.mxu1 %vm1485_vm6, %v1445_v8  ;;  %v680_v9 = vpop.permute.xlu1 %679  ;;  %v918_v21 = vpack.c.bf16 %v4172_v12, %v4171_v13 }
 0x127   : > { %v677_v11 = vpop.permute.xlu0 %676  ;;  %vm768_vm15 = vcmp.eq.s32.totalorder %v5685_v10, %v680_v9 }
 0x128   : > { %vm767_vm0 = vcmp.eq.s32.totalorder %v5685_v10, %v677_v11  ;;  %v4204_v24 = vsel %vm768_vm15, 1.0, %v5491_v15 }
 0x129   : > { %v4203_v26 = vsel %vm767_vm0, 1.0, %v5491_v15 }
 0x12a   : > { %v1064_v14 = vpop.permute.xlu1 %1063  ;;  %v934_v33 = vpack.c.bf16 %v4204_v24, %v4203_v26 }
 0x12b   : > { %v1061_v16 = vpop.permute.xlu0 %1060  ;;  %vm1216_vm1 = vcmp.eq.s32.totalorder %v5685_v10, %v1064_v14 }
 0x12c   : > { %vm1215_vm2 = vcmp.eq.s32.totalorder %v5685_v10, %v1061_v16  ;;  %v4236_v18 = vsel %vm1216_vm1, 1.0, %v5491_v15 }
 0x12d   : > { %v4235_v19 = vsel %vm1215_vm2, 1.0, %v5491_v15 }
 0x12e   : > { %v6017_v22 = vpack.c.bf16 %v4236_v18, %v4235_v19  ;;  %v1160_v28 = vpop.permute.xlu1 %1159 }
 0x12f   : > { %v1157_v29 = vpop.permute.xlu0 %1156  ;;  %vm1248_vm3 = vcmp.eq.s32.totalorder %v5685_v10, %v1160_v28 }
 0x130   : > { %v1430_v30 = vadd.bf16 %v6017_v22, %v918_v21  ;;  %vm1247_vm4 = vcmp.eq.s32.totalorder %v5685_v10, %v1157_v29  ;;  %v4268_v31 = vsel %vm1248_vm3, 1.0, %v5491_v15 }
 0x131   : > { %v4267_v32 = vsel %vm1247_vm4, 1.0, %v5491_v15 }
 0x132   : > { %v6026_v34 = vpack.c.bf16 %v4268_v31, %v4267_v32  ;;  %4952 = vmatmul.mubr.msk.bf16.gmra.mxu0 %vm1485_vm6, %v1430_v30  ;;  %v590_v37 = vpop.permute.xlu1 %589 }
 0x133   : > { %v587_v39 = vpop.permute.xlu0 %586  ;;  %vm738_vm5 = vcmp.eq.s32.totalorder %v5685_v10, %v590_v37 }
 0x134   : > { %v1446_v40 = vadd.bf16 %v6026_v34, %v934_v33  ;;  %vm737_vm7 = vcmp.eq.s32.totalorder %v5685_v10, %v587_v39  ;;  %v4174_v45 = vsel %vm738_vm5, 1.0, %v5491_v15 }
 0x135   : > { %v4173_v46 = vsel %vm737_vm7, 1.0, %v5491_v15 }
 0x136   : > { %4984 = vmatmul.mubr.msk.bf16.gmra.mxu1 %vm1485_vm6, %v1446_v40  ;;  %v686_v41 = vpop.permute.xlu1 %685  ;;  %v919_v51 = vpack.c.bf16 %v4174_v45, %v4173_v46 }
 0x137   : > { %v683_v44 = vpop.permute.xlu0 %682  ;;  %vm770_vm8 = vcmp.eq.s32.totalorder %v5685_v10, %v686_v41 }
 0x138   : > { %vm769_vm9 = vcmp.eq.s32.totalorder %v5685_v10, %v683_v44  ;;  %v4206_v53 = vsel %vm770_vm8, 1.0, %v5491_v15 }
 0x139   : > { %v4205_v57 = vsel %vm769_vm9, 1.0, %v5491_v15 }
 0x13a   : > { %v1070_v47 = vpop.permute.xlu1 %1069  ;;  %v935_v1 = vpack.c.bf16 %v4206_v53, %v4205_v57 }
 0x13b   : > { %v1067_v48 = vpop.permute.xlu0 %1066  ;;  %vm1218_vm10 = vcmp.eq.s32.totalorder %v5685_v10, %v1070_v47 }
 0x13c   : > { %vm1217_vm11 = vcmp.eq.s32.totalorder %v5685_v10, %v1067_v48  ;;  %v4238_v49 = vsel %vm1218_vm10, 1.0, %v5491_v15 }
 0x13d   : > { %v4237_v50 = vsel %vm1217_vm11, 1.0, %v5491_v15 }
 0x13e   : > { %v6041_v52 = vpack.c.bf16 %v4238_v49, %v4237_v50  ;;  %v1166_v59 = vpop.permute.xlu1 %1165 }
 0x13f   : > { %v1163_v60 = vpop.permute.xlu0 %1162  ;;  %vm1250_vm12 = vcmp.eq.s32.totalorder %v5685_v10, %v1166_v59 }
 0x140   : > { %v1431_v61 = vadd.bf16 %v6041_v52, %v919_v51  ;;  %vm1249_vm13 = vcmp.eq.s32.totalorder %v5685_v10, %v1163_v60  ;;  %v4270_v62 = vsel %vm1250_vm12, 1.0, %v5491_v15 }
 0x141   : > { %v4269_v63 = vsel %vm1249_vm13, 1.0, %v5491_v15 }
 0x142   : > { %v6050_v3 = vpack.c.bf16 %v4270_v62, %v4269_v63  ;;  %4955 = vmatprep.mubr.msk.bf16.mxu0 %vm1485_vm6, %v1431_v61  ;;  %v596_v6 = vpop.permute.xlu1 %595 }
 0x143   : > { %v593_v7 = vpop.permute.xlu0 %592  ;;  %vm740_vm14 = vcmp.eq.s32.totalorder %v5685_v10, %v596_v6 }
 0x144   : > { %v1447_v8 = vadd.bf16 %v6050_v3, %v935_v1  ;;  %vm739_vm15 = vcmp.eq.s32.totalorder %v5685_v10, %v593_v7  ;;  %v4176_v12 = vsel %vm740_vm14, 1.0, %v5491_v15 }
 0x145   : > { %v4175_v13 = vsel %vm739_vm15, 1.0, %v5491_v15 }
 0x146   : > { %4987 = vmatprep.mubr.msk.bf16.mxu1 %vm1485_vm6, %v1447_v8  ;;  %v692_v9 = vpop.permute.xlu1 %691  ;;  %v920_v21 = vpack.c.bf16 %v4176_v12, %v4175_v13 }
 0x147   : > { %v689_v11 = vpop.permute.xlu0 %688  ;;  %vm772_vm0 = vcmp.eq.s32.totalorder %v5685_v10, %v692_v9 }
 0x148   : > { %vm771_vm1 = vcmp.eq.s32.totalorder %v5685_v10, %v689_v11  ;;  %v4208_v26 = vsel %vm772_vm0, 1.0, %v5491_v15 }
 0x149   : > { %v4207_v28 = vsel %vm771_vm1, 1.0, %v5491_v15 }
 0x14a   : > { %v1076_v14 = vpop.permute.xlu1 %1075  ;;  %v936_v37 = vpack.c.bf16 %v4208_v26, %v4207_v28 }
 0x14b   : > { %v1073_v16 = vpop.permute.xlu0 %1072  ;;  %vm1220_vm2 = vcmp.eq.s32.totalorder %v5685_v10, %v1076_v14 }
 0x14c   : > { %vm1219_vm3 = vcmp.eq.s32.totalorder %v5685_v10, %v1073_v16  ;;  %v4240_v18 = vsel %vm1220_vm2, 1.0, %v5491_v15 }
 0x14d   : > { %v4239_v19 = vsel %vm1219_vm3, 1.0, %v5491_v15 }
 0x14e   : > { %v6065_v24 = vpack.c.bf16 %v4240_v18, %v4239_v19  ;;  %v1172_v29 = vpop.permute.xlu1 %1171  ;;  %v6106_v18 = vld [vmem:[%s6725_s7 + $0x38] sm:$0xff]  }
 0x14f   : > { %v1169_v30 = vpop.permute.xlu0 %1168  ;;  %vm1252_vm4 = vcmp.eq.s32.totalorder %v5685_v10, %v1172_v29  ;;  %v6111_v19 = vld [vmem:[%s6724_s6 + $0x38] sm:$0xff]   ;;  %5151 = vmatprep.subr.bf16.mxu1 %v6106_v18 }
 0x150   : > { %v1432_v31 = vadd.bf16 %v6065_v24, %v920_v21  ;;  %vm1251_vm5 = vcmp.eq.s32.totalorder %v5685_v10, %v1169_v30  ;;  %v4272_v32 = vsel %vm1252_vm4, 1.0, %v5491_v15  ;;  %5231 = vmatprep.subr.bf16.mxu0 %v6111_v19 }
 0x151   : > { %v4271_v33 = vsel %vm1251_vm5, 1.0, %v5491_v15 }
 0x152   : > { %v6074_v39 = vpack.c.bf16 %v4272_v32, %v4271_v33  ;;  %4956 = vmatmul.mubr.msk.bf16.gmra.mxu0 %vm1485_vm6, %v1432_v31  ;;  %v602_v40 = vpop.permute.xlu1 %601 }
 0x153   : > { %v599_v41 = vpop.permute.xlu0 %598  ;;  %vm742_vm7 = vcmp.eq.s32.totalorder %v5685_v10, %v602_v40 }
 0x154   : > { %v1448_v44 = vadd.bf16 %v6074_v39, %v936_v37  ;;  %vm741_vm8 = vcmp.eq.s32.totalorder %v5685_v10, %v599_v41  ;;  %v4178_v47 = vsel %vm742_vm7, 1.0, %v5491_v15 }
 0x155   : > { %v4177_v48 = vsel %vm741_vm8, 1.0, %v5491_v15 }
 0x156   : > { %4988 = vmatmul.mubr.msk.bf16.gmra.mxu1 %vm1485_vm6, %v1448_v44  ;;  %v698_v45 = vpop.permute.xlu1 %697  ;;  %v921_v57 = vpack.c.bf16 %v4178_v47, %v4177_v48 }
 0x157   : > { %v695_v46 = vpop.permute.xlu0 %694  ;;  %vm774_vm9 = vcmp.eq.s32.totalorder %v5685_v10, %v698_v45 }
 0x158   : > { %vm773_vm10 = vcmp.eq.s32.totalorder %v5685_v10, %v695_v46  ;;  %v4210_v60 = vsel %vm774_vm9, 1.0, %v5491_v15 }
 0x159   : > { %v4209_v61 = vsel %vm773_vm10, 1.0, %v5491_v15 }
 0x15a   : > { %v1082_v49 = vpop.permute.xlu1 %1081  ;;  %v937_v8 = vpack.c.bf16 %v4210_v60, %v4209_v61 }
 0x15b   : > { %v1079_v50 = vpop.permute.xlu0 %1078  ;;  %vm1222_vm11 = vcmp.eq.s32.totalorder %v5685_v10, %v1082_v49 }
 0x15c   : > { %vm1221_vm12 = vcmp.eq.s32.totalorder %v5685_v10, %v1079_v50  ;;  %v4242_v51 = vsel %vm1222_vm11, 1.0, %v5491_v15 }
 0x15d   : > { %v4241_v53 = vsel %vm1221_vm12, 1.0, %v5491_v15 }
 0x15e   : > { %v6089_v59 = vpack.c.bf16 %v4242_v51, %v4241_v53  ;;  %v1178_v62 = vpop.permute.xlu1 %1177 }
 0x15f   : > { %v1175_v63 = vpop.permute.xlu0 %1174  ;;  %vm1254_vm13 = vcmp.eq.s32.totalorder %v5685_v10, %v1178_v62 }
 0x160   : > { %v1433_v1 = vadd.bf16 %v6089_v59, %v921_v57  ;;  %vm1253_vm14 = vcmp.eq.s32.totalorder %v5685_v10, %v1175_v63  ;;  %v4274_v6 = vsel %vm1254_vm13, 1.0, %v5491_v15 }
 0x161   : > { %v4273_v7 = vsel %vm1253_vm14, 1.0, %v5491_v15 }
 0x162   : > { %v6098_v9 = vpack.c.bf16 %v4274_v6, %v4273_v7  ;;  %4959 = vmatprep.mubr.msk.bf16.mxu0 %vm1485_vm6, %v1433_v1  ;;  %v608_v11 = vpop.permute.xlu1 %607 }
 0x163   : > { %v605_v12 = vpop.permute.xlu0 %604  ;;  %vm744_vm15 = vcmp.eq.s32.totalorder %v5685_v10, %v608_v11 }
 0x164   : > { %v1449_v13 = vadd.bf16 %v6098_v9, %v937_v8  ;;  %vm743_vm0 = vcmp.eq.s32.totalorder %v5685_v10, %v605_v12  ;;  %v4180_v21 = vsel %vm744_vm15, 1.0, %v5491_v15 }
 0x165   : > { %v4179_v26 = vsel %vm743_vm0, 1.0, %v5491_v15 }
 0x166   : > { %4991 = vmatprep.mubr.msk.bf16.mxu1 %vm1485_vm6, %v1449_v13  ;;  %v704_v14 = vpop.permute.xlu1 %703  ;;  %v922_v32 = vpack.c.bf16 %v4180_v21, %v4179_v26 }
 0x167   : > { %v701_v16 = vpop.permute.xlu0 %700  ;;  %vm776_vm1 = vcmp.eq.s32.totalorder %v5685_v10, %v704_v14 }
 0x168   : > { %vm775_vm2 = vcmp.eq.s32.totalorder %v5685_v10, %v701_v16  ;;  %v4212_v37 = vsel %vm776_vm1, 1.0, %v5491_v15 }
 0x169   : > { %v4211_v40 = vsel %vm775_vm2, 1.0, %v5491_v15 }
 0x16a   : > { %v1088_v28 = vpop.permute.xlu1 %1087  ;;  %v938_v48 = vpack.c.bf16 %v4212_v37, %v4211_v40 }
 0x16b   : > { %v1085_v29 = vpop.permute.xlu0 %1084  ;;  %vm1224_vm3 = vcmp.eq.s32.totalorder %v5685_v10, %v1088_v28 }
 0x16c   : > { %vm1223_vm4 = vcmp.eq.s32.totalorder %v5685_v10, %v1085_v29  ;;  %v4244_v30 = vsel %vm1224_vm3, 1.0, %v5491_v15 }
 0x16d   : > { %v4243_v31 = vsel %vm1223_vm4, 1.0, %v5491_v15 }
 0x16e   : > { %v6125_v33 = vpack.c.bf16 %v4244_v30, %v4243_v31  ;;  %v1184_v41 = vpop.permute.xlu1 %1183 }
 0x16f   : > { %v1181_v44 = vpop.permute.xlu0 %1180  ;;  %vm1256_vm5 = vcmp.eq.s32.totalorder %v5685_v10, %v1184_v41 }
 0x170   : > { %v1434_v45 = vadd.bf16 %v6125_v33, %v922_v32  ;;  %vm1255_vm7 = vcmp.eq.s32.totalorder %v5685_v10, %v1181_v44  ;;  %v4276_v46 = vsel %vm1256_vm5, 1.0, %v5491_v15 }
 0x171   : > { %v4275_v47 = vsel %vm1255_vm7, 1.0, %v5491_v15 }
 0x172   : > { %v6134_v49 = vpack.c.bf16 %v4276_v46, %v4275_v47  ;;  %4960 = vmatmul.mubr.msk.bf16.gmra.mxu0 %vm1485_vm6, %v1434_v45  ;;  %v614_v50 = vpop.permute.xlu1 %613 }
 0x173   : > { %v611_v51 = vpop.permute.xlu0 %610  ;;  %vm746_vm8 = vcmp.eq.s32.totalorder %v5685_v10, %v614_v50 }
 0x174   : > { %v1450_v53 = vadd.bf16 %v6134_v49, %v938_v48  ;;  %vm745_vm9 = vcmp.eq.s32.totalorder %v5685_v10, %v611_v51  ;;  %v4182_v61 = vsel %vm746_vm8, 1.0, %v5491_v15 }
 0x175   : > { %v4181_v62 = vsel %vm745_vm9, 1.0, %v5491_v15 }
 0x176   : > { %4992 = vmatmul.mubr.msk.bf16.gmra.mxu1 %vm1485_vm6, %v1450_v53  ;;  %v710_v57 = vpop.permute.xlu1 %709  ;;  %v923_v8 = vpack.c.bf16 %v4182_v61, %v4181_v62 }
 0x177   : > { %v707_v60 = vpop.permute.xlu0 %706  ;;  %vm778_vm10 = vcmp.eq.s32.totalorder %v5685_v10, %v710_v57 }
 0x178   : > { %vm777_vm11 = vcmp.eq.s32.totalorder %v5685_v10, %v707_v60  ;;  %v4214_v12 = vsel %vm778_vm10, 1.0, %v5491_v15 }
 0x179   : > { %v4213_v13 = vsel %vm777_vm11, 1.0, %v5491_v15 }
 0x17a   : > { %v1094_v63 = vpop.permute.xlu1 %1093  ;;  %v939_v29 = vpack.c.bf16 %v4214_v12, %v4213_v13 }
 0x17b   : > { %v1091_v1 = vpop.permute.xlu0 %1090  ;;  %vm1226_vm12 = vcmp.eq.s32.totalorder %v5685_v10, %v1094_v63  ;;  %v5380_v63 = vld [vmem:[%s5983_s24] sm:$0xff]  }
 0x17c   : > { %vm1225_vm13 = vcmp.eq.s32.totalorder %v5685_v10, %v1091_v1  ;;  %v4246_v6 = vsel %vm1226_vm12, 1.0, %v5491_v15 }
 0x17d   : > { %v4245_v7 = vsel %vm1225_vm13, 1.0, %v5491_v15 }
 0x17e   : > { %v6149_v11 = vpack.c.bf16 %v4246_v6, %v4245_v7  ;;  %v1190_v14 = vpop.permute.xlu1 %1189 }
 0x17f   : > { %v1187_v16 = vpop.permute.xlu0 %1186  ;;  %vm1258_vm14 = vcmp.eq.s32.totalorder %v5685_v10, %v1190_v14  ;;  %v5381_v14 = vld [vmem:[%s5983_s24 + $0x8] sm:$0xff]  }
 0x180   : > { %v1435_v21 = vadd.bf16 %v6149_v11, %v923_v8  ;;  %vm1257_vm15 = vcmp.eq.s32.totalorder %v5685_v10, %v1187_v16  ;;  %v4278_v26 = vsel %vm1258_vm14, 1.0, %v5491_v15  ;;  %v5407_v16 = vld [vmem:[%s6725_s7 + $0x30] sm:$0xff]  }
 0x181   : > { %v4277_v28 = vsel %vm1257_vm15, 1.0, %v5491_v15 }
 0x182   : > { %v6158_v30 = vpack.c.bf16 %v4278_v26, %v4277_v28  ;;  %4963 = vmatprep.mubr.msk.bf16.mxu0 %vm1485_vm6, %v1435_v21  ;;  %v620_v31 = vpop.permute.xlu1 %619  ;;  %v5414_v21 = vld [vmem:[%s6724_s6 + $0x28] sm:$0xff]   ;;  %v5384_v26 = vld [vmem:[%s5983_s24 + $0x20] sm:$0xff]   ;;  %v5386_v28 = vld [vmem:[%s5983_s24 + $0x30] sm:$0xff]  }
 0x183   : > { %v617_v32 = vpop.permute.xlu0 %616  ;;  %vm748_vm0 = vcmp.eq.s32.totalorder %v5685_v10, %v620_v31  ;;  %v5417_v31 = vld [vmem:[%s6725_s7 + $0x18] sm:$0xff]  }
 0x184   : > { %v1451_v37 = vadd.bf16 %v6158_v30, %v939_v29  ;;  %vm747_vm1 = vcmp.eq.s32.totalorder %v5685_v10, %v617_v32  ;;  %v4184_v44 = vsel %vm748_vm0, 1.0, %v5491_v15  ;;  %v5424_v29 = vld [vmem:[%s6724_s6 + $0x18] sm:$0xff]   ;;  %v5388_v32 = vld [vmem:[%s5983_s24 + $0x40] sm:$0xff]  }
 0x185   : > { %v4183_v45 = vsel %vm747_vm1, 1.0, %v5491_v15 }
 0x186   : > { %4995 = vmatprep.mubr.msk.bf16.mxu1 %vm1485_vm6, %v1451_v37  ;;  %v716_v40 = vpop.permute.xlu1 %715  ;;  %v924_v51 = vpack.c.bf16 %v4184_v44, %v4183_v45  ;;  %v5421_v37 = vld [vmem:[%s6725_s7 + $0x8] sm:$0xff]  }
 0x187   : > { %v713_v41 = vpop.permute.xlu0 %712  ;;  %vm780_vm2 = vcmp.eq.s32.totalorder %v5685_v10, %v716_v40  ;;  %v5390_v40 = vld [vmem:[%s5983_s24 + $0x50] sm:$0xff]   ;;  %v5393_v44 = vld [vmem:[%s5983_s24 + $0x68] sm:$0xff]  }
 0x188   : > { %vm779_vm3 = vcmp.eq.s32.totalorder %v5685_v10, %v713_v41  ;;  %v4216_v57 = vsel %vm780_vm2, 1.0, %v5491_v15  ;;  %v5425_v41 = vld [vmem:[%s6724_s6 + $0x10] sm:$0xff]   ;;  %v5426_v45 = vld [vmem:[%s6724_s6 + $0x8] sm:$0xff]  }
 0x189   : > { %v4215_v60 = vsel %vm779_vm3, 1.0, %v5491_v15 }
 0x18a   : > { %v1100_v46 = vpop.permute.xlu1 %1099  ;;  %v940_v8 = vpack.c.bf16 %v4216_v57, %v4215_v60  ;;  %v5405_v57 = vld [vmem:[%s5983_s24 + $0xb8] sm:$0xff]  }
 0x18b   : > { %v1097_v47 = vpop.permute.xlu0 %1096  ;;  %vm1228_vm4 = vcmp.eq.s32.totalorder %v5685_v10, %v1100_v46  ;;  %v5398_v46 = vld [vmem:[%s5983_s24 + $0x90] sm:$0xff]  }
 0x18c   : > { %vm1227_vm5 = vcmp.eq.s32.totalorder %v5685_v10, %v1097_v47  ;;  %v4248_v48 = vsel %vm1228_vm4, 1.0, %v5491_v15  ;;  %v5399_v47 = vld [vmem:[%s5983_s24 + $0x98] sm:$0xff]  }
 0x18d   : > { %v4247_v50 = vsel %vm1227_vm5, 1.0, %v5491_v15 }
 0x18e   : > { %v6173_v53 = vpack.c.bf16 %v4248_v48, %v4247_v50  ;;  %v1196_v61 = vpop.permute.xlu1 %1195 }
 0x18f   : > { %v1193_v62 = vpop.permute.xlu0 %1192  ;;  %vm1260_vm7 = vcmp.eq.s32.totalorder %v5685_v10, %v1196_v61 }
 0x190   : > { %v1436_v1 = vadd.bf16 %v6173_v53, %v924_v51  ;;  %vm1259_vm8 = vcmp.eq.s32.totalorder %v5685_v10, %v1193_v62  ;;  %v4280_v6 = vsel %vm1260_vm7, 1.0, %v5491_v15  ;;  %v5382_v10 = vld [vmem:[%s5983_s24 + $0x10] sm:$0xff]   ;;  %v5403_v51 = vld [vmem:[%s5983_s24 + $0xa8] sm:$0xff]  }
 0x191   : > { %v4279_v7 = vsel %vm1259_vm8, 1.0, %v5491_v15  ;;  %v5408_v15 = vld [vmem:[%s6724_s6 + $0x30] sm:$0xff]   ;;  %v5409_v62 = vld [vmem:[%s5983_s24 + $0xc8] sm:$0xff]  }
 0x192   : > { %v6183_v12 = vpack.c.bf16 %v4280_v6, %v4279_v7  ;;  %4964 = vmatmul.mubr.msk.bf16.gmra.mxu0 %vm1485_vm6, %v1436_v1 }
 0x193   : > { %5087 = vmatprep.mubr.bf16.mxu0 %v5380_v63 }
 0x194   : > { %v1452_v13 = vadd.bf16 %v6183_v12, %v940_v8 }
 0x196   : > { %4996 = vmatmul.mubr.msk.bf16.gmra.mxu1 %vm1485_vm6, %v1452_v13 }
 0x197   : > { %5007 = vmatprep.mubr.msk.bf16.mxu1 %vm1485_vm6, %v5701_v25  ;;  %v5383_v25 = vld [vmem:[%s5983_s24 + $0x18] sm:$0xff]  }
 0x19a   : > { %5088 = vmatmul.mubr.bf16.vlgmr.msra.gmra.mxu0 %v5381_v14 }
 0x19b   : > { %5091 = vmatprep.mubr.bf16.mxu0 %v5382_v10  ;;  %5232 = vmatpush3.bf16.msra.mxu0 %v6111_v19  ;;  %v5412_v19 = vld [vmem:[%s6725_s7 + $0x28] sm:$0xff]  }
 0x19c   : > { %5233 = vmatprep.subr.bf16.mxu0 %v5408_v15 }
 0x19e   : > { %5008 = vmatmul.mubr.msk.bf16.vlgmr.msra.gmra.mxu1 %vm1485_vm6, %v5733_v55  ;;  %v5422_v55 = vld [vmem:[%s6724_s6 + $0x20] sm:$0xff]  }
 0x19f   : > { %5011 = vmatprep.mubr.msk.bf16.mxu1 %vm1485_vm6, %v5765_v23  ;;  %5152 = vmatpush3.bf16.msra.mxu1 %v6106_v18  ;;  %v5416_v23 = vld [vmem:[%s6725_s7 + $0x20] sm:$0xff]   ;;  %v5385_v18 = vld [vmem:[%s5983_s24 + $0x28] sm:$0xff]  }
 0x1a0   : > { %5153 = vmatprep.subr.bf16.mxu1 %v5407_v16  ;;  %5234 = vmatpush3.bf16.msra.mxu0 %v5408_v15 }
 0x1a1   : > { %5235 = vmatprep.subr.bf16.mxu0 %v5414_v21 }
 0x1a2   : > { %5092 = vmatmul.mubr.bf16.gmra.mxu0 %v5383_v25 }
 0x1a3   : > { %5095 = vmatprep.mubr.bf16.mxu0 %v5384_v26  ;;  %5154 = vmatpush3.bf16.msra.mxu1 %v5407_v16 }
 0x1a4   : > { %5155 = vmatprep.subr.bf16.mxu1 %v5412_v19  ;;  %5236 = vmatpush3.bf16.msra.mxu0 %v5414_v21 }
 0x1a5   : > { %5237 = vmatprep.subr.bf16.mxu0 %v5422_v55 }
 0x1a6   : > { %5012 = vmatmul.mubr.msk.bf16.gmra.mxu1 %vm1485_vm6, %v5797_v56  ;;  %v5420_v56 = vld [vmem:[%s6725_s7 + $0x10] sm:$0xff]  }
 0x1a7   : > { %5015 = vmatprep.mubr.msk.bf16.mxu1 %vm1485_vm6, %v5829_v27  ;;  %5156 = vmatpush3.bf16.msra.mxu1 %v5412_v19  ;;  %v5387_v27 = vld [vmem:[%s5983_s24 + $0x38] sm:$0xff]  }
 0x1a8   : > { %5157 = vmatprep.subr.bf16.mxu1 %v5416_v23  ;;  %5238 = vmatpush3.bf16.msra.mxu0 %v5422_v55  ;;  %v5419_v19 = vld [vmem:[%s5983_s24 + $0xf8] sm:$0xff]  }
 0x1a9   : > { %5239 = vmatprep.subr.bf16.mxu0 %v5424_v29 }
 0x1aa   : > { %5096 = vmatmul.mubr.bf16.gmra.mxu0 %v5385_v18 }
 0x1ab   : > { %5099 = vmatprep.mubr.bf16.mxu0 %v5386_v28  ;;  %5158 = vmatpush3.bf16.msra.mxu1 %v5416_v23 }
 0x1ac   : > { %5159 = vmatprep.subr.bf16.mxu1 %v5417_v31  ;;  %5240 = vmatpush3.bf16.msra.mxu0 %v5424_v29 }
 0x1ad   : > { %5241 = vmatprep.subr.bf16.mxu0 %v5425_v41 }
 0x1ae   : > { %5016 = vmatmul.mubr.msk.bf16.gmra.mxu1 %vm1485_vm6, %v5870_v0  ;;  %v5423_v0 = vld [vmem:[%s6725_s7] sm:$0xff]  }
 0x1af   : > { %5019 = vmatprep.mubr.msk.bf16.mxu1 %vm1485_vm6, %v5911_v43  ;;  %5160 = vmatpush3.bf16.msra.mxu1 %v5417_v31  ;;  %v5389_v43 = vld [vmem:[%s5983_s24 + $0x48] sm:$0xff]  }
 0x1b0   : > { %5161 = vmatprep.subr.bf16.mxu1 %v5420_v56  ;;  %5242 = vmatpush3.bf16.msra.mxu0 %v5425_v41 }
 0x1b1   : > { %5243 = vmatprep.subr.bf16.mxu0 %v5426_v45 }
 0x1b2   : > { %5100 = vmatmul.mubr.bf16.gmra.mxu0 %v5387_v27 }
 0x1b3   : > { %5103 = vmatprep.mubr.bf16.mxu0 %v5388_v32  ;;  %5162 = vmatpush3.bf16.msra.mxu1 %v5420_v56 }
 0x1b4   : > { %5163 = vmatprep.subr.bf16.mxu1 %v5421_v37  ;;  %5244 = vmatpush3.bf16.msra.mxu0 %v5426_v45 }
 0x1b6   : > { %5020 = vmatmul.mubr.msk.bf16.gmra.mxu1 %vm1485_vm6, %v5952_v20  ;;  %v5391_v20 = vld [vmem:[%s5983_s24 + $0x58] sm:$0xff]  }
 0x1b7   : > { %5023 = vmatprep.mubr.msk.bf16.mxu1 %vm1485_vm6, %v5993_v54  ;;  %5164 = vmatpush3.bf16.msra.mxu1 %v5421_v37  ;;  %v5392_v54 = vld [vmem:[%s5983_s24 + $0x60] sm:$0xff]  }
 0x1b8   : > { %5165 = vmatprep.subr.bf16.mxu1 %v5423_v0 }
 0x1ba   : > { %5104 = vmatmul.mubr.bf16.gmra.mxu0 %v5389_v43 }
 0x1bb   : > { %5107 = vmatprep.mubr.bf16.mxu0 %v5390_v40  ;;  %5166 = vmatpush3.bf16.msra.mxu1 %v5423_v0 }
 0x1be   : > { %5024 = vmatmul.mubr.msk.bf16.gmra.mxu1 %vm1485_vm6, %v6017_v22  ;;  %v5394_v22 = vld [vmem:[%s5983_s24 + $0x70] sm:$0xff]  }
 0x1bf   : > { %5027 = vmatprep.mubr.msk.bf16.mxu1 %vm1485_vm6, %v6041_v52  ;;  %v5395_v52 = vld [vmem:[%s5983_s24 + $0x78] sm:$0xff]  }
 0x1c2   : > { %5108 = vmatmul.mubr.bf16.gmra.mxu0 %v5391_v20 }
 0x1c3   : > { %5111 = vmatprep.mubr.bf16.mxu0 %v5392_v54 }
 0x1c6   : > { %5028 = vmatmul.mubr.msk.bf16.gmra.mxu1 %vm1485_vm6, %v6065_v24  ;;  %v5396_v24 = vld [vmem:[%s5983_s24 + $0x80] sm:$0xff]  }
 0x1c7   : > { %5031 = vmatprep.mubr.msk.bf16.mxu1 %vm1485_vm6, %v6089_v59  ;;  %v5397_v59 = vld [vmem:[%s5983_s24 + $0x88] sm:$0xff]  }
 0x1ca   : > { %5112 = vmatmul.mubr.bf16.gmra.mxu0 %v5393_v44 }
 0x1cb   : > { %5115 = vmatprep.mubr.bf16.mxu0 %v5394_v22 }
 0x1ce   : > { %5032 = vmatmul.mubr.msk.bf16.gmra.mxu1 %vm1485_vm6, %v6125_v33  ;;  %v5427_v33 = vld [vmem:[%s6724_s6] sm:$0xff]  }
 0x1cf   : > { %5035 = vmatprep.mubr.msk.bf16.mxu1 %vm1485_vm6, %v6149_v11  ;;  %5245 = vmatprep.subr.bf16.mxu0 %v5427_v33  ;;  %v6284_v11 = vpop.f32.mrf.mxu0 }
 0x1d0   : > { %5246 = vmatpush3.bf16.msra.mxu0 %v5427_v33  ;;  %v1873_v27 = vmul.f32 0.5, %v6284_v11 }
 0x1d1   : > { %v1616_v48 = vpop.f32.mrf.mxu0 }
 0x1d2   : > { %5116 = vmatmul.mubr.bf16.gmra.mxu0 %v5395_v52  ;;  %v1871_v23 = vmul.f32 0.5, %v1616_v48 }
 0x1d3   : > { %5119 = vmatprep.mubr.bf16.mxu0 %v5396_v24  ;;  %v6292_v50 = vpop.f32.mrf.mxu0 }
 0x1d6   : > { %5036 = vmatmul.mubr.msk.bf16.gmra.mxu1 %vm1485_vm6, %v6173_v53  ;;  %v1619_v53 = vpop.f32.mrf.mxu0 }
 0x1d7   : > { %5039 = vmatprep.mubr.msk.bf16.mxu1 %vm1485_vm6, %v5713_v36  ;;  %v5400_v36 = vld [vmem:[%s5983_s24 + $0xa0] sm:$0xff]  }
 0x1da   : > { %5120 = vmatmul.mubr.bf16.gmra.mxu0 %v5397_v59 }
 0x1db   : > { %5123 = vmatprep.mubr.bf16.mxu0 %v5398_v46 }
 0x1de   : > { %5040 = vmatmul.mubr.msk.bf16.gmra.mxu1 %vm1485_vm6, %v5744_v2  ;;  %v5404_v2 = vld [vmem:[%s5983_s24 + $0xb0] sm:$0xff]  }
 0x1df   : > { %5043 = vmatprep.mubr.msk.bf16.mxu1 %vm1485_vm6, %v5776_v35  ;;  %v6300_v35 = vpop.f32.mrf.mxu0 }
 0x1e0   : > { %v1877_v44 = vmul.f32 0.5, %v6300_v35 }
 0x1e1   : > { %v1632_v60 = vpop.f32.mrf.mxu0 }
 0x1e2   : > { %5124 = vmatmul.mubr.bf16.gmra.mxu0 %v5399_v47  ;;  %v1875_v37 = vmul.f32 0.5, %v1632_v60 }
 0x1e3   : > { %5127 = vmatprep.mubr.bf16.mxu0 %v5400_v36  ;;  %v4942_v61 = vpop.f32.mrf.mxu0 }
 0x1e6   : > { %5044 = vmatmul.mubr.msk.bf16.gmra.mxu1 %vm1485_vm6, %v5808_v4  ;;  %v5406_v4 = vld [vmem:[%s5983_s24 + $0xc0] sm:$0xff]  }
 0x1e7   : > { %5047 = vmatprep.mubr.msk.bf16.mxu1 %vm1485_vm6, %v5846_v42  ;;  %v6308_v42 = vpop.f32.mrf.mxu1 }
 0x1e9   : > { %v6316_v63 = vpop.f32.mrf.mxu1 }
 0x1ea   : > { %5128 = vmatmul.mubr.bf16.gmra.mxu0 %v5403_v51 }
 0x1eb   : > { %5131 = vmatprep.mubr.bf16.mxu0 %v5404_v2  ;;  %v6320_v6 = vpop.f32.mrf.mxu1 }
 0x1ed   : > { %v6328_v8 = vpop.f32.mrf.mxu1 }
 0x1ee   : > { %5048 = vmatmul.mubr.msk.bf16.gmra.mxu1 %vm1485_vm6, %v5887_v17  ;;  %v5410_v17 = vld [vmem:[%s5983_s24 + $0xd0] sm:$0xff]  }
 0x1ef   : > { %5051 = vmatprep.mubr.msk.bf16.mxu1 %vm1485_vm6, %v5928_v58  ;;  %v1635_v58 = vpop.f32.mrf.mxu0  ;;  %v6330_v13 = vpop.f32.mrf.mxu1 }
 0x1f1   : > { %v6318_v1 = vpop.f32.mrf.mxu0  ;;  %v6332_v10 = vpop.f32.mrf.mxu1 }
 0x1f2   : > { %5132 = vmatmul.mubr.bf16.gmra.mxu0 %v5405_v57  ;;  %v1881_v48 = vmul.f32 0.5, %v6318_v1 }
 0x1f3   : > { %5135 = vmatprep.mubr.bf16.mxu0 %v5406_v4  ;;  %v1648_v7 = vpop.f32.mrf.mxu0  ;;  %v6340_v21 = vpop.f32.mrf.mxu1 }
 0x1f4   : > { %v1879_v52 = vmul.f32 0.5, %v1648_v7 }
 0x1f5   : > { %v4946_v14 = vpop.f32.mrf.mxu0  ;;  %v6342_v26 = vpop.f32.mrf.mxu1 }
 0x1f6   : > { %5052 = vmatmul.mubr.msk.bf16.gmra.mxu1 %vm1485_vm6, %v5969_v38  ;;  %v5411_v38 = vld [vmem:[%s5983_s24 + $0xd8] sm:$0xff]   ;;  %v1882_v11 = vmul.f32 0.5, %v4946_v14 }
 0x1f7   : > { %5055 = vmatprep.mubr.msk.bf16.mxu1 %vm1485_vm6, %v6002_v5  ;;  %v5413_v5 = vld [vmem:[%s5983_s24 + $0xe0] sm:$0xff]   ;;  %v1651_v15 = vpop.f32.mrf.mxu0 }
 0x1f8   : > { %v1880_v54 = vmul.f32 0.5, %v1651_v15  ;;  %v2934_v2 = vpack.c.bf16 %v1882_v11, %v1881_v48 }
 0x1f9   : > { %v4949_v16 = vpop.f32.mrf.mxu0 }
 0x1fa   : > { %5136 = vmatmul.mubr.bf16.gmra.mxu0 %v5409_v62  ;;  %v2933_v46 = vpack.c.bf16 %v1880_v54, %v1879_v52 }
 0x1fb   : > { %5139 = vmatprep.mubr.bf16.mxu0 %v5410_v17  ;;  %v1664_v25 = vpop.f32.mrf.mxu0  ;;  %v1885_v17 = vmul.f32 0.5, %v4949_v16 }
 0x1fc   : > { %v1883_v51 = vmul.f32 0.5, %v1664_v25 }
 0x1fd   : > { %v4950_v55 = vpop.f32.mrf.mxu0 }
 0x1fe   : > { %5056 = vmatmul.mubr.msk.bf16.gmra.mxu1 %vm1485_vm6, %v6026_v34  ;;  %v5415_v34 = vld [vmem:[%s5983_s24 + $0xe8] sm:$0xff]   ;;  %v1886_v4 = vmul.f32 0.5, %v4950_v55 }
 0x1ff   : > { %5059 = vmatprep.mubr.msk.bf16.mxu1 %vm1485_vm6, %v6050_v3  ;;  %v5418_v3 = vld [vmem:[%s5983_s24 + $0xf0] sm:$0xff]   ;;  %v1667_v28 = vpop.f32.mrf.mxu0  ;;  %s356_s24 = sand.u32 1, %s5480_s10  }
 0x200   : > { %v1884_v36 = vmul.f32 0.5, %v1667_v28  ;;  %s4146_s26 = sshll.u32 %s356_s24, 8  ;;  %s6678_s13 = scalar_lea.sflag [#allocation3], %s356_s24 }
 0x201   : > { %v4953_v31 = vpop.f32.mrf.mxu0  ;;  %s6501_s25 = scalar_lea.vmem [#allocation2], %s4146_s26 }
 0x202   : > { %5140 = vmatmul.mubr.bf16.gmra.mxu0 %v5411_v38  ;;  %v2935_v57 = vpack.c.bf16 %v1884_v36, %v1883_v51  ;;  %v2936_v38 = vpack.c.bf16 %v1886_v4, %v1885_v17  ;;  %v1889_v25 = vmul.f32 0.5, %v4953_v31  ;;  %v1903_v17 = vmul.f32 0.5, %v6316_v63  ;;  %s4056_s29 = sshll.u32 %s6501_s25, 4  ;;  %s6672_s29 = int_to_ptr.vmem [resolvable:$true] %s4056_s29 }
 0x203   : > { %5143 = vmatprep.mubr.bf16.mxu0 %v5413_v5  ;;  %v1680_v32 = vpop.f32.mrf.mxu0  ;;  %s5428_s28 = scalar_lea.vmem %s6672_s29, 4096  ;;  %p5435_p0 = scmp.lt.s32.totalorder %s6672_s29, %s5433_s23 }
 0x204   : > { %v1887_v7 = vmul.f32 0.5, %v1680_v32  ;;  %p5429_p11 = scmp.ne.s32.totalorder %s6672_s29, %s5428_s28  ;;  %p5436_p1 = scmp.lt.s32.totalorder %s5434_s21, %s5428_s28 }
 0x205   : > { %v4954_v20 = vpop.f32.mrf.mxu0 }
 0x206   : > { %5060 = vmatmul.mubr.msk.bf16.gmra.mxu1 %vm1485_vm6, %v6074_v39  ;;  %v6349_v39 = vpop.f32.mrf.mxu1  ;;  %v1890_v15 = vmul.f32 0.5, %v4954_v20  ;;  %p5430_p12 = pnand %p5429_p11, %p5583_p5  ;;  %p5437_p2 = por %p5436_p1, %p5435_p0 }
 0x207   : > { %5063 = vmatprep.mubr.msk.bf16.mxu1 %vm1485_vm6, %v6098_v9  ;;  %v1872_v9 = vmul.f32 0.5, %v1619_v53  ;;  %v1683_v45 = vpop.f32.mrf.mxu0 }
 0x208   : > { %v6351_v18 = vpop.f32.mrf.mxu1  ;;  %v1888_v62 = vmul.f32 0.5, %v1683_v45  ;;  %p5431_p13 = pneg %p5430_p12 }
 0x209   : > { %v2929_v29 = vpack.c.bf16 %v1872_v9, %v1871_v23  ;;  %v2938_v23 = vpack.c.bf16 %v1890_v15, %v1889_v25 }
 0x20a   : > { %5144 = vmatmul.mubr.bf16.gmra.mxu0 %v5415_v34  ;;  %v6356_v56 = vpop.f32.mrf.mxu1  ;;  %v2937_v5 = vpack.c.bf16 %v1888_v62, %v1887_v7  ;;  %p5438_p3 = pnand %p5437_p2, %p5431_p13 }
 0x20b   : > { %5147 = vmatprep.mubr.bf16.mxu0 %v5418_v3 }
 0x20c   : > { %v6359_v43 = vpop.f32.mrf.mxu1 }
 0x20e   : > { %5064 = vmatmul.mubr.msk.bf16.gmra.mxu1 %vm1485_vm6, %v6134_v49  ;;  %v1874_v49 = vmul.f32 0.5, %v6292_v50  ;;  %v6361_v41 = vpop.f32.mrf.mxu1 }
 0x20f   : > { %5067 = vmatprep.mubr.msk.bf16.mxu1 %vm1485_vm6, %v6158_v30  ;;  %v1876_v30 = vmul.f32 0.5, %v1635_v58 }
 0x210   : > { %v2930_v0 = vpack.c.bf16 %v1874_v49, %v1873_v27  ;;  %v6364_v22 = vpop.f32.mrf.mxu1 }
 0x211   : > { %v2931_v40 = vpack.c.bf16 %v1876_v30, %v1875_v37 }
 0x212   : > { %5148 = vmatmul.mubr.bf16.gmra.mxu0 %v5419_v19  ;;  %v4957_v59 = vpop.f32.mrf.mxu0  ;;  %v6366_v33 = vpop.f32.mrf.mxu1 }
 0x213   : > { %v1893_v27 = vmul.f32 0.5, %v4957_v59 }
 0x214   : > { %v1696_v47 = vpop.f32.mrf.mxu0  ;;  %v6369_v50 = vpop.f32.mrf.mxu1 }
 0x215   : > { %v1891_v9 = vmul.f32 0.5, %v1696_v47 }
 0x216   : > { %5068 = vmatmul.mubr.msk.bf16.gmra.mxu1 %vm1485_vm6, %v6183_v12  ;;  %v1878_v12 = vmul.f32 0.5, %v4942_v61  ;;  %v6371_v53 = vpop.f32.mrf.mxu1  ;;  %v4958_v35 = vpop.f32.mrf.mxu0 }
 0x217   : > { %5167 = vmatprep.mubr.bf16.mxu1 %v2929_v29  ;;  %v1894_v49 = vmul.f32 0.5, %v4958_v35 }
 0x218   : > { %v2932_v24 = vpack.c.bf16 %v1878_v12, %v1877_v44  ;;  %v6373_v60 = vpop.f32.mrf.mxu1  ;;  %v1699_v61 = vpop.f32.mrf.mxu0 }
 0x219   : > { %v1892_v3 = vmul.f32 0.5, %v1699_v61 }
 0x21a   : > { %v6375_v1 = vpop.f32.mrf.mxu1 }
 0x21b   : > { %v2939_v16 = vpack.c.bf16 %v1892_v3, %v1891_v9  ;;  %v1908_v9 = vmul.f32 0.5, %v6342_v26  ;;  %v1910_v26 = vmul.f32 0.5, %v6340_v21 }
 0x21c   : > { %v6377_v34 = vpop.f32.mrf.mxu1 }
 0x21e   : > { %5168 = vmatmul.mubr.bf16.vlgmr.msra.gmra.mxu1 %v2930_v0  ;;  %v6379_v19 = vpop.f32.mrf.mxu1  ;;  %v2940_v0 = vpack.c.bf16 %v1894_v49, %v1893_v27 }
 0x21f   : > { %5171 = vmatprep.mubr.bf16.mxu1 %v2931_v40 }
 0x220   : > { %v6381_v28 = vpop.f32.mrf.mxu1 }
 0x222   : > { %v6383_v32 = vpop.f32.mrf.mxu1 }
 0x224   : > { %v6385_v31 = vpop.f32.mrf.mxu1 }
 0x226   : > { %5172 = vmatmul.mubr.bf16.gmra.mxu1 %v2932_v24 }
 0x227   : > { %5175 = vmatprep.mubr.bf16.mxu1 %v2933_v46 }
 0x22e   : > { %5176 = vmatmul.mubr.bf16.gmra.mxu1 %v2934_v2  ;;  %v1904_v2 = vmul.f32 0.5, %v6328_v8  ;;  %v1906_v8 = vmul.f32 0.5, %v6320_v6 }
 0x22f   : > { %5179 = vmatprep.mubr.bf16.mxu1 %v2935_v57 }
 0x232   : > { %v4961_v58 = vpop.f32.mrf.mxu0 }
 0x233   : > { %v1897_v54 = vmul.f32 0.5, %v4961_v58 }
 0x234   : > { %v1712_v14 = vpop.f32.mrf.mxu0 }
 0x235   : > { %v1895_v37 = vmul.f32 0.5, %v1712_v14  ;;  %v2945_v14 = vpack.c.bf16 %v1904_v2, %v1903_v17 }
 0x236   : > { %5180 = vmatmul.mubr.bf16.gmra.mxu1 %v2936_v38  ;;  %v4962_v55 = vpop.f32.mrf.mxu0  ;;  %v6387_v12 = vpop.f32.mrf.mxu1 }
 0x237   : > { %5183 = vmatprep.mubr.bf16.mxu1 %v2937_v5  ;;  %v1898_v20 = vmul.f32 0.5, %v4962_v55 }
 0x238   : > { %v1715_v29 = vpop.f32.mrf.mxu0  ;;  %v6389_v45 = vpop.f32.mrf.mxu1 }
 0x239   : > { %v1896_v30 = vmul.f32 0.5, %v1715_v29  ;;  %v2942_v44 = vpack.c.bf16 %v1898_v20, %v1897_v54  ;;  %v1907_v29 = vmul.f32 0.5, %v6332_v10  ;;  %v1912_v10 = vmul.f32 0.5, %v6359_v43 }
 0x23a   : > { %v6391_v52 = vpop.f32.mrf.mxu1 }
 0x23b   : > { %v2941_v40 = vpack.c.bf16 %v1896_v30, %v1895_v37 }
 0x23c   : > { %v6393_v59 = vpop.f32.mrf.mxu1 }
 0x23e   : > { %5184 = vmatmul.mubr.bf16.gmra.mxu1 %v2938_v23  ;;  %v1905_v23 = vmul.f32 0.5, %v6308_v42 }
 0x23f   : > { %5187 = vmatprep.mubr.bf16.mxu1 %v2939_v16 }
 0x240   : > { %v2946_v49 = vpack.c.bf16 %v1906_v8, %v1905_v23 }
 0x246   : > { %5188 = vmatmul.mubr.bf16.gmra.mxu1 %v2940_v0  ;;  %v2947_v0 = vpack.c.bf16 %v1908_v9, %v1907_v29 }
 0x247   : > { %5191 = vmatprep.mubr.bf16.mxu1 %v2941_v40 }
 0x24e   : > { %5192 = vmatmul.mubr.bf16.gmra.mxu1 %v2942_v44 }
 0x252   : > { %v4965_v24 = vpop.f32.mrf.mxu0 }
 0x253   : > { %v1901_v4 = vmul.f32 0.5, %v4965_v24 }
 0x254   : > { %v1728_v46 = vpop.f32.mrf.mxu0 }
 0x255   : > { %v1899_v35 = vmul.f32 0.5, %v1728_v46 }
 0x256   : > { %v4966_v11 = vpop.f32.mrf.mxu0  ;;  %v6395_v47 = vpop.f32.mrf.mxu1 }
 0x257   : > { %v1902_v36 = vmul.f32 0.5, %v4966_v11 }
 0x258   : > { %v1731_v48 = vpop.f32.mrf.mxu0  ;;  %v6397_v51 = vpop.f32.mrf.mxu1 }
 0x259   : > { %v1900_v57 = vmul.f32 0.5, %v1731_v48  ;;  %v2944_v7 = vpack.c.bf16 %v1902_v36, %v1901_v4  ;;  %v1909_v36 = vmul.f32 0.5, %v6330_v13  ;;  %v1914_v13 = vmul.f32 0.5, %v6356_v56 }
 0x25a   : > { %v6400_v61 = vpop.f32.mrf.mxu1  ;;  %v5089_v62 = vpop.f32.mrf.mxu0 }
 0x25b   : > { %v2943_v58 = vpack.c.bf16 %v1900_v57, %v1899_v35  ;;  %v1911_v35 = vmul.f32 0.5, %v6351_v18  ;;  %v2948_v57 = vpack.c.bf16 %v1910_v26, %v1909_v36  ;;  %v1916_v18 = vmul.f32 0.5, %v6369_v50 }
 0x25c   : > { %v6403_v38 = vpop.f32.mrf.mxu1  ;;  %v2626_v5 = vpop.f32.mrf.mxu0 }
 0x25d   : > { %5195 = vmatprep.mubr.bf16.mxu1 %v2943_v58  ;;  %v2949_v58 = vpack.c.bf16 %v1912_v10, %v1911_v35 }
 0x25e   : > { %v5009_v15 = vpop.f32.mrf.mxu1  ;;  %v5090_v3 = vpop.f32.mrf.mxu0  ;;  %5196 = vmatmul.mubr.bf16.gmra.mxu1 %v2944_v7 }
 0x25f   : > { %5199 = vmatprep.mubr.bf16.mxu1 %v2945_v14  ;;  %v2635_v54 = vadd.f32 %v5089_v62, %v5009_v15 }
 0x260   : > { %v2097_v25 = vpop.f32.mrf.mxu1  ;;  %v2629_v55 = vpop.f32.mrf.mxu0 }
 0x261   : > { %v2627_v40 = vadd.f32 %v2626_v5, %v2097_v25 }
 0x262   : > { %v5010_v63 = vpop.f32.mrf.mxu1  ;;  %v5093_v16 = vpop.f32.mrf.mxu0 }
 0x263   : > { %v2638_v30 = vadd.f32 %v5090_v3, %v5010_v63  ;;  %v1915_v63 = vmul.f32 0.5, %v6364_v22  ;;  %v1920_v22 = vmul.f32 0.5, %v6377_v34 }
 0x264   : > { %v2100_v27 = vpop.f32.mrf.mxu1  ;;  %v2642_v37 = vpop.f32.mrf.mxu0 }
 0x265   : > { %v2630_v20 = vadd.f32 %v2629_v55, %v2100_v27  ;;  %v2882_v42 = vpack.c.bf16 %v2638_v30, %v2635_v54  ;;  %v1913_v55 = vmul.f32 0.5, %v6349_v39  ;;  %v2951_v27 = vpack.c.bf16 %v1916_v18, %v1915_v63 }
 0x266   : > { %v5013_v44 = vpop.f32.mrf.mxu1  ;;  %v5094_v6 = vpop.f32.mrf.mxu0  ;;  %5200 = vmatmul.mubr.bf16.gmra.mxu1 %v2946_v49  ;;  %v1918_v39 = vmul.f32 0.5, %v6366_v33 }
 0x267   : > { %v2881_v24 = vpack.c.bf16 %v2630_v20, %v2627_v40  ;;  %5203 = vmatprep.mubr.bf16.mxu1 %v2947_v0  ;;  %v2651_v5 = vadd.f32 %v5093_v16, %v5013_v44  ;;  %v2950_v16 = vpack.c.bf16 %v1914_v13, %v1913_v55 }
 0x268   : > { %v2113_v46 = vpop.f32.mrf.mxu1  ;;  %v2645_v11 = vpop.f32.mrf.mxu0 }
 0x269   : > { %5247 = vmatprep.mubr.bf16.mxu0 %v2881_v24  ;;  %v2643_v7 = vadd.f32 %v2642_v37, %v2113_v46  ;;  %v1917_v24 = vmul.f32 0.5, %v6361_v41  ;;  %v1919_v46 = vmul.f32 0.5, %v6373_v60  ;;  %v1922_v41 = vmul.f32 0.5, %v6375_v1 }
 0x26a   : > { %v5014_v48 = vpop.f32.mrf.mxu1  ;;  %v5097_v2 = vpop.f32.mrf.mxu0  ;;  %5248 = vmatmul.mubr.bf16.vlgmr.msra.gmra.mxu0 %v2882_v42  ;;  %v1924_v60 = vmul.f32 0.5, %v6385_v31 }
 0x26b   : > { %v2654_v4 = vadd.f32 %v5094_v6, %v5014_v48 }
 0x26c   : > { %v2116_v62 = vpop.f32.mrf.mxu1  ;;  %v2658_v17 = vpop.f32.mrf.mxu0 }
 0x26d   : > { %v2646_v21 = vadd.f32 %v2645_v11, %v2116_v62  ;;  %v2884_v3 = vpack.c.bf16 %v2654_v4, %v2651_v5  ;;  %v2952_v11 = vpack.c.bf16 %v1918_v39, %v1917_v24 }
 0x26e   : > { %v5017_v14 = vpop.f32.mrf.mxu1  ;;  %v5098_v15 = vpop.f32.mrf.mxu0  ;;  %5204 = vmatmul.mubr.bf16.gmra.mxu1 %v2948_v57 }
 0x26f   : > { %v2883_v43 = vpack.c.bf16 %v2646_v21, %v2643_v7  ;;  %5207 = vmatprep.mubr.bf16.mxu1 %v2949_v58  ;;  %v2667_v0 = vadd.f32 %v5097_v2, %v5017_v14  ;;  %v2953_v2 = vpack.c.bf16 %v1920_v22, %v1919_v46  ;;  %v1921_v21 = vmul.f32 0.5, %v6371_v53 }
 0x270   : > { %v2129_v8 = vpop.f32.mrf.mxu1  ;;  %v2661_v25 = vpop.f32.mrf.mxu0  ;;  %v1926_v53 = vmul.f32 0.5, %v6383_v32 }
 0x271   : > { %5251 = vmatprep.mubr.bf16.mxu0 %v2883_v43  ;;  %v2659_v37 = vadd.f32 %v2658_v17, %v2129_v8  ;;  %v2954_v43 = vpack.c.bf16 %v1922_v41, %v1921_v21 }
 0x272   : > { %v5018_v9 = vpop.f32.mrf.mxu1  ;;  %v5101_v23 = vpop.f32.mrf.mxu0  ;;  %5252 = vmatmul.mubr.bf16.gmra.mxu0 %v2884_v3 }
 0x273   : > { %v2670_v29 = vadd.f32 %v5098_v15, %v5018_v9  ;;  %v1923_v15 = vmul.f32 0.5, %v6381_v28  ;;  %v1928_v28 = vmul.f32 0.5, %v6393_v59 }
 0x274   : > { %v2132_v49 = vpop.f32.mrf.mxu1  ;;  %v2674_v30 = vpop.f32.mrf.mxu0 }
 0x275   : > { %v2662_v56 = vadd.f32 %v2661_v25, %v2132_v49  ;;  %v2886_v54 = vpack.c.bf16 %v2670_v29, %v2667_v0  ;;  %v2955_v25 = vpack.c.bf16 %v1924_v60, %v1923_v15  ;;  %v1925_v49 = vmul.f32 0.5, %v6379_v19 }
 0x276   : > { %v5021_v40 = vpop.f32.mrf.mxu1  ;;  %v5102_v20 = vpop.f32.mrf.mxu0  ;;  %5208 = vmatmul.mubr.bf16.gmra.mxu1 %v2950_v16  ;;  %v1930_v19 = vmul.f32 0.5, %v6391_v52 }
 0x277   : > { %v2885_v50 = vpack.c.bf16 %v2662_v56, %v2659_v37  ;;  %5211 = vmatprep.mubr.bf16.mxu1 %v2951_v27  ;;  %v2683_v57 = vadd.f32 %v5101_v23, %v5021_v40  ;;  %v1927_v37 = vmul.f32 0.5, %v6389_v45  ;;  %v2956_v56 = vpack.c.bf16 %v1926_v53, %v1925_v49 }
 0x278   : > { %v2145_v44 = vpop.f32.mrf.mxu1  ;;  %v2677_v6 = vpop.f32.mrf.mxu0  ;;  %v1932_v45 = vmul.f32 0.5, %v6403_v38 }
 0x279   : > { %5255 = vmatprep.mubr.bf16.mxu0 %v2885_v50  ;;  %v2675_v35 = vadd.f32 %v2674_v30, %v2145_v44  ;;  %v2957_v50 = vpack.c.bf16 %v1928_v28, %v1927_v37 }
 0x27a   : > { %v5022_v26 = vpop.f32.mrf.mxu1  ;;  %v5105_v42 = vpop.f32.mrf.mxu0  ;;  %5256 = vmatmul.mubr.bf16.gmra.mxu0 %v2886_v54 }
 0x27b   : > { %v2686_v10 = vadd.f32 %v5102_v20, %v5022_v26 }
 0x27c   : > { %v2148_v36 = vpop.f32.mrf.mxu1  ;;  %v2690_v48 = vpop.f32.mrf.mxu0 }
 0x27d   : > { %v2678_v33 = vadd.f32 %v2677_v6, %v2148_v36  ;;  %v2888_v17 = vpack.c.bf16 %v2686_v10, %v2683_v57  ;;  %v1931_v10 = vmul.f32 0.5, %v6397_v51  ;;  %v1933_v51 = vmul.f32 0.5, %v6395_v47 }
 0x27e   : > { %v5025_v4 = vpop.f32.mrf.mxu1  ;;  %v5106_v62 = vpop.f32.mrf.mxu0  ;;  %5212 = vmatmul.mubr.bf16.gmra.mxu1 %v2952_v11 }
 0x27f   : > { %v2887_v34 = vpack.c.bf16 %v2678_v33, %v2675_v35  ;;  %5215 = vmatprep.mubr.bf16.mxu1 %v2953_v2  ;;  %v2699_v55 = vadd.f32 %v5105_v42, %v5025_v4  ;;  %v1929_v42 = vmul.f32 0.5, %v6387_v12  ;;  %v2959_v33 = vpack.c.bf16 %v1932_v45, %v1931_v10 }
 0x280   : > { %v2161_v58 = vpop.f32.mrf.mxu1  ;;  %v2693_v7 = vpop.f32.mrf.mxu0  ;;  %v1934_v12 = vmul.f32 0.5, %v6400_v61 }
 0x281   : > { %5259 = vmatprep.mubr.bf16.mxu0 %v2887_v34  ;;  %v2691_v18 = vadd.f32 %v2690_v48, %v2161_v58  ;;  %v2958_v36 = vpack.c.bf16 %v1930_v19, %v1929_v42 }
 0x282   : > { %v5026_v5 = vpop.f32.mrf.mxu1  ;;  %v5109_v14 = vpop.f32.mrf.mxu0  ;;  %5260 = vmatmul.mubr.bf16.gmra.mxu0 %v2888_v17  ;;  %v2960_v21 = vpack.c.bf16 %v1934_v12, %v1933_v51 }
 0x283   : > { %v2702_v13 = vadd.f32 %v5106_v62, %v5026_v5 }
 0x284   : > { %v2164_v3 = vpop.f32.mrf.mxu1  ;;  %v2706_v8 = vpop.f32.mrf.mxu0 }
 0x285   : > { %v2694_v1 = vadd.f32 %v2693_v7, %v2164_v3  ;;  %v2890_v63 = vpack.c.bf16 %v2702_v13, %v2699_v55 }
 0x286   : > { %v5029_v9 = vpop.f32.mrf.mxu1  ;;  %v5110_v23 = vpop.f32.mrf.mxu0  ;;  %5216 = vmatmul.mubr.bf16.gmra.mxu1 %v2954_v43 }
 0x287   : > { %v2889_v31 = vpack.c.bf16 %v2694_v1, %v2691_v18  ;;  %5219 = vmatprep.mubr.bf16.mxu1 %v2955_v25  ;;  %v2715_v54 = vadd.f32 %v5109_v14, %v5029_v9 }
 0x288   : > { %v2177_v16 = vpop.f32.mrf.mxu1  ;;  %v2709_v29 = vpop.f32.mrf.mxu0 }
 0x289   : > { %5263 = vmatprep.mubr.bf16.mxu0 %v2889_v31  ;;  %v2707_v39 = vadd.f32 %v2706_v8, %v2177_v16 }
 0x28a   : > { %v5030_v30 = vpop.f32.mrf.mxu1  ;;  %v5113_v27 = vpop.f32.mrf.mxu0  ;;  %5264 = vmatmul.mubr.bf16.gmra.mxu0 %v2890_v63 }
 0x28b   : > { %v2718_v0 = vadd.f32 %v5110_v23, %v5030_v30 }
 0x28c   : > { %v2180_v40 = vpop.f32.mrf.mxu1  ;;  %v2722_v20 = vpop.f32.mrf.mxu0 }
 0x28d   : > { %v2710_v32 = vadd.f32 %v2709_v29, %v2180_v40  ;;  %v2892_v22 = vpack.c.bf16 %v2718_v0, %v2715_v54 }
 0x28e   : > { %v5033_v44 = vpop.f32.mrf.mxu1  ;;  %v5114_v6 = vpop.f32.mrf.mxu0  ;;  %5220 = vmatmul.mubr.bf16.gmra.mxu1 %v2956_v56 }
 0x28f   : > { %v2891_v59 = vpack.c.bf16 %v2710_v32, %v2707_v39  ;;  %5223 = vmatprep.mubr.bf16.mxu1 %v2957_v50  ;;  %v2731_v4 = vadd.f32 %v5113_v27, %v5033_v44 }
 0x290   : > { %v2193_v24 = vpop.f32.mrf.mxu1  ;;  %v2725_v26 = vpop.f32.mrf.mxu0 }
 0x291   : > { %5267 = vmatprep.mubr.bf16.mxu0 %v2891_v59  ;;  %v2723_v57 = vadd.f32 %v2722_v20, %v2193_v24 }
 0x292   : > { %v5034_v46 = vpop.f32.mrf.mxu1  ;;  %v5117_v11 = vpop.f32.mrf.mxu0  ;;  %5268 = vmatmul.mubr.bf16.gmra.mxu0 %v2892_v22 }
 0x293   : > { %v2734_v48 = vadd.f32 %v5114_v6, %v5034_v46 }
 0x294   : > { %v2196_v2 = vpop.f32.mrf.mxu1  ;;  %v2738_v35 = vpop.f32.mrf.mxu0 }
 0x295   : > { %v2726_v52 = vadd.f32 %v2725_v26, %v2196_v2  ;;  %v2894_v41 = vpack.c.bf16 %v2734_v48, %v2731_v4 }
 0x296   : > { %v5037_v62 = vpop.f32.mrf.mxu1  ;;  %v5118_v34 = vpop.f32.mrf.mxu0  ;;  %5224 = vmatmul.mubr.bf16.gmra.mxu1 %v2958_v36 }
 0x297   : > { %v2893_v38 = vpack.c.bf16 %v2726_v52, %v2723_v57  ;;  %5227 = vmatprep.mubr.bf16.mxu1 %v2959_v33  ;;  %v2747_v3 = vadd.f32 %v5117_v11, %v5037_v62 }
 0x298   : > { %v2209_v17 = vpop.f32.mrf.mxu1  ;;  %v2741_v58 = vpop.f32.mrf.mxu0 }
 0x299   : > { %5271 = vmatprep.mubr.bf16.mxu0 %v2893_v38  ;;  %v2739_v43 = vadd.f32 %v2738_v35, %v2209_v17 }
 0x29a   : > { %v5038_v7 = vpop.f32.mrf.mxu1  ;;  %v5121_v60 = vpop.f32.mrf.mxu0  ;;  %5272 = vmatmul.mubr.bf16.gmra.mxu0 %v2894_v41 }
 0x29b   : > { %v2750_v5 = vadd.f32 %v5118_v34, %v5038_v7 }
 0x29c   : > { %v2212_v14 = vpop.f32.mrf.mxu1  ;;  %v2754_v15 = vpop.f32.mrf.mxu0 }
 0x29d   : > { %v2742_v13 = vadd.f32 %v2741_v58, %v2212_v14  ;;  %v2896_v18 = vpack.c.bf16 %v2750_v5, %v2747_v3 }
 0x29e   : > { %v5041_v8 = vpop.f32.mrf.mxu1  ;;  %v5122_v25 = vpop.f32.mrf.mxu0  ;;  %5228 = vmatmul.mubr.bf16.gmra.mxu1 %v2960_v21 }
 0x29f   : > { %v2895_v61 = vpack.c.bf16 %v2742_v13, %v2739_v43  ;;  %v2763_v29 = vadd.f32 %v5121_v60, %v5041_v8 }
 0x2a0   : > { %v2225_v1 = vpop.f32.mrf.mxu1  ;;  %v2757_v55 = vpop.f32.mrf.mxu0 }
 0x2a1   : > { %5275 = vmatprep.mubr.bf16.mxu0 %v2895_v61  ;;  %v2755_v63 = vadd.f32 %v2754_v15, %v2225_v1 }
 0x2a2   : > { %v5042_v9 = vpop.f32.mrf.mxu1  ;;  %v5125_v47 = vpop.f32.mrf.mxu0  ;;  %5276 = vmatmul.mubr.bf16.gmra.mxu0 %v2896_v18 }
 0x2a3   : > { %v2766_v23 = vadd.f32 %v5122_v25, %v5042_v9 }
 0x2a4   : > { %v2228_v31 = vpop.f32.mrf.mxu1  ;;  %v2770_v53 = vpop.f32.mrf.mxu0 }
 0x2a5   : > { %v2758_v16 = vadd.f32 %v2757_v55, %v2228_v31  ;;  %v2898_v27 = vpack.c.bf16 %v2766_v23, %v2763_v29 }
 0x2a6   : > { %v5045_v28 = vpop.f32.mrf.mxu1  ;;  %v5126_v49 = vpop.f32.mrf.mxu0 }
 0x2a7   : > { %v2897_v30 = vpack.c.bf16 %v2758_v16, %v2755_v63  ;;  %v2779_v44 = vadd.f32 %v5125_v47, %v5045_v28 }
 0x2a8   : > { %v2241_v37 = vpop.f32.mrf.mxu1  ;;  %v2773_v56 = vpop.f32.mrf.mxu0 }
 0x2a9   : > { %5279 = vmatprep.mubr.bf16.mxu0 %v2897_v30  ;;  %v2771_v32 = vadd.f32 %v2770_v53, %v2241_v37 }
 0x2aa   : > { %v5046_v0 = vpop.f32.mrf.mxu1  ;;  %v5129_v40 = vpop.f32.mrf.mxu0  ;;  %5280 = vmatmul.mubr.bf16.gmra.mxu0 %v2898_v27 }
 0x2ab   : > { %v2782_v20 = vadd.f32 %v5126_v49, %v5046_v0 }
 0x2ac   : > { %v2244_v50 = vpop.f32.mrf.mxu1  ;;  %v2786_v39 = vpop.f32.mrf.mxu0 }
 0x2ad   : > { %v2774_v54 = vadd.f32 %v2773_v56, %v2244_v50  ;;  %v2900_v22 = vpack.c.bf16 %v2782_v20, %v2779_v44 }
 0x2ae   : > { %v5049_v6 = vpop.f32.mrf.mxu1  ;;  %v5130_v59 = vpop.f32.mrf.mxu0 }
 0x2af   : > { %v2899_v19 = vpack.c.bf16 %v2774_v54, %v2771_v32  ;;  %v2795_v2 = vadd.f32 %v5129_v40, %v5049_v6 }
 0x2b0   : > { %v2257_v24 = vpop.f32.mrf.mxu1  ;;  %v2789_v26 = vpop.f32.mrf.mxu0 }
 0x2b1   : > { %5283 = vmatprep.mubr.bf16.mxu0 %v2899_v19  ;;  %v2787_v36 = vadd.f32 %v2786_v39, %v2257_v24 }
 0x2b2   : > { %v5050_v45 = vpop.f32.mrf.mxu1  ;;  %v5133_v42 = vpop.f32.mrf.mxu0  ;;  %5284 = vmatmul.mubr.bf16.gmra.mxu0 %v2900_v22 }
 0x2b3   : > { %v2798_v46 = vadd.f32 %v5130_v59, %v5050_v45 }
 0x2b4   : > { %v2260_v11 = vpop.f32.mrf.mxu1  ;;  %v2802_v10 = vpop.f32.mrf.mxu0 }
 0x2b5   : > { %v2790_v48 = vadd.f32 %v2789_v26, %v2260_v11  ;;  %v2902_v52 = vpack.c.bf16 %v2798_v46, %v2795_v2 }
 0x2b6   : > { %v5053_v35 = vpop.f32.mrf.mxu1  ;;  %v5134_v33 = vpop.f32.mrf.mxu0 }
 0x2b7   : > { %v2901_v57 = vpack.c.bf16 %v2790_v48, %v2787_v36  ;;  %v2811_v7 = vadd.f32 %v5133_v42, %v5053_v35 }
 0x2b8   : > { %v2273_v4 = vpop.f32.mrf.mxu1  ;;  %v2805_v62 = vpop.f32.mrf.mxu0 }
 0x2b9   : > { %5287 = vmatprep.mubr.bf16.mxu0 %v2901_v57  ;;  %v2803_v58 = vadd.f32 %v2802_v10, %v2273_v4 }
 0x2ba   : > { %v5054_v34 = vpop.f32.mrf.mxu1  ;;  %v5137_v38 = vpop.f32.mrf.mxu0  ;;  %5288 = vmatmul.mubr.bf16.gmra.mxu0 %v2902_v52 }
 0x2bb   : > { %v2814_v12 = vadd.f32 %v5134_v33, %v5054_v34 }
 0x2bc   : > { %v2276_v41 = vpop.f32.mrf.mxu1  ;;  %v2818_v17 = vpop.f32.mrf.mxu0 }
 0x2bd   : > { %v2806_v51 = vadd.f32 %v2805_v62, %v2276_v41  ;;  %v2904_v14 = vpack.c.bf16 %v2814_v12, %v2811_v7 }
 0x2be   : > { %v5057_v60 = vpop.f32.mrf.mxu1  ;;  %v5138_v21 = vpop.f32.mrf.mxu0 }
 0x2bf   : > { %v2903_v5 = vpack.c.bf16 %v2806_v51, %v2803_v58  ;;  %v2827_v55 = vadd.f32 %v5137_v38, %v5057_v60 }
 0x2c0   : > { %v2289_v15 = vpop.f32.mrf.mxu1  ;;  %v2821_v43 = vpop.f32.mrf.mxu0 }
 0x2c1   : > { %5291 = vmatprep.mubr.bf16.mxu0 %v2903_v5  ;;  %v2819_v18 = vadd.f32 %v2818_v17, %v2289_v15 }
 0x2c2   : > { %v5058_v13 = vpop.f32.mrf.mxu1  ;;  %v5141_v3 = vpop.f32.mrf.mxu0  ;;  %5292 = vmatmul.mubr.bf16.gmra.mxu0 %v2904_v14 }
 0x2c3   : > { %v2830_v8 = vadd.f32 %v5138_v21, %v5058_v13 }
 0x2c4   : > { %v2292_v25 = vpop.f32.mrf.mxu1  ;;  %v2834_v61 = vpop.f32.mrf.mxu0 }
 0x2c5   : > { %v2822_v1 = vadd.f32 %v2821_v43, %v2292_v25  ;;  %v2906_v31 = vpack.c.bf16 %v2830_v8, %v2827_v55 }
 0x2c6   : > { %v5061_v9 = vpop.f32.mrf.mxu1  ;;  %v5142_v47 = vpop.f32.mrf.mxu0 }
 0x2c7   : > { %v2905_v23 = vpack.c.bf16 %v2822_v1, %v2819_v18  ;;  %v2843_v56 = vadd.f32 %v5141_v3, %v5061_v9 }
 0x2c8   : > { %v2305_v53 = vpop.f32.mrf.mxu1  ;;  %v2837_v63 = vpop.f32.mrf.mxu0 }
 0x2c9   : > { %5295 = vmatprep.mubr.bf16.mxu0 %v2905_v23  ;;  %v2835_v27 = vadd.f32 %v2834_v61, %v2305_v53 }
 0x2ca   : > { %v5062_v16 = vpop.f32.mrf.mxu1  ;;  %v5145_v29 = vpop.f32.mrf.mxu0  ;;  %5296 = vmatmul.mubr.bf16.gmra.mxu0 %v2906_v31 }
 0x2cb   : > { %v2846_v28 = vadd.f32 %v5142_v47, %v5062_v16 }
 0x2cc   : > { %v2308_v49 = vpop.f32.mrf.mxu1  ;;  %v2850_v30 = vpop.f32.mrf.mxu0 }
 0x2cd   : > { %v2838_v37 = vadd.f32 %v2837_v63, %v2308_v49  ;;  %v2908_v50 = vpack.c.bf16 %v2846_v28, %v2843_v56 }
 0x2ce   : > { %v5065_v0 = vpop.f32.mrf.mxu1  ;;  %v5146_v40 = vpop.f32.mrf.mxu0 }
 0x2cf   : > { %v2907_v20 = vpack.c.bf16 %v2838_v37, %v2835_v27  ;;  %v2859_v26 = vadd.f32 %v5145_v29, %v5065_v0  ;;  %v6489_v0 = vld [vmem:[%s6726_s8] ss:$0 sm:$0xff] }
 0x2d0   : > { %v2321_v39 = vpop.f32.mrf.mxu1  ;;  %v2853_v32 = vpop.f32.mrf.mxu0 }
 0x2d1   : > { %5299 = vmatprep.mubr.bf16.mxu0 %v2907_v20  ;;  %v2851_v22 = vadd.f32 %v2850_v30, %v2321_v39 }
 0x2d2   : > { %v5066_v54 = vpop.f32.mrf.mxu1  ;;  %v5149_v44 = vpop.f32.mrf.mxu0  ;;  %5300 = vmatmul.mubr.bf16.gmra.mxu0 %v2908_v50 }
 0x2d3   : > { %v2862_v6 = vadd.f32 %v5146_v40, %v5066_v54 }
 0x2d4   : > { %v2324_v59 = vpop.f32.mrf.mxu1  ;;  %v2866_v19 = vpop.f32.mrf.mxu0 }
 0x2d5   : > { %v2854_v24 = vadd.f32 %v2853_v32, %v2324_v59  ;;  %v2910_v46 = vpack.c.bf16 %v2862_v6, %v2859_v26 }
 0x2d6   : > { %v5069_v45 = vpop.f32.mrf.mxu1  ;;  %v5150_v11 = vpop.f32.mrf.mxu0 }
 0x2d7   : > { %v2909_v42 = vpack.c.bf16 %v2854_v24, %v2851_v22  ;;  %v2875_v52 = vadd.f32 %v5149_v44, %v5069_v45 }
 0x2d8   : > { %v2337_v10 = vpop.f32.mrf.mxu1  ;;  %v2869_v48 = vpop.f32.mrf.mxu0 }
 0x2d9   : > { %5303 = vmatprep.mubr.bf16.mxu0 %v2909_v42  ;;  %v2867_v33 = vadd.f32 %v2866_v19, %v2337_v10 }
 0x2da   : > { %v5070_v36 = vpop.f32.mrf.mxu1  ;;  %5304 = vmatmul.mubr.bf16.gmra.mxu0 %v2910_v46 }
 0x2db   : > { %v2878_v2 = vadd.f32 %v5150_v11, %v5070_v36 }
 0x2dc   : > { %v2340_v35 = vpop.f32.mrf.mxu1 }
 0x2dd   : > { %v2870_v57 = vadd.f32 %v2869_v48, %v2340_v35  ;;  %v2912_v34 = vpack.c.bf16 %v2878_v2, %v2875_v52 }
 0x2de   : > { %v5169_v4 = vpop.f32.mrf.mxu1 }
 0x2df   : > { %v2911_v62 = vpack.c.bf16 %v2870_v57, %v2867_v33 }
 0x2e0   : > { %v3059_v38 = vpop.f32.mrf.mxu1 }
 0x2e1   : > { %5307 = vmatprep.mubr.bf16.mxu0 %v2911_v62 }
 0x2e2   : > { %v5170_v12 = vpop.f32.mrf.mxu1  ;;  %5308 = vmatmul.mubr.bf16.gmra.mxu0 %v2912_v34 }
 0x2e4   : > { %v3062_v41 = vpop.f32.mrf.mxu1 }
 0x2e6   : > { %v5173_v17 = vpop.f32.mrf.mxu1 }
 0x2e8   : > { %v3075_v58 = vpop.f32.mrf.mxu1 }
 0x2ea   : > { %v5174_v51 = vpop.f32.mrf.mxu1 }
 0x2ec   : > { %v3078_v7 = vpop.f32.mrf.mxu1 }
 0x2ee   : > { %v6435_v60 = vpop.f32.mrf.mxu1 }
 0x2f0   : > { %v6437_v21 = vpop.f32.mrf.mxu1 }
 0x2f2   : > { %v6439_v5 = vpop.f32.mrf.mxu1 }
 0x2f4   : > { %v6441_v14 = vpop.f32.mrf.mxu1 }
 0x2f6   : > { %v6443_v15 = vpop.f32.mrf.mxu1 }
 0x2f8   : > { %v6445_v43 = vpop.f32.mrf.mxu1 }
 0x2fa   : > { %v6447_v13 = vpop.f32.mrf.mxu1 }
 0x2fc   : > { %v6449_v3 = vpop.f32.mrf.mxu1 }
 0x2fe   : > { %v6451_v8 = vpop.f32.mrf.mxu1 }
 0x300   : > { %v6453_v25 = vpop.f32.mrf.mxu1 }
 0x302   : > { %v6455_v61 = vpop.f32.mrf.mxu1 }
 0x304   : > { %v6457_v18 = vpop.f32.mrf.mxu1 }
 0x306   : > { %v6459_v1 = vpop.f32.mrf.mxu1 }
 0x308   : > { %v6461_v55 = vpop.f32.mrf.mxu1 }
 0x30a   : > { %v6463_v9 = vpop.f32.mrf.mxu1 }
 0x30c   : > { %v6465_v47 = vpop.f32.mrf.mxu1 }
 0x30e   : > { %v6467_v23 = vpop.f32.mrf.mxu1 }
 0x310   : > { %v6469_v31 = vpop.f32.mrf.mxu1 }
 0x312   : > { %v6471_v53 = vpop.f32.mrf.mxu1 }
 0x314   : > { %v6473_v63 = vpop.f32.mrf.mxu1 }
 0x31e   : > { %v6475_v16 = vpop.f32.mrf.mxu1 }
 0x320   : > { %v6477_v29 = vpop.f32.mrf.mxu1 }
 0x322   : > { %v6479_v28 = vpop.f32.mrf.mxu1 }
 0x324   : > { %v6481_v49 = vpop.f32.mrf.mxu1 }
 0x326   : > { %v6483_v27 = vpop.f32.mrf.mxu1 }
 0x328   : > { %v6493_v39 = vpop.f32.mrf.mxu1 }
 0x32a   : > { %v5249_v30 = vpop.f32.mrf.mxu0  ;;  %v6499_v26 = vpop.f32.mrf.mxu1 }
 0x32b   : > { %v3405_v56 = vadd.f32 %v5249_v30, %v5169_v4 }
 0x32c   : > { %v3396_v37 = vpop.f32.mrf.mxu0  ;;  %v6505_v48 = vpop.f32.mrf.mxu1 }
 0x32d   : > { %v3397_v20 = vadd.f32 %v3396_v37, %v3059_v38  ;;  %v3660_v54 = vadd.f32 %v6489_v0, %v3405_v56 }
 0x32e   : > { %v5250_v40 = vpop.f32.mrf.mxu0  ;;  %v6511_v38 = vpop.f32.mrf.mxu1 }
 0x32f   : > { %v3408_v50 = vadd.f32 %v5250_v40, %v5170_v12  ;;  %v3658_v19 = vadd.f32 %v6489_v0, %v3397_v20 }
 0x330   : > { %v3399_v32 = vpop.f32.mrf.mxu0  ;;  %v6518_v30 = vpop.f32.mrf.mxu1 }
 0x331   : > { %v3661_v44 = vadd.f32 %v6489_v0, %v3408_v50  ;;  %v3400_v6 = vadd.f32 %v3399_v32, %v3062_v41 }
 0x332   : > { %v5253_v59 = vpop.f32.mrf.mxu0 }
 0x333   : > { %v4552_v22 = vpack.c.bf16 %v3661_v44, %v3660_v54  ;;  %v3659_v24 = vadd.f32 %v6489_v0, %v3400_v6  ;;  %v3421_v46 = vadd.f32 %v5253_v59, %v5173_v17  ;;  %v6525_v44 = vpop.f32.mrf.mxu1 }
 0x334   : > { %v3412_v45 = vpop.f32.mrf.mxu0 }
 0x335   : > { %4704 = vst [vmem:[%s6501_s25 + $0x8] sm:$0xff] %v4552_v22   ;;  %v4547_v42 = vpack.c.bf16 %v3659_v24, %v3658_v19  ;;  %v3413_v10 = vadd.f32 %v3412_v45, %v3075_v58  ;;  %v3664_v35 = vadd.f32 %v6489_v0, %v3421_v46  ;;  %v6532_v22 = vpop.f32.mrf.mxu1 }
 0x336   : > { %v5254_v11 = vpop.f32.mrf.mxu0 }
 0x337   : > { %4548 = vst [vmem:[%s6501_s25] sm:$0xff] %v4547_v42   ;;  %v3424_v36 = vadd.f32 %v5254_v11, %v5174_v51  ;;  %v3662_v4 = vadd.f32 %v6489_v0, %v3413_v10 }
 0x338   : > { %v3415_v2 = vpop.f32.mrf.mxu0 }
 0x339   : > { %v3665_v33 = vadd.f32 %v6489_v0, %v3424_v36  ;;  %v3416_v57 = vadd.f32 %v3415_v2, %v3078_v7  ;;  %v6539_v2 = vpop.f32.mrf.mxu1 }
 0x33a   : > { %v5257_v52 = vpop.f32.mrf.mxu0 }
 0x33b   : > { %v4562_v62 = vpack.c.bf16 %v3665_v33, %v3664_v35  ;;  %v3663_v34 = vadd.f32 %v6489_v0, %v3416_v57  ;;  %v3437_v17 = vadd.f32 %v5257_v52, %v6435_v60  ;;  %v6546_v52 = vpop.f32.mrf.mxu1 }
 0x33c   : > { %v3428_v12 = vpop.f32.mrf.mxu0 }
 0x33d   : > { %4706 = vst [vmem:[%s6501_s25 + $0x18] sm:$0xff] %v4562_v62   ;;  %v4557_v41 = vpack.c.bf16 %v3663_v34, %v3662_v4  ;;  %v3429_v51 = vadd.f32 %v3428_v12, %v6437_v21  ;;  %v3668_v56 = vadd.f32 %v6489_v0, %v3437_v17 }
 0x33e   : > { %v5258_v58 = vpop.f32.mrf.mxu0 }
 0x33f   : > { %4705 = vst [vmem:[%s6501_s25 + $0x10] sm:$0xff] %v4557_v41   ;;  %v3440_v7 = vadd.f32 %v5258_v58, %v6439_v5  ;;  %v3666_v60 = vadd.f32 %v6489_v0, %v3429_v51  ;;  %v6553_v51 = vpop.f32.mrf.mxu1 }
 0x340   : > { %v3431_v37 = vpop.f32.mrf.mxu0 }
 0x341   : > { %v3669_v40 = vadd.f32 %v6489_v0, %v3440_v7  ;;  %v3432_v20 = vadd.f32 %v3431_v37, %v6441_v14 }
 0x342   : > { %v5261_v50 = vpop.f32.mrf.mxu0 }
 0x343   : > { %v4572_v32 = vpack.c.bf16 %v3669_v40, %v3668_v56  ;;  %v3667_v54 = vadd.f32 %v6489_v0, %v3432_v20  ;;  %v3453_v6 = vadd.f32 %v5261_v50, %v6443_v15  ;;  %v6560_v40 = vpop.f32.mrf.mxu1 }
 0x344   : > { %v3444_v21 = vpop.f32.mrf.mxu0 }
 0x345   : > { %4708 = vst [vmem:[%s6501_s25 + $0x28] sm:$0xff] %v4572_v32   ;;  %v4567_v5 = vpack.c.bf16 %v3667_v54, %v3666_v60  ;;  %v3445_v19 = vadd.f32 %v3444_v21, %v6445_v43  ;;  %v3672_v45 = vadd.f32 %v6489_v0, %v3453_v6  ;;  %v6567_v6 = vpop.f32.mrf.mxu1 }
 0x346   : > { %v5262_v59 = vpop.f32.mrf.mxu0 }
 0x347   : > { %4707 = vst [vmem:[%s6501_s25 + $0x20] sm:$0xff] %v4567_v5   ;;  %v3456_v14 = vadd.f32 %v5262_v59, %v6447_v13  ;;  %v3670_v15 = vadd.f32 %v6489_v0, %v3445_v19 }
 0x348   : > { %v3447_v24 = vpop.f32.mrf.mxu0 }
 0x349   : > { %v3673_v42 = vadd.f32 %v6489_v0, %v3456_v14  ;;  %v3448_v46 = vadd.f32 %v3447_v24, %v6449_v3  ;;  %v6574_v24 = vpop.f32.mrf.mxu1 }
 0x34a   : > { %v5265_v11 = vpop.f32.mrf.mxu0 }
 0x34b   : > { %v4582_v10 = vpack.c.bf16 %v3673_v42, %v3672_v45  ;;  %v3671_v36 = vadd.f32 %v6489_v0, %v3448_v46  ;;  %v3469_v35 = vadd.f32 %v5265_v11, %v6451_v8 }
 0x34c   : > { %v3460_v43 = vpop.f32.mrf.mxu0 }
 0x34d   : > { %4710 = vst [vmem:[%s6501_s25 + $0x38] sm:$0xff] %v4582_v10   ;;  %v4577_v13 = vpack.c.bf16 %v3671_v36, %v3670_v15  ;;  %v3461_v57 = vadd.f32 %v3460_v43, %v6453_v25  ;;  %v3676_v62 = vadd.f32 %v6489_v0, %v3469_v35  ;;  %v6581_v43 = vpop.f32.mrf.mxu1 }
 0x34e   : > { %v5266_v33 = vpop.f32.mrf.mxu0 }
 0x34f   : > { %4709 = vst [vmem:[%s6501_s25 + $0x30] sm:$0xff] %v4577_v13   ;;  %v3472_v3 = vadd.f32 %v5266_v33, %v6455_v61  ;;  %v3674_v8 = vadd.f32 %v6489_v0, %v3461_v57  ;;  %v6588_v57 = vpop.f32.mrf.mxu1 }
 0x350   : > { %v3463_v4 = vpop.f32.mrf.mxu0 }
 0x351   : > { %v3677_v34 = vadd.f32 %v6489_v0, %v3472_v3  ;;  %v3464_v12 = vadd.f32 %v3463_v4, %v6457_v18 }
 0x352   : > { %v5269_v41 = vpop.f32.mrf.mxu0 }
 0x353   : > { %v4592_v17 = vpack.c.bf16 %v3677_v34, %v3676_v62  ;;  %v3675_v58 = vadd.f32 %v6489_v0, %v3464_v12  ;;  %v3485_v7 = vadd.f32 %v5269_v41, %v6459_v1 }
 0x354   : > { %v3476_v25 = vpop.f32.mrf.mxu0 }
 0x355   : > { %4712 = vst [vmem:[%s6501_s25 + $0x48] sm:$0xff] %v4592_v17   ;;  %v4587_v61 = vpack.c.bf16 %v3675_v58, %v3674_v8  ;;  %v3477_v56 = vadd.f32 %v3476_v25, %v6461_v55  ;;  %v3680_v50 = vadd.f32 %v6489_v0, %v3485_v7  ;;  %v6595_v17 = vpop.f32.mrf.mxu1 }
 0x356   : > { %v5270_v37 = vpop.f32.mrf.mxu0 }
 0x357   : > { %4711 = vst [vmem:[%s6501_s25 + $0x40] sm:$0xff] %v4587_v61   ;;  %v3488_v18 = vadd.f32 %v5270_v37, %v6463_v9  ;;  %v3678_v1 = vadd.f32 %v6489_v0, %v3477_v56  ;;  %v6602_v7 = vpop.f32.mrf.mxu1 }
 0x358   : > { %v3479_v20 = vpop.f32.mrf.mxu0 }
 0x359   : > { %v3681_v60 = vadd.f32 %v6489_v0, %v3488_v18  ;;  %v3480_v32 = vadd.f32 %v3479_v20, %v6465_v47 }
 0x35a   : > { %v5273_v54 = vpop.f32.mrf.mxu0 }
 0x35b   : > { %v4602_v21 = vpack.c.bf16 %v3681_v60, %v3680_v50  ;;  %v3679_v5 = vadd.f32 %v6489_v0, %v3480_v32  ;;  %v3501_v59 = vadd.f32 %v5273_v54, %v6467_v23  ;;  %v5218_v54 = vpop.f32.mrf.mxu1 }
 0x35c   : > { %v3492_v55 = vpop.f32.mrf.mxu0 }
 0x35d   : > { %4714 = vst [vmem:[%s6501_s25 + $0x58] sm:$0xff] %v4602_v21   ;;  %v4597_v9 = vpack.c.bf16 %v3679_v5, %v3678_v1  ;;  %v3493_v14 = vadd.f32 %v3492_v55, %v6469_v31  ;;  %v3684_v42 = vadd.f32 %v6489_v0, %v3501_v59 }
 0x35e   : > { %v5274_v19 = vpop.f32.mrf.mxu0 }
 0x35f   : > { %4713 = vst [vmem:[%s6501_s25 + $0x50] sm:$0xff] %v4597_v9   ;;  %v3504_v47 = vadd.f32 %v5274_v19, %v6471_v53  ;;  %v3682_v23 = vadd.f32 %v6489_v0, %v3493_v14 }
 0x360   : > { %v3495_v45 = vpop.f32.mrf.mxu0 }
 0x361   : > { %v3685_v46 = vadd.f32 %v6489_v0, %v3504_v47  ;;  %v3496_v11 = vadd.f32 %v3495_v45, %v6473_v63 }
 0x362   : > { %v5277_v15 = vpop.f32.mrf.mxu0 }
 0x363   : > { %v4612_v10 = vpack.c.bf16 %v3685_v46, %v3684_v42  ;;  %v3683_v36 = vadd.f32 %v6489_v0, %v3496_v11  ;;  %v3517_v13 = vadd.f32 %v5277_v15, %v6475_v16 }
 0x364   : > { %v3508_v31 = vpop.f32.mrf.mxu0 }
 0x365   : > { %4716 = vst [vmem:[%s6501_s25 + $0x68] sm:$0xff] %v4612_v10   ;;  %v4607_v53 = vpack.c.bf16 %v3683_v36, %v3682_v23  ;;  %v3509_v33 = vadd.f32 %v3508_v31, %v6477_v29  ;;  %v3688_v4 = vadd.f32 %v6489_v0, %v3517_v13 }
 0x366   : > { %v5278_v35 = vpop.f32.mrf.mxu0 }
 0x367   : > { %4715 = vst [vmem:[%s6501_s25 + $0x60] sm:$0xff] %v4607_v53   ;;  %v3520_v63 = vadd.f32 %v5278_v35, %v6479_v28  ;;  %v3686_v16 = vadd.f32 %v6489_v0, %v3509_v33 }
 0x368   : > { %v3511_v3 = vpop.f32.mrf.mxu0 }
 0x369   : > { %v3689_v62 = vadd.f32 %v6489_v0, %v3520_v63  ;;  %v3512_v34 = vadd.f32 %v3511_v3, %v6481_v49 }
 0x36a   : > { %v5281_v12 = vpop.f32.mrf.mxu0 }
 0x36b   : > { %v4622_v41 = vpack.c.bf16 %v3689_v62, %v3688_v4  ;;  %v3687_v8 = vadd.f32 %v6489_v0, %v3512_v34  ;;  %v3533_v58 = vadd.f32 %v5281_v12, %v6483_v27 }
 0x36c   : > { %v3524_v29 = vpop.f32.mrf.mxu0 }
 0x36d   : > { %4718 = vst [vmem:[%s6501_s25 + $0x78] sm:$0xff] %v4622_v41   ;;  %v4617_v28 = vpack.c.bf16 %v3687_v8, %v3686_v16  ;;  %v3525_v61 = vadd.f32 %v3524_v29, %v6493_v39  ;;  %v3692_v56 = vadd.f32 %v6489_v0, %v3533_v58 }
 0x36e   : > { %v5282_v25 = vpop.f32.mrf.mxu0 }
 0x36f   : > { %4717 = vst [vmem:[%s6501_s25 + $0x70] sm:$0xff] %v4617_v28   ;;  %v3536_v49 = vadd.f32 %v5282_v25, %v6499_v26  ;;  %v3690_v27 = vadd.f32 %v6489_v0, %v3525_v61 }
 0x370   : > { %v3527_v37 = vpop.f32.mrf.mxu0 }
 0x371   : > { %v3693_v18 = vadd.f32 %v6489_v0, %v3536_v49  ;;  %v3528_v20 = vadd.f32 %v3527_v37, %v6505_v48  ;;  %v3254_v48 = vpop.f32.mrf.mxu1 }
 0x372   : > { %v5285_v50 = vpop.f32.mrf.mxu0 }
 0x373   : > { %v4632_v60 = vpack.c.bf16 %v3693_v18, %v3692_v56  ;;  %v3691_v32 = vadd.f32 %v6489_v0, %v3528_v20  ;;  %v3549_v1 = vadd.f32 %v5285_v50, %v6511_v38  ;;  %v5221_v46 = vpop.f32.mrf.mxu1 }
 0x374   : > { %v3540_v39 = vpop.f32.mrf.mxu0 }
 0x375   : > { %4720 = vst [vmem:[%s6501_s25 + $0x88] sm:$0xff] %v4632_v60   ;;  %v4627_v26 = vpack.c.bf16 %v3691_v32, %v3690_v27  ;;  %v3541_v5 = vadd.f32 %v3540_v39, %v6518_v30  ;;  %v3696_v59 = vadd.f32 %v6489_v0, %v3549_v1 }
 0x376   : > { %v5286_v21 = vpop.f32.mrf.mxu0 }
 0x377   : > { %4719 = vst [vmem:[%s6501_s25 + $0x80] sm:$0xff] %v4627_v26   ;;  %v3552_v55 = vadd.f32 %v5286_v21, %v6525_v44  ;;  %v3694_v45 = vadd.f32 %v6489_v0, %v3541_v5 }
 0x378   : > { %v3543_v9 = vpop.f32.mrf.mxu0 }
 0x379   : > { %v3697_v19 = vadd.f32 %v6489_v0, %v3552_v55  ;;  %v3544_v14 = vadd.f32 %v3543_v9, %v6532_v22  ;;  %v3267_v22 = vpop.f32.mrf.mxu1 }
 0x37a   : > { %v5289_v47 = vpop.f32.mrf.mxu0 }
 0x37b   : > { %v4642_v38 = vpack.c.bf16 %v3697_v19, %v3696_v59  ;;  %v3695_v42 = vadd.f32 %v6489_v0, %v3544_v14  ;;  %v3565_v44 = vadd.f32 %v5289_v47, %v6539_v2  ;;  %v5222_v3 = vpop.f32.mrf.mxu1 }
 0x37c   : > { %v3556_v11 = vpop.f32.mrf.mxu0 }
 0x37d   : > { %4722 = vst [vmem:[%s6501_s25 + $0x98] sm:$0xff] %v4642_v38   ;;  %v4637_v30 = vpack.c.bf16 %v3695_v42, %v3694_v45  ;;  %v3557_v23 = vadd.f32 %v3556_v11, %v6546_v52  ;;  %v3700_v31 = vadd.f32 %v6489_v0, %v3565_v44 }
 0x37e   : > { %v5290_v15 = vpop.f32.mrf.mxu0 }
 0x37f   : > { %4721 = vst [vmem:[%s6501_s25 + $0x90] sm:$0xff] %v4637_v30   ;;  %v3568_v10 = vadd.f32 %v5290_v15, %v6553_v51  ;;  %v3698_v33 = vadd.f32 %v6489_v0, %v3557_v23 }
 0x380   : > { %v3559_v36 = vpop.f32.mrf.mxu0 }
 0x381   : > { %v3701_v53 = vadd.f32 %v6489_v0, %v3568_v10  ;;  %v3560_v13 = vadd.f32 %v3559_v36, %v6560_v40  ;;  %v3270_v40 = vpop.f32.mrf.mxu1 }
 0x382   : > { %v5293_v35 = vpop.f32.mrf.mxu0 }
 0x383   : > { %v4652_v2 = vpack.c.bf16 %v3701_v53, %v3700_v31  ;;  %v3699_v63 = vadd.f32 %v6489_v0, %v3560_v13  ;;  %v3581_v51 = vadd.f32 %v5293_v35, %v6567_v6  ;;  %v5225_v61 = vpop.f32.mrf.mxu1 }
 0x384   : > { %v3572_v4 = vpop.f32.mrf.mxu0 }
 0x385   : > { %4724 = vst [vmem:[%s6501_s25 + $0xa8] sm:$0xff] %v4652_v2   ;;  %v4647_v52 = vpack.c.bf16 %v3699_v63, %v3698_v33  ;;  %v3573_v34 = vadd.f32 %v3572_v4, %v6574_v24  ;;  %v3704_v41 = vadd.f32 %v6489_v0, %v3581_v51 }
 0x386   : > { %v5294_v62 = vpop.f32.mrf.mxu0 }
 0x387   : > { %4723 = vst [vmem:[%s6501_s25 + $0xa0] sm:$0xff] %v4647_v52   ;;  %v3584_v12 = vadd.f32 %v5294_v62, %v6581_v43  ;;  %v3702_v58 = vadd.f32 %v6489_v0, %v3573_v34 }
 0x388   : > { %v3575_v16 = vpop.f32.mrf.mxu0 }
 0x389   : > { %v3705_v8 = vadd.f32 %v6489_v0, %v3584_v12  ;;  %v3576_v29 = vadd.f32 %v3575_v16, %v6588_v57  ;;  %v3283_v57 = vpop.f32.mrf.mxu1 }
 0x38a   : > { %v5297_v28 = vpop.f32.mrf.mxu0 }
 0x38b   : > { %v4662_v6 = vpack.c.bf16 %v3705_v8, %v3704_v41  ;;  %v3703_v25 = vadd.f32 %v6489_v0, %v3576_v29  ;;  %v3597_v43 = vadd.f32 %v5297_v28, %v6595_v17  ;;  %v5226_v1 = vpop.f32.mrf.mxu1 }
 0x38c   : > { %v3588_v49 = vpop.f32.mrf.mxu0 }
 0x38d   : > { %4726 = vst [vmem:[%s6501_s25 + $0xb8] sm:$0xff] %v4662_v6   ;;  %v4657_v24 = vpack.c.bf16 %v3703_v25, %v3702_v58  ;;  %v3589_v56 = vadd.f32 %v3588_v49, %v6602_v7  ;;  %v3708_v50 = vadd.f32 %v6489_v0, %v3597_v43  ;;  %v3286_v59 = vpop.f32.mrf.mxu1 }
 0x38e   : > { %v5298_v37 = vpop.f32.mrf.mxu0 }
 0x38f   : > { %4725 = vst [vmem:[%s6501_s25 + $0xb0] sm:$0xff] %v4657_v24   ;;  %v3600_v18 = vadd.f32 %v5298_v37, %v5218_v54  ;;  %v3706_v39 = vadd.f32 %v6489_v0, %v3589_v56 }
 0x390   : > { %v3591_v20 = vpop.f32.mrf.mxu0 }
 0x391   : > { %v3709_v27 = vadd.f32 %v6489_v0, %v3600_v18  ;;  %v3592_v60 = vadd.f32 %v3591_v20, %v3254_v48 }
 0x392   : > { %v5301_v32 = vpop.f32.mrf.mxu0 }
 0x393   : > { %v4672_v26 = vpack.c.bf16 %v3709_v27, %v3708_v50  ;;  %v3707_v17 = vadd.f32 %v6489_v0, %v3592_v60  ;;  %v3613_v7 = vadd.f32 %v5301_v32, %v5221_v46  ;;  %v5229_v46 = vpop.f32.mrf.mxu1 }
 0x394   : > { %v3604_v21 = vpop.f32.mrf.mxu0 }
 0x395   : > { %4728 = vst [vmem:[%s6501_s25 + $0xc8] sm:$0xff] %v4672_v26   ;;  %v4667_v5 = vpack.c.bf16 %v3707_v17, %v3706_v39  ;;  %v3605_v55 = vadd.f32 %v3604_v21, %v3267_v22  ;;  %v3712_v48 = vadd.f32 %v6489_v0, %v3613_v7  ;;  %v3299_v36 = vpop.f32.mrf.mxu1 }
 0x396   : > { %v5302_v54 = vpop.f32.mrf.mxu0 }
 0x397   : > { %4727 = vst [vmem:[%s6501_s25 + $0xc0] sm:$0xff] %v4667_v5   ;;  %v3616_v9 = vadd.f32 %v5302_v54, %v5222_v3  ;;  %v3710_v38 = vadd.f32 %v6489_v0, %v3605_v55  ;;  %v5230_v4 = vpop.f32.mrf.mxu1 }
 0x398   : > { %v3607_v19 = vpop.f32.mrf.mxu0 }
 0x399   : > { %v3713_v14 = vadd.f32 %v6489_v0, %v3616_v9  ;;  %v3608_v47 = vadd.f32 %v3607_v19, %v3270_v40  ;;  %v3302_v16 = vpop.f32.mrf.mxu1 }
 0x39a   : > { %v5305_v45 = vpop.f32.mrf.mxu0 }
 0x39b   : > { %v4682_v42 = vpack.c.bf16 %v3713_v14, %v3712_v48  ;;  %v3711_v11 = vadd.f32 %v6489_v0, %v3608_v47  ;;  %v3629_v15 = vadd.f32 %v5305_v45, %v5225_v61 }
 0x39c   : > { %v3620_v30 = vpop.f32.mrf.mxu0 }
 0x39d   : > { %4730 = vst [vmem:[%s6501_s25 + $0xd8] sm:$0xff] %v4682_v42   ;;  %v4677_v44 = vpack.c.bf16 %v3711_v11, %v3710_v38  ;;  %v3621_v10 = vadd.f32 %v3620_v30, %v3283_v57  ;;  %v3716_v53 = vadd.f32 %v6489_v0, %v3629_v15 }
 0x39e   : > { %v5306_v23 = vpop.f32.mrf.mxu0 }
 0x39f   : > { %4729 = vst [vmem:[%s6501_s25 + $0xd0] sm:$0xff] %v4677_v44   ;;  %v3632_v22 = vadd.f32 %v5306_v23, %v5226_v1  ;;  %v3714_v2 = vadd.f32 %v6489_v0, %v3621_v10 }
 0x3a0   : > { %v3623_v31 = vpop.f32.mrf.mxu0 }
 0x3a1   : > { %v3717_v13 = vadd.f32 %v6489_v0, %v3632_v22  ;;  %v3624_v35 = vadd.f32 %v3623_v31, %v3286_v59 }
 0x3a2   : > { %v5309_v33 = vpop.f32.mrf.mxu0 }
 0x3a3   : > { %v4692_v63 = vpack.c.bf16 %v3717_v13, %v3716_v53  ;;  %v3715_v3 = vadd.f32 %v6489_v0, %v3624_v35  ;;  %v3645_v62 = vadd.f32 %v5309_v33, %v5229_v46 }
 0x3a4   : > { %v3636_v52 = vpop.f32.mrf.mxu0 }
 0x3a5   : > { %4732 = vst [vmem:[%s6501_s25 + $0xe8] sm:$0xff] %v4692_v63   ;;  %v4687_v51 = vpack.c.bf16 %v3715_v3, %v3714_v2  ;;  %v3637_v12 = vadd.f32 %v3636_v52, %v3299_v36  ;;  %v3720_v8 = vadd.f32 %v6489_v0, %v3645_v62 }
 0x3a6   : > { %v5310_v34 = vpop.f32.mrf.mxu0 }
 0x3a7   : > { %4731 = vst [vmem:[%s6501_s25 + $0xe0] sm:$0xff] %v4687_v51   ;;  %v3648_v40 = vadd.f32 %v5310_v34, %v5230_v4  ;;  %v3718_v58 = vadd.f32 %v6489_v0, %v3637_v12 }
 0x3a8   : > { %v3639_v41 = vpop.f32.mrf.mxu0 }
 0x3a9   : > { %v3721_v29 = vadd.f32 %v6489_v0, %v3648_v40  ;;  %v3640_v28 = vadd.f32 %v3639_v41, %v3302_v16 }
 0x3ab   : > { %v4702_v6 = vpack.c.bf16 %v3721_v29, %v3720_v8  ;;  %v3719_v25 = vadd.f32 %v6489_v0, %v3640_v28 }
 0x3ad   : > { %4734 = vst [vmem:[%s6501_s25 + $0xf8] sm:$0xff] %v4702_v6   ;;  %v4697_v61 = vpack.c.bf16 %v3719_v25, %v3718_v58 }
 0x3af   : > { %4733 = vst [vmem:[%s6501_s25 + $0xf0] sm:$0xff] %v4697_v61  }
 0x3b0   : > { %5441 = shalt.err (!%p5438_p3)
}
 0x3b1   : > { %s5442_s24 = scalar_lea.hbm %s6670_s17, 4096  ;;  %s5446_s27 = scalar_lea.hbm %s6727_s9, 24576 }
 0x3b2   : > { %p5443_p4 = scmp.ne.s32.totalorder %s6670_s17, %s5442_s24  ;;  %p5447_p9 = scmp.lt.s32.totalorder %s6670_s17, %s6727_s9 }
 0x3b3   : > { %p5448_p10 = scmp.lt.s32.totalorder %s5446_s27, %s5442_s24 }
 0x3b4   : > { %p5444_p7 = pnand %p5443_p4, %p5583_p5 }
 0x3b5   : > { %p5449_p11 = por %p5448_p10, %p5447_p9 }
 0x3b6   : > { %p5445_p8 = pneg %p5444_p7 }
 0x3b8   : > { %p5450_p12 = pnand %p5449_p11, %p5445_p8 }
 0x3ba   : > { %5453 = shalt.err (!%p5450_p12)
}
 0x3bb   : > { %s5493_s28 = smov 64   ;;  %s5494_s22 = smov 4  }
 0x3bc   : > { %5319 = dma.vmem_to_hbm [thread:$0]  (%p5583_p5), %s6672_s29, 4096, %s6670_s17, %s6678_s13, %s5493_s28, %s5493_s28, %s5494_s22  }
 0x3bd PF: > { %p5325_p13 = scmp.ge.s32.totalorder %s5488_s12, 2  ;;  %s4071_s23 = sand.u32 1, %s5476_s30  }
 0x3be   : > { %s4072_s21 = scalar_lea.sflag [#allocation3], %s4071_s23 }
 0x3bf   : > { %p5322_p0 = pnand %p5325_p13, %p5587_p6 }
 0x3c1   : > { %p5323_p1 = pneg %p5322_p0 }
 0x3c3   : > { %5471 = dma.done.wait (%p5323_p1), %s4072_s21, 4096  }
 0x3c4   : > { %5473 = vsyncadd (%p5323_p1), %s4072_s21, 4294963200  ;;  %p19_p2 = scmp.ge.s32.totalorder %s5570_s15, 8   ;;  %s6730_s30 = smov %s5480_s10 }
 0x3c5   : > { %s6731_s10 = smov %s5484_s11  ;;  %s6732_s11 = smov %s5581_s18 }
 0x3c6   : > { %s6733_s12 = smov %s5570_s15  ;;  %21 = sbr.rel (!%p19_p2) target bundleno = 3 (0x3), region = 97 }
 0x3cb   :  { %4077 = vsyncpa [#allocation3], 1 }
 0x3cc   :  { %4079 = vsyncpa [#allocation3 + $0x1], 1 }

</bundles_post_ra>
